<compile_context>
chip_gen: v6e
topology: v6e:2x2x1
jax: 0.10.0
libtpu: 0.0.40
codegen_flags: <defaults>
</compile_context>

<pallas_src>
import math
import functools

import jax
import jax.numpy as jnp
from jax import lax
from jax.experimental import pallas as pl
from jax.experimental.pallas import tpu as pltpu

LN_EPS = 1e-5  # PyTorch nn.LayerNorm default


def _layernorm(x, g, b):
    mu = jnp.mean(x, axis=-1, keepdims=True)
    var = jnp.mean((x - mu) ** 2, axis=-1, keepdims=True)
    return (x - mu) * lax.rsqrt(var + LN_EPS) * g + b


# ---------------------------------------------------------------------------
# Single fused kernel: whole Transformer forward for one batch element / step.
# ---------------------------------------------------------------------------
def _fused_transformer_kernel(*refs, num_heads, num_layers):
    src_ids_ref, tgt_ids_ref, pe_ref, emb_ref = refs[:4]
    rest = refs[4:]
    enc_attn = rest[0:8]         # wq, bq, wk, bk, wv, bv, wo, bo  (stacked over L)
    enc_ffn = rest[8:14]         # w1, b1, w2, b2, ln_g, ln_b
    dec_self = rest[14:22]
    dec_cross = rest[22:30]
    dec_ffn = rest[30:36]
    enc_g_ref, enc_b_ref, dec_g_ref, dec_b_ref, wout_ref, bout_ref = rest[36:42]
    out_ref = rest[42]

    bf16 = jnp.bfloat16
    f32 = jnp.float32
    H = num_heads
    vocab_pad, d_model = emb_ref.shape
    pe_row = pe_ref[0]                                    # (1, D) — pe[batch] row

    def embed(ids_ref):
        # Exact embedding row lookup via one-hot matmul (kept in f32), then the
        # reference's batch-indexed positional-encoding add.
        ids = ids_ref[0]                                  # (S, 1) int32
        seq = ids.shape[0]
        onehot = (ids == lax.broadcasted_iota(jnp.int32, (seq, vocab_pad), 1)
                  ).astype(f32)                           # (S, Vpad)
        return jnp.dot(onehot, emb_ref[...], preferred_element_type=f32) + pe_row

    def mha(x_q, x_kv, prm, l):
        # prm: wq/wk/wv (L,H,D,dk) bf16, biases (L,H,1,dk) f32 (scale folded
        # into wq/bq), wo (L,H,dk,D) bf16, bo (L,1,D) f32.
        wq, bq, wk, bk, wv, bv, wo, bo = prm
        sq, d = x_q.shape
        sk = x_kv.shape[0]
        xq_h = jnp.broadcast_to(x_q.astype(bf16), (H, sq, d))
        xkv_h = jnp.broadcast_to(x_kv.astype(bf16), (H, sk, d))
        # Head-batched projections — head axis is a leading (non-lane) axis,
        # so there is no sub-vreg lane slicing anywhere.
        q = jnp.einsum('hsd,hdf->hsf', xq_h, wq[l],
                       preferred_element_type=f32) + bq[l]       # (H,Sq,dk)
        k = jnp.einsum('hsd,hdf->hsf', xkv_h, wk[l],
                       preferred_element_type=f32) + bk[l]       # (H,Sk,dk)
        v = jnp.einsum('hsd,hdf->hsf', xkv_h, wv[l],
                       preferred_element_type=f32) + bv[l]       # (H,Sk,dk)
        s = jnp.einsum('hqd,hkd->hqk', q.astype(bf16), k.astype(bf16),
                       preferred_element_type=f32)               # (H,Sq,Sk)
        m = jnp.max(s, axis=-1, keepdims=True)
        e = jnp.exp(s - m)
        p = e / jnp.sum(e, axis=-1, keepdims=True)               # exact softmax
        o = jnp.einsum('hqk,hkd->hqd', p.astype(bf16), v.astype(bf16),
                       preferred_element_type=f32)               # (H,Sq,dk)
        # Output projection: per-head matmul + reduce over heads
        # (== concat(heads) @ Wo, but with no lane-axis concatenation).
        proj = jnp.einsum('hqd,hdf->hqf', o.astype(bf16), wo[l],
                          preferred_element_type=f32)            # (H,Sq,D)
        return jnp.sum(proj, axis=0) + bo[l]                     # (Sq,D)

    def ffn_ln(x, prm, l):
        # LayerNorm(fc2(relu(fc1(x))) + x)
        w1, b1, w2, b2, g, beta = prm
        h = jnp.maximum(
            jnp.dot(x.astype(bf16), w1[l], preferred_element_type=f32) + b1[l],
            0.0)
        y = jnp.dot(h.astype(bf16), w2[l], preferred_element_type=f32) + b2[l] + x
        return _layernorm(y, g[l], beta[l])

    # ---------------- Encoder ----------------
    memory = embed(src_ids_ref)
    for l in range(num_layers):
        a = mha(memory, memory, enc_attn, l)
        memory = ffn_ln(a, enc_ffn, l)
    memory = _layernorm(memory, enc_g_ref[...], enc_b_ref[...])

    # ---------------- Decoder (no masks, matching the reference defaults) ----
    out = embed(tgt_ids_ref)
    for l in range(num_layers):
        a = mha(out, out, dec_self, l)
        c = mha(a, memory, dec_cross, l)
        out = ffn_ln(c, dec_ffn, l)
    out = _layernorm(out, dec_g_ref[...], dec_b_ref[...])

    # ------------- Lane-dense (128-padded) output projection -----------------
    logits = jnp.dot(out.astype(bf16), wout_ref[...],
                     preferred_element_type=f32) + bout_ref[...]  # (St, 128)
    out_ref[0] = logits


# ---------------------------------------------------------------------------
# Wrapper: one pallas_call for the whole forward pass.
# ---------------------------------------------------------------------------
def transformer_forward(src_ids, tgt_ids, weights, pe, *,
                        num_heads, num_layers, out_dim):
    B, Ss = src_ids.shape
    Bt, St = tgt_ids.shape
    assert B == Bt
    D = pe.shape[-1]
    n_pad = weights[-1].shape[-1]          # padded logits width (multiple of 128)

    pe_b = pe[:B]                          # (B, 1, D): reference pe[:x.size(0)]
    src3 = src_ids[..., None].astype(jnp.int32)   # (B, Ss, 1)
    tgt3 = tgt_ids[..., None].astype(jnp.int32)   # (B, St, 1)

    vmem = pl.BlockSpec(memory_space=pltpu.MemorySpace.VMEM)  # whole array, resident
    in_specs = (
        [pl.BlockSpec((1, Ss, 1), lambda b: (b, 0, 0)),
         pl.BlockSpec((1, St, 1), lambda b: (b, 0, 0)),
         pl.BlockSpec((1, 1, D), lambda b: (b, 0, 0))]
        + [vmem] * len(weights)
    )

    out = pl.pallas_call(
        functools.partial(_fused_transformer_kernel,
                          num_heads=num_heads, num_layers=num_layers),
        grid=(B,),
        in_specs=in_specs,
        out_specs=pl.BlockSpec((1, St, n_pad), lambda b: (b, 0, 0)),
        out_shape=jax.ShapeDtypeStruct((B, St, n_pad), jnp.float32),
        compiler_params=pltpu.CompilerParams(
            dimension_semantics=("parallel",)),
    )(src3, tgt3, pe_b, *weights)

    return out[:, :, :out_dim]


# ---------------------------------------------------------------------------
# Parameter construction (reference layout) and kernel-layout packing.
# ---------------------------------------------------------------------------
def make_pe(max_len, d_model):
    position = jnp.arange(max_len, dtype=jnp.float32)[:, None]
    div_term = jnp.exp(jnp.arange(0, d_model, 2, dtype=jnp.float32)
                       * (-math.log(10000.0) / d_model))
    pe = jnp.zeros((max_len, d_model), jnp.float32)
    pe = pe.at[:, 0::2].set(jnp.sin(position * div_term))
    pe = pe.at[:, 1::2].set(jnp.cos(position * div_term))
    return pe[:, None, :]  # (max_len, 1, d_model)


def init_params(key, input_dim, output_dim, d_model, num_layers, d_ff, max_len=64):
    keys = iter(jax.random.split(key, 512))

    def w(shape, scale=0.05):
        return scale * jax.random.normal(next(keys), shape, dtype=jnp.float32)

    def mha_p():
        return dict(wq=w((d_model, d_model)), bq=w((d_model,)),
                    wk=w((d_model, d_model)), bk=w((d_model,)),
                    wv=w((d_model, d_model)), bv=w((d_model,)),
                    wo=w((d_model, d_model)), bo=w((d_model,)))

    def ffn_p():
        return dict(w1=w((d_model, d_ff)), b1=w((d_ff,)),
                    w2=w((d_ff, d_model)), b2=w((d_model,)),
                    ln_g=jnp.ones((d_model,), jnp.float32),
                    ln_b=jnp.zeros((d_model,), jnp.float32))

    return dict(
        embedding=w((input_dim, d_model), scale=0.1),
        pe=make_pe(max_len, d_model),
        enc_layers=[dict(self_attn=mha_p(), ffn=ffn_p()) for _ in range(num_layers)],
        dec_layers=[dict(self_attn=mha_p(), cross_attn=mha_p(), ffn=ffn_p())
                    for _ in range(num_layers)],
        enc_ln_g=jnp.ones((d_model,), jnp.float32),
        enc_ln_b=jnp.zeros((d_model,), jnp.float32),
        dec_ln_g=jnp.ones((d_model,), jnp.float32),
        dec_ln_b=jnp.zeros((d_model,), jnp.float32),
        wout=w((d_model, output_dim)), bout=w((output_dim,)),
    )


def pack_params(params, num_heads):
    """Pre-split heads, fold 1/sqrt(dk) scale, cast matmul weights to bf16,
    pad embedding/output to 128 lanes, stack per-layer weights."""
    D = params["wout"].shape[0]
    H = num_heads
    dk = D // H
    scale = 1.0 / math.sqrt(dk)
    bf16 = jnp.bfloat16

    def split_in(wm, bvec, s):
        wh = (wm * s).reshape(D, H, dk).transpose(1, 0, 2).astype(bf16)  # (H,D,dk)
        bh = (bvec * s).reshape(H, 1, dk).astype(jnp.float32)            # (H,1,dk)
        return wh, bh

    def pack_attn(plist):
        wq, bq = zip(*[split_in(p["wq"], p["bq"], scale) for p in plist])
        wk, bk = zip(*[split_in(p["wk"], p["bk"], 1.0) for p in plist])
        wv, bv = zip(*[split_in(p["wv"], p["bv"], 1.0) for p in plist])
        wo = [p["wo"].reshape(H, dk, D).astype(bf16) for p in plist]     # (H,dk,D)
        bo = [p["bo"].reshape(1, D) for p in plist]
        return [jnp.stack(list(x)) for x in (wq, bq, wk, bk, wv, bv, wo, bo)]

    def pack_ffn(plist):
        w1 = jnp.stack([p["w1"].astype(bf16) for p in plist])
        b1 = jnp.stack([p["b1"].reshape(1, -1) for p in plist])
        w2 = jnp.stack([p["w2"].astype(bf16) for p in plist])
        b2 = jnp.stack([p["b2"].reshape(1, D) for p in plist])
        g = jnp.stack([p["ln_g"].reshape(1, D) for p in plist])
        b = jnp.stack([p["ln_b"].reshape(1, D) for p in plist])
        return [w1, b1, w2, b2, g, b]

    vocab = params["embedding"].shape[0]
    v_pad = ((vocab + 127) // 128) * 128
    emb_pad = jnp.zeros((v_pad, D), jnp.float32).at[:vocab].set(params["embedding"])

    out_dim = params["wout"].shape[1]
    n_pad = ((out_dim + 127) // 128) * 128
    wout_pad = (jnp.zeros((D, n_pad), jnp.float32)
                .at[:, :out_dim].set(params["wout"]).astype(bf16))
    bout_pad = (jnp.zeros((1, n_pad), jnp.float32)
                .at[:, :out_dim].set(params["bout"].reshape(1, -1)))

    enc = params["enc_layers"]
    dec = params["dec_layers"]
    weights = (
        [emb_pad]
        + pack_attn([l["self_attn"] for l in enc])
        + pack_ffn([l["ffn"] for l in enc])
        + pack_attn([l["self_attn"] for l in dec])
        + pack_attn([l["cross_attn"] for l in dec])
        + pack_ffn([l["ffn"] for l in dec])
        + [params["enc_ln_g"].reshape(1, D), params["enc_ln_b"].reshape(1, D),
           params["dec_ln_g"].reshape(1, D), params["dec_ln_b"].reshape(1, D),
           wout_pad, bout_pad]
    )
    return weights, params["pe"]


# ---------------------------------------------------------------------------
if __name__ == "__main__":
    # Small, shape-consistent configuration.
    input_dim = 100     # vocab size
    output_dim = 48
    d_model = 32
    num_heads = 4
    num_layers = 2
    d_ff = 64
    batch = 2
    src_len = 8
    tgt_len = 8

    key = jax.random.PRNGKey(0)
    kp, ks, kt = jax.random.split(key, 3)
    params = init_params(kp, input_dim, output_dim, d_model, num_layers, d_ff)
    weights, pe = pack_params(params, num_heads)

    src_ids = jax.random.randint(ks, (batch, src_len), 0, input_dim, dtype=jnp.int32)
    tgt_ids = jax.random.randint(kt, (batch, tgt_len), 0, input_dim, dtype=jnp.int32)

    # TODO(synk): dropout layers are identity (eval-mode semantics); training-mode
    # dropout is not implemented.
    fwd = jax.jit(functools.partial(transformer_forward,
                                    num_heads=num_heads, num_layers=num_layers,
                                    out_dim=output_dim))
    out = fwd(src_ids, tgt_ids, weights, pe)
    jax.block_until_ready(out)

    assert out.shape == (batch, tgt_len, output_dim), out.shape
    assert bool(jnp.all(jnp.isfinite(out)))
    print("KERNEL_OK")
</pallas_src>

<mosaic_0001>
module attributes {stable_mosaic.version = 11 : i64} {
  func.func @_fused_transformer_kernel(%arg0: i32, %arg1: memref<1x8x1xi32, #tpu.memory_space<vmem>>, %arg2: memref<1x8x1xi32, #tpu.memory_space<vmem>>, %arg3: memref<1x1x32xf32, #tpu.memory_space<vmem>>, %arg4: memref<128x32xf32, #tpu.memory_space<vmem>>, %arg5: memref<2x4x32x8xbf16, #tpu.memory_space<vmem>>, %arg6: memref<2x4x1x8xf32, #tpu.memory_space<vmem>>, %arg7: memref<2x4x32x8xbf16, #tpu.memory_space<vmem>>, %arg8: memref<2x4x1x8xf32, #tpu.memory_space<vmem>>, %arg9: memref<2x4x32x8xbf16, #tpu.memory_space<vmem>>, %arg10: memref<2x4x1x8xf32, #tpu.memory_space<vmem>>, %arg11: memref<2x4x8x32xbf16, #tpu.memory_space<vmem>>, %arg12: memref<2x1x32xf32, #tpu.memory_space<vmem>>, %arg13: memref<2x32x64xbf16, #tpu.memory_space<vmem>>, %arg14: memref<2x1x64xf32, #tpu.memory_space<vmem>>, %arg15: memref<2x64x32xbf16, #tpu.memory_space<vmem>>, %arg16: memref<2x1x32xf32, #tpu.memory_space<vmem>>, %arg17: memref<2x1x32xf32, #tpu.memory_space<vmem>>, %arg18: memref<2x1x32xf32, #tpu.memory_space<vmem>>, %arg19: memref<2x4x32x8xbf16, #tpu.memory_space<vmem>>, %arg20: memref<2x4x1x8xf32, #tpu.memory_space<vmem>>, %arg21: memref<2x4x32x8xbf16, #tpu.memory_space<vmem>>, %arg22: memref<2x4x1x8xf32, #tpu.memory_space<vmem>>, %arg23: memref<2x4x32x8xbf16, #tpu.memory_space<vmem>>, %arg24: memref<2x4x1x8xf32, #tpu.memory_space<vmem>>, %arg25: memref<2x4x8x32xbf16, #tpu.memory_space<vmem>>, %arg26: memref<2x1x32xf32, #tpu.memory_space<vmem>>, %arg27: memref<2x4x32x8xbf16, #tpu.memory_space<vmem>>, %arg28: memref<2x4x1x8xf32, #tpu.memory_space<vmem>>, %arg29: memref<2x4x32x8xbf16, #tpu.memory_space<vmem>>, %arg30: memref<2x4x1x8xf32, #tpu.memory_space<vmem>>, %arg31: memref<2x4x32x8xbf16, #tpu.memory_space<vmem>>, %arg32: memref<2x4x1x8xf32, #tpu.memory_space<vmem>>, %arg33: memref<2x4x8x32xbf16, #tpu.memory_space<vmem>>, %arg34: memref<2x1x32xf32, #tpu.memory_space<vmem>>, %arg35: memref<2x32x64xbf16, #tpu.memory_space<vmem>>, %arg36: memref<2x1x64xf32, #tpu.memory_space<vmem>>, %arg37: memref<2x64x32xbf16, #tpu.memory_space<vmem>>, %arg38: memref<2x1x32xf32, #tpu.memory_space<vmem>>, %arg39: memref<2x1x32xf32, #tpu.memory_space<vmem>>, %arg40: memref<2x1x32xf32, #tpu.memory_space<vmem>>, %arg41: memref<1x32xf32, #tpu.memory_space<vmem>>, %arg42: memref<1x32xf32, #tpu.memory_space<vmem>>, %arg43: memref<1x32xf32, #tpu.memory_space<vmem>>, %arg44: memref<1x32xf32, #tpu.memory_space<vmem>>, %arg45: memref<32x128xbf16, #tpu.memory_space<vmem>>, %arg46: memref<1x128xf32, #tpu.memory_space<vmem>>, %arg47: memref<1x8x128xf32, #tpu.memory_space<vmem>>) attributes {dimension_semantics = [#tpu.dimension_semantics<parallel>], iteration_bounds = array<i64: 2>, scalar_prefetch = 0 : i64, scratch_operands = 0 : i64, tpu.core_type = #tpu.core_type<tc>, window_params = [{transform_indices = @transform_0, window_bounds = array<i64: 1, 8, 1>}, {transform_indices = @transform_1, window_bounds = array<i64: 1, 8, 1>}, {transform_indices = @transform_2, window_bounds = array<i64: 1, 1, 32>}, {pipeline_mode = #tpu.pipeline_mode<synchronous>, transform_indices = @transform_3, window_bounds = array<i64: 128, 32>}, {pipeline_mode = #tpu.pipeline_mode<synchronous>, transform_indices = @transform_4, window_bounds = array<i64: 2, 4, 32, 8>}, {pipeline_mode = #tpu.pipeline_mode<synchronous>, transform_indices = @transform_5, window_bounds = array<i64: 2, 4, 1, 8>}, {pipeline_mode = #tpu.pipeline_mode<synchronous>, transform_indices = @transform_6, window_bounds = array<i64: 2, 4, 32, 8>}, {pipeline_mode = #tpu.pipeline_mode<synchronous>, transform_indices = @transform_7, window_bounds = array<i64: 2, 4, 1, 8>}, {pipeline_mode = #tpu.pipeline_mode<synchronous>, transform_indices = @transform_8, window_bounds = array<i64: 2, 4, 32, 8>}, {pipeline_mode = #tpu.pipeline_mode<synchronous>, transform_indices = @transform_9, window_bounds = array<i64: 2, 4, 1, 8>}, {pipeline_mode = #tpu.pipeline_mode<synchronous>, transform_indices = @transform_10, window_bounds = array<i64: 2, 4, 8, 32>}, {pipeline_mode = #tpu.pipeline_mode<synchronous>, transform_indices = @transform_11, window_bounds = array<i64: 2, 1, 32>}, {pipeline_mode = #tpu.pipeline_mode<synchronous>, transform_indices = @transform_12, window_bounds = array<i64: 2, 32, 64>}, {pipeline_mode = #tpu.pipeline_mode<synchronous>, transform_indices = @transform_13, window_bounds = array<i64: 2, 1, 64>}, {pipeline_mode = #tpu.pipeline_mode<synchronous>, transform_indices = @transform_14, window_bounds = array<i64: 2, 64, 32>}, {pipeline_mode = #tpu.pipeline_mode<synchronous>, transform_indices = @transform_15, window_bounds = array<i64: 2, 1, 32>}, {pipeline_mode = #tpu.pipeline_mode<synchronous>, transform_indices = @transform_16, window_bounds = array<i64: 2, 1, 32>}, {pipeline_mode = #tpu.pipeline_mode<synchronous>, transform_indices = @transform_17, window_bounds = array<i64: 2, 1, 32>}, {pipeline_mode = #tpu.pipeline_mode<synchronous>, transform_indices = @transform_18, window_bounds = array<i64: 2, 4, 32, 8>}, {pipeline_mode = #tpu.pipeline_mode<synchronous>, transform_indices = @transform_19, window_bounds = array<i64: 2, 4, 1, 8>}, {pipeline_mode = #tpu.pipeline_mode<synchronous>, transform_indices = @transform_20, window_bounds = array<i64: 2, 4, 32, 8>}, {pipeline_mode = #tpu.pipeline_mode<synchronous>, transform_indices = @transform_21, window_bounds = array<i64: 2, 4, 1, 8>}, {pipeline_mode = #tpu.pipeline_mode<synchronous>, transform_indices = @transform_22, window_bounds = array<i64: 2, 4, 32, 8>}, {pipeline_mode = #tpu.pipeline_mode<synchronous>, transform_indices = @transform_23, window_bounds = array<i64: 2, 4, 1, 8>}, {pipeline_mode = #tpu.pipeline_mode<synchronous>, transform_indices = @transform_24, window_bounds = array<i64: 2, 4, 8, 32>}, {pipeline_mode = #tpu.pipeline_mode<synchronous>, transform_indices = @transform_25, window_bounds = array<i64: 2, 1, 32>}, {pipeline_mode = #tpu.pipeline_mode<synchronous>, transform_indices = @transform_26, window_bounds = array<i64: 2, 4, 32, 8>}, {pipeline_mode = #tpu.pipeline_mode<synchronous>, transform_indices = @transform_27, window_bounds = array<i64: 2, 4, 1, 8>}, {pipeline_mode = #tpu.pipeline_mode<synchronous>, transform_indices = @transform_28, window_bounds = array<i64: 2, 4, 32, 8>}, {pipeline_mode = #tpu.pipeline_mode<synchronous>, transform_indices = @transform_29, window_bounds = array<i64: 2, 4, 1, 8>}, {pipeline_mode = #tpu.pipeline_mode<synchronous>, transform_indices = @transform_30, window_bounds = array<i64: 2, 4, 32, 8>}, {pipeline_mode = #tpu.pipeline_mode<synchronous>, transform_indices = @transform_31, window_bounds = array<i64: 2, 4, 1, 8>}, {pipeline_mode = #tpu.pipeline_mode<synchronous>, transform_indices = @transform_32, window_bounds = array<i64: 2, 4, 8, 32>}, {pipeline_mode = #tpu.pipeline_mode<synchronous>, transform_indices = @transform_33, window_bounds = array<i64: 2, 1, 32>}, {pipeline_mode = #tpu.pipeline_mode<synchronous>, transform_indices = @transform_34, window_bounds = array<i64: 2, 32, 64>}, {pipeline_mode = #tpu.pipeline_mode<synchronous>, transform_indices = @transform_35, window_bounds = array<i64: 2, 1, 64>}, {pipeline_mode = #tpu.pipeline_mode<synchronous>, transform_indices = @transform_36, window_bounds = array<i64: 2, 64, 32>}, {pipeline_mode = #tpu.pipeline_mode<synchronous>, transform_indices = @transform_37, window_bounds = array<i64: 2, 1, 32>}, {pipeline_mode = #tpu.pipeline_mode<synchronous>, transform_indices = @transform_38, window_bounds = array<i64: 2, 1, 32>}, {pipeline_mode = #tpu.pipeline_mode<synchronous>, transform_indices = @transform_39, window_bounds = array<i64: 2, 1, 32>}, {pipeline_mode = #tpu.pipeline_mode<synchronous>, transform_indices = @transform_40, window_bounds = array<i64: 1, 32>}, {pipeline_mode = #tpu.pipeline_mode<synchronous>, transform_indices = @transform_41, window_bounds = array<i64: 1, 32>}, {pipeline_mode = #tpu.pipeline_mode<synchronous>, transform_indices = @transform_42, window_bounds = array<i64: 1, 32>}, {pipeline_mode = #tpu.pipeline_mode<synchronous>, transform_indices = @transform_43, window_bounds = array<i64: 1, 32>}, {pipeline_mode = #tpu.pipeline_mode<synchronous>, transform_indices = @transform_44, window_bounds = array<i64: 32, 128>}, {pipeline_mode = #tpu.pipeline_mode<synchronous>, transform_indices = @transform_45, window_bounds = array<i64: 1, 128>}, {transform_indices = @transform_46, window_bounds = array<i64: 1, 8, 128>}]} {
    %c0 = arith.constant 0 : index
    %c0_0 = arith.constant 0 : index
    %c0_1 = arith.constant 0 : index
    %0 = vector.load %arg3[%c0, %c0_0, %c0_1] : memref<1x1x32xf32, #tpu.memory_space<vmem>>, vector<1x1x32xf32>
    %1 = vector.shape_cast %0 : vector<1x1x32xf32> to vector<1x32xf32>
    %c0_2 = arith.constant 0 : index
    %c0_3 = arith.constant 0 : index
    %c0_4 = arith.constant 0 : index
    %2 = vector.load %arg1[%c0_2, %c0_3, %c0_4] : memref<1x8x1xi32, #tpu.memory_space<vmem>>, vector<1x8x1xi32>
    %3 = vector.shape_cast %2 : vector<1x8x1xi32> to vector<8x1xi32>
    %4 = tpu.iota {dimensions = array<i32: 1>} : vector<8x128xi32>
    %5 = vector.broadcast %3 : vector<8x1xi32> to vector<8x128xi32>
    %6 = arith.cmpi eq, %5, %4 : vector<8x128xi32>
    %7 = arith.extui %6 : vector<8x128xi1> to vector<8x128xi32>
    %8 = arith.sitofp %7 : vector<8x128xi32> to vector<8x128xf32>
    %c0_5 = arith.constant 0 : index
    %c0_6 = arith.constant 0 : index
    %9 = vector.load %arg4[%c0_5, %c0_6] : memref<128x32xf32, #tpu.memory_space<vmem>>, vector<128x32xf32>
    %cst = arith.constant dense<0.000000e+00> : vector<8x32xf32>
    %10 = tpu.matmul %8, %9, %cst {dimension_numbers = #tpu.dot_dimension_numbers<[1], [0], [0], [1], [0, 0, 1, 1], [], []>} : vector<8x128xf32>, vector<128x32xf32>, vector<8x32xf32> -> vector<8x32xf32>
    %11 = vector.broadcast %1 : vector<1x32xf32> to vector<8x32xf32>
    %12 = arith.addf %10, %11 : vector<8x32xf32>
    %13 = arith.truncf %12 : vector<8x32xf32> to vector<8x32xbf16>
    %14 = vector.shape_cast %13 : vector<8x32xbf16> to vector<1x8x32xbf16>
    %15 = vector.broadcast %14 : vector<1x8x32xbf16> to vector<4x8x32xbf16>
    %16 = arith.truncf %12 : vector<8x32xf32> to vector<8x32xbf16>
    %17 = vector.shape_cast %16 : vector<8x32xbf16> to vector<1x8x32xbf16>
    %18 = vector.broadcast %17 : vector<1x8x32xbf16> to vector<4x8x32xbf16>
    %c0_7 = arith.constant 0 : index
    %c0_8 = arith.constant 0 : index
    %c0_9 = arith.constant 0 : index
    %c0_10 = arith.constant 0 : index
    %19 = vector.load %arg5[%c0_7, %c0_8, %c0_9, %c0_10] : memref<2x4x32x8xbf16, #tpu.memory_space<vmem>>, vector<1x4x32x8xbf16>
    %20 = vector.shape_cast %19 : vector<1x4x32x8xbf16> to vector<4x32x8xbf16>
    "tpu.trace_start"() <{level = 10 : i32, message = "hsd,hdf->hsf"}> : () -> ()
    %cst_11 = arith.constant dense<0.000000e+00> : vector<4x8x8xf32>
    %21 = tpu.matmul %15, %20, %cst_11 {dimension_numbers = #tpu.dot_dimension_numbers<[2], [1], [1], [2], [0, 0, 0, 1, 1, 2], [0], [0]>} : vector<4x8x32xbf16>, vector<4x32x8xbf16>, vector<4x8x8xf32> -> vector<4x8x8xf32>
    "tpu.trace_stop"() : () -> ()
    %c0_12 = arith.constant 0 : index
    %c0_13 = arith.constant 0 : index
    %c0_14 = arith.constant 0 : index
    %c0_15 = arith.constant 0 : index
    %22 = vector.load %arg6[%c0_12, %c0_13, %c0_14, %c0_15] : memref<2x4x1x8xf32, #tpu.memory_space<vmem>>, vector<1x4x1x8xf32>
    %23 = vector.shape_cast %22 : vector<1x4x1x8xf32> to vector<4x1x8xf32>
    %24 = vector.broadcast %23 : vector<4x1x8xf32> to vector<4x8x8xf32>
    %25 = arith.addf %21, %24 : vector<4x8x8xf32>
    %c0_16 = arith.constant 0 : index
    %c0_17 = arith.constant 0 : index
    %c0_18 = arith.constant 0 : index
    %c0_19 = arith.constant 0 : index
    %26 = vector.load %arg7[%c0_16, %c0_17, %c0_18, %c0_19] : memref<2x4x32x8xbf16, #tpu.memory_space<vmem>>, vector<1x4x32x8xbf16>
    %27 = vector.shape_cast %26 : vector<1x4x32x8xbf16> to vector<4x32x8xbf16>
    "tpu.trace_start"() <{level = 10 : i32, message = "hsd,hdf->hsf"}> : () -> ()
    %cst_20 = arith.constant dense<0.000000e+00> : vector<4x8x8xf32>
    %28 = tpu.matmul %18, %27, %cst_20 {dimension_numbers = #tpu.dot_dimension_numbers<[2], [1], [1], [2], [0, 0, 0, 1, 1, 2], [0], [0]>} : vector<4x8x32xbf16>, vector<4x32x8xbf16>, vector<4x8x8xf32> -> vector<4x8x8xf32>
    "tpu.trace_stop"() : () -> ()
    %c0_21 = arith.constant 0 : index
    %c0_22 = arith.constant 0 : index
    %c0_23 = arith.constant 0 : index
    %c0_24 = arith.constant 0 : index
    %29 = vector.load %arg8[%c0_21, %c0_22, %c0_23, %c0_24] : memref<2x4x1x8xf32, #tpu.memory_space<vmem>>, vector<1x4x1x8xf32>
    %30 = vector.shape_cast %29 : vector<1x4x1x8xf32> to vector<4x1x8xf32>
    %31 = vector.broadcast %30 : vector<4x1x8xf32> to vector<4x8x8xf32>
    %32 = arith.addf %28, %31 : vector<4x8x8xf32>
    %c0_25 = arith.constant 0 : index
    %c0_26 = arith.constant 0 : index
    %c0_27 = arith.constant 0 : index
    %c0_28 = arith.constant 0 : index
    %33 = vector.load %arg9[%c0_25, %c0_26, %c0_27, %c0_28] : memref<2x4x32x8xbf16, #tpu.memory_space<vmem>>, vector<1x4x32x8xbf16>
    %34 = vector.shape_cast %33 : vector<1x4x32x8xbf16> to vector<4x32x8xbf16>
    "tpu.trace_start"() <{level = 10 : i32, message = "hsd,hdf->hsf"}> : () -> ()
    %cst_29 = arith.constant dense<0.000000e+00> : vector<4x8x8xf32>
    %35 = tpu.matmul %18, %34, %cst_29 {dimension_numbers = #tpu.dot_dimension_numbers<[2], [1], [1], [2], [0, 0, 0, 1, 1, 2], [0], [0]>} : vector<4x8x32xbf16>, vector<4x32x8xbf16>, vector<4x8x8xf32> -> vector<4x8x8xf32>
    "tpu.trace_stop"() : () -> ()
    %c0_30 = arith.constant 0 : index
    %c0_31 = arith.constant 0 : index
    %c0_32 = arith.constant 0 : index
    %c0_33 = arith.constant 0 : index
    %36 = vector.load %arg10[%c0_30, %c0_31, %c0_32, %c0_33] : memref<2x4x1x8xf32, #tpu.memory_space<vmem>>, vector<1x4x1x8xf32>
    %37 = vector.shape_cast %36 : vector<1x4x1x8xf32> to vector<4x1x8xf32>
    %38 = vector.broadcast %37 : vector<4x1x8xf32> to vector<4x8x8xf32>
    %39 = arith.addf %35, %38 : vector<4x8x8xf32>
    %40 = arith.truncf %25 : vector<4x8x8xf32> to vector<4x8x8xbf16>
    %41 = arith.truncf %32 : vector<4x8x8xf32> to vector<4x8x8xbf16>
    "tpu.trace_start"() <{level = 10 : i32, message = "hqd,hkd->hqk"}> : () -> ()
    %cst_34 = arith.constant dense<0.000000e+00> : vector<4x8x8xf32>
    %42 = tpu.matmul %40, %41, %cst_34 {dimension_numbers = #tpu.dot_dimension_numbers<[2], [2], [1], [1], [0, 0, 0, 1, 1, 1], [0], [0]>} : vector<4x8x8xbf16>, vector<4x8x8xbf16>, vector<4x8x8xf32> -> vector<4x8x8xf32>
    "tpu.trace_stop"() : () -> ()
    %cst_35 = arith.constant dense<0xFF800000> : vector<4x8xf32>
    %43 = vector.multi_reduction <maximumf>, %42, %cst_35 [2] : vector<4x8x8xf32> to vector<4x8xf32>
    %44 = vector.shape_cast %43 : vector<4x8xf32> to vector<4x8x1xf32>
    %45 = vector.broadcast %44 : vector<4x8x1xf32> to vector<4x8x8xf32>
    %46 = arith.subf %42, %45 : vector<4x8x8xf32>
    %47 = math.exp %46 : vector<4x8x8xf32>
    %cst_36 = arith.constant dense<0.000000e+00> : vector<4x8xf32>
    %48 = vector.multi_reduction <add>, %47, %cst_36 [2] : vector<4x8x8xf32> to vector<4x8xf32>
    %49 = vector.shape_cast %48 : vector<4x8xf32> to vector<4x8x1xf32>
    %50 = vector.broadcast %49 : vector<4x8x1xf32> to vector<4x8x8xf32>
    %51 = arith.divf %47, %50 : vector<4x8x8xf32>
    %52 = arith.truncf %51 : vector<4x8x8xf32> to vector<4x8x8xbf16>
    %53 = arith.truncf %39 : vector<4x8x8xf32> to vector<4x8x8xbf16>
    "tpu.trace_start"() <{level = 10 : i32, message = "hqk,hkd->hqd"}> : () -> ()
    %cst_37 = arith.constant dense<0.000000e+00> : vector<4x8x8xf32>
    %54 = tpu.matmul %52, %53, %cst_37 {dimension_numbers = #tpu.dot_dimension_numbers<[2], [1], [1], [2], [0, 0, 0, 1, 1, 2], [0], [0]>} : vector<4x8x8xbf16>, vector<4x8x8xbf16>, vector<4x8x8xf32> -> vector<4x8x8xf32>
    "tpu.trace_stop"() : () -> ()
    %55 = arith.truncf %54 : vector<4x8x8xf32> to vector<4x8x8xbf16>
    %c0_38 = arith.constant 0 : index
    %c0_39 = arith.constant 0 : index
    %c0_40 = arith.constant 0 : index
    %c0_41 = arith.constant 0 : index
    %56 = vector.load %arg11[%c0_38, %c0_39, %c0_40, %c0_41] : memref<2x4x8x32xbf16, #tpu.memory_space<vmem>>, vector<1x4x8x32xbf16>
    %57 = vector.shape_cast %56 : vector<1x4x8x32xbf16> to vector<4x8x32xbf16>
    "tpu.trace_start"() <{level = 10 : i32, message = "hqd,hdf->hqf"}> : () -> ()
    %cst_42 = arith.constant dense<0.000000e+00> : vector<4x8x32xf32>
    %58 = tpu.matmul %55, %57, %cst_42 {dimension_numbers = #tpu.dot_dimension_numbers<[2], [1], [1], [2], [0, 0, 0, 1, 1, 2], [0], [0]>} : vector<4x8x8xbf16>, vector<4x8x32xbf16>, vector<4x8x32xf32> -> vector<4x8x32xf32>
    "tpu.trace_stop"() : () -> ()
    %cst_43 = arith.constant dense<0.000000e+00> : vector<8x32xf32>
    %59 = vector.multi_reduction <add>, %58, %cst_43 [0] : vector<4x8x32xf32> to vector<8x32xf32>
    %c0_44 = arith.constant 0 : index
    %c0_45 = arith.constant 0 : index
    %c0_46 = arith.constant 0 : index
    %60 = vector.load %arg12[%c0_44, %c0_45, %c0_46] : memref<2x1x32xf32, #tpu.memory_space<vmem>>, vector<1x1x32xf32>
    %61 = vector.shape_cast %60 : vector<1x1x32xf32> to vector<1x32xf32>
    %62 = vector.broadcast %61 : vector<1x32xf32> to vector<8x32xf32>
    %63 = arith.addf %59, %62 : vector<8x32xf32>
    %64 = arith.truncf %63 : vector<8x32xf32> to vector<8x32xbf16>
    %c0_47 = arith.constant 0 : index
    %c0_48 = arith.constant 0 : index
    %c0_49 = arith.constant 0 : index
    %65 = vector.load %arg13[%c0_47, %c0_48, %c0_49] : memref<2x32x64xbf16, #tpu.memory_space<vmem>>, vector<1x32x64xbf16>
    %66 = vector.shape_cast %65 : vector<1x32x64xbf16> to vector<32x64xbf16>
    %cst_50 = arith.constant dense<0.000000e+00> : vector<8x64xf32>
    %67 = tpu.matmul %64, %66, %cst_50 {dimension_numbers = #tpu.dot_dimension_numbers<[1], [0], [0], [1], [0, 0, 1, 1], [], []>} : vector<8x32xbf16>, vector<32x64xbf16>, vector<8x64xf32> -> vector<8x64xf32>
    %c0_51 = arith.constant 0 : index
    %c0_52 = arith.constant 0 : index
    %c0_53 = arith.constant 0 : index
    %68 = vector.load %arg14[%c0_51, %c0_52, %c0_53] : memref<2x1x64xf32, #tpu.memory_space<vmem>>, vector<1x1x64xf32>
    %69 = vector.shape_cast %68 : vector<1x1x64xf32> to vector<1x64xf32>
    %70 = vector.broadcast %69 : vector<1x64xf32> to vector<8x64xf32>
    %71 = arith.addf %67, %70 : vector<8x64xf32>
    %cst_54 = arith.constant 0.000000e+00 : f32
    %72 = vector.broadcast %cst_54 : f32 to vector<8x64xf32>
    %73 = arith.maximumf %71, %72 : vector<8x64xf32>
    %74 = arith.truncf %73 : vector<8x64xf32> to vector<8x64xbf16>
    %c0_55 = arith.constant 0 : index
    %c0_56 = arith.constant 0 : index
    %c0_57 = arith.constant 0 : index
    %75 = vector.load %arg15[%c0_55, %c0_56, %c0_57] : memref<2x64x32xbf16, #tpu.memory_space<vmem>>, vector<1x64x32xbf16>
    %76 = vector.shape_cast %75 : vector<1x64x32xbf16> to vector<64x32xbf16>
    %cst_58 = arith.constant dense<0.000000e+00> : vector<8x32xf32>
    %77 = tpu.matmul %74, %76, %cst_58 {dimension_numbers = #tpu.dot_dimension_numbers<[1], [0], [0], [1], [0, 0, 1, 1], [], []>} : vector<8x64xbf16>, vector<64x32xbf16>, vector<8x32xf32> -> vector<8x32xf32>
    %c0_59 = arith.constant 0 : index
    %c0_60 = arith.constant 0 : index
    %c0_61 = arith.constant 0 : index
    %78 = vector.load %arg16[%c0_59, %c0_60, %c0_61] : memref<2x1x32xf32, #tpu.memory_space<vmem>>, vector<1x1x32xf32>
    %79 = vector.shape_cast %78 : vector<1x1x32xf32> to vector<1x32xf32>
    %80 = vector.broadcast %79 : vector<1x32xf32> to vector<8x32xf32>
    %81 = arith.addf %77, %80 : vector<8x32xf32>
    %82 = arith.addf %81, %63 : vector<8x32xf32>
    %c0_62 = arith.constant 0 : index
    %c0_63 = arith.constant 0 : index
    %c0_64 = arith.constant 0 : index
    %83 = vector.load %arg17[%c0_62, %c0_63, %c0_64] : memref<2x1x32xf32, #tpu.memory_space<vmem>>, vector<1x1x32xf32>
    %84 = vector.shape_cast %83 : vector<1x1x32xf32> to vector<1x32xf32>
    %c0_65 = arith.constant 0 : index
    %c0_66 = arith.constant 0 : index
    %c0_67 = arith.constant 0 : index
    %85 = vector.load %arg18[%c0_65, %c0_66, %c0_67] : memref<2x1x32xf32, #tpu.memory_space<vmem>>, vector<1x1x32xf32>
    %86 = vector.shape_cast %85 : vector<1x1x32xf32> to vector<1x32xf32>
    %cst_68 = arith.constant dense<0.000000e+00> : vector<8xf32>
    %87 = vector.multi_reduction <add>, %82, %cst_68 [1] : vector<8x32xf32> to vector<8xf32>
    %88 = vector.shape_cast %87 : vector<8xf32> to vector<8x1xf32>
    %cst_69 = arith.constant 3.200000e+01 : f32
    %89 = vector.broadcast %cst_69 : f32 to vector<8x1xf32>
    %90 = arith.divf %88, %89 : vector<8x1xf32>
    %91 = vector.broadcast %90 : vector<8x1xf32> to vector<8x32xf32>
    %92 = arith.subf %82, %91 : vector<8x32xf32>
    %93 = arith.mulf %92, %92 : vector<8x32xf32>
    %cst_70 = arith.constant dense<0.000000e+00> : vector<8xf32>
    %94 = vector.multi_reduction <add>, %93, %cst_70 [1] : vector<8x32xf32> to vector<8xf32>
    %95 = vector.shape_cast %94 : vector<8xf32> to vector<8x1xf32>
    %cst_71 = arith.constant 3.200000e+01 : f32
    %96 = vector.broadcast %cst_71 : f32 to vector<8x1xf32>
    %97 = arith.divf %95, %96 : vector<8x1xf32>
    %98 = vector.broadcast %90 : vector<8x1xf32> to vector<8x32xf32>
    %99 = arith.subf %82, %98 : vector<8x32xf32>
    %cst_72 = arith.constant 9.99999974E-6 : f32
    %100 = vector.broadcast %cst_72 : f32 to vector<8x1xf32>
    %101 = arith.addf %97, %100 : vector<8x1xf32>
    %102 = math.rsqrt %101 : vector<8x1xf32>
    %103 = vector.broadcast %102 : vector<8x1xf32> to vector<8x32xf32>
    %104 = arith.mulf %99, %103 : vector<8x32xf32>
    %105 = vector.broadcast %84 : vector<1x32xf32> to vector<8x32xf32>
    %106 = arith.mulf %104, %105 : vector<8x32xf32>
    %107 = vector.broadcast %86 : vector<1x32xf32> to vector<8x32xf32>
    %108 = arith.addf %106, %107 : vector<8x32xf32>
    %109 = arith.truncf %108 : vector<8x32xf32> to vector<8x32xbf16>
    %110 = vector.shape_cast %109 : vector<8x32xbf16> to vector<1x8x32xbf16>
    %111 = vector.broadcast %110 : vector<1x8x32xbf16> to vector<4x8x32xbf16>
    %112 = arith.truncf %108 : vector<8x32xf32> to vector<8x32xbf16>
    %113 = vector.shape_cast %112 : vector<8x32xbf16> to vector<1x8x32xbf16>
    %114 = vector.broadcast %113 : vector<1x8x32xbf16> to vector<4x8x32xbf16>
    %c1 = arith.constant 1 : index
    %c0_73 = arith.constant 0 : index
    %c0_74 = arith.constant 0 : index
    %c0_75 = arith.constant 0 : index
    %115 = vector.load %arg5[%c1, %c0_73, %c0_74, %c0_75] : memref<2x4x32x8xbf16, #tpu.memory_space<vmem>>, vector<1x4x32x8xbf16>
    %116 = vector.shape_cast %115 : vector<1x4x32x8xbf16> to vector<4x32x8xbf16>
    "tpu.trace_start"() <{level = 10 : i32, message = "hsd,hdf->hsf"}> : () -> ()
    %cst_76 = arith.constant dense<0.000000e+00> : vector<4x8x8xf32>
    %117 = tpu.matmul %111, %116, %cst_76 {dimension_numbers = #tpu.dot_dimension_numbers<[2], [1], [1], [2], [0, 0, 0, 1, 1, 2], [0], [0]>} : vector<4x8x32xbf16>, vector<4x32x8xbf16>, vector<4x8x8xf32> -> vector<4x8x8xf32>
    "tpu.trace_stop"() : () -> ()
    %c1_77 = arith.constant 1 : index
    %c0_78 = arith.constant 0 : index
    %c0_79 = arith.constant 0 : index
    %c0_80 = arith.constant 0 : index
    %118 = vector.load %arg6[%c1_77, %c0_78, %c0_79, %c0_80] : memref<2x4x1x8xf32, #tpu.memory_space<vmem>>, vector<1x4x1x8xf32>
    %119 = vector.shape_cast %118 : vector<1x4x1x8xf32> to vector<4x1x8xf32>
    %120 = vector.broadcast %119 : vector<4x1x8xf32> to vector<4x8x8xf32>
    %121 = arith.addf %117, %120 : vector<4x8x8xf32>
    %c1_81 = arith.constant 1 : index
    %c0_82 = arith.constant 0 : index
    %c0_83 = arith.constant 0 : index
    %c0_84 = arith.constant 0 : index
    %122 = vector.load %arg7[%c1_81, %c0_82, %c0_83, %c0_84] : memref<2x4x32x8xbf16, #tpu.memory_space<vmem>>, vector<1x4x32x8xbf16>
    %123 = vector.shape_cast %122 : vector<1x4x32x8xbf16> to vector<4x32x8xbf16>
    "tpu.trace_start"() <{level = 10 : i32, message = "hsd,hdf->hsf"}> : () -> ()
    %cst_85 = arith.constant dense<0.000000e+00> : vector<4x8x8xf32>
    %124 = tpu.matmul %114, %123, %cst_85 {dimension_numbers = #tpu.dot_dimension_numbers<[2], [1], [1], [2], [0, 0, 0, 1, 1, 2], [0], [0]>} : vector<4x8x32xbf16>, vector<4x32x8xbf16>, vector<4x8x8xf32> -> vector<4x8x8xf32>
    "tpu.trace_stop"() : () -> ()
    %c1_86 = arith.constant 1 : index
    %c0_87 = arith.constant 0 : index
    %c0_88 = arith.constant 0 : index
    %c0_89 = arith.constant 0 : index
    %125 = vector.load %arg8[%c1_86, %c0_87, %c0_88, %c0_89] : memref<2x4x1x8xf32, #tpu.memory_space<vmem>>, vector<1x4x1x8xf32>
    %126 = vector.shape_cast %125 : vector<1x4x1x8xf32> to vector<4x1x8xf32>
    %127 = vector.broadcast %126 : vector<4x1x8xf32> to vector<4x8x8xf32>
    %128 = arith.addf %124, %127 : vector<4x8x8xf32>
    %c1_90 = arith.constant 1 : index
    %c0_91 = arith.constant 0 : index
    %c0_92 = arith.constant 0 : index
    %c0_93 = arith.constant 0 : index
    %129 = vector.load %arg9[%c1_90, %c0_91, %c0_92, %c0_93] : memref<2x4x32x8xbf16, #tpu.memory_space<vmem>>, vector<1x4x32x8xbf16>
    %130 = vector.shape_cast %129 : vector<1x4x32x8xbf16> to vector<4x32x8xbf16>
    "tpu.trace_start"() <{level = 10 : i32, message = "hsd,hdf->hsf"}> : () -> ()
    %cst_94 = arith.constant dense<0.000000e+00> : vector<4x8x8xf32>
    %131 = tpu.matmul %114, %130, %cst_94 {dimension_numbers = #tpu.dot_dimension_numbers<[2], [1], [1], [2], [0, 0, 0, 1, 1, 2], [0], [0]>} : vector<4x8x32xbf16>, vector<4x32x8xbf16>, vector<4x8x8xf32> -> vector<4x8x8xf32>
    "tpu.trace_stop"() : () -> ()
    %c1_95 = arith.constant 1 : index
    %c0_96 = arith.constant 0 : index
    %c0_97 = arith.constant 0 : index
    %c0_98 = arith.constant 0 : index
    %132 = vector.load %arg10[%c1_95, %c0_96, %c0_97, %c0_98] : memref<2x4x1x8xf32, #tpu.memory_space<vmem>>, vector<1x4x1x8xf32>
    %133 = vector.shape_cast %132 : vector<1x4x1x8xf32> to vector<4x1x8xf32>
    %134 = vector.broadcast %133 : vector<4x1x8xf32> to vector<4x8x8xf32>
    %135 = arith.addf %131, %134 : vector<4x8x8xf32>
    %136 = arith.truncf %121 : vector<4x8x8xf32> to vector<4x8x8xbf16>
    %137 = arith.truncf %128 : vector<4x8x8xf32> to vector<4x8x8xbf16>
    "tpu.trace_start"() <{level = 10 : i32, message = "hqd,hkd->hqk"}> : () -> ()
    %cst_99 = arith.constant dense<0.000000e+00> : vector<4x8x8xf32>
    %138 = tpu.matmul %136, %137, %cst_99 {dimension_numbers = #tpu.dot_dimension_numbers<[2], [2], [1], [1], [0, 0, 0, 1, 1, 1], [0], [0]>} : vector<4x8x8xbf16>, vector<4x8x8xbf16>, vector<4x8x8xf32> -> vector<4x8x8xf32>
    "tpu.trace_stop"() : () -> ()
    %cst_100 = arith.constant dense<0xFF800000> : vector<4x8xf32>
    %139 = vector.multi_reduction <maximumf>, %138, %cst_100 [2] : vector<4x8x8xf32> to vector<4x8xf32>
    %140 = vector.shape_cast %139 : vector<4x8xf32> to vector<4x8x1xf32>
    %141 = vector.broadcast %140 : vector<4x8x1xf32> to vector<4x8x8xf32>
    %142 = arith.subf %138, %141 : vector<4x8x8xf32>
    %143 = math.exp %142 : vector<4x8x8xf32>
    %cst_101 = arith.constant dense<0.000000e+00> : vector<4x8xf32>
    %144 = vector.multi_reduction <add>, %143, %cst_101 [2] : vector<4x8x8xf32> to vector<4x8xf32>
    %145 = vector.shape_cast %144 : vector<4x8xf32> to vector<4x8x1xf32>
    %146 = vector.broadcast %145 : vector<4x8x1xf32> to vector<4x8x8xf32>
    %147 = arith.divf %143, %146 : vector<4x8x8xf32>
    %148 = arith.truncf %147 : vector<4x8x8xf32> to vector<4x8x8xbf16>
    %149 = arith.truncf %135 : vector<4x8x8xf32> to vector<4x8x8xbf16>
    "tpu.trace_start"() <{level = 10 : i32, message = "hqk,hkd->hqd"}> : () -> ()
    %cst_102 = arith.constant dense<0.000000e+00> : vector<4x8x8xf32>
    %150 = tpu.matmul %148, %149, %cst_102 {dimension_numbers = #tpu.dot_dimension_numbers<[2], [1], [1], [2], [0, 0, 0, 1, 1, 2], [0], [0]>} : vector<4x8x8xbf16>, vector<4x8x8xbf16>, vector<4x8x8xf32> -> vector<4x8x8xf32>
    "tpu.trace_stop"() : () -> ()
    %151 = arith.truncf %150 : vector<4x8x8xf32> to vector<4x8x8xbf16>
    %c1_103 = arith.constant 1 : index
    %c0_104 = arith.constant 0 : index
    %c0_105 = arith.constant 0 : index
    %c0_106 = arith.constant 0 : index
    %152 = vector.load %arg11[%c1_103, %c0_104, %c0_105, %c0_106] : memref<2x4x8x32xbf16, #tpu.memory_space<vmem>>, vector<1x4x8x32xbf16>
    %153 = vector.shape_cast %152 : vector<1x4x8x32xbf16> to vector<4x8x32xbf16>
    "tpu.trace_start"() <{level = 10 : i32, message = "hqd,hdf->hqf"}> : () -> ()
    %cst_107 = arith.constant dense<0.000000e+00> : vector<4x8x32xf32>
    %154 = tpu.matmul %151, %153, %cst_107 {dimension_numbers = #tpu.dot_dimension_numbers<[2], [1], [1], [2], [0, 0, 0, 1, 1, 2], [0], [0]>} : vector<4x8x8xbf16>, vector<4x8x32xbf16>, vector<4x8x32xf32> -> vector<4x8x32xf32>
    "tpu.trace_stop"() : () -> ()
    %cst_108 = arith.constant dense<0.000000e+00> : vector<8x32xf32>
    %155 = vector.multi_reduction <add>, %154, %cst_108 [0] : vector<4x8x32xf32> to vector<8x32xf32>
    %c1_109 = arith.constant 1 : index
    %c0_110 = arith.constant 0 : index
    %c0_111 = arith.constant 0 : index
    %156 = vector.load %arg12[%c1_109, %c0_110, %c0_111] : memref<2x1x32xf32, #tpu.memory_space<vmem>>, vector<1x1x32xf32>
    %157 = vector.shape_cast %156 : vector<1x1x32xf32> to vector<1x32xf32>
    %158 = vector.broadcast %157 : vector<1x32xf32> to vector<8x32xf32>
    %159 = arith.addf %155, %158 : vector<8x32xf32>
    %160 = arith.truncf %159 : vector<8x32xf32> to vector<8x32xbf16>
    %c1_112 = arith.constant 1 : index
    %c0_113 = arith.constant 0 : index
    %c0_114 = arith.constant 0 : index
    %161 = vector.load %arg13[%c1_112, %c0_113, %c0_114] : memref<2x32x64xbf16, #tpu.memory_space<vmem>>, vector<1x32x64xbf16>
    %162 = vector.shape_cast %161 : vector<1x32x64xbf16> to vector<32x64xbf16>
    %cst_115 = arith.constant dense<0.000000e+00> : vector<8x64xf32>
    %163 = tpu.matmul %160, %162, %cst_115 {dimension_numbers = #tpu.dot_dimension_numbers<[1], [0], [0], [1], [0, 0, 1, 1], [], []>} : vector<8x32xbf16>, vector<32x64xbf16>, vector<8x64xf32> -> vector<8x64xf32>
    %c1_116 = arith.constant 1 : index
    %c0_117 = arith.constant 0 : index
    %c0_118 = arith.constant 0 : index
    %164 = vector.load %arg14[%c1_116, %c0_117, %c0_118] : memref<2x1x64xf32, #tpu.memory_space<vmem>>, vector<1x1x64xf32>
    %165 = vector.shape_cast %164 : vector<1x1x64xf32> to vector<1x64xf32>
    %166 = vector.broadcast %165 : vector<1x64xf32> to vector<8x64xf32>
    %167 = arith.addf %163, %166 : vector<8x64xf32>
    %cst_119 = arith.constant 0.000000e+00 : f32
    %168 = vector.broadcast %cst_119 : f32 to vector<8x64xf32>
    %169 = arith.maximumf %167, %168 : vector<8x64xf32>
    %170 = arith.truncf %169 : vector<8x64xf32> to vector<8x64xbf16>
    %c1_120 = arith.constant 1 : index
    %c0_121 = arith.constant 0 : index
    %c0_122 = arith.constant 0 : index
    %171 = vector.load %arg15[%c1_120, %c0_121, %c0_122] : memref<2x64x32xbf16, #tpu.memory_space<vmem>>, vector<1x64x32xbf16>
    %172 = vector.shape_cast %171 : vector<1x64x32xbf16> to vector<64x32xbf16>
    %cst_123 = arith.constant dense<0.000000e+00> : vector<8x32xf32>
    %173 = tpu.matmul %170, %172, %cst_123 {dimension_numbers = #tpu.dot_dimension_numbers<[1], [0], [0], [1], [0, 0, 1, 1], [], []>} : vector<8x64xbf16>, vector<64x32xbf16>, vector<8x32xf32> -> vector<8x32xf32>
    %c1_124 = arith.constant 1 : index
    %c0_125 = arith.constant 0 : index
    %c0_126 = arith.constant 0 : index
    %174 = vector.load %arg16[%c1_124, %c0_125, %c0_126] : memref<2x1x32xf32, #tpu.memory_space<vmem>>, vector<1x1x32xf32>
    %175 = vector.shape_cast %174 : vector<1x1x32xf32> to vector<1x32xf32>
    %176 = vector.broadcast %175 : vector<1x32xf32> to vector<8x32xf32>
    %177 = arith.addf %173, %176 : vector<8x32xf32>
    %178 = arith.addf %177, %159 : vector<8x32xf32>
    %c1_127 = arith.constant 1 : index
    %c0_128 = arith.constant 0 : index
    %c0_129 = arith.constant 0 : index
    %179 = vector.load %arg17[%c1_127, %c0_128, %c0_129] : memref<2x1x32xf32, #tpu.memory_space<vmem>>, vector<1x1x32xf32>
    %180 = vector.shape_cast %179 : vector<1x1x32xf32> to vector<1x32xf32>
    %c1_130 = arith.constant 1 : index
    %c0_131 = arith.constant 0 : index
    %c0_132 = arith.constant 0 : index
    %181 = vector.load %arg18[%c1_130, %c0_131, %c0_132] : memref<2x1x32xf32, #tpu.memory_space<vmem>>, vector<1x1x32xf32>
    %182 = vector.shape_cast %181 : vector<1x1x32xf32> to vector<1x32xf32>
    %cst_133 = arith.constant dense<0.000000e+00> : vector<8xf32>
    %183 = vector.multi_reduction <add>, %178, %cst_133 [1] : vector<8x32xf32> to vector<8xf32>
    %184 = vector.shape_cast %183 : vector<8xf32> to vector<8x1xf32>
    %cst_134 = arith.constant 3.200000e+01 : f32
    %185 = vector.broadcast %cst_134 : f32 to vector<8x1xf32>
    %186 = arith.divf %184, %185 : vector<8x1xf32>
    %187 = vector.broadcast %186 : vector<8x1xf32> to vector<8x32xf32>
    %188 = arith.subf %178, %187 : vector<8x32xf32>
    %189 = arith.mulf %188, %188 : vector<8x32xf32>
    %cst_135 = arith.constant dense<0.000000e+00> : vector<8xf32>
    %190 = vector.multi_reduction <add>, %189, %cst_135 [1] : vector<8x32xf32> to vector<8xf32>
    %191 = vector.shape_cast %190 : vector<8xf32> to vector<8x1xf32>
    %cst_136 = arith.constant 3.200000e+01 : f32
    %192 = vector.broadcast %cst_136 : f32 to vector<8x1xf32>
    %193 = arith.divf %191, %192 : vector<8x1xf32>
    %194 = vector.broadcast %186 : vector<8x1xf32> to vector<8x32xf32>
    %195 = arith.subf %178, %194 : vector<8x32xf32>
    %cst_137 = arith.constant 9.99999974E-6 : f32
    %196 = vector.broadcast %cst_137 : f32 to vector<8x1xf32>
    %197 = arith.addf %193, %196 : vector<8x1xf32>
    %198 = math.rsqrt %197 : vector<8x1xf32>
    %199 = vector.broadcast %198 : vector<8x1xf32> to vector<8x32xf32>
    %200 = arith.mulf %195, %199 : vector<8x32xf32>
    %201 = vector.broadcast %180 : vector<1x32xf32> to vector<8x32xf32>
    %202 = arith.mulf %200, %201 : vector<8x32xf32>
    %203 = vector.broadcast %182 : vector<1x32xf32> to vector<8x32xf32>
    %204 = arith.addf %202, %203 : vector<8x32xf32>
    %c0_138 = arith.constant 0 : index
    %c0_139 = arith.constant 0 : index
    %205 = vector.load %arg41[%c0_138, %c0_139] : memref<1x32xf32, #tpu.memory_space<vmem>>, vector<1x32xf32>
    %c0_140 = arith.constant 0 : index
    %c0_141 = arith.constant 0 : index
    %206 = vector.load %arg42[%c0_140, %c0_141] : memref<1x32xf32, #tpu.memory_space<vmem>>, vector<1x32xf32>
    %cst_142 = arith.constant dense<0.000000e+00> : vector<8xf32>
    %207 = vector.multi_reduction <add>, %204, %cst_142 [1] : vector<8x32xf32> to vector<8xf32>
    %208 = vector.shape_cast %207 : vector<8xf32> to vector<8x1xf32>
    %cst_143 = arith.constant 3.200000e+01 : f32
    %209 = vector.broadcast %cst_143 : f32 to vector<8x1xf32>
    %210 = arith.divf %208, %209 : vector<8x1xf32>
    %211 = vector.broadcast %210 : vector<8x1xf32> to vector<8x32xf32>
    %212 = arith.subf %204, %211 : vector<8x32xf32>
    %213 = arith.mulf %212, %212 : vector<8x32xf32>
    %cst_144 = arith.constant dense<0.000000e+00> : vector<8xf32>
    %214 = vector.multi_reduction <add>, %213, %cst_144 [1] : vector<8x32xf32> to vector<8xf32>
    %215 = vector.shape_cast %214 : vector<8xf32> to vector<8x1xf32>
    %cst_145 = arith.constant 3.200000e+01 : f32
    %216 = vector.broadcast %cst_145 : f32 to vector<8x1xf32>
    %217 = arith.divf %215, %216 : vector<8x1xf32>
    %218 = vector.broadcast %210 : vector<8x1xf32> to vector<8x32xf32>
    %219 = arith.subf %204, %218 : vector<8x32xf32>
    %cst_146 = arith.constant 9.99999974E-6 : f32
    %220 = vector.broadcast %cst_146 : f32 to vector<8x1xf32>
    %221 = arith.addf %217, %220 : vector<8x1xf32>
    %222 = math.rsqrt %221 : vector<8x1xf32>
    %223 = vector.broadcast %222 : vector<8x1xf32> to vector<8x32xf32>
    %224 = arith.mulf %219, %223 : vector<8x32xf32>
    %225 = vector.broadcast %205 : vector<1x32xf32> to vector<8x32xf32>
    %226 = arith.mulf %224, %225 : vector<8x32xf32>
    %227 = vector.broadcast %206 : vector<1x32xf32> to vector<8x32xf32>
    %228 = arith.addf %226, %227 : vector<8x32xf32>
    %c0_147 = arith.constant 0 : index
    %c0_148 = arith.constant 0 : index
    %c0_149 = arith.constant 0 : index
    %229 = vector.load %arg2[%c0_147, %c0_148, %c0_149] : memref<1x8x1xi32, #tpu.memory_space<vmem>>, vector<1x8x1xi32>
    %230 = vector.shape_cast %229 : vector<1x8x1xi32> to vector<8x1xi32>
    %231 = tpu.iota {dimensions = array<i32: 1>} : vector<8x128xi32>
    %232 = vector.broadcast %230 : vector<8x1xi32> to vector<8x128xi32>
    %233 = arith.cmpi eq, %232, %231 : vector<8x128xi32>
    %234 = arith.extui %233 : vector<8x128xi1> to vector<8x128xi32>
    %235 = arith.sitofp %234 : vector<8x128xi32> to vector<8x128xf32>
    %c0_150 = arith.constant 0 : index
    %c0_151 = arith.constant 0 : index
    %236 = vector.load %arg4[%c0_150, %c0_151] : memref<128x32xf32, #tpu.memory_space<vmem>>, vector<128x32xf32>
    %cst_152 = arith.constant dense<0.000000e+00> : vector<8x32xf32>
    %237 = tpu.matmul %235, %236, %cst_152 {dimension_numbers = #tpu.dot_dimension_numbers<[1], [0], [0], [1], [0, 0, 1, 1], [], []>} : vector<8x128xf32>, vector<128x32xf32>, vector<8x32xf32> -> vector<8x32xf32>
    %238 = vector.broadcast %1 : vector<1x32xf32> to vector<8x32xf32>
    %239 = arith.addf %237, %238 : vector<8x32xf32>
    %240 = arith.truncf %239 : vector<8x32xf32> to vector<8x32xbf16>
    %241 = vector.shape_cast %240 : vector<8x32xbf16> to vector<1x8x32xbf16>
    %242 = vector.broadcast %241 : vector<1x8x32xbf16> to vector<4x8x32xbf16>
    %243 = arith.truncf %239 : vector<8x32xf32> to vector<8x32xbf16>
    %244 = vector.shape_cast %243 : vector<8x32xbf16> to vector<1x8x32xbf16>
    %245 = vector.broadcast %244 : vector<1x8x32xbf16> to vector<4x8x32xbf16>
    %c0_153 = arith.constant 0 : index
    %c0_154 = arith.constant 0 : index
    %c0_155 = arith.constant 0 : index
    %c0_156 = arith.constant 0 : index
    %246 = vector.load %arg19[%c0_153, %c0_154, %c0_155, %c0_156] : memref<2x4x32x8xbf16, #tpu.memory_space<vmem>>, vector<1x4x32x8xbf16>
    %247 = vector.shape_cast %246 : vector<1x4x32x8xbf16> to vector<4x32x8xbf16>
    "tpu.trace_start"() <{level = 10 : i32, message = "hsd,hdf->hsf"}> : () -> ()
    %cst_157 = arith.constant dense<0.000000e+00> : vector<4x8x8xf32>
    %248 = tpu.matmul %242, %247, %cst_157 {dimension_numbers = #tpu.dot_dimension_numbers<[2], [1], [1], [2], [0, 0, 0, 1, 1, 2], [0], [0]>} : vector<4x8x32xbf16>, vector<4x32x8xbf16>, vector<4x8x8xf32> -> vector<4x8x8xf32>
    "tpu.trace_stop"() : () -> ()
    %c0_158 = arith.constant 0 : index
    %c0_159 = arith.constant 0 : index
    %c0_160 = arith.constant 0 : index
    %c0_161 = arith.constant 0 : index
    %249 = vector.load %arg20[%c0_158, %c0_159, %c0_160, %c0_161] : memref<2x4x1x8xf32, #tpu.memory_space<vmem>>, vector<1x4x1x8xf32>
    %250 = vector.shape_cast %249 : vector<1x4x1x8xf32> to vector<4x1x8xf32>
    %251 = vector.broadcast %250 : vector<4x1x8xf32> to vector<4x8x8xf32>
    %252 = arith.addf %248, %251 : vector<4x8x8xf32>
    %c0_162 = arith.constant 0 : index
    %c0_163 = arith.constant 0 : index
    %c0_164 = arith.constant 0 : index
    %c0_165 = arith.constant 0 : index
    %253 = vector.load %arg21[%c0_162, %c0_163, %c0_164, %c0_165] : memref<2x4x32x8xbf16, #tpu.memory_space<vmem>>, vector<1x4x32x8xbf16>
    %254 = vector.shape_cast %253 : vector<1x4x32x8xbf16> to vector<4x32x8xbf16>
    "tpu.trace_start"() <{level = 10 : i32, message = "hsd,hdf->hsf"}> : () -> ()
    %cst_166 = arith.constant dense<0.000000e+00> : vector<4x8x8xf32>
    %255 = tpu.matmul %245, %254, %cst_166 {dimension_numbers = #tpu.dot_dimension_numbers<[2], [1], [1], [2], [0, 0, 0, 1, 1, 2], [0], [0]>} : vector<4x8x32xbf16>, vector<4x32x8xbf16>, vector<4x8x8xf32> -> vector<4x8x8xf32>
    "tpu.trace_stop"() : () -> ()
    %c0_167 = arith.constant 0 : index
    %c0_168 = arith.constant 0 : index
    %c0_169 = arith.constant 0 : index
    %c0_170 = arith.constant 0 : index
    %256 = vector.load %arg22[%c0_167, %c0_168, %c0_169, %c0_170] : memref<2x4x1x8xf32, #tpu.memory_space<vmem>>, vector<1x4x1x8xf32>
    %257 = vector.shape_cast %256 : vector<1x4x1x8xf32> to vector<4x1x8xf32>
    %258 = vector.broadcast %257 : vector<4x1x8xf32> to vector<4x8x8xf32>
    %259 = arith.addf %255, %258 : vector<4x8x8xf32>
    %c0_171 = arith.constant 0 : index
    %c0_172 = arith.constant 0 : index
    %c0_173 = arith.constant 0 : index
    %c0_174 = arith.constant 0 : index
    %260 = vector.load %arg23[%c0_171, %c0_172, %c0_173, %c0_174] : memref<2x4x32x8xbf16, #tpu.memory_space<vmem>>, vector<1x4x32x8xbf16>
    %261 = vector.shape_cast %260 : vector<1x4x32x8xbf16> to vector<4x32x8xbf16>
    "tpu.trace_start"() <{level = 10 : i32, message = "hsd,hdf->hsf"}> : () -> ()
    %cst_175 = arith.constant dense<0.000000e+00> : vector<4x8x8xf32>
    %262 = tpu.matmul %245, %261, %cst_175 {dimension_numbers = #tpu.dot_dimension_numbers<[2], [1], [1], [2], [0, 0, 0, 1, 1, 2], [0], [0]>} : vector<4x8x32xbf16>, vector<4x32x8xbf16>, vector<4x8x8xf32> -> vector<4x8x8xf32>
    "tpu.trace_stop"() : () -> ()
    %c0_176 = arith.constant 0 : index
    %c0_177 = arith.constant 0 : index
    %c0_178 = arith.constant 0 : index
    %c0_179 = arith.constant 0 : index
    %263 = vector.load %arg24[%c0_176, %c0_177, %c0_178, %c0_179] : memref<2x4x1x8xf32, #tpu.memory_space<vmem>>, vector<1x4x1x8xf32>
    %264 = vector.shape_cast %263 : vector<1x4x1x8xf32> to vector<4x1x8xf32>
    %265 = vector.broadcast %264 : vector<4x1x8xf32> to vector<4x8x8xf32>
    %266 = arith.addf %262, %265 : vector<4x8x8xf32>
    %267 = arith.truncf %252 : vector<4x8x8xf32> to vector<4x8x8xbf16>
    %268 = arith.truncf %259 : vector<4x8x8xf32> to vector<4x8x8xbf16>
    "tpu.trace_start"() <{level = 10 : i32, message = "hqd,hkd->hqk"}> : () -> ()
    %cst_180 = arith.constant dense<0.000000e+00> : vector<4x8x8xf32>
    %269 = tpu.matmul %267, %268, %cst_180 {dimension_numbers = #tpu.dot_dimension_numbers<[2], [2], [1], [1], [0, 0, 0, 1, 1, 1], [0], [0]>} : vector<4x8x8xbf16>, vector<4x8x8xbf16>, vector<4x8x8xf32> -> vector<4x8x8xf32>
    "tpu.trace_stop"() : () -> ()
    %cst_181 = arith.constant dense<0xFF800000> : vector<4x8xf32>
    %270 = vector.multi_reduction <maximumf>, %269, %cst_181 [2] : vector<4x8x8xf32> to vector<4x8xf32>
    %271 = vector.shape_cast %270 : vector<4x8xf32> to vector<4x8x1xf32>
    %272 = vector.broadcast %271 : vector<4x8x1xf32> to vector<4x8x8xf32>
    %273 = arith.subf %269, %272 : vector<4x8x8xf32>
    %274 = math.exp %273 : vector<4x8x8xf32>
    %cst_182 = arith.constant dense<0.000000e+00> : vector<4x8xf32>
    %275 = vector.multi_reduction <add>, %274, %cst_182 [2] : vector<4x8x8xf32> to vector<4x8xf32>
    %276 = vector.shape_cast %275 : vector<4x8xf32> to vector<4x8x1xf32>
    %277 = vector.broadcast %276 : vector<4x8x1xf32> to vector<4x8x8xf32>
    %278 = arith.divf %274, %277 : vector<4x8x8xf32>
    %279 = arith.truncf %278 : vector<4x8x8xf32> to vector<4x8x8xbf16>
    %280 = arith.truncf %266 : vector<4x8x8xf32> to vector<4x8x8xbf16>
    "tpu.trace_start"() <{level = 10 : i32, message = "hqk,hkd->hqd"}> : () -> ()
    %cst_183 = arith.constant dense<0.000000e+00> : vector<4x8x8xf32>
    %281 = tpu.matmul %279, %280, %cst_183 {dimension_numbers = #tpu.dot_dimension_numbers<[2], [1], [1], [2], [0, 0, 0, 1, 1, 2], [0], [0]>} : vector<4x8x8xbf16>, vector<4x8x8xbf16>, vector<4x8x8xf32> -> vector<4x8x8xf32>
    "tpu.trace_stop"() : () -> ()
    %282 = arith.truncf %281 : vector<4x8x8xf32> to vector<4x8x8xbf16>
    %c0_184 = arith.constant 0 : index
    %c0_185 = arith.constant 0 : index
    %c0_186 = arith.constant 0 : index
    %c0_187 = arith.constant 0 : index
    %283 = vector.load %arg25[%c0_184, %c0_185, %c0_186, %c0_187] : memref<2x4x8x32xbf16, #tpu.memory_space<vmem>>, vector<1x4x8x32xbf16>
    %284 = vector.shape_cast %283 : vector<1x4x8x32xbf16> to vector<4x8x32xbf16>
    "tpu.trace_start"() <{level = 10 : i32, message = "hqd,hdf->hqf"}> : () -> ()
    %cst_188 = arith.constant dense<0.000000e+00> : vector<4x8x32xf32>
    %285 = tpu.matmul %282, %284, %cst_188 {dimension_numbers = #tpu.dot_dimension_numbers<[2], [1], [1], [2], [0, 0, 0, 1, 1, 2], [0], [0]>} : vector<4x8x8xbf16>, vector<4x8x32xbf16>, vector<4x8x32xf32> -> vector<4x8x32xf32>
    "tpu.trace_stop"() : () -> ()
    %cst_189 = arith.constant dense<0.000000e+00> : vector<8x32xf32>
    %286 = vector.multi_reduction <add>, %285, %cst_189 [0] : vector<4x8x32xf32> to vector<8x32xf32>
    %c0_190 = arith.constant 0 : index
    %c0_191 = arith.constant 0 : index
    %c0_192 = arith.constant 0 : index
    %287 = vector.load %arg26[%c0_190, %c0_191, %c0_192] : memref<2x1x32xf32, #tpu.memory_space<vmem>>, vector<1x1x32xf32>
    %288 = vector.shape_cast %287 : vector<1x1x32xf32> to vector<1x32xf32>
    %289 = vector.broadcast %288 : vector<1x32xf32> to vector<8x32xf32>
    %290 = arith.addf %286, %289 : vector<8x32xf32>
    %291 = arith.truncf %290 : vector<8x32xf32> to vector<8x32xbf16>
    %292 = vector.shape_cast %291 : vector<8x32xbf16> to vector<1x8x32xbf16>
    %293 = vector.broadcast %292 : vector<1x8x32xbf16> to vector<4x8x32xbf16>
    %294 = arith.truncf %228 : vector<8x32xf32> to vector<8x32xbf16>
    %295 = vector.shape_cast %294 : vector<8x32xbf16> to vector<1x8x32xbf16>
    %296 = vector.broadcast %295 : vector<1x8x32xbf16> to vector<4x8x32xbf16>
    %c0_193 = arith.constant 0 : index
    %c0_194 = arith.constant 0 : index
    %c0_195 = arith.constant 0 : index
    %c0_196 = arith.constant 0 : index
    %297 = vector.load %arg27[%c0_193, %c0_194, %c0_195, %c0_196] : memref<2x4x32x8xbf16, #tpu.memory_space<vmem>>, vector<1x4x32x8xbf16>
    %298 = vector.shape_cast %297 : vector<1x4x32x8xbf16> to vector<4x32x8xbf16>
    "tpu.trace_start"() <{level = 10 : i32, message = "hsd,hdf->hsf"}> : () -> ()
    %cst_197 = arith.constant dense<0.000000e+00> : vector<4x8x8xf32>
    %299 = tpu.matmul %293, %298, %cst_197 {dimension_numbers = #tpu.dot_dimension_numbers<[2], [1], [1], [2], [0, 0, 0, 1, 1, 2], [0], [0]>} : vector<4x8x32xbf16>, vector<4x32x8xbf16>, vector<4x8x8xf32> -> vector<4x8x8xf32>
    "tpu.trace_stop"() : () -> ()
    %c0_198 = arith.constant 0 : index
    %c0_199 = arith.constant 0 : index
    %c0_200 = arith.constant 0 : index
    %c0_201 = arith.constant 0 : index
    %300 = vector.load %arg28[%c0_198, %c0_199, %c0_200, %c0_201] : memref<2x4x1x8xf32, #tpu.memory_space<vmem>>, vector<1x4x1x8xf32>
    %301 = vector.shape_cast %300 : vector<1x4x1x8xf32> to vector<4x1x8xf32>
    %302 = vector.broadcast %301 : vector<4x1x8xf32> to vector<4x8x8xf32>
    %303 = arith.addf %299, %302 : vector<4x8x8xf32>
    %c0_202 = arith.constant 0 : index
    %c0_203 = arith.constant 0 : index
    %c0_204 = arith.constant 0 : index
    %c0_205 = arith.constant 0 : index
    %304 = vector.load %arg29[%c0_202, %c0_203, %c0_204, %c0_205] : memref<2x4x32x8xbf16, #tpu.memory_space<vmem>>, vector<1x4x32x8xbf16>
    %305 = vector.shape_cast %304 : vector<1x4x32x8xbf16> to vector<4x32x8xbf16>
    "tpu.trace_start"() <{level = 10 : i32, message = "hsd,hdf->hsf"}> : () -> ()
    %cst_206 = arith.constant dense<0.000000e+00> : vector<4x8x8xf32>
    %306 = tpu.matmul %296, %305, %cst_206 {dimension_numbers = #tpu.dot_dimension_numbers<[2], [1], [1], [2], [0, 0, 0, 1, 1, 2], [0], [0]>} : vector<4x8x32xbf16>, vector<4x32x8xbf16>, vector<4x8x8xf32> -> vector<4x8x8xf32>
    "tpu.trace_stop"() : () -> ()
    %c0_207 = arith.constant 0 : index
    %c0_208 = arith.constant 0 : index
    %c0_209 = arith.constant 0 : index
    %c0_210 = arith.constant 0 : index
    %307 = vector.load %arg30[%c0_207, %c0_208, %c0_209, %c0_210] : memref<2x4x1x8xf32, #tpu.memory_space<vmem>>, vector<1x4x1x8xf32>
    %308 = vector.shape_cast %307 : vector<1x4x1x8xf32> to vector<4x1x8xf32>
    %309 = vector.broadcast %308 : vector<4x1x8xf32> to vector<4x8x8xf32>
    %310 = arith.addf %306, %309 : vector<4x8x8xf32>
    %c0_211 = arith.constant 0 : index
    %c0_212 = arith.constant 0 : index
    %c0_213 = arith.constant 0 : index
    %c0_214 = arith.constant 0 : index
    %311 = vector.load %arg31[%c0_211, %c0_212, %c0_213, %c0_214] : memref<2x4x32x8xbf16, #tpu.memory_space<vmem>>, vector<1x4x32x8xbf16>
    %312 = vector.shape_cast %311 : vector<1x4x32x8xbf16> to vector<4x32x8xbf16>
    "tpu.trace_start"() <{level = 10 : i32, message = "hsd,hdf->hsf"}> : () -> ()
    %cst_215 = arith.constant dense<0.000000e+00> : vector<4x8x8xf32>
    %313 = tpu.matmul %296, %312, %cst_215 {dimension_numbers = #tpu.dot_dimension_numbers<[2], [1], [1], [2], [0, 0, 0, 1, 1, 2], [0], [0]>} : vector<4x8x32xbf16>, vector<4x32x8xbf16>, vector<4x8x8xf32> -> vector<4x8x8xf32>
    "tpu.trace_stop"() : () -> ()
    %c0_216 = arith.constant 0 : index
    %c0_217 = arith.constant 0 : index
    %c0_218 = arith.constant 0 : index
    %c0_219 = arith.constant 0 : index
    %314 = vector.load %arg32[%c0_216, %c0_217, %c0_218, %c0_219] : memref<2x4x1x8xf32, #tpu.memory_space<vmem>>, vector<1x4x1x8xf32>
    %315 = vector.shape_cast %314 : vector<1x4x1x8xf32> to vector<4x1x8xf32>
    %316 = vector.broadcast %315 : vector<4x1x8xf32> to vector<4x8x8xf32>
    %317 = arith.addf %313, %316 : vector<4x8x8xf32>
    %318 = arith.truncf %303 : vector<4x8x8xf32> to vector<4x8x8xbf16>
    %319 = arith.truncf %310 : vector<4x8x8xf32> to vector<4x8x8xbf16>
    "tpu.trace_start"() <{level = 10 : i32, message = "hqd,hkd->hqk"}> : () -> ()
    %cst_220 = arith.constant dense<0.000000e+00> : vector<4x8x8xf32>
    %320 = tpu.matmul %318, %319, %cst_220 {dimension_numbers = #tpu.dot_dimension_numbers<[2], [2], [1], [1], [0, 0, 0, 1, 1, 1], [0], [0]>} : vector<4x8x8xbf16>, vector<4x8x8xbf16>, vector<4x8x8xf32> -> vector<4x8x8xf32>
    "tpu.trace_stop"() : () -> ()
    %cst_221 = arith.constant dense<0xFF800000> : vector<4x8xf32>
    %321 = vector.multi_reduction <maximumf>, %320, %cst_221 [2] : vector<4x8x8xf32> to vector<4x8xf32>
    %322 = vector.shape_cast %321 : vector<4x8xf32> to vector<4x8x1xf32>
    %323 = vector.broadcast %322 : vector<4x8x1xf32> to vector<4x8x8xf32>
    %324 = arith.subf %320, %323 : vector<4x8x8xf32>
    %325 = math.exp %324 : vector<4x8x8xf32>
    %cst_222 = arith.constant dense<0.000000e+00> : vector<4x8xf32>
    %326 = vector.multi_reduction <add>, %325, %cst_222 [2] : vector<4x8x8xf32> to vector<4x8xf32>
    %327 = vector.shape_cast %326 : vector<4x8xf32> to vector<4x8x1xf32>
    %328 = vector.broadcast %327 : vector<4x8x1xf32> to vector<4x8x8xf32>
    %329 = arith.divf %325, %328 : vector<4x8x8xf32>
    %330 = arith.truncf %329 : vector<4x8x8xf32> to vector<4x8x8xbf16>
    %331 = arith.truncf %317 : vector<4x8x8xf32> to vector<4x8x8xbf16>
    "tpu.trace_start"() <{level = 10 : i32, message = "hqk,hkd->hqd"}> : () -> ()
    %cst_223 = arith.constant dense<0.000000e+00> : vector<4x8x8xf32>
    %332 = tpu.matmul %330, %331, %cst_223 {dimension_numbers = #tpu.dot_dimension_numbers<[2], [1], [1], [2], [0, 0, 0, 1, 1, 2], [0], [0]>} : vector<4x8x8xbf16>, vector<4x8x8xbf16>, vector<4x8x8xf32> -> vector<4x8x8xf32>
    "tpu.trace_stop"() : () -> ()
    %333 = arith.truncf %332 : vector<4x8x8xf32> to vector<4x8x8xbf16>
    %c0_224 = arith.constant 0 : index
    %c0_225 = arith.constant 0 : index
    %c0_226 = arith.constant 0 : index
    %c0_227 = arith.constant 0 : index
    %334 = vector.load %arg33[%c0_224, %c0_225, %c0_226, %c0_227] : memref<2x4x8x32xbf16, #tpu.memory_space<vmem>>, vector<1x4x8x32xbf16>
    %335 = vector.shape_cast %334 : vector<1x4x8x32xbf16> to vector<4x8x32xbf16>
    "tpu.trace_start"() <{level = 10 : i32, message = "hqd,hdf->hqf"}> : () -> ()
    %cst_228 = arith.constant dense<0.000000e+00> : vector<4x8x32xf32>
    %336 = tpu.matmul %333, %335, %cst_228 {dimension_numbers = #tpu.dot_dimension_numbers<[2], [1], [1], [2], [0, 0, 0, 1, 1, 2], [0], [0]>} : vector<4x8x8xbf16>, vector<4x8x32xbf16>, vector<4x8x32xf32> -> vector<4x8x32xf32>
    "tpu.trace_stop"() : () -> ()
    %cst_229 = arith.constant dense<0.000000e+00> : vector<8x32xf32>
    %337 = vector.multi_reduction <add>, %336, %cst_229 [0] : vector<4x8x32xf32> to vector<8x32xf32>
    %c0_230 = arith.constant 0 : index
    %c0_231 = arith.constant 0 : index
    %c0_232 = arith.constant 0 : index
    %338 = vector.load %arg34[%c0_230, %c0_231, %c0_232] : memref<2x1x32xf32, #tpu.memory_space<vmem>>, vector<1x1x32xf32>
    %339 = vector.shape_cast %338 : vector<1x1x32xf32> to vector<1x32xf32>
    %340 = vector.broadcast %339 : vector<1x32xf32> to vector<8x32xf32>
    %341 = arith.addf %337, %340 : vector<8x32xf32>
    %342 = arith.truncf %341 : vector<8x32xf32> to vector<8x32xbf16>
    %c0_233 = arith.constant 0 : index
    %c0_234 = arith.constant 0 : index
    %c0_235 = arith.constant 0 : index
    %343 = vector.load %arg35[%c0_233, %c0_234, %c0_235] : memref<2x32x64xbf16, #tpu.memory_space<vmem>>, vector<1x32x64xbf16>
    %344 = vector.shape_cast %343 : vector<1x32x64xbf16> to vector<32x64xbf16>
    %cst_236 = arith.constant dense<0.000000e+00> : vector<8x64xf32>
    %345 = tpu.matmul %342, %344, %cst_236 {dimension_numbers = #tpu.dot_dimension_numbers<[1], [0], [0], [1], [0, 0, 1, 1], [], []>} : vector<8x32xbf16>, vector<32x64xbf16>, vector<8x64xf32> -> vector<8x64xf32>
    %c0_237 = arith.constant 0 : index
    %c0_238 = arith.constant 0 : index
    %c0_239 = arith.constant 0 : index
    %346 = vector.load %arg36[%c0_237, %c0_238, %c0_239] : memref<2x1x64xf32, #tpu.memory_space<vmem>>, vector<1x1x64xf32>
    %347 = vector.shape_cast %346 : vector<1x1x64xf32> to vector<1x64xf32>
    %348 = vector.broadcast %347 : vector<1x64xf32> to vector<8x64xf32>
    %349 = arith.addf %345, %348 : vector<8x64xf32>
    %cst_240 = arith.constant 0.000000e+00 : f32
    %350 = vector.broadcast %cst_240 : f32 to vector<8x64xf32>
    %351 = arith.maximumf %349, %350 : vector<8x64xf32>
    %352 = arith.truncf %351 : vector<8x64xf32> to vector<8x64xbf16>
    %c0_241 = arith.constant 0 : index
    %c0_242 = arith.constant 0 : index
    %c0_243 = arith.constant 0 : index
    %353 = vector.load %arg37[%c0_241, %c0_242, %c0_243] : memref<2x64x32xbf16, #tpu.memory_space<vmem>>, vector<1x64x32xbf16>
    %354 = vector.shape_cast %353 : vector<1x64x32xbf16> to vector<64x32xbf16>
    %cst_244 = arith.constant dense<0.000000e+00> : vector<8x32xf32>
    %355 = tpu.matmul %352, %354, %cst_244 {dimension_numbers = #tpu.dot_dimension_numbers<[1], [0], [0], [1], [0, 0, 1, 1], [], []>} : vector<8x64xbf16>, vector<64x32xbf16>, vector<8x32xf32> -> vector<8x32xf32>
    %c0_245 = arith.constant 0 : index
    %c0_246 = arith.constant 0 : index
    %c0_247 = arith.constant 0 : index
    %356 = vector.load %arg38[%c0_245, %c0_246, %c0_247] : memref<2x1x32xf32, #tpu.memory_space<vmem>>, vector<1x1x32xf32>
    %357 = vector.shape_cast %356 : vector<1x1x32xf32> to vector<1x32xf32>
    %358 = vector.broadcast %357 : vector<1x32xf32> to vector<8x32xf32>
    %359 = arith.addf %355, %358 : vector<8x32xf32>
    %360 = arith.addf %359, %341 : vector<8x32xf32>
    %c0_248 = arith.constant 0 : index
    %c0_249 = arith.constant 0 : index
    %c0_250 = arith.constant 0 : index
    %361 = vector.load %arg39[%c0_248, %c0_249, %c0_250] : memref<2x1x32xf32, #tpu.memory_space<vmem>>, vector<1x1x32xf32>
    %362 = vector.shape_cast %361 : vector<1x1x32xf32> to vector<1x32xf32>
    %c0_251 = arith.constant 0 : index
    %c0_252 = arith.constant 0 : index
    %c0_253 = arith.constant 0 : index
    %363 = vector.load %arg40[%c0_251, %c0_252, %c0_253] : memref<2x1x32xf32, #tpu.memory_space<vmem>>, vector<1x1x32xf32>
    %364 = vector.shape_cast %363 : vector<1x1x32xf32> to vector<1x32xf32>
    %cst_254 = arith.constant dense<0.000000e+00> : vector<8xf32>
    %365 = vector.multi_reduction <add>, %360, %cst_254 [1] : vector<8x32xf32> to vector<8xf32>
    %366 = vector.shape_cast %365 : vector<8xf32> to vector<8x1xf32>
    %cst_255 = arith.constant 3.200000e+01 : f32
    %367 = vector.broadcast %cst_255 : f32 to vector<8x1xf32>
    %368 = arith.divf %366, %367 : vector<8x1xf32>
    %369 = vector.broadcast %368 : vector<8x1xf32> to vector<8x32xf32>
    %370 = arith.subf %360, %369 : vector<8x32xf32>
    %371 = arith.mulf %370, %370 : vector<8x32xf32>
    %cst_256 = arith.constant dense<0.000000e+00> : vector<8xf32>
    %372 = vector.multi_reduction <add>, %371, %cst_256 [1] : vector<8x32xf32> to vector<8xf32>
    %373 = vector.shape_cast %372 : vector<8xf32> to vector<8x1xf32>
    %cst_257 = arith.constant 3.200000e+01 : f32
    %374 = vector.broadcast %cst_257 : f32 to vector<8x1xf32>
    %375 = arith.divf %373, %374 : vector<8x1xf32>
    %376 = vector.broadcast %368 : vector<8x1xf32> to vector<8x32xf32>
    %377 = arith.subf %360, %376 : vector<8x32xf32>
    %cst_258 = arith.constant 9.99999974E-6 : f32
    %378 = vector.broadcast %cst_258 : f32 to vector<8x1xf32>
    %379 = arith.addf %375, %378 : vector<8x1xf32>
    %380 = math.rsqrt %379 : vector<8x1xf32>
    %381 = vector.broadcast %380 : vector<8x1xf32> to vector<8x32xf32>
    %382 = arith.mulf %377, %381 : vector<8x32xf32>
    %383 = vector.broadcast %362 : vector<1x32xf32> to vector<8x32xf32>
    %384 = arith.mulf %382, %383 : vector<8x32xf32>
    %385 = vector.broadcast %364 : vector<1x32xf32> to vector<8x32xf32>
    %386 = arith.addf %384, %385 : vector<8x32xf32>
    %387 = arith.truncf %386 : vector<8x32xf32> to vector<8x32xbf16>
    %388 = vector.shape_cast %387 : vector<8x32xbf16> to vector<1x8x32xbf16>
    %389 = vector.broadcast %388 : vector<1x8x32xbf16> to vector<4x8x32xbf16>
    %390 = arith.truncf %386 : vector<8x32xf32> to vector<8x32xbf16>
    %391 = vector.shape_cast %390 : vector<8x32xbf16> to vector<1x8x32xbf16>
    %392 = vector.broadcast %391 : vector<1x8x32xbf16> to vector<4x8x32xbf16>
    %c1_259 = arith.constant 1 : index
    %c0_260 = arith.constant 0 : index
    %c0_261 = arith.constant 0 : index
    %c0_262 = arith.constant 0 : index
    %393 = vector.load %arg19[%c1_259, %c0_260, %c0_261, %c0_262] : memref<2x4x32x8xbf16, #tpu.memory_space<vmem>>, vector<1x4x32x8xbf16>
    %394 = vector.shape_cast %393 : vector<1x4x32x8xbf16> to vector<4x32x8xbf16>
    "tpu.trace_start"() <{level = 10 : i32, message = "hsd,hdf->hsf"}> : () -> ()
    %cst_263 = arith.constant dense<0.000000e+00> : vector<4x8x8xf32>
    %395 = tpu.matmul %389, %394, %cst_263 {dimension_numbers = #tpu.dot_dimension_numbers<[2], [1], [1], [2], [0, 0, 0, 1, 1, 2], [0], [0]>} : vector<4x8x32xbf16>, vector<4x32x8xbf16>, vector<4x8x8xf32> -> vector<4x8x8xf32>
    "tpu.trace_stop"() : () -> ()
    %c1_264 = arith.constant 1 : index
    %c0_265 = arith.constant 0 : index
    %c0_266 = arith.constant 0 : index
    %c0_267 = arith.constant 0 : index
    %396 = vector.load %arg20[%c1_264, %c0_265, %c0_266, %c0_267] : memref<2x4x1x8xf32, #tpu.memory_space<vmem>>, vector<1x4x1x8xf32>
    %397 = vector.shape_cast %396 : vector<1x4x1x8xf32> to vector<4x1x8xf32>
    %398 = vector.broadcast %397 : vector<4x1x8xf32> to vector<4x8x8xf32>
    %399 = arith.addf %395, %398 : vector<4x8x8xf32>
    %c1_268 = arith.constant 1 : index
    %c0_269 = arith.constant 0 : index
    %c0_270 = arith.constant 0 : index
    %c0_271 = arith.constant 0 : index
    %400 = vector.load %arg21[%c1_268, %c0_269, %c0_270, %c0_271] : memref<2x4x32x8xbf16, #tpu.memory_space<vmem>>, vector<1x4x32x8xbf16>
    %401 = vector.shape_cast %400 : vector<1x4x32x8xbf16> to vector<4x32x8xbf16>
    "tpu.trace_start"() <{level = 10 : i32, message = "hsd,hdf->hsf"}> : () -> ()
    %cst_272 = arith.constant dense<0.000000e+00> : vector<4x8x8xf32>
    %402 = tpu.matmul %392, %401, %cst_272 {dimension_numbers = #tpu.dot_dimension_numbers<[2], [1], [1], [2], [0, 0, 0, 1, 1, 2], [0], [0]>} : vector<4x8x32xbf16>, vector<4x32x8xbf16>, vector<4x8x8xf32> -> vector<4x8x8xf32>
    "tpu.trace_stop"() : () -> ()
    %c1_273 = arith.constant 1 : index
    %c0_274 = arith.constant 0 : index
    %c0_275 = arith.constant 0 : index
    %c0_276 = arith.constant 0 : index
    %403 = vector.load %arg22[%c1_273, %c0_274, %c0_275, %c0_276] : memref<2x4x1x8xf32, #tpu.memory_space<vmem>>, vector<1x4x1x8xf32>
    %404 = vector.shape_cast %403 : vector<1x4x1x8xf32> to vector<4x1x8xf32>
    %405 = vector.broadcast %404 : vector<4x1x8xf32> to vector<4x8x8xf32>
    %406 = arith.addf %402, %405 : vector<4x8x8xf32>
    %c1_277 = arith.constant 1 : index
    %c0_278 = arith.constant 0 : index
    %c0_279 = arith.constant 0 : index
    %c0_280 = arith.constant 0 : index
    %407 = vector.load %arg23[%c1_277, %c0_278, %c0_279, %c0_280] : memref<2x4x32x8xbf16, #tpu.memory_space<vmem>>, vector<1x4x32x8xbf16>
    %408 = vector.shape_cast %407 : vector<1x4x32x8xbf16> to vector<4x32x8xbf16>
    "tpu.trace_start"() <{level = 10 : i32, message = "hsd,hdf->hsf"}> : () -> ()
    %cst_281 = arith.constant dense<0.000000e+00> : vector<4x8x8xf32>
    %409 = tpu.matmul %392, %408, %cst_281 {dimension_numbers = #tpu.dot_dimension_numbers<[2], [1], [1], [2], [0, 0, 0, 1, 1, 2], [0], [0]>} : vector<4x8x32xbf16>, vector<4x32x8xbf16>, vector<4x8x8xf32> -> vector<4x8x8xf32>
    "tpu.trace_stop"() : () -> ()
    %c1_282 = arith.constant 1 : index
    %c0_283 = arith.constant 0 : index
    %c0_284 = arith.constant 0 : index
    %c0_285 = arith.constant 0 : index
    %410 = vector.load %arg24[%c1_282, %c0_283, %c0_284, %c0_285] : memref<2x4x1x8xf32, #tpu.memory_space<vmem>>, vector<1x4x1x8xf32>
    %411 = vector.shape_cast %410 : vector<1x4x1x8xf32> to vector<4x1x8xf32>
    %412 = vector.broadcast %411 : vector<4x1x8xf32> to vector<4x8x8xf32>
    %413 = arith.addf %409, %412 : vector<4x8x8xf32>
    %414 = arith.truncf %399 : vector<4x8x8xf32> to vector<4x8x8xbf16>
    %415 = arith.truncf %406 : vector<4x8x8xf32> to vector<4x8x8xbf16>
    "tpu.trace_start"() <{level = 10 : i32, message = "hqd,hkd->hqk"}> : () -> ()
    %cst_286 = arith.constant dense<0.000000e+00> : vector<4x8x8xf32>
    %416 = tpu.matmul %414, %415, %cst_286 {dimension_numbers = #tpu.dot_dimension_numbers<[2], [2], [1], [1], [0, 0, 0, 1, 1, 1], [0], [0]>} : vector<4x8x8xbf16>, vector<4x8x8xbf16>, vector<4x8x8xf32> -> vector<4x8x8xf32>
    "tpu.trace_stop"() : () -> ()
    %cst_287 = arith.constant dense<0xFF800000> : vector<4x8xf32>
    %417 = vector.multi_reduction <maximumf>, %416, %cst_287 [2] : vector<4x8x8xf32> to vector<4x8xf32>
    %418 = vector.shape_cast %417 : vector<4x8xf32> to vector<4x8x1xf32>
    %419 = vector.broadcast %418 : vector<4x8x1xf32> to vector<4x8x8xf32>
    %420 = arith.subf %416, %419 : vector<4x8x8xf32>
    %421 = math.exp %420 : vector<4x8x8xf32>
    %cst_288 = arith.constant dense<0.000000e+00> : vector<4x8xf32>
    %422 = vector.multi_reduction <add>, %421, %cst_288 [2] : vector<4x8x8xf32> to vector<4x8xf32>
    %423 = vector.shape_cast %422 : vector<4x8xf32> to vector<4x8x1xf32>
    %424 = vector.broadcast %423 : vector<4x8x1xf32> to vector<4x8x8xf32>
    %425 = arith.divf %421, %424 : vector<4x8x8xf32>
    %426 = arith.truncf %425 : vector<4x8x8xf32> to vector<4x8x8xbf16>
    %427 = arith.truncf %413 : vector<4x8x8xf32> to vector<4x8x8xbf16>
    "tpu.trace_start"() <{level = 10 : i32, message = "hqk,hkd->hqd"}> : () -> ()
    %cst_289 = arith.constant dense<0.000000e+00> : vector<4x8x8xf32>
    %428 = tpu.matmul %426, %427, %cst_289 {dimension_numbers = #tpu.dot_dimension_numbers<[2], [1], [1], [2], [0, 0, 0, 1, 1, 2], [0], [0]>} : vector<4x8x8xbf16>, vector<4x8x8xbf16>, vector<4x8x8xf32> -> vector<4x8x8xf32>
    "tpu.trace_stop"() : () -> ()
    %429 = arith.truncf %428 : vector<4x8x8xf32> to vector<4x8x8xbf16>
    %c1_290 = arith.constant 1 : index
    %c0_291 = arith.constant 0 : index
    %c0_292 = arith.constant 0 : index
    %c0_293 = arith.constant 0 : index
    %430 = vector.load %arg25[%c1_290, %c0_291, %c0_292, %c0_293] : memref<2x4x8x32xbf16, #tpu.memory_space<vmem>>, vector<1x4x8x32xbf16>
    %431 = vector.shape_cast %430 : vector<1x4x8x32xbf16> to vector<4x8x32xbf16>
    "tpu.trace_start"() <{level = 10 : i32, message = "hqd,hdf->hqf"}> : () -> ()
    %cst_294 = arith.constant dense<0.000000e+00> : vector<4x8x32xf32>
    %432 = tpu.matmul %429, %431, %cst_294 {dimension_numbers = #tpu.dot_dimension_numbers<[2], [1], [1], [2], [0, 0, 0, 1, 1, 2], [0], [0]>} : vector<4x8x8xbf16>, vector<4x8x32xbf16>, vector<4x8x32xf32> -> vector<4x8x32xf32>
    "tpu.trace_stop"() : () -> ()
    %cst_295 = arith.constant dense<0.000000e+00> : vector<8x32xf32>
    %433 = vector.multi_reduction <add>, %432, %cst_295 [0] : vector<4x8x32xf32> to vector<8x32xf32>
    %c1_296 = arith.constant 1 : index
    %c0_297 = arith.constant 0 : index
    %c0_298 = arith.constant 0 : index
    %434 = vector.load %arg26[%c1_296, %c0_297, %c0_298] : memref<2x1x32xf32, #tpu.memory_space<vmem>>, vector<1x1x32xf32>
    %435 = vector.shape_cast %434 : vector<1x1x32xf32> to vector<1x32xf32>
    %436 = vector.broadcast %435 : vector<1x32xf32> to vector<8x32xf32>
    %437 = arith.addf %433, %436 : vector<8x32xf32>
    %438 = arith.truncf %437 : vector<8x32xf32> to vector<8x32xbf16>
    %439 = vector.shape_cast %438 : vector<8x32xbf16> to vector<1x8x32xbf16>
    %440 = vector.broadcast %439 : vector<1x8x32xbf16> to vector<4x8x32xbf16>
    %441 = arith.truncf %228 : vector<8x32xf32> to vector<8x32xbf16>
    %442 = vector.shape_cast %441 : vector<8x32xbf16> to vector<1x8x32xbf16>
    %443 = vector.broadcast %442 : vector<1x8x32xbf16> to vector<4x8x32xbf16>
    %c1_299 = arith.constant 1 : index
    %c0_300 = arith.constant 0 : index
    %c0_301 = arith.constant 0 : index
    %c0_302 = arith.constant 0 : index
    %444 = vector.load %arg27[%c1_299, %c0_300, %c0_301, %c0_302] : memref<2x4x32x8xbf16, #tpu.memory_space<vmem>>, vector<1x4x32x8xbf16>
    %445 = vector.shape_cast %444 : vector<1x4x32x8xbf16> to vector<4x32x8xbf16>
    "tpu.trace_start"() <{level = 10 : i32, message = "hsd,hdf->hsf"}> : () -> ()
    %cst_303 = arith.constant dense<0.000000e+00> : vector<4x8x8xf32>
    %446 = tpu.matmul %440, %445, %cst_303 {dimension_numbers = #tpu.dot_dimension_numbers<[2], [1], [1], [2], [0, 0, 0, 1, 1, 2], [0], [0]>} : vector<4x8x32xbf16>, vector<4x32x8xbf16>, vector<4x8x8xf32> -> vector<4x8x8xf32>
    "tpu.trace_stop"() : () -> ()
    %c1_304 = arith.constant 1 : index
    %c0_305 = arith.constant 0 : index
    %c0_306 = arith.constant 0 : index
    %c0_307 = arith.constant 0 : index
    %447 = vector.load %arg28[%c1_304, %c0_305, %c0_306, %c0_307] : memref<2x4x1x8xf32, #tpu.memory_space<vmem>>, vector<1x4x1x8xf32>
    %448 = vector.shape_cast %447 : vector<1x4x1x8xf32> to vector<4x1x8xf32>
    %449 = vector.broadcast %448 : vector<4x1x8xf32> to vector<4x8x8xf32>
    %450 = arith.addf %446, %449 : vector<4x8x8xf32>
    %c1_308 = arith.constant 1 : index
    %c0_309 = arith.constant 0 : index
    %c0_310 = arith.constant 0 : index
    %c0_311 = arith.constant 0 : index
    %451 = vector.load %arg29[%c1_308, %c0_309, %c0_310, %c0_311] : memref<2x4x32x8xbf16, #tpu.memory_space<vmem>>, vector<1x4x32x8xbf16>
    %452 = vector.shape_cast %451 : vector<1x4x32x8xbf16> to vector<4x32x8xbf16>
    "tpu.trace_start"() <{level = 10 : i32, message = "hsd,hdf->hsf"}> : () -> ()
    %cst_312 = arith.constant dense<0.000000e+00> : vector<4x8x8xf32>
    %453 = tpu.matmul %443, %452, %cst_312 {dimension_numbers = #tpu.dot_dimension_numbers<[2], [1], [1], [2], [0, 0, 0, 1, 1, 2], [0], [0]>} : vector<4x8x32xbf16>, vector<4x32x8xbf16>, vector<4x8x8xf32> -> vector<4x8x8xf32>
    "tpu.trace_stop"() : () -> ()
    %c1_313 = arith.constant 1 : index
    %c0_314 = arith.constant 0 : index
    %c0_315 = arith.constant 0 : index
    %c0_316 = arith.constant 0 : index
    %454 = vector.load %arg30[%c1_313, %c0_314, %c0_315, %c0_316] : memref<2x4x1x8xf32, #tpu.memory_space<vmem>>, vector<1x4x1x8xf32>
    %455 = vector.shape_cast %454 : vector<1x4x1x8xf32> to vector<4x1x8xf32>
    %456 = vector.broadcast %455 : vector<4x1x8xf32> to vector<4x8x8xf32>
    %457 = arith.addf %453, %456 : vector<4x8x8xf32>
    %c1_317 = arith.constant 1 : index
    %c0_318 = arith.constant 0 : index
    %c0_319 = arith.constant 0 : index
    %c0_320 = arith.constant 0 : index
    %458 = vector.load %arg31[%c1_317, %c0_318, %c0_319, %c0_320] : memref<2x4x32x8xbf16, #tpu.memory_space<vmem>>, vector<1x4x32x8xbf16>
    %459 = vector.shape_cast %458 : vector<1x4x32x8xbf16> to vector<4x32x8xbf16>
    "tpu.trace_start"() <{level = 10 : i32, message = "hsd,hdf->hsf"}> : () -> ()
    %cst_321 = arith.constant dense<0.000000e+00> : vector<4x8x8xf32>
    %460 = tpu.matmul %443, %459, %cst_321 {dimension_numbers = #tpu.dot_dimension_numbers<[2], [1], [1], [2], [0, 0, 0, 1, 1, 2], [0], [0]>} : vector<4x8x32xbf16>, vector<4x32x8xbf16>, vector<4x8x8xf32> -> vector<4x8x8xf32>
    "tpu.trace_stop"() : () -> ()
    %c1_322 = arith.constant 1 : index
    %c0_323 = arith.constant 0 : index
    %c0_324 = arith.constant 0 : index
    %c0_325 = arith.constant 0 : index
    %461 = vector.load %arg32[%c1_322, %c0_323, %c0_324, %c0_325] : memref<2x4x1x8xf32, #tpu.memory_space<vmem>>, vector<1x4x1x8xf32>
    %462 = vector.shape_cast %461 : vector<1x4x1x8xf32> to vector<4x1x8xf32>
    %463 = vector.broadcast %462 : vector<4x1x8xf32> to vector<4x8x8xf32>
    %464 = arith.addf %460, %463 : vector<4x8x8xf32>
    %465 = arith.truncf %450 : vector<4x8x8xf32> to vector<4x8x8xbf16>
    %466 = arith.truncf %457 : vector<4x8x8xf32> to vector<4x8x8xbf16>
    "tpu.trace_start"() <{level = 10 : i32, message = "hqd,hkd->hqk"}> : () -> ()
    %cst_326 = arith.constant dense<0.000000e+00> : vector<4x8x8xf32>
    %467 = tpu.matmul %465, %466, %cst_326 {dimension_numbers = #tpu.dot_dimension_numbers<[2], [2], [1], [1], [0, 0, 0, 1, 1, 1], [0], [0]>} : vector<4x8x8xbf16>, vector<4x8x8xbf16>, vector<4x8x8xf32> -> vector<4x8x8xf32>
    "tpu.trace_stop"() : () -> ()
    %cst_327 = arith.constant dense<0xFF800000> : vector<4x8xf32>
    %468 = vector.multi_reduction <maximumf>, %467, %cst_327 [2] : vector<4x8x8xf32> to vector<4x8xf32>
    %469 = vector.shape_cast %468 : vector<4x8xf32> to vector<4x8x1xf32>
    %470 = vector.broadcast %469 : vector<4x8x1xf32> to vector<4x8x8xf32>
    %471 = arith.subf %467, %470 : vector<4x8x8xf32>
    %472 = math.exp %471 : vector<4x8x8xf32>
    %cst_328 = arith.constant dense<0.000000e+00> : vector<4x8xf32>
    %473 = vector.multi_reduction <add>, %472, %cst_328 [2] : vector<4x8x8xf32> to vector<4x8xf32>
    %474 = vector.shape_cast %473 : vector<4x8xf32> to vector<4x8x1xf32>
    %475 = vector.broadcast %474 : vector<4x8x1xf32> to vector<4x8x8xf32>
    %476 = arith.divf %472, %475 : vector<4x8x8xf32>
    %477 = arith.truncf %476 : vector<4x8x8xf32> to vector<4x8x8xbf16>
    %478 = arith.truncf %464 : vector<4x8x8xf32> to vector<4x8x8xbf16>
    "tpu.trace_start"() <{level = 10 : i32, message = "hqk,hkd->hqd"}> : () -> ()
    %cst_329 = arith.constant dense<0.000000e+00> : vector<4x8x8xf32>
    %479 = tpu.matmul %477, %478, %cst_329 {dimension_numbers = #tpu.dot_dimension_numbers<[2], [1], [1], [2], [0, 0, 0, 1, 1, 2], [0], [0]>} : vector<4x8x8xbf16>, vector<4x8x8xbf16>, vector<4x8x8xf32> -> vector<4x8x8xf32>
    "tpu.trace_stop"() : () -> ()
    %480 = arith.truncf %479 : vector<4x8x8xf32> to vector<4x8x8xbf16>
    %c1_330 = arith.constant 1 : index
    %c0_331 = arith.constant 0 : index
    %c0_332 = arith.constant 0 : index
    %c0_333 = arith.constant 0 : index
    %481 = vector.load %arg33[%c1_330, %c0_331, %c0_332, %c0_333] : memref<2x4x8x32xbf16, #tpu.memory_space<vmem>>, vector<1x4x8x32xbf16>
    %482 = vector.shape_cast %481 : vector<1x4x8x32xbf16> to vector<4x8x32xbf16>
    "tpu.trace_start"() <{level = 10 : i32, message = "hqd,hdf->hqf"}> : () -> ()
    %cst_334 = arith.constant dense<0.000000e+00> : vector<4x8x32xf32>
    %483 = tpu.matmul %480, %482, %cst_334 {dimension_numbers = #tpu.dot_dimension_numbers<[2], [1], [1], [2], [0, 0, 0, 1, 1, 2], [0], [0]>} : vector<4x8x8xbf16>, vector<4x8x32xbf16>, vector<4x8x32xf32> -> vector<4x8x32xf32>
    "tpu.trace_stop"() : () -> ()
    %cst_335 = arith.constant dense<0.000000e+00> : vector<8x32xf32>
    %484 = vector.multi_reduction <add>, %483, %cst_335 [0] : vector<4x8x32xf32> to vector<8x32xf32>
    %c1_336 = arith.constant 1 : index
    %c0_337 = arith.constant 0 : index
    %c0_338 = arith.constant 0 : index
    %485 = vector.load %arg34[%c1_336, %c0_337, %c0_338] : memref<2x1x32xf32, #tpu.memory_space<vmem>>, vector<1x1x32xf32>
    %486 = vector.shape_cast %485 : vector<1x1x32xf32> to vector<1x32xf32>
    %487 = vector.broadcast %486 : vector<1x32xf32> to vector<8x32xf32>
    %488 = arith.addf %484, %487 : vector<8x32xf32>
    %489 = arith.truncf %488 : vector<8x32xf32> to vector<8x32xbf16>
    %c1_339 = arith.constant 1 : index
    %c0_340 = arith.constant 0 : index
    %c0_341 = arith.constant 0 : index
    %490 = vector.load %arg35[%c1_339, %c0_340, %c0_341] : memref<2x32x64xbf16, #tpu.memory_space<vmem>>, vector<1x32x64xbf16>
    %491 = vector.shape_cast %490 : vector<1x32x64xbf16> to vector<32x64xbf16>
    %cst_342 = arith.constant dense<0.000000e+00> : vector<8x64xf32>
    %492 = tpu.matmul %489, %491, %cst_342 {dimension_numbers = #tpu.dot_dimension_numbers<[1], [0], [0], [1], [0, 0, 1, 1], [], []>} : vector<8x32xbf16>, vector<32x64xbf16>, vector<8x64xf32> -> vector<8x64xf32>
    %c1_343 = arith.constant 1 : index
    %c0_344 = arith.constant 0 : index
    %c0_345 = arith.constant 0 : index
    %493 = vector.load %arg36[%c1_343, %c0_344, %c0_345] : memref<2x1x64xf32, #tpu.memory_space<vmem>>, vector<1x1x64xf32>
    %494 = vector.shape_cast %493 : vector<1x1x64xf32> to vector<1x64xf32>
    %495 = vector.broadcast %494 : vector<1x64xf32> to vector<8x64xf32>
    %496 = arith.addf %492, %495 : vector<8x64xf32>
    %cst_346 = arith.constant 0.000000e+00 : f32
    %497 = vector.broadcast %cst_346 : f32 to vector<8x64xf32>
    %498 = arith.maximumf %496, %497 : vector<8x64xf32>
    %499 = arith.truncf %498 : vector<8x64xf32> to vector<8x64xbf16>
    %c1_347 = arith.constant 1 : index
    %c0_348 = arith.constant 0 : index
    %c0_349 = arith.constant 0 : index
    %500 = vector.load %arg37[%c1_347, %c0_348, %c0_349] : memref<2x64x32xbf16, #tpu.memory_space<vmem>>, vector<1x64x32xbf16>
    %501 = vector.shape_cast %500 : vector<1x64x32xbf16> to vector<64x32xbf16>
    %cst_350 = arith.constant dense<0.000000e+00> : vector<8x32xf32>
    %502 = tpu.matmul %499, %501, %cst_350 {dimension_numbers = #tpu.dot_dimension_numbers<[1], [0], [0], [1], [0, 0, 1, 1], [], []>} : vector<8x64xbf16>, vector<64x32xbf16>, vector<8x32xf32> -> vector<8x32xf32>
    %c1_351 = arith.constant 1 : index
    %c0_352 = arith.constant 0 : index
    %c0_353 = arith.constant 0 : index
    %503 = vector.load %arg38[%c1_351, %c0_352, %c0_353] : memref<2x1x32xf32, #tpu.memory_space<vmem>>, vector<1x1x32xf32>
    %504 = vector.shape_cast %503 : vector<1x1x32xf32> to vector<1x32xf32>
    %505 = vector.broadcast %504 : vector<1x32xf32> to vector<8x32xf32>
    %506 = arith.addf %502, %505 : vector<8x32xf32>
    %507 = arith.addf %506, %488 : vector<8x32xf32>
    %c1_354 = arith.constant 1 : index
    %c0_355 = arith.constant 0 : index
    %c0_356 = arith.constant 0 : index
    %508 = vector.load %arg39[%c1_354, %c0_355, %c0_356] : memref<2x1x32xf32, #tpu.memory_space<vmem>>, vector<1x1x32xf32>
    %509 = vector.shape_cast %508 : vector<1x1x32xf32> to vector<1x32xf32>
    %c1_357 = arith.constant 1 : index
    %c0_358 = arith.constant 0 : index
    %c0_359 = arith.constant 0 : index
    %510 = vector.load %arg40[%c1_357, %c0_358, %c0_359] : memref<2x1x32xf32, #tpu.memory_space<vmem>>, vector<1x1x32xf32>
    %511 = vector.shape_cast %510 : vector<1x1x32xf32> to vector<1x32xf32>
    %cst_360 = arith.constant dense<0.000000e+00> : vector<8xf32>
    %512 = vector.multi_reduction <add>, %507, %cst_360 [1] : vector<8x32xf32> to vector<8xf32>
    %513 = vector.shape_cast %512 : vector<8xf32> to vector<8x1xf32>
    %cst_361 = arith.constant 3.200000e+01 : f32
    %514 = vector.broadcast %cst_361 : f32 to vector<8x1xf32>
    %515 = arith.divf %513, %514 : vector<8x1xf32>
    %516 = vector.broadcast %515 : vector<8x1xf32> to vector<8x32xf32>
    %517 = arith.subf %507, %516 : vector<8x32xf32>
    %518 = arith.mulf %517, %517 : vector<8x32xf32>
    %cst_362 = arith.constant dense<0.000000e+00> : vector<8xf32>
    %519 = vector.multi_reduction <add>, %518, %cst_362 [1] : vector<8x32xf32> to vector<8xf32>
    %520 = vector.shape_cast %519 : vector<8xf32> to vector<8x1xf32>
    %cst_363 = arith.constant 3.200000e+01 : f32
    %521 = vector.broadcast %cst_363 : f32 to vector<8x1xf32>
    %522 = arith.divf %520, %521 : vector<8x1xf32>
    %523 = vector.broadcast %515 : vector<8x1xf32> to vector<8x32xf32>
    %524 = arith.subf %507, %523 : vector<8x32xf32>
    %cst_364 = arith.constant 9.99999974E-6 : f32
    %525 = vector.broadcast %cst_364 : f32 to vector<8x1xf32>
    %526 = arith.addf %522, %525 : vector<8x1xf32>
    %527 = math.rsqrt %526 : vector<8x1xf32>
    %528 = vector.broadcast %527 : vector<8x1xf32> to vector<8x32xf32>
    %529 = arith.mulf %524, %528 : vector<8x32xf32>
    %530 = vector.broadcast %509 : vector<1x32xf32> to vector<8x32xf32>
    %531 = arith.mulf %529, %530 : vector<8x32xf32>
    %532 = vector.broadcast %511 : vector<1x32xf32> to vector<8x32xf32>
    %533 = arith.addf %531, %532 : vector<8x32xf32>
    %c0_365 = arith.constant 0 : index
    %c0_366 = arith.constant 0 : index
    %534 = vector.load %arg43[%c0_365, %c0_366] : memref<1x32xf32, #tpu.memory_space<vmem>>, vector<1x32xf32>
    %c0_367 = arith.constant 0 : index
    %c0_368 = arith.constant 0 : index
    %535 = vector.load %arg44[%c0_367, %c0_368] : memref<1x32xf32, #tpu.memory_space<vmem>>, vector<1x32xf32>
    %cst_369 = arith.constant dense<0.000000e+00> : vector<8xf32>
    %536 = vector.multi_reduction <add>, %533, %cst_369 [1] : vector<8x32xf32> to vector<8xf32>
    %537 = vector.shape_cast %536 : vector<8xf32> to vector<8x1xf32>
    %cst_370 = arith.constant 3.200000e+01 : f32
    %538 = vector.broadcast %cst_370 : f32 to vector<8x1xf32>
    %539 = arith.divf %537, %538 : vector<8x1xf32>
    %540 = vector.broadcast %539 : vector<8x1xf32> to vector<8x32xf32>
    %541 = arith.subf %533, %540 : vector<8x32xf32>
    %542 = arith.mulf %541, %541 : vector<8x32xf32>
    %cst_371 = arith.constant dense<0.000000e+00> : vector<8xf32>
    %543 = vector.multi_reduction <add>, %542, %cst_371 [1] : vector<8x32xf32> to vector<8xf32>
    %544 = vector.shape_cast %543 : vector<8xf32> to vector<8x1xf32>
    %cst_372 = arith.constant 3.200000e+01 : f32
    %545 = vector.broadcast %cst_372 : f32 to vector<8x1xf32>
    %546 = arith.divf %544, %545 : vector<8x1xf32>
    %547 = vector.broadcast %539 : vector<8x1xf32> to vector<8x32xf32>
    %548 = arith.subf %533, %547 : vector<8x32xf32>
    %cst_373 = arith.constant 9.99999974E-6 : f32
    %549 = vector.broadcast %cst_373 : f32 to vector<8x1xf32>
    %550 = arith.addf %546, %549 : vector<8x1xf32>
    %551 = math.rsqrt %550 : vector<8x1xf32>
    %552 = vector.broadcast %551 : vector<8x1xf32> to vector<8x32xf32>
    %553 = arith.mulf %548, %552 : vector<8x32xf32>
    %554 = vector.broadcast %534 : vector<1x32xf32> to vector<8x32xf32>
    %555 = arith.mulf %553, %554 : vector<8x32xf32>
    %556 = vector.broadcast %535 : vector<1x32xf32> to vector<8x32xf32>
    %557 = arith.addf %555, %556 : vector<8x32xf32>
    %558 = arith.truncf %557 : vector<8x32xf32> to vector<8x32xbf16>
    %c0_374 = arith.constant 0 : index
    %c0_375 = arith.constant 0 : index
    %559 = vector.load %arg45[%c0_374, %c0_375] : memref<32x128xbf16, #tpu.memory_space<vmem>>, vector<32x128xbf16>
    %cst_376 = arith.constant dense<0.000000e+00> : vector<8x128xf32>
    %560 = tpu.matmul %558, %559, %cst_376 {dimension_numbers = #tpu.dot_dimension_numbers<[1], [0], [0], [1], [0, 0, 1, 1], [], []>} : vector<8x32xbf16>, vector<32x128xbf16>, vector<8x128xf32> -> vector<8x128xf32>
    %c0_377 = arith.constant 0 : index
    %c0_378 = arith.constant 0 : index
    %561 = vector.load %arg46[%c0_377, %c0_378] : memref<1x128xf32, #tpu.memory_space<vmem>>, vector<1x128xf32>
    %562 = vector.broadcast %561 : vector<1x128xf32> to vector<8x128xf32>
    %563 = arith.addf %560, %562 : vector<8x128xf32>
    %c0_379 = arith.constant 0 : index
    %c0_380 = arith.constant 0 : index
    %c0_381 = arith.constant 0 : index
    %564 = vector.load %arg47[%c0_379, %c0_380, %c0_381] : memref<1x8x128xf32, #tpu.memory_space<vmem>>, vector<1x8x128xf32>
    %565 = vector.shape_cast %564 : vector<1x8x128xf32> to vector<8x128xf32>
    %566 = vector.shape_cast %563 : vector<8x128xf32> to vector<1x8x128xf32>
    tpu.vector_store %arg47[%c0_379, %c0_380, %c0_381], %566 {strides = array<i32>} : memref<1x8x128xf32, #tpu.memory_space<vmem>>, vector<1x8x128xf32>,
    return
  }
  func.func @transform_0(%arg0: i32) -> (i32, i32, i32) {
    %c0_i32 = arith.constant 0 : i32
    %c0_i32_0 = arith.constant 0 : i32
    %c0_i32_1 = arith.constant 0 : i32
    return %arg0, %c0_i32, %c0_i32_0 : i32, i32, i32
  }
  func.func @transform_1(%arg0: i32) -> (i32, i32, i32) {
    %c0_i32 = arith.constant 0 : i32
    %c0_i32_0 = arith.constant 0 : i32
    %c0_i32_1 = arith.constant 0 : i32
    return %arg0, %c0_i32, %c0_i32_0 : i32, i32, i32
  }
  func.func @transform_2(%arg0: i32) -> (i32, i32, i32) {
    %c0_i32 = arith.constant 0 : i32
    %c0_i32_0 = arith.constant 0 : i32
    %c0_i32_1 = arith.constant 0 : i32
    return %arg0, %c0_i32, %c0_i32_0 : i32, i32, i32
  }
  func.func @transform_3(%arg0: i32) -> (i32, i32) {
    %c0_i32 = arith.constant 0 : i32
    %c0_i32_0 = arith.constant 0 : i32
    %c0_i32_1 = arith.constant 0 : i32
    return %c0_i32, %c0_i32_0 : i32, i32
  }
  func.func @transform_4(%arg0: i32) -> (i32, i32, i32, i32) {
    %c0_i32 = arith.constant 0 : i32
    %c0_i32_0 = arith.constant 0 : i32
    %c0_i32_1 = arith.constant 0 : i32
    %c0_i32_2 = arith.constant 0 : i32
    %c0_i32_3 = arith.constant 0 : i32
    return %c0_i32, %c0_i32_0, %c0_i32_1, %c0_i32_2 : i32, i32, i32, i32
  }
  func.func @transform_5(%arg0: i32) -> (i32, i32, i32, i32) {
    %c0_i32 = arith.constant 0 : i32
    %c0_i32_0 = arith.constant 0 : i32
    %c0_i32_1 = arith.constant 0 : i32
    %c0_i32_2 = arith.constant 0 : i32
    %c0_i32_3 = arith.constant 0 : i32
    return %c0_i32, %c0_i32_0, %c0_i32_1, %c0_i32_2 : i32, i32, i32, i32
  }
  func.func @transform_6(%arg0: i32) -> (i32, i32, i32, i32) {
    %c0_i32 = arith.constant 0 : i32
    %c0_i32_0 = arith.constant 0 : i32
    %c0_i32_1 = arith.constant 0 : i32
    %c0_i32_2 = arith.constant 0 : i32
    %c0_i32_3 = arith.constant 0 : i32
    return %c0_i32, %c0_i32_0, %c0_i32_1, %c0_i32_2 : i32, i32, i32, i32
  }
  func.func @transform_7(%arg0: i32) -> (i32, i32, i32, i32) {
    %c0_i32 = arith.constant 0 : i32
    %c0_i32_0 = arith.constant 0 : i32
    %c0_i32_1 = arith.constant 0 : i32
    %c0_i32_2 = arith.constant 0 : i32
    %c0_i32_3 = arith.constant 0 : i32
    return %c0_i32, %c0_i32_0, %c0_i32_1, %c0_i32_2 : i32, i32, i32, i32
  }
  func.func @transform_8(%arg0: i32) -> (i32, i32, i32, i32) {
    %c0_i32 = arith.constant 0 : i32
    %c0_i32_0 = arith.constant 0 : i32
    %c0_i32_1 = arith.constant 0 : i32
    %c0_i32_2 = arith.constant 0 : i32
    %c0_i32_3 = arith.constant 0 : i32
    return %c0_i32, %c0_i32_0, %c0_i32_1, %c0_i32_2 : i32, i32, i32, i32
  }
  func.func @transform_9(%arg0: i32) -> (i32, i32, i32, i32) {
    %c0_i32 = arith.constant 0 : i32
    %c0_i32_0 = arith.constant 0 : i32
    %c0_i32_1 = arith.constant 0 : i32
    %c0_i32_2 = arith.constant 0 : i32
    %c0_i32_3 = arith.constant 0 : i32
    return %c0_i32, %c0_i32_0, %c0_i32_1, %c0_i32_2 : i32, i32, i32, i32
  }
  func.func @transform_10(%arg0: i32) -> (i32, i32, i32, i32) {
    %c0_i32 = arith.constant 0 : i32
    %c0_i32_0 = arith.constant 0 : i32
    %c0_i32_1 = arith.constant 0 : i32
    %c0_i32_2 = arith.constant 0 : i32
    %c0_i32_3 = arith.constant 0 : i32
    return %c0_i32, %c0_i32_0, %c0_i32_1, %c0_i32_2 : i32, i32, i32, i32
  }
  func.func @transform_11(%arg0: i32) -> (i32, i32, i32) {
    %c0_i32 = arith.constant 0 : i32
    %c0_i32_0 = arith.constant 0 : i32
    %c0_i32_1 = arith.constant 0 : i32
    %c0_i32_2 = arith.constant 0 : i32
    return %c0_i32, %c0_i32_0, %c0_i32_1 : i32, i32, i32
  }
  func.func @transform_12(%arg0: i32) -> (i32, i32, i32) {
    %c0_i32 = arith.constant 0 : i32
    %c0_i32_0 = arith.constant 0 : i32
    %c0_i32_1 = arith.constant 0 : i32
    %c0_i32_2 = arith.constant 0 : i32
    return %c0_i32, %c0_i32_0, %c0_i32_1 : i32, i32, i32
  }
  func.func @transform_13(%arg0: i32) -> (i32, i32, i32) {
    %c0_i32 = arith.constant 0 : i32
    %c0_i32_0 = arith.constant 0 : i32
    %c0_i32_1 = arith.constant 0 : i32
    %c0_i32_2 = arith.constant 0 : i32
    return %c0_i32, %c0_i32_0, %c0_i32_1 : i32, i32, i32
  }
  func.func @transform_14(%arg0: i32) -> (i32, i32, i32) {
    %c0_i32 = arith.constant 0 : i32
    %c0_i32_0 = arith.constant 0 : i32
    %c0_i32_1 = arith.constant 0 : i32
    %c0_i32_2 = arith.constant 0 : i32
    return %c0_i32, %c0_i32_0, %c0_i32_1 : i32, i32, i32
  }
  func.func @transform_15(%arg0: i32) -> (i32, i32, i32) {
    %c0_i32 = arith.constant 0 : i32
    %c0_i32_0 = arith.constant 0 : i32
    %c0_i32_1 = arith.constant 0 : i32
    %c0_i32_2 = arith.constant 0 : i32
    return %c0_i32, %c0_i32_0, %c0_i32_1 : i32, i32, i32
  }
  func.func @transform_16(%arg0: i32) -> (i32, i32, i32) {
    %c0_i32 = arith.constant 0 : i32
    %c0_i32_0 = arith.constant 0 : i32
    %c0_i32_1 = arith.constant 0 : i32
    %c0_i32_2 = arith.constant 0 : i32
    return %c0_i32, %c0_i32_0, %c0_i32_1 : i32, i32, i32
  }
  func.func @transform_17(%arg0: i32) -> (i32, i32, i32) {
    %c0_i32 = arith.constant 0 : i32
    %c0_i32_0 = arith.constant 0 : i32
    %c0_i32_1 = arith.constant 0 : i32
    %c0_i32_2 = arith.constant 0 : i32
    return %c0_i32, %c0_i32_0, %c0_i32_1 : i32, i32, i32
  }
  func.func @transform_18(%arg0: i32) -> (i32, i32, i32, i32) {
    %c0_i32 = arith.constant 0 : i32
    %c0_i32_0 = arith.constant 0 : i32
    %c0_i32_1 = arith.constant 0 : i32
    %c0_i32_2 = arith.constant 0 : i32
    %c0_i32_3 = arith.constant 0 : i32
    return %c0_i32, %c0_i32_0, %c0_i32_1, %c0_i32_2 : i32, i32, i32, i32
  }
  func.func @transform_19(%arg0: i32) -> (i32, i32, i32, i32) {
    %c0_i32 = arith.constant 0 : i32
    %c0_i32_0 = arith.constant 0 : i32
    %c0_i32_1 = arith.constant 0 : i32
    %c0_i32_2 = arith.constant 0 : i32
    %c0_i32_3 = arith.constant 0 : i32
    return %c0_i32, %c0_i32_0, %c0_i32_1, %c0_i32_2 : i32, i32, i32, i32
  }
  func.func @transform_20(%arg0: i32) -> (i32, i32, i32, i32) {
    %c0_i32 = arith.constant 0 : i32
    %c0_i32_0 = arith.constant 0 : i32
    %c0_i32_1 = arith.constant 0 : i32
    %c0_i32_2 = arith.constant 0 : i32
    %c0_i32_3 = arith.constant 0 : i32
    return %c0_i32, %c0_i32_0, %c0_i32_1, %c0_i32_2 : i32, i32, i32, i32
  }
  func.func @transform_21(%arg0: i32) -> (i32, i32, i32, i32) {
    %c0_i32 = arith.constant 0 : i32
    %c0_i32_0 = arith.constant 0 : i32
    %c0_i32_1 = arith.constant 0 : i32
    %c0_i32_2 = arith.constant 0 : i32
    %c0_i32_3 = arith.constant 0 : i32
    return %c0_i32, %c0_i32_0, %c0_i32_1, %c0_i32_2 : i32, i32, i32, i32
  }
  func.func @transform_22(%arg0: i32) -> (i32, i32, i32, i32) {
    %c0_i32 = arith.constant 0 : i32
    %c0_i32_0 = arith.constant 0 : i32
    %c0_i32_1 = arith.constant 0 : i32
    %c0_i32_2 = arith.constant 0 : i32
    %c0_i32_3 = arith.constant 0 : i32
    return %c0_i32, %c0_i32_0, %c0_i32_1, %c0_i32_2 : i32, i32, i32, i32
  }
  func.func @transform_23(%arg0: i32) -> (i32, i32, i32, i32) {
    %c0_i32 = arith.constant 0 : i32
    %c0_i32_0 = arith.constant 0 : i32
    %c0_i32_1 = arith.constant 0 : i32
    %c0_i32_2 = arith.constant 0 : i32
    %c0_i32_3 = arith.constant 0 : i32
    return %c0_i32, %c0_i32_0, %c0_i32_1, %c0_i32_2 : i32, i32, i32, i32
  }
  func.func @transform_24(%arg0: i32) -> (i32, i32, i32, i32) {
    %c0_i32 = arith.constant 0 : i32
    %c0_i32_0 = arith.constant 0 : i32
    %c0_i32_1 = arith.constant 0 : i32
    %c0_i32_2 = arith.constant 0 : i32
    %c0_i32_3 = arith.constant 0 : i32
    return %c0_i32, %c0_i32_0, %c0_i32_1, %c0_i32_2 : i32, i32, i32, i32
  }
  func.func @transform_25(%arg0: i32) -> (i32, i32, i32) {
    %c0_i32 = arith.constant 0 : i32
    %c0_i32_0 = arith.constant 0 : i32
    %c0_i32_1 = arith.constant 0 : i32
    %c0_i32_2 = arith.constant 0 : i32
    return %c0_i32, %c0_i32_0, %c0_i32_1 : i32, i32, i32
  }
  func.func @transform_26(%arg0: i32) -> (i32, i32, i32, i32) {
    %c0_i32 = arith.constant 0 : i32
    %c0_i32_0 = arith.constant 0 : i32
    %c0_i32_1 = arith.constant 0 : i32
    %c0_i32_2 = arith.constant 0 : i32
    %c0_i32_3 = arith.constant 0 : i32
    return %c0_i32, %c0_i32_0, %c0_i32_1, %c0_i32_2 : i32, i32, i32, i32
  }
  func.func @transform_27(%arg0: i32) -> (i32, i32, i32, i32) {
    %c0_i32 = arith.constant 0 : i32
    %c0_i32_0 = arith.constant 0 : i32
    %c0_i32_1 = arith.constant 0 : i32
    %c0_i32_2 = arith.constant 0 : i32
    %c0_i32_3 = arith.constant 0 : i32
    return %c0_i32, %c0_i32_0, %c0_i32_1, %c0_i32_2 : i32, i32, i32, i32
  }
  func.func @transform_28(%arg0: i32) -> (i32, i32, i32, i32) {
    %c0_i32 = arith.constant 0 : i32
    %c0_i32_0 = arith.constant 0 : i32
    %c0_i32_1 = arith.constant 0 : i32
    %c0_i32_2 = arith.constant 0 : i32
    %c0_i32_3 = arith.constant 0 : i32
    return %c0_i32, %c0_i32_0, %c0_i32_1, %c0_i32_2 : i32, i32, i32, i32
  }
  func.func @transform_29(%arg0: i32) -> (i32, i32, i32, i32) {
    %c0_i32 = arith.constant 0 : i32
    %c0_i32_0 = arith.constant 0 : i32
    %c0_i32_1 = arith.constant 0 : i32
    %c0_i32_2 = arith.constant 0 : i32
    %c0_i32_3 = arith.constant 0 : i32
    return %c0_i32, %c0_i32_0, %c0_i32_1, %c0_i32_2 : i32, i32, i32, i32
  }
  func.func @transform_30(%arg0: i32) -> (i32, i32, i32, i32) {
    %c0_i32 = arith.constant 0 : i32
    %c0_i32_0 = arith.constant 0 : i32
    %c0_i32_1 = arith.constant 0 : i32
    %c0_i32_2 = arith.constant 0 : i32
    %c0_i32_3 = arith.constant 0 : i32
    return %c0_i32, %c0_i32_0, %c0_i32_1, %c0_i32_2 : i32, i32, i32, i32
  }
  func.func @transform_31(%arg0: i32) -> (i32, i32, i32, i32) {
    %c0_i32 = arith.constant 0 : i32
    %c0_i32_0 = arith.constant 0 : i32
    %c0_i32_1 = arith.constant 0 : i32
    %c0_i32_2 = arith.constant 0 : i32
    %c0_i32_3 = arith.constant 0 : i32
    return %c0_i32, %c0_i32_0, %c0_i32_1, %c0_i32_2 : i32, i32, i32, i32
  }
  func.func @transform_32(%arg0: i32) -> (i32, i32, i32, i32) {
    %c0_i32 = arith.constant 0 : i32
    %c0_i32_0 = arith.constant 0 : i32
    %c0_i32_1 = arith.constant 0 : i32
    %c0_i32_2 = arith.constant 0 : i32
    %c0_i32_3 = arith.constant 0 : i32
    return %c0_i32, %c0_i32_0, %c0_i32_1, %c0_i32_2 : i32, i32, i32, i32
  }
  func.func @transform_33(%arg0: i32) -> (i32, i32, i32) {
    %c0_i32 = arith.constant 0 : i32
    %c0_i32_0 = arith.constant 0 : i32
    %c0_i32_1 = arith.constant 0 : i32
    %c0_i32_2 = arith.constant 0 : i32
    return %c0_i32, %c0_i32_0, %c0_i32_1 : i32, i32, i32
  }
  func.func @transform_34(%arg0: i32) -> (i32, i32, i32) {
    %c0_i32 = arith.constant 0 : i32
    %c0_i32_0 = arith.constant 0 : i32
    %c0_i32_1 = arith.constant 0 : i32
    %c0_i32_2 = arith.constant 0 : i32
    return %c0_i32, %c0_i32_0, %c0_i32_1 : i32, i32, i32
  }
  func.func @transform_35(%arg0: i32) -> (i32, i32, i32) {
    %c0_i32 = arith.constant 0 : i32
    %c0_i32_0 = arith.constant 0 : i32
    %c0_i32_1 = arith.constant 0 : i32
    %c0_i32_2 = arith.constant 0 : i32
    return %c0_i32, %c0_i32_0, %c0_i32_1 : i32, i32, i32
  }
  func.func @transform_36(%arg0: i32) -> (i32, i32, i32) {
    %c0_i32 = arith.constant 0 : i32
    %c0_i32_0 = arith.constant 0 : i32
    %c0_i32_1 = arith.constant 0 : i32
    %c0_i32_2 = arith.constant 0 : i32
    return %c0_i32, %c0_i32_0, %c0_i32_1 : i32, i32, i32
  }
  func.func @transform_37(%arg0: i32) -> (i32, i32, i32) {
    %c0_i32 = arith.constant 0 : i32
    %c0_i32_0 = arith.constant 0 : i32
    %c0_i32_1 = arith.constant 0 : i32
    %c0_i32_2 = arith.constant 0 : i32
    return %c0_i32, %c0_i32_0, %c0_i32_1 : i32, i32, i32
  }
  func.func @transform_38(%arg0: i32) -> (i32, i32, i32) {
    %c0_i32 = arith.constant 0 : i32
    %c0_i32_0 = arith.constant 0 : i32
    %c0_i32_1 = arith.constant 0 : i32
    %c0_i32_2 = arith.constant 0 : i32
    return %c0_i32, %c0_i32_0, %c0_i32_1 : i32, i32, i32
  }
  func.func @transform_39(%arg0: i32) -> (i32, i32, i32) {
    %c0_i32 = arith.constant 0 : i32
    %c0_i32_0 = arith.constant 0 : i32
    %c0_i32_1 = arith.constant 0 : i32
    %c0_i32_2 = arith.constant 0 : i32
    return %c0_i32, %c0_i32_0, %c0_i32_1 : i32, i32, i32
  }
  func.func @transform_40(%arg0: i32) -> (i32, i32) {
    %c0_i32 = arith.constant 0 : i32
    %c0_i32_0 = arith.constant 0 : i32
    %c0_i32_1 = arith.constant 0 : i32
    return %c0_i32, %c0_i32_0 : i32, i32
  }
  func.func @transform_41(%arg0: i32) -> (i32, i32) {
    %c0_i32 = arith.constant 0 : i32
    %c0_i32_0 = arith.constant 0 : i32
    %c0_i32_1 = arith.constant 0 : i32
    return %c0_i32, %c0_i32_0 : i32, i32
  }
  func.func @transform_42(%arg0: i32) -> (i32, i32) {
    %c0_i32 = arith.constant 0 : i32
    %c0_i32_0 = arith.constant 0 : i32
    %c0_i32_1 = arith.constant 0 : i32
    return %c0_i32, %c0_i32_0 : i32, i32
  }
  func.func @transform_43(%arg0: i32) -> (i32, i32) {
    %c0_i32 = arith.constant 0 : i32
    %c0_i32_0 = arith.constant 0 : i32
    %c0_i32_1 = arith.constant 0 : i32
    return %c0_i32, %c0_i32_0 : i32, i32
  }
  func.func @transform_44(%arg0: i32) -> (i32, i32) {
    %c0_i32 = arith.constant 0 : i32
    %c0_i32_0 = arith.constant 0 : i32
    %c0_i32_1 = arith.constant 0 : i32
    return %c0_i32, %c0_i32_0 : i32, i32
  }
  func.func @transform_45(%arg0: i32) -> (i32, i32) {
    %c0_i32 = arith.constant 0 : i32
    %c0_i32_0 = arith.constant 0 : i32
    %c0_i32_1 = arith.constant 0 : i32
    return %c0_i32, %c0_i32_0 : i32, i32
  }
  func.func @transform_46(%arg0: i32) -> (i32, i32, i32) {
    %c0_i32 = arith.constant 0 : i32
    %c0_i32_0 = arith.constant 0 : i32
    %c0_i32_1 = arith.constant 0 : i32
    return %arg0, %c0_i32, %c0_i32_0 : i32, i32, i32
  }
}

</mosaic_0001>

<bundles_post_ra>
// kernel: transformer_forward.1
= control target key start
LH: loop header
LB: loop body
LE: loop exit
PB: predicated region body
PF: predicated region fallthrough
CT: control target
= control target key end

     0   :  { %s13697_s6 = smov 1   ;;  %s13698_s10 = smov 2   ;;  %s15443_s0 = inlined_call_operand.smem [shape: u32[47], index: -1, kind: input, shape index: {}] }
   0x1   :  { %s13756_s5 = sld [smem:[%s15443_s0]]   ;;  %s13699_s14 = smov 3  }
   0x2   :  { %s13761_s9 = sld [smem:[%s15443_s0 + %s13697_s6]]   ;;  %s13700_s18 = smov 4  }
   0x3   :  { %s13766_s13 = sld [smem:[%s15443_s0 + %s13698_s10]]   ;;  %s13701_s22 = smov 5  }
   0x4   :  { %s13771_s17 = sld [smem:[%s15443_s0 + %s13699_s14]]   ;;  %s13702_s26 = smov 6  }
   0x5   :  { %s13776_s21 = sld [smem:[%s15443_s0 + %s13700_s18]]   ;;  %s13703_s30 = smov 7  }
   0x6   :  { %s13781_s25 = sld [smem:[%s15443_s0 + %s13701_s22]]   ;;  %s13704_s4 = smov 8  }
   0x7   :  { %15499 = sst [smem:[#allocation5_spill]] %s13756_s5  ;;  %s13705_s10 = smov 9  }
   0x8   :  { %15500 = sst [smem:[#allocation6_spill]] %s13761_s9  ;;  %s13706_s15 = smov 10  }
   0x9   :  { %15501 = sst [smem:[#allocation7_spill]] %s13766_s13  ;;  %s13707_s20 = smov 11  }
   0xa   :  { %15502 = sst [smem:[#allocation8_spill]] %s13771_s17  ;;  %s13709_s1 = smov 13  }
   0xb   :  { %15503 = sst [smem:[#allocation9_spill]] %s13776_s21  ;;  %s13710_s7 = smov 14  }
   0xc   :  { %15504 = sst [smem:[#allocation10_spill]] %s13781_s25  ;;  %s13712_s22 = smov 16  }
   0xd   :  { %s13786_s29 = sld [smem:[%s15443_s0 + %s13702_s26]]   ;;  %s13708_s26 = smov 12  }
   0xe   :  { %s13791_s3 = sld [smem:[%s15443_s0 + %s13703_s30]]   ;;  %s13713_s28 = smov 17  }
   0xf   :  { %s13796_s8 = sld [smem:[%s15443_s0 + %s13704_s4]]  }
  0x10   :  { %s13801_s14 = sld [smem:[%s15443_s0 + %s13705_s10]]  }
  0x11   :  { %s13806_s19 = sld [smem:[%s15443_s0 + %s13706_s15]]   ;;  %s13711_s15 = smov 15  }
  0x12   :  { %s13811_s24 = sld [smem:[%s15443_s0 + %s13707_s20]]  }
  0x13   :  { %15505 = sst [smem:[#allocation11_spill]] %s13786_s29 }
  0x14   :  { %15506 = sst [smem:[#allocation12_spill]] %s13791_s3 }
  0x15   :  { %15507 = sst [smem:[#allocation13_spill]] %s13796_s8 }
  0x16   :  { %15508 = sst [smem:[#allocation14_spill]] %s13801_s14 }
  0x17   :  { %15509 = sst [smem:[#allocation15_spill]] %s13806_s19 }
  0x18   :  { %15510 = sst [smem:[#allocation16_spill]] %s13811_s24 }
  0x19   :  { %s13816_s30 = sld [smem:[%s15443_s0 + %s13708_s26]]  }
  0x1a   :  { %s13821_s6 = sld [smem:[%s15443_s0 + %s13709_s1]]  }
  0x1b   :  { %s13826_s12 = sld [smem:[%s15443_s0 + %s13710_s7]]   ;;  %s13714_s7 = smov 18  }
  0x1c   :  { %s13831_s20 = sld [smem:[%s15443_s0 + %s13711_s15]]   ;;  %s13715_s15 = smov 19  }
  0x1d   :  { %s13836_s27 = sld [smem:[%s15443_s0 + %s13712_s22]]   ;;  %s13716_s22 = smov 20  }
  0x1e   :  { %s13841_s4 = sld [smem:[%s15443_s0 + %s13713_s28]]   ;;  %s13717_s28 = smov 21  }
  0x1f   :  { %15511 = sst [smem:[#allocation17_spill]] %s13816_s30 }
  0x20   :  { %15512 = sst [smem:[#allocation18_spill]] %s13821_s6 }
  0x21   :  { %15513 = sst [smem:[#allocation19_spill]] %s13826_s12 }
  0x22   :  { %15514 = sst [smem:[#allocation20_spill]] %s13831_s20 }
  0x23   :  { %15515 = sst [smem:[#allocation21_spill]] %s13836_s27 }
  0x24   :  { %15516 = sst [smem:[#allocation22_spill]] %s13841_s4 }
  0x25   :  { %s13846_s9 = sld [smem:[%s15443_s0 + %s13714_s7]]   ;;  %s13718_s7 = smov 22  }
  0x26   :  { %s13851_s20 = sld [smem:[%s15443_s0 + %s13715_s15]]   ;;  %s13719_s15 = smov 23  }
  0x27   :  { %s13856_s27 = sld [smem:[%s15443_s0 + %s13716_s22]]   ;;  %s13720_s22 = smov 24  }
  0x28   :  { %s13861_s4 = sld [smem:[%s15443_s0 + %s13717_s28]]   ;;  %s13721_s28 = smov 25  }
  0x2b   :  { %15517 = sst [smem:[#allocation23_spill]] %s13846_s9 }
  0x2c   :  { %15518 = sst [smem:[#allocation24_spill]] %s13851_s20 }
  0x2d   :  { %15519 = sst [smem:[#allocation25_spill]] %s13856_s27 }
  0x2e   :  { %15520 = sst [smem:[#allocation26_spill]] %s13861_s4 }
  0x2f   :  { %s13866_s9 = sld [smem:[%s15443_s0 + %s13718_s7]]   ;;  %s13722_s7 = smov 26  }
  0x30   :  { %s13871_s20 = sld [smem:[%s15443_s0 + %s13719_s15]]   ;;  %s13723_s15 = smov 27  }
  0x31   :  { %s13876_s27 = sld [smem:[%s15443_s0 + %s13720_s22]]   ;;  %s13724_s22 = smov 28  }
  0x32   :  { %s13881_s4 = sld [smem:[%s15443_s0 + %s13721_s28]]   ;;  %s13725_s28 = smov 29  }
  0x35   :  { %15521 = sst [smem:[#allocation27_spill]] %s13866_s9 }
  0x36   :  { %15522 = sst [smem:[#allocation28_spill]] %s13871_s20 }
  0x37   :  { %15523 = sst [smem:[#allocation29_spill]] %s13876_s27 }
  0x38   :  { %15524 = sst [smem:[#allocation30_spill]] %s13881_s4 }
  0x39   :  { %s13886_s9 = sld [smem:[%s15443_s0 + %s13722_s7]]   ;;  %s13726_s7 = smov 30  }
  0x3a   :  { %s13891_s20 = sld [smem:[%s15443_s0 + %s13723_s15]]   ;;  %s13727_s15 = smov 31  }
  0x3b   :  { %s13896_s27 = sld [smem:[%s15443_s0 + %s13724_s22]]   ;;  %s13728_s22 = smov 32  }
  0x3c   :  { %s13901_s4 = sld [smem:[%s15443_s0 + %s13725_s28]]   ;;  %s13729_s28 = smov 33  }
  0x3f   :  { %15525 = sst [smem:[#allocation31_spill]] %s13886_s9 }
  0x40   :  { %15526 = sst [smem:[#allocation32_spill]] %s13891_s20 }
  0x41   :  { %15527 = sst [smem:[#allocation33_spill]] %s13896_s27 }
  0x42   :  { %15528 = sst [smem:[#allocation34_spill]] %s13901_s4 }
  0x43   :  { %s13906_s9 = sld [smem:[%s15443_s0 + %s13726_s7]]   ;;  %s13730_s7 = smov 34  }
  0x44   :  { %s13911_s20 = sld [smem:[%s15443_s0 + %s13727_s15]]   ;;  %s13731_s15 = smov 35  }
  0x45   :  { %s13916_s27 = sld [smem:[%s15443_s0 + %s13728_s22]]   ;;  %s13732_s22 = smov 36  }
  0x46   :  { %s13921_s4 = sld [smem:[%s15443_s0 + %s13729_s28]]   ;;  %s13733_s28 = smov 37  }
  0x49   :  { %15529 = sst [smem:[#allocation35_spill]] %s13906_s9 }
  0x4a   :  { %15530 = sst [smem:[#allocation36_spill]] %s13911_s20 }
  0x4b   :  { %15531 = sst [smem:[#allocation37_spill]] %s13916_s27 }
  0x4c   :  { %15532 = sst [smem:[#allocation38_spill]] %s13921_s4 }
  0x4d   :  { %s13926_s9 = sld [smem:[%s15443_s0 + %s13730_s7]]   ;;  %s13734_s7 = smov 38  }
  0x4e   :  { %s13931_s20 = sld [smem:[%s15443_s0 + %s13731_s15]]   ;;  %s13735_s15 = smov 39  }
  0x4f   :  { %s13936_s27 = sld [smem:[%s15443_s0 + %s13732_s22]]   ;;  %s13736_s22 = smov 40  }
  0x50   :  { %s13941_s4 = sld [smem:[%s15443_s0 + %s13733_s28]]   ;;  %s13737_s28 = smov 41  }
  0x53   :  { %15533 = sst [smem:[#allocation39_spill]] %s13926_s9 }
  0x54   :  { %15534 = sst [smem:[#allocation40_spill]] %s13931_s20 }
  0x55   :  { %15535 = sst [smem:[#allocation41_spill]] %s13936_s27 }
  0x56   :  { %15536 = sst [smem:[#allocation42_spill]] %s13941_s4 }
  0x57   :  { %s13946_s9 = sld [smem:[%s15443_s0 + %s13734_s7]]   ;;  %s13738_s7 = smov 42  }
  0x58   :  { %s13951_s20 = sld [smem:[%s15443_s0 + %s13735_s15]]   ;;  %s13739_s15 = smov 43  }
  0x59   :  { %s13956_s27 = sld [smem:[%s15443_s0 + %s13736_s22]]   ;;  %s13740_s22 = smov 44  }
  0x5a   :  { %s13961_s4 = sld [smem:[%s15443_s0 + %s13737_s28]]   ;;  %s13741_s28 = smov 45  }
  0x5d   :  { %15537 = sst [smem:[#allocation43_spill]] %s13946_s9 }
  0x5e   :  { %15538 = sst [smem:[#allocation44_spill]] %s13951_s20 }
  0x5f   :  { %15539 = sst [smem:[#allocation45_spill]] %s13956_s27 }
  0x60   :  { %15540 = sst [smem:[#allocation46_spill]] %s13961_s4 }
  0x61   :  { %s13966_s9 = sld [smem:[%s15443_s0 + %s13738_s7]]   ;;  %s13742_s7 = smov 46  }
  0x62   :  { %s13971_s20 = sld [smem:[%s15443_s0 + %s13739_s15]]  }
  0x63   :  { %s13976_s27 = sld [smem:[%s15443_s0 + %s13740_s22]]  }
  0x64   :  { %s13981_s4 = sld [smem:[%s15443_s0 + %s13741_s28]]  }
  0x67   :  { %15541 = sst [smem:[#allocation47_spill]] %s13966_s9 }
  0x68   :  { %s13986_s9 = sld [smem:[%s15443_s0 + %s13742_s7]]  }
  0x6a   :  { %15542 = sst [smem:[#allocation48_spill]] %s13981_s4 }
  0x6b   :  { %98 = vsyncpa [#allocation3], 0 }
  0x6c   :  { %100 = vsyncpa [#allocation3 + $0x1], 0  ;;  %s13988_s15 = smov 0   ;;  %s13990_s16 = smov 0  }
  0x6d   :  { %s13992_s18 = smov 0   ;;  %s13994_s22 = smov 0  }
  0x6e LB: > { %s15543_s30 = sld [smem:[#allocation17_spill]]  ;;  %s14009_s0 = sadd.s32 4294967295, %s13695_s22   ;;  %s13695_s22 = sphi %s13994_s22, %s15602_s22   ;;  %s13691_s18 = sphi %s13992_s18, %s15604_s18   ;;  %s13687_s16 = sphi %s13990_s16, %s15606_s16   ;;  %s13683_s15 = sphi %s13988_s15, %s15605_s15  }
  0x6f   : > { %s15544_s29 = sld [smem:[#allocation11_spill]]  ;;  %s11006_s23 = sadd.s32 4294967294, %s13695_s22  }
  0x70   : > { %s15545_s25 = sld [smem:[#allocation10_spill]]  ;;  %s14013_s26 = sadd.s32 1, %s13695_s22  }
  0x71   : > { %s15546_s24 = sld [smem:[#allocation16_spill]]  ;;  %s1094_s28 = sadd.s32 1, %s13691_s18 }
  0x72   : > { %s15547_s21 = sld [smem:[#allocation9_spill]]  ;;  %s1091_s1 = ssub.s32 %s13695_s22, %s14013_s26 }
  0x73   : > { %s15548_s19 = sld [smem:[#allocation15_spill]]  ;;  %p1104_p0 = scmp.ne.s32.totalorder %s13691_s18, %s13687_s16 }
  0x74   : > { %s15549_s17 = sld [smem:[#allocation8_spill]]  ;;  %p1092_p1 = scmp.eq.s32.totalorder %s1091_s1, 0 }
  0x75   : > { %s15550_s14 = sld [smem:[#allocation14_spill]]  ;;  %p1105_p2 = scmp.eq.s32.totalorder %s14009_s0, 1 }
  0x76   : > { %s15551_s12 = sld [smem:[#allocation19_spill]]  ;;  %p1110_p3 = scmp.ne.s32.totalorder %s13687_s16, %s13683_s15 }
  0x77   : > { %s15552_s6 = sld [smem:[#allocation18_spill]]  ;;  %p1111_p4 = scmp.eq.s32.totalorder %s11006_s23, 1 }
  0x78   : > { %s15553_s8 = sld [smem:[#allocation13_spill]]  ;;  %p14026_p5 = por %p1105_p2, %p1104_p0 }
  0x79   : > { %s15554_s3 = sld [smem:[#allocation12_spill]]  ;;  %p14030_p6 = por %p1111_p4, %p1110_p3 }
  0x7a   : > { %15555 = sst [smem:[#allocation49_spill]] %s13683_s15  ;;  %p11009_p7 = scmp.ge.s32.totalorder %s13695_s22, 1 }
  0x7b   : > { %15556 = sst [smem:[#allocation50_spill]] %s13691_s18  ;;  %p1278_p8 = scmp.lt.s32.totalorder %s13695_s22, 3 }
  0x7c   : > { %15557 = sst [smem:[#allocation51_spill]] %s14013_s26 }
  0x7d   : > { %s14024_s2 = scalar_select %p1092_p1, %s13691_s18, %s1094_s28  }
  0x7e   : > { %s15559_s7 = scalar_select %p14026_p5, 1, 0 }
  0x7f   : > { %15558 = sst [smem:[#allocation52_spill]] %s14024_s2  ;;  %p1279_p9 = pnand %p11009_p7, %p1278_p8 }
  0x80   : > { %15560 = sst [smem:[#allocation53_spill]] %s15559_s7  ;;  %p1394_p10 = scmp.lt.s32.totalorder (!%p1279_p9), %s14009_s0, 1 }
  0x81   : > { %s15561_s10 = scalar_select %p14030_p6, 1, 0 }
  0x82   : > { %1282 = sbr.rel (%p1279_p9) target bundleno = 10216 (0x27e8), region = 204  ;;  %s15563_s5 = sld [smem:[#allocation5_spill]] (!%p1279_p9) }
  0x83   : > { %15562 = sst [smem:[#allocation54_spill]] %s15561_s10 }
  0x84   : > { %s15564_s13 = sld [smem:[#allocation7_spill]] (!%p1279_p9) }
  0x85   : > { %s15590_s2 = sld [smem:[#allocation40_spill]] (!%p1279_p9) }
  0x86   : > { %s15591_s18 = sld [smem:[#allocation42_spill]] (!%p1279_p9) }
  0x87   : > { %v1431_v0 = vld [vmem:[%s15549_s17 + $0x78] sm:$0xff]  ;;  %v13743_v1 = vmov 0   ;;  %v13744_v2 = vmov 0.0   ;;  %v1430_v3 = vld [vmem:[%s15549_s17 + $0x70] sm:$0xff]  ;;  %s14041_s11 = scalar_select %p1394_p10, %s14009_s0, 1  ;;  %v1429_v4 = vld [vmem:[%s15549_s17 + $0x68] sm:$0xff]  ;;  %v1408_v20 = vlaneseq }
  0x88   : > { %13355 = vset.pattern.permute.xlu0 %v13743_v1  ;;  %12100 = vmatprep.subr.mxu0 %v13744_v2  ;;  %vm13745_vm0 = vmmov 0   ;;  %v1428_v5 = vld [vmem:[%s15549_s17 + $0x60] sm:$0xff]  ;;  %v13356_v7 = vld [vmem:[%s15547_s21 + $0x8] sm:$0xff]   ;;  %v1427_v8 = vld [vmem:[%s15549_s17 + $0x58] sm:$0xff]  ;;  %v13746_v24 = vmov 1.0   ;;  %vm1565_vm2 = vcmask 261120  }
  0x89   : > { %12101 = vmatpush3.msra.mxu0 %v1431_v0  ;;  %12135 = vmatprep.subr.bf16.mxu1 %v13744_v2  ;;  %s15469_s23 = sshll.u32 %s14041_s11, 3  ;;  %v1426_v9 = vld [vmem:[%s15549_s17 + $0x50] sm:$0xff]  ;;  %v1425_v10 = vld [vmem:[%s15549_s17 + $0x48] sm:$0xff]  ;;  %v1424_v11 = vld [vmem:[%s15549_s17 + $0x40] sm:$0xff]  ;;  %v14084_v21 = vand.u32 127, %v1408_v20  ;;  %vm2277_vm3 = vcmask 64512  }
  0x8a   : > { %12102 = vmatprep.subr.mxu0 %v13744_v2  ;;  %12132 = vmatprep.mubr.msk.f32.mxu0 %vm13745_vm0, %v13744_v2  ;;  %s1397_s28 = scalar_lea.vmem %s15563_s5, %s15469_s23  ;;  %v1423_v12 = vld [vmem:[%s15549_s17 + $0x38] sm:$0xff]  ;;  %v1422_v13 = vld [vmem:[%s15549_s17 + $0x30] sm:$0xff]  ;;  %v1421_v14 = vld [vmem:[%s15549_s17 + $0x28] sm:$0xff]  ;;  %s14098_s1 = scalar_lea.vmem %s15564_s13, %s14041_s11  ;;  %vm2517_vm4 = vcmask 1043456   ;;  %vm3014_vm5 = vcmask 523264  }
  0x8b   : > { %12103 = vmatpush3.msra.mxu0 %v1430_v3  ;;  %12139 = vmatprep.mubr.msk.bf16.mxu1 %vm13745_vm0, %v13744_v2  ;;  %v1407_v6 = vld [vmem:[%s1397_s28] sm:$0xff]  ;;  %v1419_v16 = vld [vmem:[%s15549_s17 + $0x18] sm:$0xff]  ;;  %v1418_v17 = vld [vmem:[%s15549_s17 + $0x10] sm:$0xff]  ;;  %s15565_s28 = sld [smem:[#allocation20_spill]] }
  0x8c   : > { %12104 = vmatprep.subr.mxu0 %v13744_v2  ;;  %1411 = vperm.xlu0 %13355, %v1407_v6   ;;  %v1420_v15 = vld [vmem:[%s15549_s17 + $0x20] sm:$0xff]  ;;  %v1417_v18 = vld [vmem:[%s15549_s17 + $0x8] sm:$0xff]  ;;  %v13360_v31 = vld [vmem:[%s15547_s21 + $0x18] sm:$0xff]   ;;  %s15566_s23 = sld [smem:[#allocation21_spill]]  ;;  %s15592_s26 = smov %s15591_s18 }
  0x8d   : > { %12105 = vmatpush3.msra.mxu0 %v1429_v4  ;;  %12136 = vmatpush3.bf16.msra.mxu1 %v13356_v7  ;;  %v1416_v19 = vld [vmem:[%s15549_s17] sm:$0xff]  ;;  %v13357_v22 = vld [vmem:[%s15544_s29 + $0x8] sm:$0xff]   ;;  %v13362_v34 = vld [vmem:[%s15547_s21 + $0x10] sm:$0xff]   ;;  %s15567_s5 = sld [smem:[#allocation22_spill]] }
  0x8e   : > { %12106 = vmatprep.subr.mxu0 %v13744_v2  ;;  %12137 = vmatprep.subr.bf16.mxu1 %v13744_v2  ;;  %v13358_v25 = vld [vmem:[%s15547_s21] sm:$0xff]   ;;  %v13361_v32 = vld [vmem:[%s15544_s29 + $0x28] sm:$0xff]   ;;  %v13368_v40 = vld [vmem:[%s15547_s21 + $0x38] sm:$0xff]   ;;  %s15595_s15 = sld [smem:[#allocation44_spill]] }
  0x8f   : > { %12107 = vmatpush3.msra.mxu0 %v1428_v5  ;;  %v13359_v26 = vld [vmem:[%s15544_s29] sm:$0xff]   ;;  %v13364_v36 = vld [vmem:[%s15547_s21 + $0x28] sm:$0xff]   ;;  %v13370_v42 = vld [vmem:[%s15547_s21 + $0x30] sm:$0xff]   ;;  %s15598_s4 = sld [smem:[#allocation48_spill]] }
  0x90   : > { %12108 = vmatprep.subr.mxu0 %v13744_v2  ;;  %v11014_v27 = vld [vmem:[%s14098_s1] ss:$0 sm:$0xff]  ;;  %v13365_v37 = vld [vmem:[%s15553_s8 + $0x8] sm:$0xff]   ;;  %v13372_v44 = vld [vmem:[%s15544_s29 + $0x18] sm:$0xff]  }
  0x91   : > { %12109 = vmatpush3.msra.mxu0 %v1427_v8  ;;  %12138 = vmatpush3.bf16.msra.mxu1 %v13358_v25  ;;  %v13363_v35 = vld [vmem:[%s15544_s29 + $0x20] sm:$0xff]   ;;  %v13369_v41 = vld [vmem:[%s15553_s8 + $0x28] sm:$0xff]   ;;  %v13373_v45 = vld [vmem:[%s15544_s29 + $0x10] sm:$0xff]  }
  0x92   : > { %12110 = vmatprep.subr.mxu0 %v13744_v2  ;;  %12143 = vmatprep.subr.bf16.mxu1 %v13744_v2  ;;  %v13366_v38 = vld [vmem:[%s15547_s21 + $0x20] sm:$0xff]   ;;  %v13374_v46 = vld [vmem:[%s15544_s29 + $0x38] sm:$0xff]   ;;  %v13375_v47 = vld [vmem:[%s15544_s29 + $0x30] sm:$0xff]  }
  0x93   : > { %12111 = vmatpush3.msra.mxu0 %v1426_v9  ;;  %v13367_v39 = vld [vmem:[%s15553_s8] sm:$0xff]   ;;  %v13376_v48 = vld [vmem:[%s15553_s8 + $0x18] sm:$0xff]   ;;  %v13377_v49 = vld [vmem:[%s15553_s8 + $0x10] sm:$0xff]  }
  0x94   : > { %12112 = vmatprep.subr.mxu0 %v13744_v2  ;;  %v13371_v43 = vld [vmem:[%s15553_s8 + $0x20] sm:$0xff]   ;;  %v13378_v50 = vld [vmem:[%s15553_s8 + $0x38] sm:$0xff]   ;;  %v13379_v51 = vld [vmem:[%s15553_s8 + $0x30] sm:$0xff]   ;;  %s15596_s7 = smov %s15595_s15 }
  0x95   : > { %12113 = vmatpush3.msra.mxu0 %v1425_v10  ;;  %v11032_v52 = vld [vmem:[%s15554_s3] ss:$0 sm:$0xff]  ;;  %v11034_v1 = vld [vmem:[%s15554_s3 + $0x2] ss:$0 sm:$0xff] }
  0x96   : > { %12114 = vmatprep.subr.mxu0 %v13744_v2  ;;  %v11016_v59 = vld [vmem:[%s15545_s25] ss:$0 sm:$0xff] }
  0x97   : > { %12115 = vmatpush3.msra.mxu0 %v1424_v11 }
  0x98   : > { %12116 = vmatprep.subr.mxu0 %v13744_v2 }
  0x99   : > { %12117 = vmatpush3.msra.mxu0 %v1423_v12 }
  0x9a   : > { %12118 = vmatprep.subr.mxu0 %v13744_v2 }
  0x9b   : > { %12119 = vmatpush3.msra.mxu0 %v1422_v13 }
  0x9c   : > { %12120 = vmatprep.subr.mxu0 %v13744_v2 }
  0x9d   : > { %12121 = vmatpush3.msra.mxu0 %v1421_v14 }
  0x9e   : > { %12122 = vmatprep.subr.mxu0 %v13744_v2 }
  0x9f   : > { %12123 = vmatpush3.msra.mxu0 %v1420_v15 }
  0xa0   : > { %12124 = vmatprep.subr.mxu0 %v13744_v2 }
  0xa1   : > { %12125 = vmatpush3.msra.mxu0 %v1419_v16  ;;  %v11018_v16 = vld [vmem:[%s15545_s25 + $0x2] ss:$0 sm:$0xff] }
  0xa2   : > { %12126 = vmatprep.subr.mxu0 %v13744_v2 }
  0xa3   : > { %12127 = vmatpush3.msra.mxu0 %v1418_v17  ;;  %v11048_v17 = vld [vmem:[%s15550_s14] ss:$0 sm:$0xff] }
  0xa4   : > { %12128 = vmatprep.subr.mxu0 %v13744_v2 }
  0xa5   : > { %12129 = vmatpush3.msra.mxu0 %v1417_v18 }
  0xa6   : > { %12130 = vmatprep.subr.mxu0 %v13744_v2 }
  0xa7   : > { %12131 = vmatpush3.msra.mxu0 %v1416_v19 }
  0xa8   : > { %12167 = vmatprep.subr.bf16.mxu0 %v13744_v2 }
 0x107   : > { %v1412_v23 = vpop.permute.xlu0 %1411 }
 0x108   : > { %vm1413_vm1 = vcmp.eq.s32.totalorder %v1412_v23, %v14084_v21 }
 0x109   : > { %12133 = vmatmul.mubr.msk.f32.vlgmr.msra.gmra.mxu0 %vm1413_vm1, %v13746_v24 }
 0x10a   : > { %12168 = vmatpush3.bf16.msra.mxu0 %v13357_v22  ;;  %12171 = vmatprep.mubr.msk.bf16.mxu0 %vm13745_vm0, %v13744_v2 }
 0x10b   : > { %12169 = vmatprep.subr.bf16.mxu0 %v13744_v2 }
 0x10e   : > { %12170 = vmatpush3.bf16.msra.mxu0 %v13359_v26 }
 0x10f   : > { %12183 = vmatprep.subr.bf16.mxu0 %v13744_v2 }
 0x1c9   : > { %v1504_v28 = vpop.f32.mrf.mxu0 }
 0x1ca   : > { %v1505_v29 = vadd.f32 %v11014_v27, %v1504_v28 }
 0x1cb   : > { %v12134_v30 = vpop.f32.mrf.mxu0 }
 0x1cc   : > { %v14103_v33 = vpack.c.bf16 %v1505_v29, %v1505_v29 }
 0x1ce   : > { %12140 = vmatmul.mubr.msk.bf16.vlgmr.msra.gmra.mxu1 %vm1565_vm2, %v14103_v33  ;;  %12172 = vmatmul.mubr.msk.bf16.vlgmr.msra.gmra.mxu0 %vm1565_vm2, %v14103_v33 }
 0x1cf   : > { %12144 = vmatpush3.bf16.msra.mxu1 %v13360_v31  ;;  %12184 = vmatpush3.bf16.msra.mxu0 %v13361_v32 }
 0x1d0   : > { %12145 = vmatprep.subr.bf16.mxu1 %v13744_v2  ;;  %12185 = vmatprep.subr.bf16.mxu0 %v13744_v2 }
 0x1d1   : > { %12147 = vmatprep.mubr.msk.bf16.mxu1 %vm13745_vm0, %v13744_v2  ;;  %12187 = vmatprep.mubr.msk.bf16.mxu0 %vm13745_vm0, %v13744_v2 }
 0x1d3   : > { %12146 = vmatpush3.bf16.msra.mxu1 %v13362_v34  ;;  %12186 = vmatpush3.bf16.msra.mxu0 %v13363_v35 }
 0x1d4   : > { %12151 = vmatprep.subr.bf16.mxu1 %v13744_v2  ;;  %12199 = vmatprep.subr.bf16.mxu0 %v13744_v2 }
 0x1d6   : > { %12148 = vmatmul.mubr.msk.bf16.vlgmr.msra.gmra.mxu1 %vm1565_vm2, %v14103_v33  ;;  %12188 = vmatmul.mubr.msk.bf16.vlgmr.msra.gmra.mxu0 %vm1565_vm2, %v14103_v33 }
 0x1d7   : > { %12152 = vmatpush3.bf16.msra.mxu1 %v13364_v36  ;;  %12200 = vmatpush3.bf16.msra.mxu0 %v13365_v37 }
 0x1d8   : > { %12153 = vmatprep.subr.bf16.mxu1 %v13744_v2  ;;  %12201 = vmatprep.subr.bf16.mxu0 %v13744_v2 }
 0x1d9   : > { %12155 = vmatprep.mubr.msk.bf16.mxu1 %vm13745_vm0, %v13744_v2  ;;  %12203 = vmatprep.mubr.msk.bf16.mxu0 %vm13745_vm0, %v13744_v2 }
 0x1db   : > { %12154 = vmatpush3.bf16.msra.mxu1 %v13366_v38  ;;  %12202 = vmatpush3.bf16.msra.mxu0 %v13367_v39 }
 0x1dc   : > { %12159 = vmatprep.subr.bf16.mxu1 %v13744_v2  ;;  %12215 = vmatprep.subr.bf16.mxu0 %v13744_v2 }
 0x1de   : > { %12156 = vmatmul.mubr.msk.bf16.vlgmr.msra.gmra.mxu1 %vm1565_vm2, %v14103_v33  ;;  %12204 = vmatmul.mubr.msk.bf16.vlgmr.msra.gmra.mxu0 %vm1565_vm2, %v14103_v33 }
 0x1df   : > { %12160 = vmatpush3.bf16.msra.mxu1 %v13368_v40  ;;  %12216 = vmatpush3.bf16.msra.mxu0 %v13369_v41  ;;  %v11033_v41 = vld [vmem:[%s15554_s3 + $0x1] ss:$0 sm:$0xff] }
 0x1e0   : > { %12161 = vmatprep.subr.bf16.mxu1 %v13744_v2  ;;  %12217 = vmatprep.subr.bf16.mxu0 %v13744_v2 }
 0x1e1   : > { %12163 = vmatprep.mubr.msk.bf16.mxu1 %vm13745_vm0, %v13744_v2  ;;  %12219 = vmatprep.mubr.msk.bf16.mxu0 %vm13745_vm0, %v13744_v2 }
 0x1e3   : > { %12162 = vmatpush3.bf16.msra.mxu1 %v13370_v42  ;;  %12218 = vmatpush3.bf16.msra.mxu0 %v13371_v43 }
 0x1e4   : > { %12175 = vmatprep.subr.bf16.mxu1 %v13744_v2  ;;  %12231 = vmatprep.subr.bf16.mxu0 %v13744_v2 }
 0x1e6   : > { %12164 = vmatmul.mubr.msk.bf16.vlgmr.msra.gmra.mxu1 %vm1565_vm2, %v14103_v33  ;;  %12220 = vmatmul.mubr.msk.bf16.vlgmr.msra.gmra.mxu0 %vm1565_vm2, %v14103_v33 }
 0x1e7   : > { %12176 = vmatpush3.bf16.msra.mxu1 %v13372_v44  ;;  %12179 = vmatprep.mubr.msk.bf16.mxu1 %vm13745_vm0, %v13744_v2 }
 0x1e8   : > { %12177 = vmatprep.subr.bf16.mxu1 %v13744_v2  ;;  %12233 = vmatprep.mubr.msk.bf16.mxu0 %vm13745_vm0, %v13744_v2 }
 0x1eb   : > { %12178 = vmatpush3.bf16.msra.mxu1 %v13373_v45 }
 0x1ec   : > { %12191 = vmatprep.subr.bf16.mxu1 %v13744_v2 }
 0x1ee   : > { %12180 = vmatmul.mubr.msk.bf16.vlgmr.msra.gmra.mxu1 %vm1565_vm2, %v14103_v33 }
 0x1ef   : > { %12192 = vmatpush3.bf16.msra.mxu1 %v13374_v46  ;;  %12195 = vmatprep.mubr.msk.bf16.mxu1 %vm13745_vm0, %v13744_v2  ;;  %v11017_v46 = vld [vmem:[%s15545_s25 + $0x1] ss:$0 sm:$0xff] }
 0x1f0   : > { %12193 = vmatprep.subr.bf16.mxu1 %v13744_v2 }
 0x1f3   : > { %12194 = vmatpush3.bf16.msra.mxu1 %v13375_v47 }
 0x1f4   : > { %12207 = vmatprep.subr.bf16.mxu1 %v13744_v2 }
 0x1f6   : > { %12196 = vmatmul.mubr.msk.bf16.vlgmr.msra.gmra.mxu1 %vm1565_vm2, %v14103_v33 }
 0x1f7   : > { %12208 = vmatpush3.bf16.msra.mxu1 %v13376_v48  ;;  %12211 = vmatprep.mubr.msk.bf16.mxu1 %vm13745_vm0, %v13744_v2 }
 0x1f8   : > { %12209 = vmatprep.subr.bf16.mxu1 %v13744_v2 }
 0x1fb   : > { %12210 = vmatpush3.bf16.msra.mxu1 %v13377_v49 }
 0x1fc   : > { %12223 = vmatprep.subr.bf16.mxu1 %v13744_v2 }
 0x1fe   : > { %12212 = vmatmul.mubr.msk.bf16.vlgmr.msra.gmra.mxu1 %vm1565_vm2, %v14103_v33 }
 0x1ff   : > { %12224 = vmatpush3.bf16.msra.mxu1 %v13378_v50  ;;  %12227 = vmatprep.mubr.msk.bf16.mxu1 %vm13745_vm0, %v13744_v2  ;;  %v11035_v50 = vld [vmem:[%s15554_s3 + $0x3] ss:$0 sm:$0xff] }
 0x200   : > { %12225 = vmatprep.subr.bf16.mxu1 %v13744_v2 }
 0x203   : > { %12226 = vmatpush3.bf16.msra.mxu1 %v13379_v51 }
 0x204   : > { %12237 = vmatprep.subr.bf16.mxu1 %v13744_v2 }
 0x206   : > { %12228 = vmatmul.mubr.msk.bf16.vlgmr.msra.gmra.mxu1 %vm1565_vm2, %v14103_v33 }
 0x207   : > { %12239 = vmatprep.mubr.msk.bf16.mxu1 %vm13745_vm0, %v13744_v2 }
 0x28e   : > { %v1603_v53 = vpop.f32.mrf.mxu1  ;;  %v1855_v54 = vpop.f32.mrf.mxu0 }
 0x28f   : > { %v1856_v55 = vadd.f32 %v11032_v52, %v1855_v54  ;;  %v1604_v3 = vadd.f32 %v11016_v59, %v1603_v53 }
 0x290   : > { %v12141_v56 = vpop.f32.mrf.mxu1  ;;  %v12173_v57 = vpop.f32.mrf.mxu0 }
 0x291   : > { %v2273_v58 = vpack.c.bf16 %v1856_v55, %v1856_v55  ;;  %v2269_v9 = vpack.c.bf16 %v1604_v3, %v1604_v3  ;;  %v11019_v57 = vld [vmem:[%s15545_s25 + $0x3] ss:$0 sm:$0xff] }
 0x292   : > { %v1606_v60 = vpop.f32.mrf.mxu1  ;;  %v1858_v61 = vpop.f32.mrf.mxu0 }
 0x293   : > { %v2282_v62 = vsel %vm2277_vm3, %v2273_v58, 0  ;;  %v11049_v61 = vld [vmem:[%s15550_s14 + $0x1] ss:$0 sm:$0xff] }
 0x294   : > { %v12142_v63 = vpop.f32.mrf.mxu1  ;;  %v12174_v0 = vpop.f32.mrf.mxu0  ;;  %12232 = vmatpush3.bf16.xpose.msra.mxu0 %v2282_v62 }
 0x295   : > { %12243 = vmatprep.subr.bf16.mxu0 %v13744_v2 }
 0x296   : > { %v1655_v4 = vpop.f32.mrf.mxu1  ;;  %v1959_v5 = vpop.f32.mrf.mxu0 }
 0x297   : > { %v1960_v6 = vadd.f32 %v11034_v1, %v1959_v5  ;;  %v1656_v51 = vadd.f32 %v11017_v46, %v1655_v4 }
 0x298   : > { %v12149_v7 = vpop.f32.mrf.mxu1  ;;  %v12189_v8 = vpop.f32.mrf.mxu0 }
 0x299   : > { %v2275_v10 = vpack.c.bf16 %v1960_v6, %v1960_v6  ;;  %v2270_v55 = vpack.c.bf16 %v1656_v51, %v1656_v51 }
 0x29a   : > { %v1658_v11 = vpop.f32.mrf.mxu1  ;;  %v1962_v12 = vpop.f32.mrf.mxu0 }
 0x29b   : > { %v2374_v13 = vsel %vm2277_vm3, %v2275_v10, 0  ;;  %12234 = vmatmul.mubr.msk.bf16.vlgmr.msra.gmra.mxu0 %vm2277_vm3, %v2269_v9 }
 0x29c   : > { %v12150_v14 = vpop.f32.mrf.mxu1  ;;  %v12190_v15 = vpop.f32.mrf.mxu0  ;;  %12244 = vmatpush3.bf16.xpose.msra.mxu0 %v2374_v13  ;;  %12245 = vmatprep.mubr.msk.bf16.mxu0 %vm13745_vm0, %v13744_v2 }
 0x29d   : > { %12255 = vmatprep.subr.bf16.mxu0 %v13744_v2 }
 0x29e   : > { %v1707_v18 = vpop.f32.mrf.mxu1  ;;  %v2107_v19 = vpop.f32.mrf.mxu0 }
 0x29f   : > { %v1708_v20 = vadd.f32 %v11018_v16, %v1707_v18  ;;  %v2108_v22 = vadd.f32 %v11048_v17, %v2107_v19 }
 0x2a0   : > { %v12157_v23 = vpop.f32.mrf.mxu1  ;;  %v12205_v25 = vpop.f32.mrf.mxu0 }
 0x2a1   : > { %v2271_v26 = vpack.c.bf16 %v1708_v20, %v1708_v20  ;;  %v2510_v27 = vpack.c.bf16 %v2108_v22, %v2108_v22 }
 0x2a2   : > { %v1710_v28 = vpop.f32.mrf.mxu1  ;;  %v2110_v29 = vpop.f32.mrf.mxu0 }
 0x2a3   : > { %v2519_v30 = vsel %vm2517_vm4, %v2510_v27, 0  ;;  %12246 = vmatmul.mubr.msk.bf16.vlgmr.msra.gmra.mxu0 %vm2277_vm3, %v2271_v26 }
 0x2a4   : > { %v12158_v31 = vpop.f32.mrf.mxu1  ;;  %v12206_v32 = vpop.f32.mrf.mxu0  ;;  %12256 = vmatpush3.bf16.msra.mxu0 %v2519_v30  ;;  %12257 = vmatprep.mubr.msk.bf16.mxu0 %vm13745_vm0, %v13744_v2 }
 0x2a5   : > { %12267 = vmatprep.subr.bf16.mxu0 %v13744_v2 }
 0x2a6   : > { %v1759_v33 = vpop.f32.mrf.mxu1  ;;  %v14208_v34 = vpop.f32.mrf.mxu0 }
 0x2a7   : > { %v1760_v62 = vadd.f32 %v11019_v57, %v1759_v33 }
 0x2a8   : > { %v12165_v35 = vpop.f32.mrf.mxu1  ;;  %v12221_v36 = vpop.f32.mrf.mxu0 }
 0x2a9   : > { %v2272_v3 = vpack.c.bf16 %v1760_v62, %v1760_v62 }
 0x2aa   : > { %v1762_v37 = vpop.f32.mrf.mxu1  ;;  %v2214_v38 = vpop.f32.mrf.mxu0 }
 0x2ac   : > { %v12166_v39 = vpop.f32.mrf.mxu1  ;;  %v12222_v40 = vpop.f32.mrf.mxu0 }
 0x2ae   : > { %v1907_v42 = vpop.f32.mrf.mxu1 }
 0x2af   : > { %v1908_v43 = vadd.f32 %v11033_v41, %v1907_v42 }
 0x2b0   : > { %v12181_v44 = vpop.f32.mrf.mxu1 }
 0x2b1   : > { %v2274_v45 = vpack.c.bf16 %v1908_v43, %v1908_v43 }
 0x2b2   : > { %v1910_v47 = vpop.f32.mrf.mxu1 }
 0x2b3   : > { %v2328_v48 = vsel %vm2277_vm3, %v2274_v45, 0 }
 0x2b4   : > { %v12182_v49 = vpop.f32.mrf.mxu1  ;;  %12238 = vmatpush3.bf16.xpose.msra.mxu1 %v2328_v48 }
 0x2b5   : > { %12249 = vmatprep.subr.bf16.mxu1 %v13744_v2 }
 0x2b6   : > { %v2011_v52 = vpop.f32.mrf.mxu1 }
 0x2b7   : > { %v2012_v53 = vadd.f32 %v11035_v50, %v2011_v52 }
 0x2b8   : > { %v12197_v54 = vpop.f32.mrf.mxu1 }
 0x2b9   : > { %v2276_v56 = vpack.c.bf16 %v2012_v53, %v2012_v53 }
 0x2ba   : > { %v2014_v58 = vpop.f32.mrf.mxu1 }
 0x2bb   : > { %v2420_v59 = vsel %vm2277_vm3, %v2276_v56, 0  ;;  %12240 = vmatmul.mubr.msk.bf16.vlgmr.msra.gmra.mxu1 %vm2277_vm3, %v2270_v55  ;;  %v11050_v56 = vld [vmem:[%s15550_s14 + $0x2] ss:$0 sm:$0xff] }
 0x2bc   : > { %v12198_v60 = vpop.f32.mrf.mxu1  ;;  %12250 = vmatpush3.bf16.xpose.msra.mxu1 %v2420_v59  ;;  %12251 = vmatprep.mubr.msk.bf16.mxu1 %vm13745_vm0, %v13744_v2  ;;  %v2212_v57 = vadd.f32 %v11050_v56, %v14208_v34 }
 0x2bd   : > { %12261 = vmatprep.subr.bf16.mxu1 %v13744_v2 }
 0x2be   : > { %v2159_v63 = vpop.f32.mrf.mxu1  ;;  %v2512_v59 = vpack.c.bf16 %v2212_v57, %v2212_v57 }
 0x2bf   : > { %v2160_v0 = vadd.f32 %v11049_v61, %v2159_v63 }
 0x2c0   : > { %v12213_v1 = vpop.f32.mrf.mxu1  ;;  %v2611_v62 = vsel %vm2517_vm4, %v2512_v59, 0 }
 0x2c1   : > { %v2511_v4 = vpack.c.bf16 %v2160_v0, %v2160_v0  ;;  %v11051_v1 = vld [vmem:[%s15550_s14 + $0x3] ss:$0 sm:$0xff] }
 0x2c2   : > { %v2162_v5 = vpop.f32.mrf.mxu1 }
 0x2c3   : > { %v2565_v6 = vsel %vm2517_vm4, %v2511_v4, 0  ;;  %12252 = vmatmul.mubr.msk.bf16.vlgmr.msra.gmra.mxu1 %vm2277_vm3, %v2272_v3 }
 0x2c4   : > { %v12214_v7 = vpop.f32.mrf.mxu1  ;;  %12262 = vmatpush3.bf16.msra.mxu1 %v2565_v6  ;;  %12263 = vmatprep.mubr.msk.bf16.mxu1 %vm13745_vm0, %v13744_v2 }
 0x2c5   : > { %12273 = vmatprep.subr.bf16.mxu1 %v13744_v2 }
 0x2c6   : > { %v14227_v8 = vpop.f32.mrf.mxu1 }
 0x2c7   : > { %v2264_v3 = vadd.f32 %v11051_v1, %v14227_v8 }
 0x2c8   : > { %v12229_v9 = vpop.f32.mrf.mxu1 }
 0x2c9   : > { %v2513_v5 = vpack.c.bf16 %v2264_v3, %v2264_v3 }
 0x2ca   : > { %v2266_v10 = vpop.f32.mrf.mxu1 }
 0x2cb   : > { %v2657_v10 = vsel %vm2517_vm4, %v2513_v5, 0 }
 0x2cc   : > { %v12230_v11 = vpop.f32.mrf.mxu1 }
 0x35b   : > { %v2318_v12 = vpop.f32.mrf.mxu0 }
 0x35c   : > { %v2462_v13 = vsel %vm2277_vm3, %v2318_v12, -inf }
 0x35d   : > { %2463 = vmax.xlane.f32.xlu0 %v2462_v13  ;;  %v12235_v14 = vpop.f32.mrf.mxu0 }
 0x35f   : > { %v2321_v15 = vpop.f32.mrf.mxu0 }
 0x360   : > { %v2703_v15 = vld [vmem:[%s15548_s19] sm:$0xf] }
 0x361   : > { %v12236_v16 = vpop.f32.mrf.mxu0 }
 0x362   : > { %v2711_v16 = vsel %vm2517_vm4, %v2703_v15, 0 }
 0x363   : > { %v2410_v17 = vpop.f32.mrf.mxu0 }
 0x364   : > { %v2468_v27 = vsel %vm2277_vm3, %v2410_v17, -inf }
 0x365   : > { %v12247_v18 = vpop.f32.mrf.mxu0 }
 0x367   : > { %v2413_v19 = vpop.f32.mrf.mxu0 }
 0x368   : > { %v2705_v19 = vld [vmem:[%s15548_s19 + $0x8] sm:$0xf] }
 0x369   : > { %v12248_v20 = vpop.f32.mrf.mxu0 }
 0x37b   : > { %v2364_v22 = vpop.f32.mrf.mxu1 }
 0x37c   : > { %v2465_v23 = vsel %vm2277_vm3, %v2364_v22, -inf }
 0x37d   : > { %2466 = vmax.xlane.f32.xlu1 %v2465_v23  ;;  %v12241_v25 = vpop.f32.mrf.mxu1  ;;  %v2803_v23 = vsel %vm2517_vm4, %v2705_v19, 0 }
 0x37f   : > { %v2367_v26 = vpop.f32.mrf.mxu1 }
 0x381   : > { %v12242_v28 = vpop.f32.mrf.mxu1  ;;  %2469 = vmax.xlane.f32.xlu1 %v2468_v27 }
 0x382   : > { %v2706_v28 = vld [vmem:[%s15548_s19 + $0xc] sm:$0xf] }
 0x383   : > { %v2456_v29 = vpop.f32.mrf.mxu1 }
 0x384   : > { %v2471_v30 = vsel %vm2277_vm3, %v2456_v29, -inf }
 0x385   : > { %v12253_v31 = vpop.f32.mrf.mxu1  ;;  %2472 = vmax.xlane.f32.xlu1 %v2471_v30 }
 0x386   : > { %v2849_v31 = vsel %vm2517_vm4, %v2706_v28, 0 }
 0x387   : > { %v2459_v32 = vpop.f32.mrf.mxu1 }
 0x389   : > { %v12254_v33 = vpop.f32.mrf.mxu1 }
 0x3e6   : > { %v2464_v35 = vpop.xlane.xlu0 %2463 }
 0x3e7   : > { %v2474_v36 = vsub.f32 %v2318_v12, %v2464_v35 }
 0x3e9   : > { %v2478_v37 = vmul.f32 1.442695, %v2474_v36 }
 0x3eb   : > { %13526 = vpow2.f32 %v2478_v37 }
 0x3f8   : > { %v13527_v38 = vpop.eup %13526 }
 0x3f9   : > { %v2486_v39 = vsel %vm2277_vm3, %v13527_v38, 0.0 }
 0x3fa   : > { %2487 = vadd.xlane.f32.xlu1 %v2486_v39 }
 0x406   : > { %v2467_v40 = vpop.xlane.xlu1 %2466 }
 0x407   : > { %v2475_v41 = vsub.f32 %v2364_v22, %v2467_v40 }
 0x409   : > { %v2480_v42 = vmul.f32 1.442695, %v2475_v41 }
 0x40a   : > { %v2470_v43 = vpop.xlane.xlu1 %2469 }
 0x40b   : > { %13528 = vpow2.f32 %v2480_v42  ;;  %v2476_v44 = vsub.f32 %v2410_v17, %v2470_v43  ;;  %v2704_v17 = vld [vmem:[%s15548_s19 + $0x4] sm:$0xf] }
 0x40c   : > { %v2757_v18 = vsel %vm2517_vm4, %v2704_v17, 0 }
 0x40d   : > { %v2482_v45 = vmul.f32 1.442695, %v2476_v44 }
 0x40e   : > { %v2473_v46 = vpop.xlane.xlu1 %2472 }
 0x40f   : > { %13530 = vpow2.f32 %v2482_v45  ;;  %v2477_v47 = vsub.f32 %v2456_v29, %v2473_v46  ;;  %v13380_v46 = vld [vmem:[%s15543_s30 + $0x8] sm:$0xff]  }
 0x411   : > { %v2484_v48 = vmul.f32 1.442695, %v2477_v47  ;;  %v13381_v47 = vld [vmem:[%s15543_s30] sm:$0xff]  }
 0x413   : > { %13532 = vpow2.f32 %v2484_v48  ;;  %v13382_v48 = vld [vmem:[%s15551_s12 + $0x18] sm:$0xff]  }
 0x418   : > { %v13529_v49 = vpop.eup %13528 }
 0x419   : > { %v2489_v50 = vsel %vm2277_vm3, %v13529_v49, 0.0 }
 0x41a   : > { %2490 = vadd.xlane.f32.xlu1 %v2489_v50 }
 0x41c   : > { %v13531_v51 = vpop.eup %13530 }
 0x41d   : > { %v2492_v52 = vsel %vm2277_vm3, %v13531_v51, 0.0 }
 0x41e   : > { %2493 = vadd.xlane.f32.xlu1 %v2492_v52 }
 0x420   : > { %v13533_v53 = vpop.eup %13532 }
 0x421   : > { %v2495_v54 = vsel %vm2277_vm3, %v13533_v53, 0.0 }
 0x422   : > { %2496 = vadd.xlane.f32.xlu1 %v2495_v54 }
 0x483   : > { %v2488_v55 = vpop.xlane.xlu1 %2487 }
 0x484   : > { %13534 = vrcp.f32 %v2488_v55 }
 0x491   : > { %v13535_v58 = vpop.eup %13534 }
 0x492   : > { %v2499_v60 = vmul.f32 %v13535_v58, %v13527_v38 }
 0x494   : > { %v2506_v61 = vpack.c.bf16 %v2499_v60, %v2499_v60 }
 0x496   : > { %12258 = vmatmul.mubr.msk.bf16.vlgmr.msra.gmra.mxu0 %vm2277_vm3, %v2506_v61 }
 0x497   : > { %12268 = vmatpush3.bf16.msra.mxu0 %v2611_v62  ;;  %12269 = vmatprep.mubr.msk.bf16.mxu0 %vm13745_vm0, %v13744_v2 }
 0x498   : > { %12279 = vmatprep.subr.bf16.mxu0 %v13744_v2 }
 0x4a3   : > { %v2491_v63 = vpop.xlane.xlu1 %2490 }
 0x4a4   : > { %13536 = vrcp.f32 %v2491_v63 }
 0x4a7   : > { %v2494_v0 = vpop.xlane.xlu1 %2493 }
 0x4a8   : > { %13538 = vrcp.f32 %v2494_v0 }
 0x4ab   : > { %v2497_v34 = vpop.xlane.xlu1 %2496 }
 0x4ac   : > { %13540 = vrcp.f32 %v2497_v34 }
 0x4b1   : > { %v13537_v4 = vpop.eup %13536 }
 0x4b2   : > { %v2501_v6 = vmul.f32 %v13537_v4, %v13529_v49  ;;  %v13383_v49 = vld [vmem:[%s15551_s12 + $0x10] sm:$0xff]   ;;  %v11076_v4 = vld [vmem:[%s15546_s24] ss:$0 sm:$0xff] }
 0x4b4   : > { %v2507_v7 = vpack.c.bf16 %v2501_v6, %v2501_v6 }
 0x4b5   : > { %v13539_v9 = vpop.eup %13538 }
 0x4b6   : > { %12264 = vmatmul.mubr.msk.bf16.vlgmr.msra.gmra.mxu1 %vm2277_vm3, %v2507_v7  ;;  %v2503_v11 = vmul.f32 %v13539_v9, %v13531_v51 }
 0x4b7   : > { %12274 = vmatpush3.bf16.msra.mxu1 %v2657_v10  ;;  %12275 = vmatprep.mubr.msk.bf16.mxu1 %vm13745_vm0, %v13744_v2 }
 0x4b8   : > { %v2508_v12 = vpack.c.bf16 %v2503_v11, %v2503_v11  ;;  %12285 = vmatprep.subr.bf16.mxu1 %v13744_v2 }
 0x4b9   : > { %v13541_v8 = vpop.eup %13540 }
 0x4ba   : > { %12270 = vmatmul.mubr.msk.bf16.vlgmr.msra.gmra.mxu0 %vm2277_vm3, %v2508_v12  ;;  %v2505_v13 = vmul.f32 %v13541_v8, %v13533_v53  ;;  %v13384_v8 = vld [vmem:[%s15551_s12 + $0x8] sm:$0xff]  }
 0x4bb   : > { %12281 = vmatprep.mubr.msk.bf16.mxu0 %vm13745_vm0, %v13744_v2  ;;  %12280 = vmatpush3.bf16.msra.mxu0 %v2711_v16 }
 0x4bc   : > { %v2509_v14 = vpack.c.bf16 %v2505_v13, %v2505_v13  ;;  %12291 = vmatprep.subr.bf16.mxu0 %v13744_v2  ;;  %v13385_v13 = vld [vmem:[%s15551_s12] sm:$0xff]  }
 0x4be   : > { %12276 = vmatmul.mubr.msk.bf16.vlgmr.msra.gmra.mxu1 %vm2277_vm3, %v2509_v14  ;;  %v11077_v14 = vld [vmem:[%s15552_s6] ss:$0 sm:$0xff] }
 0x4bf   : > { %12287 = vmatprep.mubr.msk.bf16.mxu1 %vm13745_vm0, %v13744_v2  ;;  %12286 = vmatpush3.bf16.msra.mxu1 %v2757_v18 }
 0x4c0   : > { %12297 = vmatprep.subr.bf16.mxu1 %v13744_v2 }
 0x556   : > { %v2555_v20 = vpop.f32.mrf.mxu0 }
 0x557   : > { %v2699_v22 = vpack.c.bf16 %v2555_v20, %v2555_v20 }
 0x558   : > { %v12259_v25 = vpop.f32.mrf.mxu0 }
 0x559   : > { %12282 = vmatmul.mubr.msk.bf16.vlgmr.msra.gmra.mxu0 %vm2277_vm3, %v2699_v22 }
 0x55a   : > { %v2558_v26 = vpop.f32.mrf.mxu0  ;;  %12292 = vmatpush3.bf16.msra.mxu0 %v2803_v23  ;;  %12293 = vmatprep.mubr.msk.bf16.mxu0 %vm13745_vm0, %v13744_v2  ;;  %v11081_v23 = vld [vmem:[%s15565_s28] ss:$0 sm:$0xff] }
 0x55b   : > { %12303 = vmatprep.subr.bf16.mxu0 %v13744_v2 }
 0x55c   : > { %v12260_v27 = vpop.f32.mrf.mxu0 }
 0x576   : > { %v2601_v29 = vpop.f32.mrf.mxu1 }
 0x577   : > { %v2700_v30 = vpack.c.bf16 %v2601_v29, %v2601_v29 }
 0x578   : > { %v12265_v32 = vpop.f32.mrf.mxu1 }
 0x579   : > { %12288 = vmatmul.mubr.msk.bf16.vlgmr.msra.gmra.mxu1 %vm2277_vm3, %v2700_v30 }
 0x57a   : > { %v2604_v33 = vpop.f32.mrf.mxu1  ;;  %v2647_v35 = vpop.f32.mrf.mxu0  ;;  %12298 = vmatpush3.bf16.msra.mxu1 %v2849_v31  ;;  %12299 = vmatprep.mubr.msk.bf16.mxu1 %vm13745_vm0, %v13744_v2 }
 0x57b   : > { %v2701_v36 = vpack.c.bf16 %v2647_v35, %v2647_v35  ;;  %12311 = vmatprep.subr.bf16.mxu1 %v13744_v2 }
 0x57c   : > { %v12266_v37 = vpop.f32.mrf.mxu1  ;;  %v12271_v38 = vpop.f32.mrf.mxu0 }
 0x57d   : > { %12294 = vmatmul.mubr.msk.bf16.vlgmr.msra.gmra.mxu0 %vm2277_vm3, %v2701_v36  ;;  %v13386_v38 = vld [vmem:[%s15547_s21 + $0x48] sm:$0xff]  }
 0x57e   : > { %v2650_v39 = vpop.f32.mrf.mxu0  ;;  %v2693_v40 = vpop.f32.mrf.mxu1  ;;  %12307 = vmatprep.mubr.msk.bf16.mxu0 %vm13745_vm0, %v13744_v2  ;;  %12304 = vmatpush3.bf16.msra.mxu0 %v13380_v46  ;;  %v11087_v46 = vld [vmem:[%s15566_s23] ss:$0 sm:$0xff] }
 0x57f   : > { %v2702_v41 = vpack.c.bf16 %v2693_v40, %v2693_v40  ;;  %12305 = vmatprep.subr.bf16.mxu0 %v13744_v2  ;;  %v13387_v39 = vld [vmem:[%s15547_s21 + $0x68] sm:$0xff]   ;;  %v13388_v40 = vld [vmem:[%s15547_s21 + $0x40] sm:$0xff]  }
 0x580   : > { %v12272_v42 = vpop.f32.mrf.mxu0  ;;  %v12277_v43 = vpop.f32.mrf.mxu1 }
 0x581   : > { %12300 = vmatmul.mubr.msk.bf16.vlgmr.msra.gmra.mxu1 %vm2277_vm3, %v2702_v41  ;;  %v13389_v41 = vld [vmem:[%s15547_s21 + $0x60] sm:$0xff]  }
 0x582   : > { %v2696_v44 = vpop.f32.mrf.mxu1  ;;  %12319 = vmatprep.mubr.msk.bf16.mxu1 %vm13745_vm0, %v13744_v2  ;;  %12306 = vmatpush3.bf16.msra.mxu0 %v13381_v47 }
 0x583   : > { %12323 = vmatprep.subr.bf16.mxu0 %v13744_v2  ;;  %12312 = vmatpush3.bf16.msra.mxu1 %v13382_v48  ;;  %v11088_v48 = vld [vmem:[%s15567_s5] ss:$0 sm:$0xff] }
 0x584   : > { %v12278_v45 = vpop.f32.mrf.mxu1  ;;  %12313 = vmatprep.subr.bf16.mxu1 %v13744_v2 }
 0x587   : > { %12314 = vmatpush3.bf16.msra.mxu1 %v13383_v49 }
 0x588   : > { %12315 = vmatprep.subr.bf16.mxu1 %v13744_v2 }
 0x58b   : > { %12316 = vmatpush3.bf16.msra.mxu1 %v13384_v8 }
 0x58c   : > { %12317 = vmatprep.subr.bf16.mxu1 %v13744_v2 }
 0x58f   : > { %12318 = vmatpush3.bf16.msra.mxu1 %v13385_v13 }
 0x590   : > { %12339 = vmatprep.subr.bf16.mxu1 %v13744_v2 }
 0x619   : > { %v2747_v50 = vpop.f32.mrf.mxu0 }
 0x61a   : > { %v2891_v59 = vsel %vm1565_vm2, %v2747_v50, 0.0 }
 0x61b   : > { %v12283_v51 = vpop.f32.mrf.mxu0 }
 0x61c   : > { %v13390_v51 = vld [vmem:[%s15547_s21 + $0x58] sm:$0xff]  }
 0x61d   : > { %v2750_v52 = vpop.f32.mrf.mxu0 }
 0x61e   : > { %v13391_v52 = vld [vmem:[%s15544_s29 + $0x48] sm:$0xff]  }
 0x61f   : > { %v12284_v53 = vpop.f32.mrf.mxu0 }
 0x639   : > { %v2793_v54 = vpop.f32.mrf.mxu1 }
 0x63a   : > { %v2892_v56 = vsel %vm1565_vm2, %v2793_v54, 0.0  ;;  %v13392_v54 = vld [vmem:[%s15547_s21 + $0x50] sm:$0xff]  }
 0x63b   : > { %v12289_v55 = vpop.f32.mrf.mxu1  ;;  %v2893_v61 = vadd.f32 %v2892_v56, %v2891_v59  ;;  %v13394_v56 = vld [vmem:[%s15547_s21 + $0x78] sm:$0xff]   ;;  %v13397_v59 = vld [vmem:[%s15544_s29 + $0x60] sm:$0xff]  }
 0x63c   : > { %v13393_v55 = vld [vmem:[%s15544_s29 + $0x40] sm:$0xff]  }
 0x63d   : > { %v2796_v57 = vpop.f32.mrf.mxu1  ;;  %v2839_v58 = vpop.f32.mrf.mxu0 }
 0x63e   : > { %v2894_v60 = vsel %vm1565_vm2, %v2839_v58, 0.0  ;;  %v13395_v57 = vld [vmem:[%s15544_s29 + $0x68] sm:$0xff]   ;;  %v13396_v58 = vld [vmem:[%s15547_s21 + $0x70] sm:$0xff]   ;;  %s15581_s21 = sld [smem:[#allocation46_spill]] }
 0x63f   : > { %v12290_v62 = vpop.f32.mrf.mxu1  ;;  %v12295_v63 = vpop.f32.mrf.mxu0  ;;  %v2895_v0 = vadd.f32 %v2894_v60, %v2893_v61  ;;  %v13398_v60 = vld [vmem:[%s15544_s29 + $0x58] sm:$0xff]   ;;  %v13399_v61 = vld [vmem:[%s15553_s8 + $0x48] sm:$0xff]  }
 0x640   : > { %v13400_v62 = vld [vmem:[%s15544_s29 + $0x50] sm:$0xff]   ;;  %v13401_v63 = vld [vmem:[%s15553_s8 + $0x40] sm:$0xff]  }
 0x641   : > { %v2842_v1 = vpop.f32.mrf.mxu0  ;;  %v2885_v34 = vpop.f32.mrf.mxu1 }
 0x642   : > { %v2896_v3 = vsel %vm1565_vm2, %v2885_v34, 0.0  ;;  %v13403_v1 = vld [vmem:[%s15553_s8 + $0x68] sm:$0xff]   ;;  %v13404_v34 = vld [vmem:[%s15544_s29 + $0x70] sm:$0xff]  }
 0x643   : > { %v2897_v5 = vadd.f32 %v2896_v3, %v2895_v0  ;;  %v12296_v6 = vpop.f32.mrf.mxu0  ;;  %v12301_v7 = vpop.f32.mrf.mxu1  ;;  %v13402_v0 = vld [vmem:[%s15544_s29 + $0x78] sm:$0xff]   ;;  %v13405_v3 = vld [vmem:[%s15553_s8 + $0x60] sm:$0xff]   ;;  %s15588_s29 = sld [smem:[#allocation41_spill]] }
 0x644   : > { %v13408_v6 = vld [vmem:[%s15553_s8 + $0x78] sm:$0xff]   ;;  %v13409_v7 = vld [vmem:[%s15553_s8 + $0x70] sm:$0xff]  }
 0x645   : > { %v2905_v9 = vadd.f32 %v11076_v4, %v2897_v5  ;;  %v2888_v10 = vpop.f32.mrf.mxu1  ;;  %v13406_v4 = vld [vmem:[%s15553_s8 + $0x58] sm:$0xff]   ;;  %v13407_v5 = vld [vmem:[%s15553_s8 + $0x50] sm:$0xff]   ;;  %s15569_s8 = sshll.u32 %s14041_s11, 3  ;;  %s15573_s11 = sld [smem:[#allocation26_spill]] }
 0x647   : > { %v2906_v11 = vpack.c.bf16 %v2905_v9, %v2905_v9  ;;  %v12302_v12 = vpop.f32.mrf.mxu1 }
 0x649   : > { %12308 = vmatmul.mubr.msk.bf16.vlgmr.msra.gmra.mxu0 %vm1565_vm2, %v2906_v11 }
 0x64a   : > { %12327 = vmatprep.mubr.msk.bf16.mxu0 %vm13745_vm0, %v13744_v2  ;;  %12324 = vmatpush3.bf16.msra.mxu0 %v13386_v38 }
 0x64b   : > { %12325 = vmatprep.subr.bf16.mxu0 %v13744_v2 }
 0x64e   : > { %12326 = vmatpush3.bf16.msra.mxu0 %v13388_v40 }
 0x64f   : > { %12331 = vmatprep.subr.bf16.mxu0 %v13744_v2 }
 0x709   : > { %v2967_v15 = vpop.f32.mrf.mxu0 }
 0x70a   : > { %v2968_v16 = vadd.f32 %v11077_v14, %v2967_v15 }
 0x70b   : > { %v12309_v17 = vpop.f32.mrf.mxu0 }
 0x70c   : > { %v2973_v18 = vmax.f32 %v2968_v16, 0.0  ;;  %v11145_v16 = vld [vmem:[%s15554_s3 + $0x4] ss:$0 sm:$0xff] }
 0x70d   : > { %v2970_v19 = vpop.f32.mrf.mxu0 }
 0x70e   : > { %v2974_v20 = vpack.c.bf16 %v2973_v18, %v2973_v18 }
 0x70f   : > { %v12310_v22 = vpop.f32.mrf.mxu0 }
 0x710   : > { %12320 = vmatmul.mubr.msk.bf16.vlgmr.msra.gmra.mxu1 %vm3014_vm5, %v2974_v20 }
 0x711   : > { %12343 = vmatprep.mubr.msk.bf16.mxu1 %vm13745_vm0, %v13744_v2  ;;  %12340 = vmatpush3.bf16.msra.mxu1 %v13387_v39 }
 0x712   : > { %12341 = vmatprep.subr.bf16.mxu1 %v13744_v2 }
 0x715   : > { %12342 = vmatpush3.bf16.msra.mxu1 %v13389_v41  ;;  %v11111_v41 = vld [vmem:[%s15545_s25 + $0x6] ss:$0 sm:$0xff] }
 0x716   : > { %12355 = vmatprep.subr.bf16.mxu1 %v13744_v2 }
 0x7d0   : > { %v3052_v25 = vpop.f32.mrf.mxu1 }
 0x7d1   : > { %v3053_v26 = vadd.f32 %v11081_v23, %v3052_v25  ;;  %v11109_v25 = vld [vmem:[%s15545_s25 + $0x4] ss:$0 sm:$0xff] }
 0x7d2   : > { %v12321_v27 = vpop.f32.mrf.mxu1 }
 0x7d3   : > { %v3058_v28 = vadd.f32 %v3053_v26, %v2905_v9 }
 0x7d4   : > { %v3055_v29 = vpop.f32.mrf.mxu1 }
 0x7d5   : > { %v3061_v30 = vsel %vm1565_vm2, %v3058_v28, 0.0 }
 0x7d6   : > { %3062 = vadd.xlane.f32.xlu1 %v3061_v30  ;;  %v12322_v31 = vpop.f32.mrf.mxu1 }
 0x7d7   : > { %v11147_v31 = vld [vmem:[%s15554_s3 + $0x6] ss:$0 sm:$0xff] }
 0x85f   : > { %v3063_v32 = vpop.xlane.xlu1 %3062 }
 0x860   : > { %v3065_v33 = vmul.f32 0.03125, %v3063_v32 }
 0x862   : > { %v3066_v35 = vsub.f32 %v3058_v28, %v3065_v33 }
 0x864   : > { %v3067_v36 = vmul.f32 %v3066_v35, %v3066_v35 }
 0x866   : > { %v3068_v37 = vsel %vm1565_vm2, %v3067_v36, 0.0 }
 0x867   : > { %3069 = vadd.xlane.f32.xlu1 %v3068_v37 }
 0x8f0   : > { %v3070_v42 = vpop.xlane.xlu1 %3069 }
 0x8f1   : > { %v3071_v43 = vmul.f32 0.03125, %v3070_v42 }
 0x8f3   : > { %v3072_v44 = vadd.f32 1e-05, %v3071_v43 }
 0x8f5   : > { %13542 = vrsqrt.f32 %v3072_v44 }
 0x902   : > { %v13543_v45 = vpop.eup %13542 }
 0x903   : > { %v3074_v47 = vmul.f32 %v13543_v45, %v3066_v35 }
 0x905   : > { %v3081_v49 = vmul.f32 %v11087_v46, %v3074_v47  ;;  %v11146_v47 = vld [vmem:[%s15554_s3 + $0x5] ss:$0 sm:$0xff] }
 0x907   : > { %v3088_v50 = vadd.f32 %v11088_v48, %v3081_v49  ;;  %v11181_v48 = vld [vmem:[%s15550_s14 + $0x4] ss:$0 sm:$0xff] }
 0x909   : > { %v14320_v53 = vpack.c.bf16 %v3088_v50, %v3088_v50 }
 0x90b   : > { %12328 = vmatmul.mubr.msk.bf16.vlgmr.msra.gmra.mxu0 %vm1565_vm2, %v14320_v53  ;;  %12344 = vmatmul.mubr.msk.bf16.vlgmr.msra.gmra.mxu1 %vm1565_vm2, %v14320_v53 }
 0x90c   : > { %12332 = vmatpush3.bf16.msra.mxu0 %v13390_v51  ;;  %12356 = vmatpush3.bf16.msra.mxu1 %v13391_v52 }
 0x90d   : > { %12333 = vmatprep.subr.bf16.mxu0 %v13744_v2  ;;  %12357 = vmatprep.subr.bf16.mxu1 %v13744_v2 }
 0x90e   : > { %12335 = vmatprep.mubr.msk.bf16.mxu0 %vm13745_vm0, %v13744_v2  ;;  %12359 = vmatprep.mubr.msk.bf16.mxu1 %vm13745_vm0, %v13744_v2 }
 0x910   : > { %12334 = vmatpush3.bf16.msra.mxu0 %v13392_v54  ;;  %12358 = vmatpush3.bf16.msra.mxu1 %v13393_v55 }
 0x911   : > { %12347 = vmatprep.subr.bf16.mxu0 %v13744_v2  ;;  %12371 = vmatprep.subr.bf16.mxu1 %v13744_v2 }
 0x913   : > { %12336 = vmatmul.mubr.msk.bf16.vlgmr.msra.gmra.mxu0 %vm1565_vm2, %v14320_v53  ;;  %12360 = vmatmul.mubr.msk.bf16.vlgmr.msra.gmra.mxu1 %vm1565_vm2, %v14320_v53 }
 0x914   : > { %12348 = vmatpush3.bf16.msra.mxu0 %v13394_v56  ;;  %12372 = vmatpush3.bf16.msra.mxu1 %v13395_v57 }
 0x915   : > { %12349 = vmatprep.subr.bf16.mxu0 %v13744_v2  ;;  %12373 = vmatprep.subr.bf16.mxu1 %v13744_v2 }
 0x916   : > { %12351 = vmatprep.mubr.msk.bf16.mxu0 %vm13745_vm0, %v13744_v2  ;;  %12375 = vmatprep.mubr.msk.bf16.mxu1 %vm13745_vm0, %v13744_v2 }
 0x918   : > { %12350 = vmatpush3.bf16.msra.mxu0 %v13396_v58  ;;  %12374 = vmatpush3.bf16.msra.mxu1 %v13397_v59  ;;  %v11110_v59 = vld [vmem:[%s15545_s25 + $0x5] ss:$0 sm:$0xff] }
 0x919   : > { %12363 = vmatprep.subr.bf16.mxu0 %v13744_v2  ;;  %12387 = vmatprep.subr.bf16.mxu1 %v13744_v2 }
 0x91b   : > { %12352 = vmatmul.mubr.msk.bf16.vlgmr.msra.gmra.mxu0 %vm1565_vm2, %v14320_v53  ;;  %12376 = vmatmul.mubr.msk.bf16.vlgmr.msra.gmra.mxu1 %vm1565_vm2, %v14320_v53 }
 0x91c   : > { %12364 = vmatpush3.bf16.msra.mxu0 %v13398_v60  ;;  %12388 = vmatpush3.bf16.msra.mxu1 %v13399_v61 }
 0x91d   : > { %12365 = vmatprep.subr.bf16.mxu0 %v13744_v2  ;;  %12389 = vmatprep.subr.bf16.mxu1 %v13744_v2 }
 0x91e   : > { %12367 = vmatprep.mubr.msk.bf16.mxu0 %vm13745_vm0, %v13744_v2  ;;  %12391 = vmatprep.mubr.msk.bf16.mxu1 %vm13745_vm0, %v13744_v2 }
 0x920   : > { %12366 = vmatpush3.bf16.msra.mxu0 %v13400_v62  ;;  %12390 = vmatpush3.bf16.msra.mxu1 %v13401_v63 }
 0x921   : > { %12379 = vmatprep.subr.bf16.mxu0 %v13744_v2  ;;  %12403 = vmatprep.subr.bf16.mxu1 %v13744_v2 }
 0x923   : > { %12368 = vmatmul.mubr.msk.bf16.vlgmr.msra.gmra.mxu0 %vm1565_vm2, %v14320_v53  ;;  %12392 = vmatmul.mubr.msk.bf16.vlgmr.msra.gmra.mxu1 %vm1565_vm2, %v14320_v53 }
 0x924   : > { %12380 = vmatpush3.bf16.msra.mxu0 %v13402_v0  ;;  %12404 = vmatpush3.bf16.msra.mxu1 %v13403_v1 }
 0x925   : > { %12381 = vmatprep.subr.bf16.mxu0 %v13744_v2  ;;  %12405 = vmatprep.subr.bf16.mxu1 %v13744_v2 }
 0x926   : > { %12383 = vmatprep.mubr.msk.bf16.mxu0 %vm13745_vm0, %v13744_v2  ;;  %12407 = vmatprep.mubr.msk.bf16.mxu1 %vm13745_vm0, %v13744_v2 }
 0x928   : > { %12382 = vmatpush3.bf16.msra.mxu0 %v13404_v34  ;;  %12406 = vmatpush3.bf16.msra.mxu1 %v13405_v3  ;;  %v11148_v34 = vld [vmem:[%s15554_s3 + $0x7] ss:$0 sm:$0xff]  ;;  %s15568_s3 = sld [smem:[#allocation6_spill]] }
 0x929   : > { %12395 = vmatprep.subr.bf16.mxu0 %v13744_v2  ;;  %12419 = vmatprep.subr.bf16.mxu1 %v13744_v2 }
 0x92b   : > { %12384 = vmatmul.mubr.msk.bf16.vlgmr.msra.gmra.mxu0 %vm1565_vm2, %v14320_v53  ;;  %12408 = vmatmul.mubr.msk.bf16.vlgmr.msra.gmra.mxu1 %vm1565_vm2, %v14320_v53 }
 0x92c   : > { %12396 = vmatpush3.bf16.msra.mxu0 %v13406_v4  ;;  %12399 = vmatprep.mubr.msk.bf16.mxu0 %vm13745_vm0, %v13744_v2 }
 0x92d   : > { %12397 = vmatprep.subr.bf16.mxu0 %v13744_v2  ;;  %12421 = vmatprep.mubr.msk.bf16.mxu1 %vm13745_vm0, %v13744_v2 }
 0x92e   : > { %s1401_s13 = scalar_lea.vmem %s15568_s3, %s15569_s8  ;;  %s15571_s3 = sld [smem:[#allocation25_spill]] }
 0x92f   : > { %s15572_s8 = sld [smem:[#allocation27_spill]] }
 0x930   : > { %12398 = vmatpush3.bf16.msra.mxu0 %v13407_v5 }
 0x931   : > { %12411 = vmatprep.subr.bf16.mxu0 %v13744_v2 }
 0x933   : > { %12400 = vmatmul.mubr.msk.bf16.vlgmr.msra.gmra.mxu0 %vm1565_vm2, %v14320_v53 }
 0x934   : > { %12412 = vmatpush3.bf16.msra.mxu0 %v13408_v6  ;;  %12415 = vmatprep.mubr.msk.bf16.mxu0 %vm13745_vm0, %v13744_v2 }
 0x935   : > { %12413 = vmatprep.subr.bf16.mxu0 %v13744_v2 }
 0x938   : > { %12414 = vmatpush3.bf16.msra.mxu0 %v13409_v7 }
 0x939   : > { %12425 = vmatprep.subr.bf16.mxu0 %v13744_v2 }
 0x93b   : > { %12416 = vmatmul.mubr.msk.bf16.vlgmr.msra.gmra.mxu0 %vm1565_vm2, %v14320_v53 }
 0x93c   : > { %12427 = vmatprep.mubr.msk.bf16.mxu0 %vm13745_vm0, %v13744_v2 }
 0x9cb   : > { %v3185_v9 = vpop.f32.mrf.mxu0  ;;  %v3289_v10 = vpop.f32.mrf.mxu1 }
 0x9cc   : > { %v3186_v32 = vadd.f32 %v11109_v25, %v3185_v9  ;;  %v3290_v49 = vadd.f32 %v11111_v41, %v3289_v10 }
 0x9cd   : > { %v12329_v11 = vpop.f32.mrf.mxu0  ;;  %v12345_v12 = vpop.f32.mrf.mxu1 }
 0x9ce   : > { %v3855_v39 = vpack.c.bf16 %v3186_v32, %v3186_v32  ;;  %v3857_v56 = vpack.c.bf16 %v3290_v49, %v3290_v49  ;;  %v11112_v12 = vld [vmem:[%s15545_s25 + $0x7] ss:$0 sm:$0xff]  ;;  %s15586_s25 = sld [smem:[#allocation37_spill]] }
 0x9cf   : > { %v3188_v8 = vpop.f32.mrf.mxu0  ;;  %v3292_v13 = vpop.f32.mrf.mxu1 }
 0x9d1   : > { %v12330_v14 = vpop.f32.mrf.mxu0  ;;  %v12346_v15 = vpop.f32.mrf.mxu1 }
 0x9d3   : > { %v3237_v17 = vpop.f32.mrf.mxu0  ;;  %v3439_v18 = vpop.f32.mrf.mxu1 }
 0x9d4   : > { %v3440_v19 = vadd.f32 %v11145_v16, %v3439_v18  ;;  %v3238_v3 = vadd.f32 %v11110_v59, %v3237_v17  ;;  %v11182_v17 = vld [vmem:[%s15550_s14 + $0x5] ss:$0 sm:$0xff] }
 0x9d5   : > { %v12337_v20 = vpop.f32.mrf.mxu0  ;;  %v12361_v22 = vpop.f32.mrf.mxu1 }
 0x9d6   : > { %v3859_v23 = vpack.c.bf16 %v3440_v19, %v3440_v19  ;;  %v3856_v10 = vpack.c.bf16 %v3238_v3, %v3238_v3 }
 0x9d7   : > { %v3240_v26 = vpop.f32.mrf.mxu0  ;;  %v3442_v27 = vpop.f32.mrf.mxu1 }
 0x9d8   : > { %v3867_v28 = vsel %vm2277_vm3, %v3859_v23, 0 }
 0x9d9   : > { %v12338_v29 = vpop.f32.mrf.mxu0  ;;  %v12362_v30 = vpop.f32.mrf.mxu1  ;;  %12420 = vmatpush3.bf16.xpose.msra.mxu1 %v3867_v28 }
 0x9da   : > { %12431 = vmatprep.subr.bf16.mxu1 %v13744_v2 }
 0x9db   : > { %v3341_v33 = vpop.f32.mrf.mxu0  ;;  %v3543_v35 = vpop.f32.mrf.mxu1 }
 0x9dc   : > { %v3544_v36 = vadd.f32 %v11147_v31, %v3543_v35  ;;  %v3342_v18 = vadd.f32 %v11112_v12, %v3341_v33  ;;  %v4708_v12 = vld [vmem:[%s1401_s13] sm:$0xff]  ;;  %s15570_s13 = sld [smem:[#allocation23_spill]] }
 0x9dd   : > { %v12353_v37 = vpop.f32.mrf.mxu0  ;;  %v12377_v38 = vpop.f32.mrf.mxu1 }
 0x9de   : > { %v3861_v40 = vpack.c.bf16 %v3544_v36, %v3544_v36  ;;  %v3858_v23 = vpack.c.bf16 %v3342_v18, %v3342_v18 }
 0x9df   : > { %v3344_v42 = vpop.f32.mrf.mxu0  ;;  %v3546_v43 = vpop.f32.mrf.mxu1 }
 0x9e0   : > { %v3959_v44 = vsel %vm2277_vm3, %v3861_v40, 0  ;;  %12422 = vmatmul.mubr.msk.bf16.vlgmr.msra.gmra.mxu1 %vm2277_vm3, %v3855_v39 }
 0x9e1   : > { %v12354_v45 = vpop.f32.mrf.mxu0  ;;  %v12378_v46 = vpop.f32.mrf.mxu1  ;;  %12432 = vmatpush3.bf16.xpose.msra.mxu1 %v3959_v44  ;;  %12433 = vmatprep.mubr.msk.bf16.mxu1 %vm13745_vm0, %v13744_v2 }
 0x9e2   : > { %12443 = vmatprep.subr.bf16.mxu1 %v13744_v2 }
 0x9e3   : > { %v3491_v50 = vpop.f32.mrf.mxu0  ;;  %v3693_v51 = vpop.f32.mrf.mxu1 }
 0x9e4   : > { %v3492_v52 = vadd.f32 %v11146_v47, %v3491_v50  ;;  %v3694_v53 = vadd.f32 %v11181_v48, %v3693_v51 }
 0x9e5   : > { %v12369_v54 = vpop.f32.mrf.mxu0  ;;  %v12393_v55 = vpop.f32.mrf.mxu1 }
 0x9e6   : > { %v3860_v57 = vpack.c.bf16 %v3492_v52, %v3492_v52  ;;  %v4095_v58 = vpack.c.bf16 %v3694_v53, %v3694_v53 }
 0x9e7   : > { %v3494_v60 = vpop.f32.mrf.mxu0  ;;  %v3696_v61 = vpop.f32.mrf.mxu1 }
 0x9e8   : > { %v3913_v62 = vsel %vm2277_vm3, %v3860_v57, 0  ;;  %v4103_v63 = vsel %vm2517_vm4, %v4095_v58, 0  ;;  %12434 = vmatmul.mubr.msk.bf16.vlgmr.msra.gmra.mxu1 %vm2277_vm3, %v3857_v56 }
 0x9e9   : > { %v12370_v0 = vpop.f32.mrf.mxu0  ;;  %v12394_v1 = vpop.f32.mrf.mxu1  ;;  %12426 = vmatpush3.bf16.xpose.msra.mxu0 %v3913_v62  ;;  %12444 = vmatpush3.bf16.msra.mxu1 %v4103_v63 }
 0x9ea   : > { %12437 = vmatprep.subr.bf16.mxu0 %v13744_v2  ;;  %12445 = vmatprep.mubr.msk.bf16.mxu1 %vm13745_vm0, %v13744_v2 }
 0x9eb   : > { %v3595_v4 = vpop.f32.mrf.mxu0  ;;  %v14429_v5 = vpop.f32.mrf.mxu1  ;;  %12455 = vmatprep.subr.bf16.mxu1 %v13744_v2 }
 0x9ec   : > { %v3596_v6 = vadd.f32 %v11148_v34, %v3595_v4 }
 0x9ed   : > { %v12385_v7 = vpop.f32.mrf.mxu0  ;;  %v12409_v9 = vpop.f32.mrf.mxu1 }
 0x9ee   : > { %v3862_v11 = vpack.c.bf16 %v3596_v6, %v3596_v6 }
 0x9ef   : > { %v3598_v8 = vpop.f32.mrf.mxu0  ;;  %v3800_v13 = vpop.f32.mrf.mxu1 }
 0x9f0   : > { %v4005_v14 = vsel %vm2277_vm3, %v3862_v11, 0  ;;  %12428 = vmatmul.mubr.msk.bf16.vlgmr.msra.gmra.mxu0 %vm2277_vm3, %v3856_v10  ;;  %v11183_v13 = vld [vmem:[%s15550_s14 + $0x6] ss:$0 sm:$0xff] }
 0x9f1   : > { %v12386_v15 = vpop.f32.mrf.mxu0  ;;  %v12410_v16 = vpop.f32.mrf.mxu1  ;;  %12438 = vmatpush3.bf16.xpose.msra.mxu0 %v4005_v14  ;;  %12439 = vmatprep.mubr.msk.bf16.mxu0 %vm13745_vm0, %v13744_v2 }
 0x9f2   : > { %12449 = vmatprep.subr.bf16.mxu0 %v13744_v2  ;;  %v3798_v15 = vadd.f32 %v11183_v13, %v14429_v5 }
 0x9f3   : > { %v3745_v19 = vpop.f32.mrf.mxu0 }
 0x9f4   : > { %v3746_v20 = vadd.f32 %v11182_v17, %v3745_v19  ;;  %v4097_v17 = vpack.c.bf16 %v3798_v15, %v3798_v15 }
 0x9f5   : > { %v12401_v22 = vpop.f32.mrf.mxu0 }
 0x9f6   : > { %v4096_v25 = vpack.c.bf16 %v3746_v20, %v3746_v20  ;;  %v4195_v22 = vsel %vm2517_vm4, %v4097_v17, 0 }
 0x9f7   : > { %v3748_v26 = vpop.f32.mrf.mxu0 }
 0x9f8   : > { %v4149_v27 = vsel %vm2517_vm4, %v4096_v25, 0  ;;  %12440 = vmatmul.mubr.msk.bf16.vlgmr.msra.gmra.mxu0 %vm2277_vm3, %v3858_v23  ;;  %v11184_v26 = vld [vmem:[%s15550_s14 + $0x7] ss:$0 sm:$0xff]  ;;  %s15578_s14 = sld [smem:[#allocation30_spill]] }
 0x9f9   : > { %v12402_v28 = vpop.f32.mrf.mxu0  ;;  %12450 = vmatpush3.bf16.msra.mxu0 %v4149_v27  ;;  %12451 = vmatprep.mubr.msk.bf16.mxu0 %vm13745_vm0, %v13744_v2 }
 0x9fa   : > { %12461 = vmatprep.subr.bf16.mxu0 %v13744_v2 }
 0x9fb   : > { %v14444_v29 = vpop.f32.mrf.mxu0 }
 0x9fc   : > { %v3850_v28 = vadd.f32 %v11184_v26, %v14444_v29 }
 0x9fd   : > { %v12417_v30 = vpop.f32.mrf.mxu0 }
 0x9ff   : > { %v3852_v31 = vpop.f32.mrf.mxu0 }
 0xa00   : > { %v4098_v31 = vpack.c.bf16 %v3850_v28, %v3850_v28 }
 0xa01   : > { %v12418_v32 = vpop.f32.mrf.mxu0 }
 0xaa0   : > { %v3903_v33 = vpop.f32.mrf.mxu1 }
 0xaa1   : > { %v4047_v35 = vsel %vm2277_vm3, %v3903_v33, -inf }
 0xaa2   : > { %4048 = vmax.xlane.f32.xlu0 %v4047_v35  ;;  %v12423_v36 = vpop.f32.mrf.mxu1  ;;  %v4241_v35 = vsel %vm2517_vm4, %v4098_v31, 0 }
 0xaa4   : > { %v3906_v37 = vpop.f32.mrf.mxu1 }
 0xaa6   : > { %v12424_v38 = vpop.f32.mrf.mxu1 }
 0xaa7   : > { %v11205_v38 = vld [vmem:[%s15548_s19 + $0x10] sm:$0xf] }
 0xaa8   : > { %v3995_v39 = vpop.f32.mrf.mxu1 }
 0xaa9   : > { %v4053_v40 = vsel %vm2277_vm3, %v3995_v39, -inf }
 0xaaa   : > { %4054 = vmax.xlane.f32.xlu0 %v4053_v40  ;;  %v12435_v41 = vpop.f32.mrf.mxu1  ;;  %v11206_v40 = vld [vmem:[%s15548_s19 + $0x14] sm:$0xf] }
 0xaab   : > { %v4342_v41 = vsel %vm2517_vm4, %v11206_v40, 0  ;;  %v4725_v40 = vld [vmem:[%s15549_s17 + $0x50] sm:$0xff] }
 0xaac   : > { %v3998_v42 = vpop.f32.mrf.mxu1 }
 0xaad   : > { %v11207_v42 = vld [vmem:[%s15548_s19 + $0x18] sm:$0xf] }
 0xaae   : > { %v12436_v43 = vpop.f32.mrf.mxu1 }
 0xab0   : > { %v3949_v44 = vpop.f32.mrf.mxu0 }
 0xab1   : > { %v4050_v45 = vsel %vm2277_vm3, %v3949_v44, -inf }
 0xab2   : > { %4051 = vmax.xlane.f32.xlu1 %v4050_v45  ;;  %v12429_v46 = vpop.f32.mrf.mxu0  ;;  %v4388_v45 = vsel %vm2517_vm4, %v11207_v42, 0  ;;  %v4723_v42 = vld [vmem:[%s15549_s17 + $0x40] sm:$0xff] }
 0xab4   : > { %v3952_v47 = vpop.f32.mrf.mxu0 }
 0xab6   : > { %v12430_v48 = vpop.f32.mrf.mxu0 }
 0xab8   : > { %v4041_v49 = vpop.f32.mrf.mxu0 }
 0xab9   : > { %v4056_v50 = vsel %vm2277_vm3, %v4041_v49, -inf }
 0xaba   : > { %4057 = vmax.xlane.f32.xlu1 %v4056_v50  ;;  %v12441_v51 = vpop.f32.mrf.mxu0 }
 0xabc   : > { %v4044_v52 = vpop.f32.mrf.mxu0 }
 0xabe   : > { %v12442_v53 = vpop.f32.mrf.mxu0 }
 0xb2b   : > { %v4049_v54 = vpop.xlane.xlu0 %4048 }
 0xb2c   : > { %v4059_v55 = vsub.f32 %v3903_v33, %v4049_v54  ;;  %v11208_v54 = vld [vmem:[%s15548_s19 + $0x1c] sm:$0xf]  ;;  %s15580_s19 = sld [smem:[#allocation45_spill]] }
 0xb2e   : > { %v4063_v56 = vmul.f32 1.442695, %v4059_v55 }
 0xb30   : > { %13544 = vpow2.f32 %v4063_v56 }
 0xb33   : > { %v4055_v57 = vpop.xlane.xlu0 %4054 }
 0xb34   : > { %v4061_v58 = vsub.f32 %v3995_v39, %v4055_v57  ;;  %v4296_v39 = vsel %vm2517_vm4, %v11205_v38, 0  ;;  %v4434_v57 = vsel %vm2517_vm4, %v11208_v54, 0  ;;  %v4727_v38 = vld [vmem:[%s15549_s17 + $0x60] sm:$0xff]  ;;  %v13417_v54 = vld [vmem:[%s15570_s13 + $0x38] sm:$0xff]  }
 0xb36   : > { %v4067_v59 = vmul.f32 1.442695, %v4061_v58 }
 0xb38   : > { %13546 = vpow2.f32 %v4067_v59 }
 0xb3b   : > { %v4052_v60 = vpop.xlane.xlu1 %4051 }
 0xb3c   : > { %v4060_v61 = vsub.f32 %v3949_v44, %v4052_v60 }
 0xb3d   : > { %v13545_v62 = vpop.eup %13544 }
 0xb3e   : > { %v4065_v63 = vmul.f32 1.442695, %v4060_v61  ;;  %v4071_v0 = vsel %vm2277_vm3, %v13545_v62, 0.0 }
 0xb3f   : > { %4072 = vadd.xlane.f32.xlu0 %v4071_v0 }
 0xb40   : > { %13548 = vpow2.f32 %v4065_v63 }
 0xb43   : > { %v4058_v1 = vpop.xlane.xlu1 %4057 }
 0xb44   : > { %v4062_v34 = vsub.f32 %v4041_v49, %v4058_v1 }
 0xb45   : > { %v13547_v3 = vpop.eup %13546 }
 0xb46   : > { %v4069_v4 = vmul.f32 1.442695, %v4062_v34  ;;  %v4077_v6 = vsel %vm2277_vm3, %v13547_v3, 0.0  ;;  %v13410_v34 = vld [vmem:[%s15543_s30 + $0x18] sm:$0xff]  }
 0xb47   : > { %4078 = vadd.xlane.f32.xlu0 %v4077_v6  ;;  %v13413_v6 = vld [vmem:[%s15551_s12 + $0x30] sm:$0xff]  }
 0xb48   : > { %13550 = vpow2.f32 %v4069_v4  ;;  %v13412_v4 = vld [vmem:[%s15551_s12 + $0x38] sm:$0xff]  }
 0xb4d   : > { %v13549_v7 = vpop.eup %13548 }
 0xb4e   : > { %v4074_v9 = vsel %vm2277_vm3, %v13549_v7, 0.0 }
 0xb4f   : > { %4075 = vadd.xlane.f32.xlu1 %v4074_v9 }
 0xb55   : > { %v13551_v10 = vpop.eup %13550 }
 0xb56   : > { %v4080_v11 = vsel %vm2277_vm3, %v13551_v10, 0.0 }
 0xb57   : > { %4081 = vadd.xlane.f32.xlu1 %v4080_v11 }
 0xb5d   : > { %4710 = vperm.xlu0 %13355, %v4708_v12  }
 0xbc8   : > { %v4073_v8 = vpop.xlane.xlu0 %4072 }
 0xbc9   : > { %13552 = vrcp.f32 %v4073_v8 }
 0xbd0   : > { %v4079_v14 = vpop.xlane.xlu0 %4078 }
 0xbd1   : > { %13554 = vrcp.f32 %v4079_v14 }
 0xbd6   : > { %v13553_v16 = vpop.eup %13552 }
 0xbd7   : > { %v4084_v18 = vmul.f32 %v13553_v16, %v13545_v62 }
 0xbd8   : > { %v4076_v19 = vpop.xlane.xlu1 %4075 }
 0xbd9   : > { %13556 = vrcp.f32 %v4076_v19  ;;  %v4091_v20 = vpack.c.bf16 %v4084_v18, %v4084_v18 }
 0xbdb   : > { %12446 = vmatmul.mubr.msk.bf16.vlgmr.msra.gmra.mxu1 %vm2277_vm3, %v4091_v20 }
 0xbdc   : > { %12456 = vmatpush3.bf16.msra.mxu1 %v4195_v22  ;;  %12457 = vmatprep.mubr.msk.bf16.mxu1 %vm13745_vm0, %v13744_v2 }
 0xbdd   : > { %12467 = vmatprep.subr.bf16.mxu1 %v13744_v2 }
 0xbde   : > { %v13555_v23 = vpop.eup %13554 }
 0xbdf   : > { %v4088_v25 = vmul.f32 %v13555_v23, %v13547_v3  ;;  %v13411_v3 = vld [vmem:[%s15543_s30 + $0x10] sm:$0xff]   ;;  %s15589_s30 = sld [smem:[#allocation38_spill]] }
 0xbe0   : > { %v4082_v5 = vpop.xlane.xlu1 %4081 }
 0xbe1   : > { %13558 = vrcp.f32 %v4082_v5  ;;  %v4093_v27 = vpack.c.bf16 %v4088_v25, %v4088_v25 }
 0xbe3   : > { %12458 = vmatmul.mubr.msk.bf16.vlgmr.msra.gmra.mxu1 %vm2277_vm3, %v4093_v27  ;;  %v11214_v27 = vld [vmem:[%s15546_s24 + $0x1] ss:$0 sm:$0xff]  ;;  %s15585_s24 = sld [smem:[#allocation36_spill]] }
 0xbe4   : > { %12469 = vmatprep.mubr.msk.bf16.mxu1 %vm13745_vm0, %v13744_v2  ;;  %12468 = vmatpush3.bf16.msra.mxu1 %v4296_v39  ;;  %v4726_v39 = vld [vmem:[%s15549_s17 + $0x58] sm:$0xff] }
 0xbe5   : > { %12479 = vmatprep.subr.bf16.mxu1 %v13744_v2 }
 0xbe6   : > { %v13557_v30 = vpop.eup %13556 }
 0xbe7   : > { %v4086_v32 = vmul.f32 %v13557_v30, %v13549_v7 }
 0xbe9   : > { %v4092_v33 = vpack.c.bf16 %v4086_v32, %v4086_v32 }
 0xbeb   : > { %12452 = vmatmul.mubr.msk.bf16.vlgmr.msra.gmra.mxu0 %vm2277_vm3, %v4092_v33 }
 0xbec   : > { %12462 = vmatpush3.bf16.msra.mxu0 %v4241_v35  ;;  %12463 = vmatprep.mubr.msk.bf16.mxu0 %vm13745_vm0, %v13744_v2 }
 0xbed   : > { %12473 = vmatprep.subr.bf16.mxu0 %v13744_v2 }
 0xbee   : > { %v13559_v29 = vpop.eup %13558 }
 0xbef   : > { %v4090_v36 = vmul.f32 %v13559_v29, %v13551_v10  ;;  %v4730_v29 = vld [vmem:[%s15549_s17 + $0x78] sm:$0xff] }
 0xbf1   : > { %v4094_v37 = vpack.c.bf16 %v4090_v36, %v4090_v36  ;;  %v4729_v36 = vld [vmem:[%s15549_s17 + $0x70] sm:$0xff] }
 0xbf3   : > { %12464 = vmatmul.mubr.msk.bf16.vlgmr.msra.gmra.mxu0 %vm2277_vm3, %v4094_v37  ;;  %v4728_v37 = vld [vmem:[%s15549_s17 + $0x68] sm:$0xff] }
 0xbf4   : > { %12475 = vmatprep.mubr.msk.bf16.mxu0 %vm13745_vm0, %v13744_v2  ;;  %12474 = vmatpush3.bf16.msra.mxu0 %v4342_v41  ;;  %v4724_v41 = vld [vmem:[%s15549_s17 + $0x48] sm:$0xff] }
 0xbf5   : > { %12485 = vmatprep.subr.bf16.mxu0 %v13744_v2 }
 0xc9b   : > { %v4139_v43 = vpop.f32.mrf.mxu1 }
 0xc9c   : > { %v4283_v44 = vpack.c.bf16 %v4139_v43, %v4139_v43  ;;  %v4722_v43 = vld [vmem:[%s15549_s17 + $0x38] sm:$0xff] }
 0xc9d   : > { %v12447_v46 = vpop.f32.mrf.mxu1 }
 0xc9e   : > { %12470 = vmatmul.mubr.msk.bf16.vlgmr.msra.gmra.mxu1 %vm2277_vm3, %v4283_v44  ;;  %v4721_v44 = vld [vmem:[%s15549_s17 + $0x30] sm:$0xff]  ;;  %v4719_v46 = vld [vmem:[%s15549_s17 + $0x20] sm:$0xff] }
 0xc9f   : > { %v4142_v47 = vpop.f32.mrf.mxu1  ;;  %12480 = vmatpush3.bf16.msra.mxu1 %v4388_v45  ;;  %12481 = vmatprep.mubr.msk.bf16.mxu1 %vm13745_vm0, %v13744_v2  ;;  %v4720_v45 = vld [vmem:[%s15549_s17 + $0x28] sm:$0xff] }
 0xca0   : > { %12491 = vmatprep.subr.bf16.mxu1 %v13744_v2  ;;  %v4718_v47 = vld [vmem:[%s15549_s17 + $0x18] sm:$0xff] }
 0xca1   : > { %v12448_v48 = vpop.f32.mrf.mxu1 }
 0xca2   : > { %v4717_v48 = vld [vmem:[%s15549_s17 + $0x10] sm:$0xff] }
 0xca3   : > { %v4231_v49 = vpop.f32.mrf.mxu1 }
 0xca4   : > { %v4285_v50 = vpack.c.bf16 %v4231_v49, %v4231_v49  ;;  %v4716_v49 = vld [vmem:[%s15549_s17 + $0x8] sm:$0xff] }
 0xca5   : > { %v12459_v51 = vpop.f32.mrf.mxu1 }
 0xca6   : > { %12482 = vmatmul.mubr.msk.bf16.vlgmr.msra.gmra.mxu1 %vm2277_vm3, %v4285_v50  ;;  %v4711_v50 = vpop.permute.xlu0 %4710  ;;  %v4715_v51 = vld [vmem:[%s15549_s17] sm:$0xff]  ;;  %s15579_s17 = sld [smem:[#allocation33_spill]] }
 0xca7   : > { %v4234_v52 = vpop.f32.mrf.mxu1  ;;  %12495 = vmatprep.mubr.msk.bf16.mxu1 %vm13745_vm0, %v13744_v2  ;;  %12492 = vmatpush3.bf16.msra.mxu1 %v13410_v34  ;;  %vm4712_vm6 = vcmp.eq.s32.totalorder %v4711_v50, %v14084_v21  ;;  %v13419_v21 = vld [vmem:[%s15570_s13 + $0x30] sm:$0xff]  }
 0xca8   : > { %12493 = vmatprep.subr.bf16.mxu1 %v13744_v2  ;;  %v13414_v52 = vld [vmem:[%s15551_s12 + $0x28] sm:$0xff]  }
 0xca9   : > { %v12460_v53 = vpop.f32.mrf.mxu1 }
 0xcaa   : > { %v13415_v53 = vld [vmem:[%s15551_s12 + $0x20] sm:$0xff]   ;;  %s15576_s12 = sld [smem:[#allocation29_spill]] }
 0xcab   : > { %v4185_v55 = vpop.f32.mrf.mxu0  ;;  %12494 = vmatpush3.bf16.msra.mxu1 %v13411_v3 }
 0xcac   : > { %v4284_v56 = vpack.c.bf16 %v4185_v55, %v4185_v55  ;;  %12511 = vmatprep.subr.mxu1 %v13744_v2 }
 0xcad   : > { %v12453_v58 = vpop.f32.mrf.mxu0 }
 0xcae   : > { %12476 = vmatmul.mubr.msk.bf16.vlgmr.msra.gmra.mxu0 %vm2277_vm3, %v4284_v56 }
 0xcaf   : > { %v4188_v59 = vpop.f32.mrf.mxu0  ;;  %12486 = vmatpush3.bf16.msra.mxu0 %v4434_v57  ;;  %12487 = vmatprep.mubr.msk.bf16.mxu0 %vm13745_vm0, %v13744_v2 }
 0xcb0   : > { %12499 = vmatprep.subr.bf16.mxu0 %v13744_v2 }
 0xcb1   : > { %v12454_v60 = vpop.f32.mrf.mxu0 }
 0xcb2   : > { %v13416_v60 = vld [vmem:[%s15570_s13 + $0x8] sm:$0xff]  }
 0xcb3   : > { %v4277_v61 = vpop.f32.mrf.mxu0 }
 0xcb4   : > { %v4286_v62 = vpack.c.bf16 %v4277_v61, %v4277_v61 }
 0xcb5   : > { %v12465_v63 = vpop.f32.mrf.mxu0 }
 0xcb6   : > { %12488 = vmatmul.mubr.msk.bf16.vlgmr.msra.gmra.mxu0 %vm2277_vm3, %v4286_v62  ;;  %v13418_v63 = vld [vmem:[%s15570_s13] sm:$0xff]  }
 0xcb7   : > { %v4280_v0 = vpop.f32.mrf.mxu0  ;;  %12507 = vmatprep.mubr.msk.bf16.mxu0 %vm13745_vm0, %v13744_v2  ;;  %12500 = vmatpush3.bf16.msra.mxu0 %v13412_v4  ;;  %v13420_v4 = vld [vmem:[%s15570_s13 + $0x18] sm:$0xff]  }
 0xcb8   : > { %12501 = vmatprep.subr.bf16.mxu0 %v13744_v2 }
 0xcb9   : > { %v12466_v1 = vpop.f32.mrf.mxu0 }
 0xcba   : > { %v13634_v1 = vld [vmem:[%s14098_s1] ss:$0 sm:$0xff]  ;;  %s15574_s1 = sld [smem:[#allocation24_spill]] }
 0xcbb   : > { %12502 = vmatpush3.bf16.msra.mxu0 %v13413_v6  ;;  %v13421_v6 = vld [vmem:[%s15571_s3 + $0x18] sm:$0xff]  }
 0xcbc   : > { %12503 = vmatprep.subr.bf16.mxu0 %v13744_v2 }
 0xcbf   : > { %12504 = vmatpush3.bf16.msra.mxu0 %v13414_v52 }
 0xcc0   : > { %12505 = vmatprep.subr.bf16.mxu0 %v13744_v2 }
 0xcc3   : > { %12506 = vmatpush3.bf16.msra.mxu0 %v13415_v53 }
 0xcc4   : > { %12546 = vmatprep.subr.bf16.mxu0 %v13744_v2 }
 0xd5e   : > { %v4332_v7 = vpop.f32.mrf.mxu1 }
 0xd5f   : > { %v4476_v18 = vsel %vm1565_vm2, %v4332_v7, 0.0 }
 0xd60   : > { %v12471_v9 = vpop.f32.mrf.mxu1 }
 0xd61   : > { %v13422_v9 = vld [vmem:[%s15570_s13 + $0x10] sm:$0xff]  }
 0xd62   : > { %v4335_v10 = vpop.f32.mrf.mxu1 }
 0xd63   : > { %v13423_v10 = vld [vmem:[%s15571_s3 + $0x10] sm:$0xff]  }
 0xd64   : > { %v12472_v11 = vpop.f32.mrf.mxu1 }
 0xd65   : > { %v13424_v11 = vld [vmem:[%s15570_s13 + $0x28] sm:$0xff]  }
 0xd66   : > { %v4424_v12 = vpop.f32.mrf.mxu1 }
 0xd67   : > { %v4479_v23 = vsel %vm1565_vm2, %v4424_v12, 0.0  ;;  %v13425_v12 = vld [vmem:[%s15571_s3 + $0x38] sm:$0xff]  }
 0xd68   : > { %v12483_v8 = vpop.f32.mrf.mxu1 }
 0xd69   : > { %v13426_v8 = vld [vmem:[%s15570_s13 + $0x20] sm:$0xff]  }
 0xd6a   : > { %v4427_v13 = vpop.f32.mrf.mxu1 }
 0xd6b   : > { %v13427_v13 = vld [vmem:[%s15571_s3 + $0x30] sm:$0xff]  }
 0xd6c   : > { %v12484_v14 = vpop.f32.mrf.mxu1 }
 0xd6d   : > { %v13428_v14 = vld [vmem:[%s15571_s3 + $0x8] sm:$0xff]  }
 0xd6e   : > { %v4378_v15 = vpop.f32.mrf.mxu0 }
 0xd6f   : > { %v4477_v16 = vsel %vm1565_vm2, %v4378_v15, 0.0  ;;  %v13429_v15 = vld [vmem:[%s15572_s8 + $0x18] sm:$0xff]  }
 0xd70   : > { %v12477_v17 = vpop.f32.mrf.mxu0  ;;  %v4478_v19 = vadd.f32 %v4477_v16, %v4476_v18  ;;  %v13430_v16 = vld [vmem:[%s15571_s3] sm:$0xff]   ;;  %v13432_v18 = vld [vmem:[%s15571_s3 + $0x28] sm:$0xff]  }
 0xd71   : > { %v13431_v17 = vld [vmem:[%s15572_s8 + $0x10] sm:$0xff]  }
 0xd72   : > { %v4381_v20 = vpop.f32.mrf.mxu0  ;;  %v4480_v26 = vadd.f32 %v4479_v23, %v4478_v19  ;;  %v13433_v19 = vld [vmem:[%s15572_s8 + $0x38] sm:$0xff]   ;;  %v13436_v23 = vld [vmem:[%s15572_s8 + $0x8] sm:$0xff]  }
 0xd73   : > { %v13434_v20 = vld [vmem:[%s15571_s3 + $0x20] sm:$0xff]  }
 0xd74   : > { %v12478_v22 = vpop.f32.mrf.mxu0 }
 0xd75   : > { %v13435_v22 = vld [vmem:[%s15572_s8 + $0x30] sm:$0xff]  }
 0xd76   : > { %v4470_v25 = vpop.f32.mrf.mxu0 }
 0xd77   : > { %v4481_v5 = vsel %vm1565_vm2, %v4470_v25, 0.0  ;;  %v13437_v25 = vld [vmem:[%s15572_s8] sm:$0xff]  }
 0xd78   : > { %v4482_v28 = vadd.f32 %v4481_v5, %v4480_v26  ;;  %v12489_v30 = vpop.f32.mrf.mxu0  ;;  %v13438_v26 = vld [vmem:[%s15572_s8 + $0x28] sm:$0xff]   ;;  %v13439_v5 = vld [vmem:[%s15572_s8 + $0x20] sm:$0xff]  }
 0xd7a   : > { %v14514_v31 = vadd.f32 %v11214_v27, %v4482_v28  ;;  %v4473_v32 = vpop.f32.mrf.mxu0 }
 0xd7c   : > { %v4492_v33 = vpack.c.bf16 %v14514_v31, %v14514_v31  ;;  %v12490_v35 = vpop.f32.mrf.mxu0 }
 0xd7e   : > { %12496 = vmatmul.mubr.msk.bf16.vlgmr.msra.gmra.mxu1 %vm1565_vm2, %v4492_v33 }
 0xd7f   : > { %12512 = vmatpush3.msra.mxu1 %v4730_v29  ;;  %12543 = vmatprep.mubr.msk.f32.mxu1 %vm13745_vm0, %v13744_v2 }
 0xd80   : > { %12513 = vmatprep.subr.mxu1 %v13744_v2 }
 0xd81   : > { %12514 = vmatpush3.msra.mxu1 %v4729_v36 }
 0xd82   : > { %12515 = vmatprep.subr.mxu1 %v13744_v2 }
 0xd83   : > { %12516 = vmatpush3.msra.mxu1 %v4728_v37 }
 0xd84   : > { %12517 = vmatprep.subr.mxu1 %v13744_v2 }
 0xd85   : > { %12518 = vmatpush3.msra.mxu1 %v4727_v38 }
 0xd86   : > { %12519 = vmatprep.subr.mxu1 %v13744_v2 }
 0xd87   : > { %12520 = vmatpush3.msra.mxu1 %v4726_v39 }
 0xd88   : > { %12521 = vmatprep.subr.mxu1 %v13744_v2 }
 0xd89   : > { %12522 = vmatpush3.msra.mxu1 %v4725_v40 }
 0xd8a   : > { %12523 = vmatprep.subr.mxu1 %v13744_v2 }
 0xd8b   : > { %12524 = vmatpush3.msra.mxu1 %v4724_v41  ;;  %v11264_v41 = vld [vmem:[%s15573_s11 + $0x1] ss:$0 sm:$0xff] }
 0xd8c   : > { %12525 = vmatprep.subr.mxu1 %v13744_v2 }
 0xd8d   : > { %12526 = vmatpush3.msra.mxu1 %v4723_v42 }
 0xd8e   : > { %12527 = vmatprep.subr.mxu1 %v13744_v2 }
 0xd8f   : > { %12528 = vmatpush3.msra.mxu1 %v4722_v43 }
 0xd90   : > { %12529 = vmatprep.subr.mxu1 %v13744_v2 }
 0xd91   : > { %12530 = vmatpush3.msra.mxu1 %v4721_v44 }
 0xd92   : > { %12531 = vmatprep.subr.mxu1 %v13744_v2 }
 0xd93   : > { %12532 = vmatpush3.msra.mxu1 %v4720_v45 }
 0xd94   : > { %12533 = vmatprep.subr.mxu1 %v13744_v2 }
 0xd95   : > { %12534 = vmatpush3.msra.mxu1 %v4719_v46 }
 0xd96   : > { %12535 = vmatprep.subr.mxu1 %v13744_v2 }
 0xd97   : > { %12536 = vmatpush3.msra.mxu1 %v4718_v47 }
 0xd98   : > { %12537 = vmatprep.subr.mxu1 %v13744_v2 }
 0xd99   : > { %12538 = vmatpush3.msra.mxu1 %v4717_v48  ;;  %v11248_v48 = vld [vmem:[%s15574_s1 + $0x1] ss:$0 sm:$0xff] }
 0xd9a   : > { %12539 = vmatprep.subr.mxu1 %v13744_v2 }
 0xd9b   : > { %12540 = vmatpush3.msra.mxu1 %v4716_v49 }
 0xd9c   : > { %12541 = vmatprep.subr.mxu1 %v13744_v2 }
 0xd9d   : > { %12542 = vmatpush3.msra.mxu1 %v4715_v51 }
 0xd9e   : > { %12544 = vmatmul.mubr.msk.f32.vlgmr.msra.gmra.mxu1 %vm4712_vm6, %v13746_v24  ;;  %12570 = vmatprep.subr.bf16.mxu1 %v13744_v2  ;;  %v11220_v24 = vld [vmem:[%s15552_s6 + $0x1] ss:$0 sm:$0xff]  ;;  %s15575_s6 = sld [smem:[#allocation28_spill]] }
 0xd9f   : > { %12574 = vmatprep.mubr.msk.bf16.mxu1 %vm13745_vm0, %v13744_v2  ;;  %12571 = vmatpush3.bf16.msra.mxu1 %v13417_v54  ;;  %v11266_v54 = vld [vmem:[%s15573_s11 + $0x3] ss:$0 sm:$0xff] }
 0xda0   : > { %12572 = vmatprep.subr.bf16.mxu1 %v13744_v2 }
 0xda3   : > { %12573 = vmatpush3.bf16.msra.mxu1 %v13419_v21 }
 0xda4   : > { %12586 = vmatprep.subr.bf16.mxu1 %v13744_v2 }
 0xe3e   : > { %v4555_v55 = vpop.f32.mrf.mxu1 }
 0xe3f   : > { %v4556_v56 = vadd.f32 %v11220_v24, %v4555_v55 }
 0xe40   : > { %v12497_v57 = vpop.f32.mrf.mxu1 }
 0xe41   : > { %v4561_v58 = vmax.f32 %v4556_v56, 0.0 }
 0xe42   : > { %v4558_v59 = vpop.f32.mrf.mxu1 }
 0xe43   : > { %v4562_v61 = vpack.c.bf16 %v4561_v58, %v4561_v58 }
 0xe44   : > { %v12498_v62 = vpop.f32.mrf.mxu1 }
 0xe45   : > { %12508 = vmatmul.mubr.msk.bf16.vlgmr.msra.gmra.mxu0 %vm3014_vm5, %v4562_v61  ;;  %v11250_v61 = vld [vmem:[%s15574_s1 + $0x3] ss:$0 sm:$0xff] }
 0xe46   : > { %12547 = vmatpush3.bf16.msra.mxu0 %v13416_v60  ;;  %12550 = vmatprep.mubr.msk.bf16.mxu0 %vm13745_vm0, %v13744_v2 }
 0xe47   : > { %12548 = vmatprep.subr.bf16.mxu0 %v13744_v2 }
 0xe4a   : > { %12549 = vmatpush3.bf16.msra.mxu0 %v13418_v63 }
 0xe4b   : > { %12554 = vmatprep.subr.bf16.mxu0 %v13744_v2 }
 0xe5e   : > { %v4797_v0 = vpop.f32.mrf.mxu1 }
 0xe5f   : > { %v4798_v34 = vadd.f32 %v13634_v1, %v4797_v0 }
 0xe60   : > { %v12545_v3 = vpop.f32.mrf.mxu1 }
 0xe61   : > { %v14576_v7 = vpack.c.bf16 %v4798_v34, %v4798_v34  ;;  %v11263_v3 = vld [vmem:[%s15573_s11] ss:$0 sm:$0xff] }
 0xe63   : > { %12551 = vmatmul.mubr.msk.bf16.vlgmr.msra.gmra.mxu0 %vm1565_vm2, %v14576_v7  ;;  %12575 = vmatmul.mubr.msk.bf16.vlgmr.msra.gmra.mxu1 %vm1565_vm2, %v14576_v7 }
 0xe64   : > { %12555 = vmatpush3.bf16.msra.mxu0 %v13420_v4  ;;  %12587 = vmatpush3.bf16.msra.mxu1 %v13421_v6  ;;  %v11280_v4 = vld [vmem:[%s15575_s6 + $0x1] ss:$0 sm:$0xff] }
 0xe65   : > { %12556 = vmatprep.subr.bf16.mxu0 %v13744_v2  ;;  %12588 = vmatprep.subr.bf16.mxu1 %v13744_v2 }
 0xe66   : > { %12558 = vmatprep.mubr.msk.bf16.mxu0 %vm13745_vm0, %v13744_v2  ;;  %12590 = vmatprep.mubr.msk.bf16.mxu1 %vm13745_vm0, %v13744_v2 }
 0xe68   : > { %12557 = vmatpush3.bf16.msra.mxu0 %v13422_v9  ;;  %12589 = vmatpush3.bf16.msra.mxu1 %v13423_v10 }
 0xe69   : > { %12562 = vmatprep.subr.bf16.mxu0 %v13744_v2  ;;  %12602 = vmatprep.subr.bf16.mxu1 %v13744_v2 }
 0xe6b   : > { %12559 = vmatmul.mubr.msk.bf16.vlgmr.msra.gmra.mxu0 %vm1565_vm2, %v14576_v7  ;;  %12591 = vmatmul.mubr.msk.bf16.vlgmr.msra.gmra.mxu1 %vm1565_vm2, %v14576_v7 }
 0xe6c   : > { %12563 = vmatpush3.bf16.msra.mxu0 %v13424_v11  ;;  %12603 = vmatpush3.bf16.msra.mxu1 %v13425_v12 }
 0xe6d   : > { %12564 = vmatprep.subr.bf16.mxu0 %v13744_v2  ;;  %12604 = vmatprep.subr.bf16.mxu1 %v13744_v2 }
 0xe6e   : > { %12566 = vmatprep.mubr.msk.bf16.mxu0 %vm13745_vm0, %v13744_v2  ;;  %12606 = vmatprep.mubr.msk.bf16.mxu1 %vm13745_vm0, %v13744_v2 }
 0xe70   : > { %12565 = vmatpush3.bf16.msra.mxu0 %v13426_v8  ;;  %12605 = vmatpush3.bf16.msra.mxu1 %v13427_v13 }
 0xe71   : > { %12578 = vmatprep.subr.bf16.mxu0 %v13744_v2  ;;  %12618 = vmatprep.subr.bf16.mxu1 %v13744_v2 }
 0xe73   : > { %12567 = vmatmul.mubr.msk.bf16.vlgmr.msra.gmra.mxu0 %vm1565_vm2, %v14576_v7  ;;  %12607 = vmatmul.mubr.msk.bf16.vlgmr.msra.gmra.mxu1 %vm1565_vm2, %v14576_v7 }
 0xe74   : > { %12579 = vmatpush3.bf16.msra.mxu0 %v13428_v14  ;;  %12619 = vmatpush3.bf16.msra.mxu1 %v13429_v15 }
 0xe75   : > { %12580 = vmatprep.subr.bf16.mxu0 %v13744_v2  ;;  %12620 = vmatprep.subr.bf16.mxu1 %v13744_v2 }
 0xe76   : > { %12582 = vmatprep.mubr.msk.bf16.mxu0 %vm13745_vm0, %v13744_v2  ;;  %12622 = vmatprep.mubr.msk.bf16.mxu1 %vm13745_vm0, %v13744_v2 }
 0xe78   : > { %12581 = vmatpush3.bf16.msra.mxu0 %v13430_v16  ;;  %12621 = vmatpush3.bf16.msra.mxu1 %v13431_v17  ;;  %v11247_v16 = vld [vmem:[%s15574_s1] ss:$0 sm:$0xff] }
 0xe79   : > { %12594 = vmatprep.subr.bf16.mxu0 %v13744_v2  ;;  %12634 = vmatprep.subr.bf16.mxu1 %v13744_v2 }
 0xe7b   : > { %12583 = vmatmul.mubr.msk.bf16.vlgmr.msra.gmra.mxu0 %vm1565_vm2, %v14576_v7  ;;  %12623 = vmatmul.mubr.msk.bf16.vlgmr.msra.gmra.mxu1 %vm1565_vm2, %v14576_v7 }
 0xe7c   : > { %12595 = vmatpush3.bf16.msra.mxu0 %v13432_v18  ;;  %12635 = vmatpush3.bf16.msra.mxu1 %v13433_v19 }
 0xe7d   : > { %12596 = vmatprep.subr.bf16.mxu0 %v13744_v2  ;;  %12636 = vmatprep.subr.bf16.mxu1 %v13744_v2 }
 0xe7e   : > { %12598 = vmatprep.mubr.msk.bf16.mxu0 %vm13745_vm0, %v13744_v2  ;;  %12638 = vmatprep.mubr.msk.bf16.mxu1 %vm13745_vm0, %v13744_v2 }
 0xe80   : > { %12597 = vmatpush3.bf16.msra.mxu0 %v13434_v20  ;;  %12637 = vmatpush3.bf16.msra.mxu1 %v13435_v22 }
 0xe81   : > { %12610 = vmatprep.subr.bf16.mxu0 %v13744_v2  ;;  %12648 = vmatprep.subr.bf16.mxu1 %v13744_v2 }
 0xe83   : > { %12599 = vmatmul.mubr.msk.bf16.vlgmr.msra.gmra.mxu0 %vm1565_vm2, %v14576_v7  ;;  %12639 = vmatmul.mubr.msk.bf16.vlgmr.msra.gmra.mxu1 %vm1565_vm2, %v14576_v7 }
 0xe84   : > { %12611 = vmatpush3.bf16.msra.mxu0 %v13436_v23  ;;  %12614 = vmatprep.mubr.msk.bf16.mxu0 %vm13745_vm0, %v13744_v2 }
 0xe85   : > { %12612 = vmatprep.subr.bf16.mxu0 %v13744_v2  ;;  %12650 = vmatprep.mubr.msk.bf16.mxu1 %vm13745_vm0, %v13744_v2 }
 0xe88   : > { %12613 = vmatpush3.bf16.msra.mxu0 %v13437_v25  ;;  %v11265_v25 = vld [vmem:[%s15573_s11 + $0x2] ss:$0 sm:$0xff] }
 0xe89   : > { %12626 = vmatprep.subr.bf16.mxu0 %v13744_v2 }
 0xe8b   : > { %12615 = vmatmul.mubr.msk.bf16.vlgmr.msra.gmra.mxu0 %vm1565_vm2, %v14576_v7 }
 0xe8c   : > { %12627 = vmatpush3.bf16.msra.mxu0 %v13438_v26  ;;  %12630 = vmatprep.mubr.msk.bf16.mxu0 %vm13745_vm0, %v13744_v2 }
 0xe8d   : > { %12628 = vmatprep.subr.bf16.mxu0 %v13744_v2 }
 0xe90   : > { %12629 = vmatpush3.bf16.msra.mxu0 %v13439_v5 }
 0xe91   : > { %12642 = vmatprep.subr.bf16.mxu0 %v13744_v2 }
 0xe93   : > { %12631 = vmatmul.mubr.msk.bf16.vlgmr.msra.gmra.mxu0 %vm1565_vm2, %v14576_v7 }
 0xe94   : > { %12644 = vmatprep.mubr.msk.bf16.mxu0 %vm13745_vm0, %v13744_v2 }
 0xf05   : > { %v14664_v27 = vpop.f32.mrf.mxu0 }
 0xf07   : > { %v12509_v28 = vpop.f32.mrf.mxu0 }
 0xf09   : > { %v4644_v30 = vpop.f32.mrf.mxu0 }
 0xf0b   : > { %v12510_v32 = vpop.f32.mrf.mxu0 }
 0xf23   : > { %v14666_v33 = vpop.f32.mrf.mxu0  ;;  %v5051_v35 = vpop.f32.mrf.mxu1 }
 0xf24   : > { %v5052_v6 = vadd.f32 %v11250_v61, %v5051_v35  ;;  %v4896_v26 = vadd.f32 %v11247_v16, %v14666_v33 }
 0xf25   : > { %v12552_v29 = vpop.f32.mrf.mxu0  ;;  %v12576_v36 = vpop.f32.mrf.mxu1 }
 0xf26   : > { %v5564_v13 = vpack.c.bf16 %v5052_v6, %v5052_v6  ;;  %v5561_v29 = vpack.c.bf16 %v4896_v26, %v4896_v26 }
 0xf27   : > { %v4898_v37 = vpop.f32.mrf.mxu0  ;;  %v5054_v38 = vpop.f32.mrf.mxu1 }
 0xf28   : > { %v11249_v37 = vld [vmem:[%s15574_s1 + $0x2] ss:$0 sm:$0xff] }
 0xf29   : > { %v12553_v39 = vpop.f32.mrf.mxu0  ;;  %v12577_v40 = vpop.f32.mrf.mxu1 }
 0xf2b   : > { %v4947_v42 = vpop.f32.mrf.mxu0  ;;  %v5199_v43 = vpop.f32.mrf.mxu1 }
 0xf2c   : > { %v5200_v44 = vadd.f32 %v11264_v41, %v5199_v43  ;;  %v4948_v21 = vadd.f32 %v11248_v48, %v4947_v42  ;;  %v11279_v42 = vld [vmem:[%s15575_s6] ss:$0 sm:$0xff] }
 0xf2d   : > { %v12560_v45 = vpop.f32.mrf.mxu0  ;;  %v12592_v46 = vpop.f32.mrf.mxu1 }
 0xf2e   : > { %v5566_v47 = vpack.c.bf16 %v5200_v44, %v5200_v44  ;;  %v5562_v59 = vpack.c.bf16 %v4948_v21, %v4948_v21 }
 0xf2f   : > { %v4950_v49 = vpop.f32.mrf.mxu0  ;;  %v5202_v50 = vpop.f32.mrf.mxu1 }
 0xf30   : > { %v5619_v51 = vsel %vm2277_vm3, %v5566_v47, 0 }
 0xf31   : > { %v12561_v52 = vpop.f32.mrf.mxu0  ;;  %v12593_v53 = vpop.f32.mrf.mxu1  ;;  %12649 = vmatpush3.bf16.xpose.msra.mxu1 %v5619_v51 }
 0xf32   : > { %12660 = vmatprep.subr.bf16.mxu1 %v13744_v2 }
 0xf33   : > { %v4999_v24 = vpop.f32.mrf.mxu0  ;;  %v5303_v55 = vpop.f32.mrf.mxu1 }
 0xf34   : > { %v5304_v56 = vadd.f32 %v11266_v54, %v5303_v55  ;;  %v5000_v43 = vadd.f32 %v11249_v37, %v4999_v24 }
 0xf35   : > { %v12568_v57 = vpop.f32.mrf.mxu0  ;;  %v12608_v58 = vpop.f32.mrf.mxu1 }
 0xf36   : > { %v5568_v60 = vpack.c.bf16 %v5304_v56, %v5304_v56  ;;  %v5563_v47 = vpack.c.bf16 %v5000_v43, %v5000_v43 }
 0xf37   : > { %v5002_v62 = vpop.f32.mrf.mxu0  ;;  %v5306_v63 = vpop.f32.mrf.mxu1 }
 0xf38   : > { %v5711_v0 = vsel %vm2277_vm3, %v5568_v60, 0  ;;  %12651 = vmatmul.mubr.msk.bf16.vlgmr.msra.gmra.mxu1 %vm2277_vm3, %v5562_v59 }
 0xf39   : > { %v12569_v1 = vpop.f32.mrf.mxu0  ;;  %v12609_v34 = vpop.f32.mrf.mxu1  ;;  %12661 = vmatpush3.bf16.xpose.msra.mxu1 %v5711_v0  ;;  %12662 = vmatprep.mubr.msk.bf16.mxu1 %vm13745_vm0, %v13744_v2 }
 0xf3a   : > { %12672 = vmatprep.subr.bf16.mxu1 %v13744_v2 }
 0xf3b   : > { %v5147_v7 = vpop.f32.mrf.mxu0  ;;  %v5451_v9 = vpop.f32.mrf.mxu1 }
 0xf3c   : > { %v5148_v10 = vadd.f32 %v11263_v3, %v5147_v7  ;;  %v5452_v11 = vadd.f32 %v11280_v4, %v5451_v9 }
 0xf3d   : > { %v12584_v12 = vpop.f32.mrf.mxu0  ;;  %v12624_v8 = vpop.f32.mrf.mxu1 }
 0xf3e   : > { %v5565_v14 = vpack.c.bf16 %v5148_v10, %v5148_v10  ;;  %v5802_v15 = vpack.c.bf16 %v5452_v11, %v5452_v11 }
 0xf3f   : > { %v5150_v17 = vpop.f32.mrf.mxu0  ;;  %v5454_v18 = vpop.f32.mrf.mxu1 }
 0xf40   : > { %v5573_v19 = vsel %vm2277_vm3, %v5565_v14, 0  ;;  %v5855_v20 = vsel %vm2517_vm4, %v5802_v15, 0  ;;  %12663 = vmatmul.mubr.msk.bf16.vlgmr.msra.gmra.mxu1 %vm2277_vm3, %v5564_v13 }
 0xf41   : > { %v12585_v22 = vpop.f32.mrf.mxu0  ;;  %v12625_v23 = vpop.f32.mrf.mxu1  ;;  %12643 = vmatpush3.bf16.xpose.msra.mxu0 %v5573_v19  ;;  %12673 = vmatpush3.bf16.msra.mxu1 %v5855_v20 }
 0xf42   : > { %12654 = vmatprep.subr.bf16.mxu0 %v13744_v2  ;;  %12674 = vmatprep.mubr.msk.bf16.mxu1 %vm13745_vm0, %v13744_v2 }
 0xf43   : > { %v5251_v5 = vpop.f32.mrf.mxu0  ;;  %v14690_v28 = vpop.f32.mrf.mxu1  ;;  %12684 = vmatprep.subr.bf16.mxu1 %v13744_v2 }
 0xf44   : > { %v5252_v30 = vadd.f32 %v11265_v25, %v5251_v5 }
 0xf45   : > { %v12600_v32 = vpop.f32.mrf.mxu0  ;;  %v12640_v35 = vpop.f32.mrf.mxu1 }
 0xf46   : > { %v5567_v36 = vpack.c.bf16 %v5252_v30, %v5252_v30  ;;  %v11233_v32 = vld [vmem:[%s15565_s28 + $0x1] ss:$0 sm:$0xff]  ;;  %s15587_s28 = sld [smem:[#allocation39_spill]] }
 0xf47   : > { %v5254_v38 = vpop.f32.mrf.mxu0  ;;  %v5558_v39 = vpop.f32.mrf.mxu1 }
 0xf48   : > { %v5665_v33 = vsel %vm2277_vm3, %v5567_v36, 0  ;;  %12645 = vmatmul.mubr.msk.bf16.vlgmr.msra.gmra.mxu0 %vm2277_vm3, %v5561_v29  ;;  %v4642_v29 = vadd.f32 %v11233_v32, %v14664_v27 }
 0xf49   : > { %v12601_v40 = vpop.f32.mrf.mxu0  ;;  %v12641_v41 = vpop.f32.mrf.mxu1  ;;  %12655 = vmatpush3.bf16.xpose.msra.mxu0 %v5665_v33  ;;  %12656 = vmatprep.mubr.msk.bf16.mxu0 %vm13745_vm0, %v13744_v2 }
 0xf4a   : > { %12666 = vmatprep.subr.bf16.mxu0 %v13744_v2  ;;  %v4647_v39 = vadd.f32 %v4642_v29, %v14514_v31 }
 0xf4b   : > { %v5399_v44 = vpop.f32.mrf.mxu0 }
 0xf4c   : > { %v5400_v45 = vadd.f32 %v11279_v42, %v5399_v44  ;;  %v4652_v33 = vsel %vm1565_vm2, %v4647_v39, 0.0  ;;  %v11281_v42 = vld [vmem:[%s15575_s6 + $0x2] ss:$0 sm:$0xff]  ;;  %v11282_v44 = vld [vmem:[%s15575_s6 + $0x3] ss:$0 sm:$0xff] }
 0xf4d   : > { %v12616_v46 = vpop.f32.mrf.mxu0 }
 0xf4e   : > { %v5801_v48 = vpack.c.bf16 %v5400_v45, %v5400_v45 }
 0xf4f   : > { %v5402_v49 = vpop.f32.mrf.mxu0 }
 0xf50   : > { %v5809_v50 = vsel %vm2517_vm4, %v5801_v48, 0  ;;  %12657 = vmatmul.mubr.msk.bf16.vlgmr.msra.gmra.mxu0 %vm2277_vm3, %v5563_v47  ;;  %v5556_v47 = vadd.f32 %v11282_v44, %v14690_v28 }
 0xf51   : > { %v12617_v51 = vpop.f32.mrf.mxu0  ;;  %12667 = vmatpush3.bf16.msra.mxu0 %v5809_v50  ;;  %12668 = vmatprep.mubr.msk.bf16.mxu0 %vm13745_vm0, %v13744_v2 }
 0xf52   : > { %12678 = vmatprep.subr.bf16.mxu0 %v13744_v2 }
 0xf53   : > { %v14705_v52 = vpop.f32.mrf.mxu0 }
 0xf54   : > { %v5504_v27 = vadd.f32 %v11281_v42, %v14705_v52 }
 0xf55   : > { %v12632_v53 = vpop.f32.mrf.mxu0 }
 0xf56   : > { %v5803_v31 = vpack.c.bf16 %v5504_v27, %v5504_v27 }
 0xf57   : > { %v5506_v54 = vpop.f32.mrf.mxu0 }
 0xf58   : > { %v5804_v54 = vpack.c.bf16 %v5556_v47, %v5556_v47 }
 0xf59   : > { %v12633_v21 = vpop.f32.mrf.mxu0 }
 0xf5a   : > { %v5901_v21 = vsel %vm2517_vm4, %v5803_v31, 0 }
 0xff8   : > { %v5655_v24 = vpop.f32.mrf.mxu1 }
 0xff9   : > { %v5756_v34 = vsel %vm2277_vm3, %v5655_v24, -inf }
 0xffa   : > { %v12652_v55 = vpop.f32.mrf.mxu1 }
 0xffc   : > { %v5658_v56 = vpop.f32.mrf.mxu1 }
 0xffe   : > { %v12653_v57 = vpop.f32.mrf.mxu1 }
 0xfff   : > { %v5947_v57 = vsel %vm2517_vm4, %v5804_v54, 0 }
0x1000   : > { %v5747_v58 = vpop.f32.mrf.mxu1 }
0x1001   : > { %v5762_v10 = vsel %vm2277_vm3, %v5747_v58, -inf }
0x1002   : > { %v12664_v59 = vpop.f32.mrf.mxu1 }
0x1004   : > { %v5750_v60 = vpop.f32.mrf.mxu1 }
0x1006   : > { %v12665_v61 = vpop.f32.mrf.mxu1 }
0x1008   : > { %v5609_v62 = vpop.f32.mrf.mxu0 }
0x1009   : > { %v5753_v63 = vsel %vm2277_vm3, %v5609_v62, -inf }
0x100a   : > { %5754 = vmax.xlane.f32.xlu1 %v5753_v63  ;;  %v12646_v0 = vpop.f32.mrf.mxu0 }
0x100b   : > { %v5993_v0 = vld [vmem:[%s15576_s12] sm:$0xf] }
0x100c   : > { %v5612_v1 = vpop.f32.mrf.mxu0 }
0x100d   : > { %v6001_v1 = vsel %vm2517_vm4, %v5993_v0, 0 }
0x100e   : > { %5757 = vmax.xlane.f32.xlu1 %v5756_v34  ;;  %v12647_v3 = vpop.f32.mrf.mxu0  ;;  %v5994_v34 = vld [vmem:[%s15576_s12 + $0x4] sm:$0xf] }
0x100f   : > { %v6047_v3 = vsel %vm2517_vm4, %v5994_v34, 0  ;;  %v11307_v34 = vld [vmem:[%s15578_s14] ss:$0 sm:$0xff] }
0x1010   : > { %v5701_v4 = vpop.f32.mrf.mxu0 }
0x1011   : > { %v5759_v6 = vsel %vm2277_vm3, %v5701_v4, -inf }
0x1012   : > { %5760 = vmax.xlane.f32.xlu1 %v5759_v6  ;;  %v12658_v7 = vpop.f32.mrf.mxu0 }
0x1014   : > { %v5704_v9 = vpop.f32.mrf.mxu0 }
0x1016   : > { %5763 = vmax.xlane.f32.xlu1 %v5762_v10  ;;  %v12659_v11 = vpop.f32.mrf.mxu0  ;;  %v11241_v10 = vld [vmem:[%s15566_s23 + $0x1] ss:$0 sm:$0xff]  ;;  %s15582_s23 = sld [smem:[#allocation35_spill]] }
0x1093   : > { %v5755_v12 = vpop.xlane.xlu1 %5754 }
0x1094   : > { %v5765_v8 = vsub.f32 %v5609_v62, %v5755_v12  ;;  %v11242_v12 = vld [vmem:[%s15567_s5 + $0x1] ss:$0 sm:$0xff]  ;;  %s15577_s5 = sld [smem:[#allocation31_spill]] }
0x1096   : > { %v5769_v13 = vmul.f32 1.442695, %v5765_v8 }
0x1097   : > { %v5758_v14 = vpop.xlane.xlu1 %5757 }
0x1098   : > { %13560 = vpow2.f32 %v5769_v13  ;;  %v5766_v15 = vsub.f32 %v5655_v24, %v5758_v14 }
0x109a   : > { %v5771_v16 = vmul.f32 1.442695, %v5766_v15  ;;  %v5995_v15 = vld [vmem:[%s15576_s12 + $0x8] sm:$0xf]  ;;  %v13441_v44 = vld [vmem:[%s15577_s5 + $0x18] sm:$0xff]  }
0x109b   : > { %v5761_v17 = vpop.xlane.xlu1 %5760  ;;  %v13440_v27 = vld [vmem:[%s15577_s5 + $0x8] sm:$0xff]  }
0x109c   : > { %13562 = vpow2.f32 %v5771_v16  ;;  %v5767_v18 = vsub.f32 %v5701_v4, %v5761_v17 }
0x109e   : > { %v5773_v19 = vmul.f32 1.442695, %v5767_v18  ;;  %v6093_v18 = vsel %vm2517_vm4, %v5995_v15, 0  ;;  %v13448_v15 = vld [vmem:[%s15579_s17 + $0x8] sm:$0xff]  }
0x109f   : > { %v5764_v20 = vpop.xlane.xlu1 %5763 }
0x10a0   : > { %13564 = vpow2.f32 %v5773_v19  ;;  %v5768_v22 = vsub.f32 %v5747_v58, %v5764_v20  ;;  %v5996_v20 = vld [vmem:[%s15576_s12 + $0xc] sm:$0xf] }
0x10a2   : > { %v5775_v23 = vmul.f32 1.442695, %v5768_v22 }
0x10a4   : > { %13566 = vpow2.f32 %v5775_v23 }
0x10a5   : > { %v13561_v25 = vpop.eup %13560 }
0x10a6   : > { %v5777_v26 = vsel %vm2277_vm3, %v13561_v25, 0.0 }
0x10a7   : > { %5778 = vadd.xlane.f32.xlu1 %v5777_v26  ;;  %v6139_v26 = vsel %vm2517_vm4, %v5996_v20, 0 }
0x10a9   : > { %v13563_v5 = vpop.eup %13562 }
0x10aa   : > { %v5780_v30 = vsel %vm2277_vm3, %v13563_v5, 0.0 }
0x10ab   : > { %5781 = vadd.xlane.f32.xlu1 %v5780_v30 }
0x10ad   : > { %v13565_v35 = vpop.eup %13564 }
0x10ae   : > { %v5783_v36 = vsel %vm2277_vm3, %v13565_v35, 0.0 }
0x10af   : > { %5784 = vadd.xlane.f32.xlu0 %v5783_v36 }
0x10b1   : > { %v13567_v37 = vpop.eup %13566 }
0x10b2   : > { %v5786_v38 = vsel %vm2277_vm3, %v13567_v37, 0.0 }
0x10b3   : > { %5787 = vadd.xlane.f32.xlu1 %v5786_v38 }
0x10b7   : > { %4653 = vadd.xlane.f32.xlu1 %v4652_v33 }
0x1130   : > { %v5779_v40 = vpop.xlane.xlu1 %5778 }
0x1131   : > { %13568 = vrcp.f32 %v5779_v40 }
0x1134   : > { %v5782_v41 = vpop.xlane.xlu1 %5781 }
0x1135   : > { %13570 = vrcp.f32 %v5782_v41 }
0x1138   : > { %v5785_v43 = vpop.xlane.xlu0 %5784 }
0x1139   : > { %13572 = vrcp.f32 %v5785_v43 }
0x113c   : > { %v5788_v45 = vpop.xlane.xlu1 %5787 }
0x113d   : > { %13574 = vrcp.f32 %v5788_v45  ;;  %v13442_v45 = vld [vmem:[%s15577_s5] sm:$0xff]  }
0x113e   : > { %v13569_v46 = vpop.eup %13568 }
0x113f   : > { %v5790_v48 = vmul.f32 %v13569_v46, %v13561_v25  ;;  %v13443_v46 = vld [vmem:[%s15577_s5 + $0x10] sm:$0xff]  }
0x1140   : > { %v4654_v49 = vpop.xlane.xlu1 %4653 }
0x1141   : > { %v5797_v50 = vpack.c.bf16 %v5790_v48, %v5790_v48  ;;  %v4655_v51 = vmul.f32 0.03125, %v4654_v49 }
0x1142   : > { %v13571_v53 = vpop.eup %13570 }
0x1143   : > { %v5792_v24 = vmul.f32 %v13571_v53, %v13563_v5  ;;  %v4656_v55 = vsub.f32 %v4647_v39, %v4655_v51  ;;  %12669 = vmatmul.mubr.msk.bf16.vlgmr.msra.gmra.mxu0 %vm2277_vm3, %v5797_v50 }
0x1144   : > { %12679 = vmatpush3.bf16.msra.mxu0 %v5901_v21  ;;  %12680 = vmatprep.mubr.msk.bf16.mxu0 %vm13745_vm0, %v13744_v2 }
0x1145   : > { %v5798_v52 = vpack.c.bf16 %v5792_v24, %v5792_v24  ;;  %v4657_v56 = vmul.f32 %v4656_v55, %v4656_v55  ;;  %12690 = vmatprep.subr.bf16.mxu0 %v13744_v2 }
0x1146   : > { %v13573_v28 = vpop.eup %13572 }
0x1147   : > { %v5794_v58 = vmul.f32 %v13573_v28, %v13565_v35  ;;  %12675 = vmatmul.mubr.msk.bf16.vlgmr.msra.gmra.mxu1 %vm2277_vm3, %v5798_v52  ;;  %v4658_v59 = vsel %vm1565_vm2, %v4657_v56, 0.0 }
0x1148   : > { %12685 = vmatpush3.bf16.msra.mxu1 %v5947_v57  ;;  %4659 = vadd.xlane.f32.xlu1 %v4658_v59 }
0x1149   : > { %v5799_v60 = vpack.c.bf16 %v5794_v58, %v5794_v58  ;;  %12686 = vmatprep.mubr.msk.bf16.mxu1 %vm13745_vm0, %v13744_v2  ;;  %12696 = vmatprep.subr.bf16.mxu1 %v13744_v2 }
0x114a   : > { %v13575_v61 = vpop.eup %13574 }
0x114b   : > { %v5796_v62 = vmul.f32 %v13575_v61, %v13567_v37  ;;  %12681 = vmatmul.mubr.msk.bf16.vlgmr.msra.gmra.mxu0 %vm2277_vm3, %v5799_v60 }
0x114c   : > { %12692 = vmatprep.mubr.msk.bf16.mxu0 %vm13745_vm0, %v13744_v2  ;;  %12691 = vmatpush3.bf16.msra.mxu0 %v6001_v1 }
0x114d   : > { %v5800_v63 = vpack.c.bf16 %v5796_v62, %v5796_v62  ;;  %12702 = vmatprep.subr.bf16.mxu0 %v13744_v2 }
0x114f   : > { %12687 = vmatmul.mubr.msk.bf16.vlgmr.msra.gmra.mxu1 %vm2277_vm3, %v5800_v63 }
0x1150   : > { %12698 = vmatprep.mubr.msk.bf16.mxu1 %vm13745_vm0, %v13744_v2  ;;  %12697 = vmatpush3.bf16.msra.mxu1 %v6047_v3 }
0x1151   : > { %12708 = vmatprep.subr.bf16.mxu1 %v13744_v2 }
0x11d1   : > { %v4660_v4 = vpop.xlane.xlu1 %4659 }
0x11d2   : > { %v4661_v6 = vmul.f32 0.03125, %v4660_v4 }
0x11d4   : > { %v4662_v7 = vadd.f32 1e-05, %v4661_v6 }
0x11d6   : > { %13576 = vrsqrt.f32 %v4662_v7 }
0x11e3   : > { %v13577_v9 = vpop.eup %13576 }
0x11e4   : > { %v4664_v11 = vmul.f32 %v13577_v9, %v4656_v55 }
0x11e6   : > { %v4671_v8 = vmul.f32 %v11241_v10, %v4664_v11  ;;  %v13444_v10 = vld [vmem:[%s15577_s5 + $0x28] sm:$0xff]   ;;  %v13445_v11 = vld [vmem:[%s15577_s5 + $0x38] sm:$0xff]  }
0x11e8   : > { %v4678_v13 = vadd.f32 %v11242_v12, %v4671_v8 }
0x11ea   : > { %v4681_v14 = vsel %vm1565_vm2, %v4678_v13, 0.0 }
0x11eb   : > { %4682 = vadd.xlane.f32.xlu1 %v4681_v14  ;;  %v13447_v14 = vld [vmem:[%s15577_s5 + $0x30] sm:$0xff]  }
0x1203   : > { %v5845_v16 = vpop.f32.mrf.mxu0 }
0x1204   : > { %v5989_v17 = vpack.c.bf16 %v5845_v16, %v5845_v16  ;;  %v13449_v16 = vld [vmem:[%s15579_s17 + $0x18] sm:$0xff]  }
0x1205   : > { %v12670_v19 = vpop.f32.mrf.mxu0 }
0x1206   : > { %12693 = vmatmul.mubr.msk.bf16.vlgmr.msra.gmra.mxu0 %vm2277_vm3, %v5989_v17  ;;  %v13450_v17 = vld [vmem:[%s15579_s17] sm:$0xff]  }
0x1207   : > { %v5848_v22 = vpop.f32.mrf.mxu0  ;;  %v5891_v23 = vpop.f32.mrf.mxu1  ;;  %12703 = vmatpush3.bf16.msra.mxu0 %v6093_v18  ;;  %12704 = vmatprep.mubr.msk.bf16.mxu0 %vm13745_vm0, %v13744_v2  ;;  %v13451_v18 = vld [vmem:[%s15579_s17 + $0x10] sm:$0xff]  }
0x1208   : > { %v5990_v25 = vpack.c.bf16 %v5891_v23, %v5891_v23  ;;  %12714 = vmatprep.subr.bf16.mxu0 %v13744_v2 }
0x1209   : > { %v12671_v5 = vpop.f32.mrf.mxu0  ;;  %v12676_v30 = vpop.f32.mrf.mxu1 }
0x120a   : > { %12699 = vmatmul.mubr.msk.bf16.vlgmr.msra.gmra.mxu1 %vm2277_vm3, %v5990_v25  ;;  %v11243_v25 = vld [vmem:[%s15580_s19] ss:$0 sm:$0xff]  ;;  %s15584_s19 = sld [smem:[#allocation32_spill]] }
0x120b   : > { %v5894_v32 = vpop.f32.mrf.mxu1  ;;  %v5937_v35 = vpop.f32.mrf.mxu0  ;;  %12709 = vmatpush3.bf16.msra.mxu1 %v6139_v26  ;;  %12710 = vmatprep.mubr.msk.bf16.mxu1 %vm13745_vm0, %v13744_v2  ;;  %v11244_v5 = vld [vmem:[%s15581_s21] ss:$0 sm:$0xff]  ;;  %s15583_s21 = sld [smem:[#allocation34_spill]] }
0x120c   : > { %v5991_v29 = vpack.c.bf16 %v5937_v35, %v5937_v35  ;;  %12722 = vmatprep.subr.bf16.mxu1 %v13744_v2  ;;  %v13452_v35 = vld [vmem:[%s15579_s17 + $0x28] sm:$0xff]  }
0x120d   : > { %v12677_v36 = vpop.f32.mrf.mxu1  ;;  %v12682_v37 = vpop.f32.mrf.mxu0 }
0x120e   : > { %12705 = vmatmul.mubr.msk.bf16.vlgmr.msra.gmra.mxu0 %vm2277_vm3, %v5991_v29  ;;  %v13453_v29 = vld [vmem:[%s15579_s17 + $0x38] sm:$0xff]   ;;  %v13454_v37 = vld [vmem:[%s15579_s17 + $0x20] sm:$0xff]  }
0x120f   : > { %v5940_v38 = vpop.f32.mrf.mxu0  ;;  %v5983_v39 = vpop.f32.mrf.mxu1  ;;  %12718 = vmatprep.mubr.msk.bf16.mxu0 %vm13745_vm0, %v13744_v2  ;;  %12715 = vmatpush3.bf16.msra.mxu0 %v13440_v27  ;;  %v13462_v27 = vld [vmem:[%s15582_s23 + $0x20] sm:$0xff]  }
0x1210   : > { %v5992_v33 = vpack.c.bf16 %v5983_v39, %v5983_v39  ;;  %12716 = vmatprep.subr.bf16.mxu0 %v13744_v2  ;;  %v13455_v38 = vld [vmem:[%s15579_s17 + $0x30] sm:$0xff]   ;;  %v13456_v39 = vld [vmem:[%s15582_s23 + $0x8] sm:$0xff]  }
0x1211   : > { %v12683_v40 = vpop.f32.mrf.mxu0  ;;  %v12688_v41 = vpop.f32.mrf.mxu1 }
0x1212   : > { %12711 = vmatmul.mubr.msk.bf16.vlgmr.msra.gmra.mxu1 %vm2277_vm3, %v5992_v33  ;;  %v13457_v33 = vld [vmem:[%s15582_s23 + $0x18] sm:$0xff]   ;;  %v13458_v40 = vld [vmem:[%s15582_s23] sm:$0xff]   ;;  %v13459_v41 = vld [vmem:[%s15582_s23 + $0x10] sm:$0xff]  }
0x1213   : > { %v5986_v42 = vpop.f32.mrf.mxu1  ;;  %12726 = vmatprep.mubr.msk.bf16.mxu1 %vm13745_vm0, %v13744_v2  ;;  %12723 = vmatpush3.bf16.msra.mxu1 %v13441_v44  ;;  %v13463_v44 = vld [vmem:[%s15582_s23 + $0x30] sm:$0xff]  }
0x1214   : > { %12724 = vmatprep.subr.bf16.mxu1 %v13744_v2  ;;  %12717 = vmatpush3.bf16.msra.mxu0 %v13442_v45  ;;  %v13460_v42 = vld [vmem:[%s15582_s23 + $0x28] sm:$0xff]  }
0x1215   : > { %v12689_v43 = vpop.f32.mrf.mxu1  ;;  %12730 = vmatprep.subr.bf16.mxu0 %v13744_v2 }
0x1216   : > { %v13461_v43 = vld [vmem:[%s15582_s23 + $0x38] sm:$0xff]  }
0x1217   : > { %12725 = vmatpush3.bf16.msra.mxu1 %v13443_v46 }
0x1218   : > { %12738 = vmatprep.subr.bf16.mxu1 %v13744_v2 }
0x1274   : > { %v4683_v47 = vpop.xlane.xlu1 %4682 }
0x1275   : > { %v4684_v31 = vmul.f32 0.03125, %v4683_v47 }
0x1277   : > { %v14775_v48 = vsub.f32 %v4678_v13, %v4684_v31  ;;  %v13446_v13 = vld [vmem:[%s15577_s5 + $0x20] sm:$0xff]  }
0x1279   : > { %v4686_v49 = vmul.f32 %v14775_v48, %v14775_v48 }
0x127b   : > { %v4687_v50 = vsel %vm1565_vm2, %v4686_v49, 0.0 }
0x127c   : > { %4688 = vadd.xlane.f32.xlu1 %v4687_v50 }
0x12c6   : > { %v6037_v51 = vpop.f32.mrf.mxu0 }
0x12c7   : > { %v6181_v57 = vsel %vm1565_vm2, %v6037_v51, 0.0 }
0x12c8   : > { %v12694_v53 = vpop.f32.mrf.mxu0 }
0x12ca   : > { %v6040_v54 = vpop.f32.mrf.mxu0  ;;  %v6083_v21 = vpop.f32.mrf.mxu1 }
0x12cb   : > { %v6182_v52 = vsel %vm1565_vm2, %v6083_v21, 0.0 }
0x12cc   : > { %v12695_v24 = vpop.f32.mrf.mxu0  ;;  %v12700_v55 = vpop.f32.mrf.mxu1  ;;  %v6183_v59 = vadd.f32 %v6182_v52, %v6181_v57  ;;  %v11324_v57 = vld [vmem:[%s15583_s21] ss:$0 sm:$0xff] }
0x12ce   : > { %v6086_v56 = vpop.f32.mrf.mxu1  ;;  %v6129_v28 = vpop.f32.mrf.mxu0 }
0x12cf   : > { %v6184_v58 = vsel %vm1565_vm2, %v6129_v28, 0.0 }
0x12d0   : > { %v12701_v60 = vpop.f32.mrf.mxu1  ;;  %v12706_v61 = vpop.f32.mrf.mxu0  ;;  %v6185_v62 = vadd.f32 %v6184_v58, %v6183_v59  ;;  %v11325_v58 = vld [vmem:[%s15583_s21 + $0x1] ss:$0 sm:$0xff] }
0x12d2   : > { %v6132_v63 = vpop.f32.mrf.mxu0  ;;  %v6175_v0 = vpop.f32.mrf.mxu1 }
0x12d3   : > { %v6186_v1 = vsel %vm1565_vm2, %v6175_v0, 0.0 }
0x12d4   : > { %v6187_v3 = vadd.f32 %v6186_v1, %v6185_v62  ;;  %v12707_v4 = vpop.f32.mrf.mxu0  ;;  %v12712_v6 = vpop.f32.mrf.mxu1 }
0x12d5   : > { %v11309_v4 = vld [vmem:[%s15584_s19 + $0x1] ss:$0 sm:$0xff] }
0x12d6   : > { %v6195_v7 = vadd.f32 %v11307_v34, %v6187_v3  ;;  %v6178_v9 = vpop.f32.mrf.mxu1  ;;  %v11308_v3 = vld [vmem:[%s15584_s19] ss:$0 sm:$0xff] }
0x12d8   : > { %v6196_v12 = vpack.c.bf16 %v6195_v7, %v6195_v7  ;;  %v12713_v8 = vpop.f32.mrf.mxu1 }
0x12d9   : > { %v11326_v8 = vld [vmem:[%s15583_s21 + $0x2] ss:$0 sm:$0xff] }
0x12da   : > { %12719 = vmatmul.mubr.msk.bf16.vlgmr.msra.gmra.mxu0 %vm1565_vm2, %v6196_v12  ;;  %12727 = vmatmul.mubr.msk.bf16.vlgmr.msra.gmra.mxu1 %vm1565_vm2, %v6196_v12 }
0x12db   : > { %12731 = vmatpush3.bf16.msra.mxu0 %v13444_v10  ;;  %12739 = vmatpush3.bf16.msra.mxu1 %v13445_v11 }
0x12dc   : > { %12732 = vmatprep.subr.bf16.mxu0 %v13744_v2  ;;  %12740 = vmatprep.subr.bf16.mxu1 %v13744_v2 }
0x12dd   : > { %12734 = vmatprep.mubr.msk.bf16.mxu0 %vm13745_vm0, %v13744_v2  ;;  %12742 = vmatprep.mubr.msk.bf16.mxu1 %vm13745_vm0, %v13744_v2 }
0x12df   : > { %12733 = vmatpush3.bf16.msra.mxu0 %v13446_v13  ;;  %12741 = vmatpush3.bf16.msra.mxu1 %v13447_v14  ;;  %v11327_v13 = vld [vmem:[%s15583_s21 + $0x3] ss:$0 sm:$0xff] }
0x12e0   : > { %12746 = vmatprep.subr.bf16.mxu0 %v13744_v2  ;;  %12754 = vmatprep.subr.bf16.mxu1 %v13744_v2 }
0x12e2   : > { %12735 = vmatmul.mubr.msk.bf16.vlgmr.msra.gmra.mxu0 %vm1565_vm2, %v6196_v12  ;;  %12743 = vmatmul.mubr.msk.bf16.vlgmr.msra.gmra.mxu1 %vm1565_vm2, %v6196_v12 }
0x12e3   : > { %12747 = vmatpush3.bf16.msra.mxu0 %v13448_v15  ;;  %12755 = vmatpush3.bf16.msra.mxu1 %v13449_v16 }
0x12e4   : > { %12748 = vmatprep.subr.bf16.mxu0 %v13744_v2  ;;  %12756 = vmatprep.subr.bf16.mxu1 %v13744_v2 }
0x12e5   : > { %12750 = vmatprep.mubr.msk.bf16.mxu0 %vm13745_vm0, %v13744_v2  ;;  %12758 = vmatprep.mubr.msk.bf16.mxu1 %vm13745_vm0, %v13744_v2 }
0x12e7   : > { %12749 = vmatpush3.bf16.msra.mxu0 %v13450_v17  ;;  %12757 = vmatpush3.bf16.msra.mxu1 %v13451_v18 }
0x12e8   : > { %12762 = vmatprep.subr.bf16.mxu0 %v13744_v2  ;;  %12770 = vmatprep.subr.bf16.mxu1 %v13744_v2 }
0x1305   : > { %v4689_v19 = vpop.xlane.xlu1 %4688 }
0x1306   : > { %v4690_v20 = vmul.f32 0.03125, %v4689_v19 }
0x1308   : > { %v4691_v22 = vadd.f32 1e-05, %v4690_v20 }
0x130a   : > { %13578 = vrsqrt.f32 %v4691_v22 }
0x1317   : > { %v13579_v23 = vpop.eup %13578 }
0x1318   : > { %v4693_v26 = vmul.f32 %v13579_v23, %v14775_v48 }
0x131a   : > { %v4700_v30 = vmul.f32 %v11243_v25, %v4693_v26 }
0x131c   : > { %v4707_v32 = vadd.f32 %v11244_v5, %v4700_v30  ;;  %v11310_v30 = vld [vmem:[%s15584_s19 + $0x2] ss:$0 sm:$0xff] }
0x131e   : > { %v14818_v36 = vpack.c.bf16 %v4707_v32, %v4707_v32  ;;  %v11311_v32 = vld [vmem:[%s15584_s19 + $0x3] ss:$0 sm:$0xff] }
0x1320   : > { %12751 = vmatmul.mubr.msk.bf16.vlgmr.msra.gmra.mxu0 %vm1565_vm2, %v14818_v36  ;;  %12759 = vmatmul.mubr.msk.bf16.vlgmr.msra.gmra.mxu1 %vm1565_vm2, %v14818_v36 }
0x1321   : > { %12763 = vmatpush3.bf16.msra.mxu0 %v13452_v35  ;;  %12771 = vmatpush3.bf16.msra.mxu1 %v13453_v29 }
0x1322   : > { %12764 = vmatprep.subr.bf16.mxu0 %v13744_v2  ;;  %12772 = vmatprep.subr.bf16.mxu1 %v13744_v2 }
0x1323   : > { %12766 = vmatprep.mubr.msk.bf16.mxu0 %vm13745_vm0, %v13744_v2  ;;  %12774 = vmatprep.mubr.msk.bf16.mxu1 %vm13745_vm0, %v13744_v2 }
0x1325   : > { %12765 = vmatpush3.bf16.msra.mxu0 %v13454_v37  ;;  %12773 = vmatpush3.bf16.msra.mxu1 %v13455_v38 }
0x1326   : > { %12778 = vmatprep.subr.bf16.mxu0 %v13744_v2  ;;  %12786 = vmatprep.subr.bf16.mxu1 %v13744_v2 }
0x1328   : > { %12767 = vmatmul.mubr.msk.bf16.vlgmr.msra.gmra.mxu0 %vm1565_vm2, %v14818_v36  ;;  %12775 = vmatmul.mubr.msk.bf16.vlgmr.msra.gmra.mxu1 %vm1565_vm2, %v14818_v36 }
0x1329   : > { %12779 = vmatpush3.bf16.msra.mxu0 %v13456_v39  ;;  %12787 = vmatpush3.bf16.msra.mxu1 %v13457_v33 }
0x132a   : > { %12780 = vmatprep.subr.bf16.mxu0 %v13744_v2  ;;  %12788 = vmatprep.subr.bf16.mxu1 %v13744_v2 }
0x132b   : > { %12782 = vmatprep.mubr.msk.bf16.mxu0 %vm13745_vm0, %v13744_v2  ;;  %12790 = vmatprep.mubr.msk.bf16.mxu1 %vm13745_vm0, %v13744_v2 }
0x132d   : > { %12781 = vmatpush3.bf16.msra.mxu0 %v13458_v40  ;;  %12789 = vmatpush3.bf16.msra.mxu1 %v13459_v41  ;;  %v11340_v40 = vld [vmem:[%s15585_s24] ss:$0 sm:$0xff]  ;;  %v11341_v41 = vld [vmem:[%s15585_s24 + $0x1] ss:$0 sm:$0xff] }
0x132e   : > { %12794 = vmatprep.subr.bf16.mxu0 %v13744_v2  ;;  %12802 = vmatprep.subr.bf16.mxu1 %v13744_v2 }
0x1330   : > { %12783 = vmatmul.mubr.msk.bf16.vlgmr.msra.gmra.mxu0 %vm1565_vm2, %v14818_v36  ;;  %12791 = vmatmul.mubr.msk.bf16.vlgmr.msra.gmra.mxu1 %vm1565_vm2, %v14818_v36 }
0x1331   : > { %12795 = vmatpush3.bf16.msra.mxu0 %v13460_v42  ;;  %12803 = vmatpush3.bf16.msra.mxu1 %v13461_v43 }
0x1332   : > { %12796 = vmatprep.subr.bf16.mxu0 %v13744_v2  ;;  %12804 = vmatprep.subr.bf16.mxu1 %v13744_v2 }
0x1333   : > { %12798 = vmatprep.mubr.msk.bf16.mxu0 %vm13745_vm0, %v13744_v2  ;;  %12806 = vmatprep.mubr.msk.bf16.mxu1 %vm13745_vm0, %v13744_v2 }
0x1335   : > { %12797 = vmatpush3.bf16.msra.mxu0 %v13462_v27  ;;  %12805 = vmatpush3.bf16.msra.mxu1 %v13463_v44 }
0x1336   : > { %12810 = vmatprep.subr.bf16.mxu0 %v13744_v2  ;;  %12816 = vmatprep.subr.bf16.mxu1 %v13744_v2 }
0x1338   : > { %12799 = vmatmul.mubr.msk.bf16.vlgmr.msra.gmra.mxu0 %vm1565_vm2, %v14818_v36  ;;  %12807 = vmatmul.mubr.msk.bf16.vlgmr.msra.gmra.mxu1 %vm1565_vm2, %v14818_v36 }
0x1339   : > { %12812 = vmatprep.mubr.msk.bf16.mxu0 %vm13745_vm0, %v13744_v2  ;;  %12818 = vmatprep.mubr.msk.bf16.mxu1 %vm13745_vm0, %v13744_v2 }
0x139a   : > { %v6291_v45 = vpop.f32.mrf.mxu0  ;;  %v6343_v46 = vpop.f32.mrf.mxu1 }
0x139b   : > { %v6292_v14 = vadd.f32 %v11308_v3, %v6291_v45  ;;  %v6344_v15 = vadd.f32 %v11309_v4, %v6343_v46 }
0x139c   : > { %v12720_v47 = vpop.f32.mrf.mxu0  ;;  %v12728_v31 = vpop.f32.mrf.mxu1 }
0x139d   : > { %v6960_v23 = vpack.c.bf16 %v6292_v14, %v6292_v14  ;;  %v6961_v25 = vpack.c.bf16 %v6344_v15, %v6344_v15 }
0x139e   : > { %v6294_v48 = vpop.f32.mrf.mxu0  ;;  %v6346_v49 = vpop.f32.mrf.mxu1 }
0x13a0   : > { %v12721_v50 = vpop.f32.mrf.mxu0  ;;  %v12729_v51 = vpop.f32.mrf.mxu1 }
0x13a2   : > { %v6395_v53 = vpop.f32.mrf.mxu0  ;;  %v6447_v54 = vpop.f32.mrf.mxu1 }
0x13a3   : > { %v6396_v42 = vadd.f32 %v11310_v30, %v6395_v53  ;;  %v6448_v43 = vadd.f32 %v11311_v32, %v6447_v54 }
0x13a4   : > { %v12736_v21 = vpop.f32.mrf.mxu0  ;;  %v12744_v24 = vpop.f32.mrf.mxu1 }
0x13a5   : > { %v6962_v48 = vpack.c.bf16 %v6396_v42, %v6396_v42  ;;  %v6963_v49 = vpack.c.bf16 %v6448_v43, %v6448_v43 }
0x13a6   : > { %v6398_v55 = vpop.f32.mrf.mxu0  ;;  %v6450_v52 = vpop.f32.mrf.mxu1 }
0x13a8   : > { %v12737_v56 = vpop.f32.mrf.mxu0  ;;  %v12745_v28 = vpop.f32.mrf.mxu1 }
0x13e0   : > { %v6546_v59 = vpop.f32.mrf.mxu0  ;;  %v6598_v60 = vpop.f32.mrf.mxu1 }
0x13e1   : > { %v6547_v61 = vadd.f32 %v11324_v57, %v6546_v59  ;;  %v6599_v62 = vadd.f32 %v11325_v58, %v6598_v60 }
0x13e2   : > { %v12752_v63 = vpop.f32.mrf.mxu0  ;;  %v12760_v0 = vpop.f32.mrf.mxu1 }
0x13e3   : > { %v6964_v1 = vpack.c.bf16 %v6547_v61, %v6547_v61  ;;  %v6965_v34 = vpack.c.bf16 %v6599_v62, %v6599_v62 }
0x13e4   : > { %v6549_v6 = vpop.f32.mrf.mxu0  ;;  %v6601_v7 = vpop.f32.mrf.mxu1 }
0x13e5   : > { %v6972_v9 = vsel %vm2277_vm3, %v6964_v1, 0  ;;  %v7018_v10 = vsel %vm2277_vm3, %v6965_v34, 0 }
0x13e6   : > { %v12753_v11 = vpop.f32.mrf.mxu0  ;;  %v12761_v12 = vpop.f32.mrf.mxu1  ;;  %12811 = vmatpush3.bf16.xpose.msra.mxu0 %v6972_v9  ;;  %12817 = vmatpush3.bf16.xpose.msra.mxu1 %v7018_v10 }
0x13e7   : > { %12822 = vmatprep.subr.bf16.mxu0 %v13744_v2  ;;  %12828 = vmatprep.subr.bf16.mxu1 %v13744_v2 }
0x13e8   : > { %v6650_v16 = vpop.f32.mrf.mxu0  ;;  %v6702_v17 = vpop.f32.mrf.mxu1 }
0x13e9   : > { %v6651_v18 = vadd.f32 %v11326_v8, %v6650_v16  ;;  %v6703_v19 = vadd.f32 %v11327_v13, %v6702_v17 }
0x13ea   : > { %v12768_v20 = vpop.f32.mrf.mxu0  ;;  %v12776_v22 = vpop.f32.mrf.mxu1 }
0x13eb   : > { %v6966_v26 = vpack.c.bf16 %v6651_v18, %v6651_v18  ;;  %v6967_v5 = vpack.c.bf16 %v6703_v19, %v6703_v19 }
0x13ec   : > { %v6653_v35 = vpop.f32.mrf.mxu0  ;;  %v6705_v29 = vpop.f32.mrf.mxu1 }
0x13ed   : > { %v7064_v37 = vsel %vm2277_vm3, %v6966_v26, 0  ;;  %v7110_v38 = vsel %vm2277_vm3, %v6967_v5, 0  ;;  %12813 = vmatmul.mubr.msk.bf16.vlgmr.msra.gmra.mxu0 %vm2277_vm3, %v6960_v23  ;;  %12819 = vmatmul.mubr.msk.bf16.vlgmr.msra.gmra.mxu1 %vm2277_vm3, %v6961_v25 }
0x13ee   : > { %v12769_v39 = vpop.f32.mrf.mxu0  ;;  %v12777_v33 = vpop.f32.mrf.mxu1  ;;  %12823 = vmatpush3.bf16.xpose.msra.mxu0 %v7064_v37  ;;  %12829 = vmatpush3.bf16.xpose.msra.mxu1 %v7110_v38 }
0x13ef   : > { %12824 = vmatprep.mubr.msk.bf16.mxu0 %vm13745_vm0, %v13744_v2  ;;  %12830 = vmatprep.mubr.msk.bf16.mxu1 %vm13745_vm0, %v13744_v2 }
0x13f0   : > { %v6798_v27 = vpop.f32.mrf.mxu0  ;;  %v6850_v44 = vpop.f32.mrf.mxu1  ;;  %12834 = vmatprep.subr.bf16.mxu0 %v13744_v2  ;;  %12840 = vmatprep.subr.bf16.mxu1 %v13744_v2 }
0x13f1   : > { %v6799_v45 = vadd.f32 %v11340_v40, %v6798_v27  ;;  %v6851_v46 = vadd.f32 %v11341_v41, %v6850_v44 }
0x13f2   : > { %v12784_v47 = vpop.f32.mrf.mxu0  ;;  %v12792_v31 = vpop.f32.mrf.mxu1 }
0x13f3   : > { %v7200_v50 = vpack.c.bf16 %v6799_v45, %v6799_v45  ;;  %v7201_v51 = vpack.c.bf16 %v6851_v46, %v6851_v46  ;;  %v11342_v47 = vld [vmem:[%s15585_s24 + $0x2] ss:$0 sm:$0xff] }
0x13f4   : > { %v6801_v53 = vpop.f32.mrf.mxu0  ;;  %v6853_v54 = vpop.f32.mrf.mxu1 }
0x13f5   : > { %v7208_v21 = vsel %vm2517_vm4, %v7200_v50, 0  ;;  %v7254_v24 = vsel %vm2517_vm4, %v7201_v51, 0  ;;  %12825 = vmatmul.mubr.msk.bf16.vlgmr.msra.gmra.mxu0 %vm2277_vm3, %v6962_v48  ;;  %12831 = vmatmul.mubr.msk.bf16.vlgmr.msra.gmra.mxu1 %vm2277_vm3, %v6963_v49  ;;  %v11343_v50 = vld [vmem:[%s15585_s24 + $0x3] ss:$0 sm:$0xff] }
0x13f6   : > { %v12785_v55 = vpop.f32.mrf.mxu0  ;;  %v12793_v52 = vpop.f32.mrf.mxu1  ;;  %12835 = vmatpush3.bf16.msra.mxu0 %v7208_v21  ;;  %12841 = vmatpush3.bf16.msra.mxu1 %v7254_v24 }
0x13f7   : > { %12836 = vmatprep.mubr.msk.bf16.mxu0 %vm13745_vm0, %v13744_v2  ;;  %12846 = vmatprep.subr.bf16.mxu0 %v13744_v2 }
0x13f8   : > { %v14905_v56 = vpop.f32.mrf.mxu0  ;;  %v14907_v28 = vpop.f32.mrf.mxu1  ;;  %12842 = vmatprep.mubr.msk.bf16.mxu1 %vm13745_vm0, %v13744_v2  ;;  %12852 = vmatprep.subr.bf16.mxu1 %v13744_v2 }
0x13f9   : > { %v6903_v49 = vadd.f32 %v11342_v47, %v14905_v56  ;;  %v6955_v54 = vadd.f32 %v11343_v50, %v14907_v28 }
0x13fa   : > { %v12800_v57 = vpop.f32.mrf.mxu0  ;;  %v12808_v58 = vpop.f32.mrf.mxu1 }
0x13fb   : > { %v7202_v53 = vpack.c.bf16 %v6903_v49, %v6903_v49  ;;  %v7203_v57 = vpack.c.bf16 %v6955_v54, %v6955_v54 }
0x13fc   : > { %v6905_v59 = vpop.f32.mrf.mxu0  ;;  %v6957_v60 = vpop.f32.mrf.mxu1 }
0x13fd   : > { %v7300_v52 = vsel %vm2517_vm4, %v7202_v53, 0  ;;  %v7346_v28 = vsel %vm2517_vm4, %v7203_v57, 0 }
0x13fe   : > { %v12801_v61 = vpop.f32.mrf.mxu0  ;;  %v12809_v62 = vpop.f32.mrf.mxu1 }
0x13ff   : > { %v7392_v61 = vld [vmem:[%s15586_s25] sm:$0xf] }
0x14ad   : > { %v7008_v63 = vpop.f32.mrf.mxu0  ;;  %v7054_v0 = vpop.f32.mrf.mxu1 }
0x14ae   : > { %v7152_v1 = vsel %vm2277_vm3, %v7008_v63, -inf  ;;  %v7155_v7 = vsel %vm2277_vm3, %v7054_v0, -inf }
0x14af   : > { %v12820_v34 = vpop.f32.mrf.mxu1  ;;  %7153 = vmax.xlane.f32.xlu1 %v7152_v1  ;;  %v12814_v3 = vpop.f32.mrf.mxu0  ;;  %v7400_v1 = vsel %vm2517_vm4, %v7392_v61, 0  ;;  %v13468_v61 = vld [vmem:[%s15588_s29 + $0x8] sm:$0xff]  }
0x14b0   : > { %v7393_v3 = vld [vmem:[%s15586_s25 + $0x4] sm:$0xf] }
0x14b1   : > { %v7011_v4 = vpop.f32.mrf.mxu0  ;;  %v7057_v6 = vpop.f32.mrf.mxu1 }
0x14b2   : > { %v7446_v4 = vsel %vm2517_vm4, %v7393_v3, 0  ;;  %v7394_v6 = vld [vmem:[%s15586_s25 + $0x8] sm:$0xf] }
0x14b3   : > { %v12821_v9 = vpop.f32.mrf.mxu1  ;;  %7156 = vmax.xlane.f32.xlu1 %v7155_v7  ;;  %v12815_v10 = vpop.f32.mrf.mxu0 }
0x14b4   : > { %v7492_v10 = vsel %vm2517_vm4, %v7394_v6, 0 }
0x14b5   : > { %v7100_v11 = vpop.f32.mrf.mxu0  ;;  %v7146_v12 = vpop.f32.mrf.mxu1 }
0x14b6   : > { %v7161_v8 = vsel %vm2277_vm3, %v7146_v12, -inf  ;;  %v7158_v13 = vsel %vm2277_vm3, %v7100_v11, -inf }
0x14b7   : > { %v12832_v14 = vpop.f32.mrf.mxu1  ;;  %7162 = vmax.xlane.f32.xlu1 %v7161_v8  ;;  %7159 = vmax.xlane.f32.xlu0 %v7158_v13  ;;  %v12826_v15 = vpop.f32.mrf.mxu0 }
0x14b9   : > { %v7103_v16 = vpop.f32.mrf.mxu0  ;;  %v7149_v17 = vpop.f32.mrf.mxu1 }
0x14bb   : > { %v12827_v18 = vpop.f32.mrf.mxu0  ;;  %v12833_v19 = vpop.f32.mrf.mxu1 }
0x1538   : > { %v7154_v20 = vpop.xlane.xlu1 %7153 }
0x1539   : > { %v7164_v22 = vsub.f32 %v7008_v63, %v7154_v20 }
0x153b   : > { %v7168_v23 = vmul.f32 1.442695, %v7164_v22 }
0x153c   : > { %v7157_v25 = vpop.xlane.xlu1 %7156 }
0x153d   : > { %13580 = vpow2.f32 %v7168_v23  ;;  %v7165_v26 = vsub.f32 %v7054_v0, %v7157_v25 }
0x153f   : > { %v7170_v5 = vmul.f32 1.442695, %v7165_v26 }
0x1540   : > { %v7163_v30 = vpop.xlane.xlu1 %7162  ;;  %v7160_v32 = vpop.xlane.xlu0 %7159 }
0x1541   : > { %13582 = vpow2.f32 %v7170_v5  ;;  %v7167_v35 = vsub.f32 %v7146_v12, %v7163_v30  ;;  %v7166_v29 = vsub.f32 %v7100_v11, %v7160_v32  ;;  %v7395_v12 = vld [vmem:[%s15586_s25 + $0xc] sm:$0xf] }
0x1542   : > { %v7538_v15 = vsel %vm2517_vm4, %v7395_v12, 0 }
0x1543   : > { %v7174_v37 = vmul.f32 1.442695, %v7167_v35  ;;  %v7172_v38 = vmul.f32 1.442695, %v7166_v29 }
0x1545   : > { %13584 = vpow2.f32 %v7174_v37  ;;  %v13464_v37 = vld [vmem:[%s15587_s28 + $0x8] sm:$0xff]  }
0x1546   : > { %13586 = vpow2.f32 %v7172_v38  ;;  %v13465_v38 = vld [vmem:[%s15587_s28] sm:$0xff]  }
0x154a   : > { %v13581_v39 = vpop.eup %13580 }
0x154b   : > { %v7176_v33 = vsel %vm2277_vm3, %v13581_v39, 0.0 }
0x154c   : > { %7177 = vadd.xlane.f32.xlu0 %v7176_v33  ;;  %v13467_v33 = vld [vmem:[%s15588_s29 + $0x10] sm:$0xff]  }
0x154e   : > { %v13583_v40 = vpop.eup %13582 }
0x154f   : > { %v7179_v41 = vsel %vm2277_vm3, %v13583_v40, 0.0 }
0x1550   : > { %7180 = vadd.xlane.f32.xlu1 %v7179_v41 }
0x1552   : > { %v13585_v42 = vpop.eup %13584 }
0x1553   : > { %v13587_v43 = vpop.eup %13586  ;;  %v7185_v27 = vsel %vm2277_vm3, %v13585_v42, 0.0 }
0x1554   : > { %7186 = vadd.xlane.f32.xlu1 %v7185_v27  ;;  %v7182_v44 = vsel %vm2277_vm3, %v13587_v43, 0.0 }
0x1555   : > { %7183 = vadd.xlane.f32.xlu0 %v7182_v44 }
0x15d5   : > { %v7178_v45 = vpop.xlane.xlu0 %7177 }
0x15d6   : > { %13588 = vrcp.f32 %v7178_v45 }
0x15d9   : > { %v7181_v46 = vpop.xlane.xlu1 %7180 }
0x15da   : > { %13590 = vrcp.f32 %v7181_v46 }
0x15dd   : > { %v7187_v31 = vpop.xlane.xlu1 %7186 }
0x15de   : > { %13592 = vrcp.f32 %v7187_v31  ;;  %v7184_v48 = vpop.xlane.xlu0 %7183 }
0x15df   : > { %13594 = vrcp.f32 %v7184_v48 }
0x15e3   : > { %v13589_v51 = vpop.eup %13588 }
0x15e4   : > { %v7189_v21 = vmul.f32 %v13589_v51, %v13581_v39  ;;  %v13466_v39 = vld [vmem:[%s15588_s29 + $0x18] sm:$0xff]  }
0x15e6   : > { %v7196_v24 = vpack.c.bf16 %v7189_v21, %v7189_v21 }
0x15e7   : > { %v13591_v55 = vpop.eup %13590 }
0x15e8   : > { %v7191_v58 = vmul.f32 %v13591_v55, %v13583_v40  ;;  %12837 = vmatmul.mubr.msk.bf16.vlgmr.msra.gmra.mxu0 %vm2277_vm3, %v7196_v24  ;;  %v11368_v55 = vld [vmem:[%s15589_s30] ss:$0 sm:$0xff] }
0x15e9   : > { %12847 = vmatpush3.bf16.msra.mxu0 %v7300_v52  ;;  %12848 = vmatprep.mubr.msk.bf16.mxu0 %vm13745_vm0, %v13744_v2 }
0x15ea   : > { %v7197_v56 = vpack.c.bf16 %v7191_v58, %v7191_v58  ;;  %12858 = vmatprep.subr.bf16.mxu0 %v13744_v2 }
0x15eb   : > { %v13593_v59 = vpop.eup %13592 }
0x15ec   : > { %v13595_v60 = vpop.eup %13594  ;;  %12843 = vmatmul.mubr.msk.bf16.vlgmr.msra.gmra.mxu1 %vm2277_vm3, %v7197_v56  ;;  %v7195_v63 = vmul.f32 %v13593_v59, %v13585_v42 }
0x15ed   : > { %v7193_v62 = vmul.f32 %v13595_v60, %v13587_v43  ;;  %12853 = vmatpush3.bf16.msra.mxu1 %v7346_v28  ;;  %12854 = vmatprep.mubr.msk.bf16.mxu1 %vm13745_vm0, %v13744_v2 }
0x15ee   : > { %12864 = vmatprep.subr.bf16.mxu1 %v13744_v2  ;;  %v7199_v34 = vpack.c.bf16 %v7195_v63, %v7195_v63  ;;  %v11369_v63 = vld [vmem:[%s15590_s2] ss:$0 sm:$0xff] }
0x15ef   : > { %v7198_v0 = vpack.c.bf16 %v7193_v62, %v7193_v62  ;;  %v13469_v62 = vld [vmem:[%s15588_s29] sm:$0xff]  }
0x15f1   : > { %12849 = vmatmul.mubr.msk.bf16.vlgmr.msra.gmra.mxu0 %vm2277_vm3, %v7198_v0 }
0x15f2   : > { %12859 = vmatpush3.bf16.msra.mxu0 %v7400_v1  ;;  %12860 = vmatprep.mubr.msk.bf16.mxu0 %vm13745_vm0, %v13744_v2 }
0x15f3   : > { %12870 = vmatprep.subr.bf16.mxu0 %v13744_v2 }
0x15f4   : > { %12855 = vmatmul.mubr.msk.bf16.vlgmr.msra.gmra.mxu1 %vm2277_vm3, %v7199_v34 }
0x15f5   : > { %12866 = vmatprep.mubr.msk.bf16.mxu1 %vm13745_vm0, %v13744_v2  ;;  %12865 = vmatpush3.bf16.msra.mxu1 %v7446_v4 }
0x15f6   : > { %12876 = vmatprep.subr.bf16.mxu1 %v13744_v2 }
0x16a8   : > { %v7244_v7 = vpop.f32.mrf.mxu0 }
0x16a9   : > { %v7388_v9 = vpack.c.bf16 %v7244_v7, %v7244_v7 }
0x16aa   : > { %v12838_v11 = vpop.f32.mrf.mxu0 }
0x16ab   : > { %12861 = vmatmul.mubr.msk.bf16.vlgmr.msra.gmra.mxu0 %vm2277_vm3, %v7388_v9  ;;  %v11373_v9 = vld [vmem:[%s15591_s18] ss:$0 sm:$0xff]  ;;  %s15593_s18 = sld [smem:[#allocation43_spill]] }
0x16ac   : > { %v7247_v8 = vpop.f32.mrf.mxu0  ;;  %v7290_v13 = vpop.f32.mrf.mxu1  ;;  %12871 = vmatpush3.bf16.msra.mxu0 %v7492_v10  ;;  %12872 = vmatprep.mubr.msk.bf16.mxu0 %vm13745_vm0, %v13744_v2 }
0x16ad   : > { %v7389_v14 = vpack.c.bf16 %v7290_v13, %v7290_v13  ;;  %12882 = vmatprep.subr.bf16.mxu0 %v13744_v2 }
0x16ae   : > { %v12839_v16 = vpop.f32.mrf.mxu0  ;;  %v12844_v17 = vpop.f32.mrf.mxu1 }
0x16af   : > { %12867 = vmatmul.mubr.msk.bf16.vlgmr.msra.gmra.mxu1 %vm2277_vm3, %v7389_v14 }
0x16b0   : > { %v7293_v18 = vpop.f32.mrf.mxu1  ;;  %12877 = vmatpush3.bf16.msra.mxu1 %v7538_v15  ;;  %12878 = vmatprep.mubr.msk.bf16.mxu1 %vm13745_vm0, %v13744_v2 }
0x16b1   : > { %v7336_v19 = vpop.f32.mrf.mxu0  ;;  %12890 = vmatprep.subr.bf16.mxu1 %v13744_v2  ;;  %s15594_s10 = smov %s15593_s18 }
0x16b2   : > { %v7390_v20 = vpack.c.bf16 %v7336_v19, %v7336_v19  ;;  %v12845_v22 = vpop.f32.mrf.mxu1 }
0x16b3   : > { %v12850_v23 = vpop.f32.mrf.mxu0  ;;  %v13470_v22 = vld [vmem:[%s15570_s13 + $0x48] sm:$0xff]  }
0x16b4   : > { %12873 = vmatmul.mubr.msk.bf16.vlgmr.msra.gmra.mxu0 %vm2277_vm3, %v7390_v20  ;;  %v7382_v25 = vpop.f32.mrf.mxu1  ;;  %v13471_v23 = vld [vmem:[%s15570_s13 + $0x68] sm:$0xff]  }
0x16b5   : > { %v7339_v26 = vpop.f32.mrf.mxu0  ;;  %v7391_v5 = vpack.c.bf16 %v7382_v25, %v7382_v25  ;;  %12886 = vmatprep.mubr.msk.bf16.mxu0 %vm13745_vm0, %v13744_v2  ;;  %12883 = vmatpush3.bf16.msra.mxu0 %v13464_v37  ;;  %v13472_v25 = vld [vmem:[%s15570_s13 + $0x40] sm:$0xff]  }
0x16b6   : > { %v12856_v30 = vpop.f32.mrf.mxu1  ;;  %12884 = vmatprep.subr.bf16.mxu0 %v13744_v2  ;;  %v13473_v26 = vld [vmem:[%s15570_s13 + $0x60] sm:$0xff]  }
0x16b7   : > { %v12851_v32 = vpop.f32.mrf.mxu0  ;;  %12879 = vmatmul.mubr.msk.bf16.vlgmr.msra.gmra.mxu1 %vm2277_vm3, %v7391_v5 }
0x16b8   : > { %v7385_v35 = vpop.f32.mrf.mxu1  ;;  %12898 = vmatprep.mubr.msk.bf16.mxu1 %vm13745_vm0, %v13744_v2  ;;  %12891 = vmatpush3.bf16.msra.mxu1 %v13466_v39 }
0x16b9   : > { %12885 = vmatpush3.bf16.msra.mxu0 %v13465_v38  ;;  %12892 = vmatprep.subr.bf16.mxu1 %v13744_v2  ;;  %v11380_v38 = vld [vmem:[%s15595_s15] ss:$0 sm:$0xff]  ;;  %s15597_s15 = sld [smem:[#allocation47_spill]] }
0x16ba   : > { %v12857_v29 = vpop.f32.mrf.mxu1  ;;  %12902 = vmatprep.subr.bf16.mxu0 %v13744_v2 }
0x16bb   : > { %v11379_v29 = vld [vmem:[%s15593_s18] ss:$0 sm:$0xff]  ;;  %s1391_s18 = sand.u32 1, %s13687_s16  }
0x16bc   : > { %12893 = vmatpush3.bf16.msra.mxu1 %v13467_v33 }
0x16bd   : > { %12894 = vmatprep.subr.bf16.mxu1 %v13744_v2 }
0x16c0   : > { %12895 = vmatpush3.bf16.msra.mxu1 %v13468_v61 }
0x16c1   : > { %12896 = vmatprep.subr.bf16.mxu1 %v13744_v2 }
0x16c4   : > { %12897 = vmatpush3.bf16.msra.mxu1 %v13469_v62 }
0x16c5   : > { %12918 = vmatprep.subr.bf16.mxu1 %v13744_v2 }
0x176b   : > { %v7436_v40 = vpop.f32.mrf.mxu0 }
0x176c   : > { %v7580_v47 = vsel %vm1565_vm2, %v7436_v40, 0.0  ;;  %v13474_v40 = vld [vmem:[%s15570_s13 + $0x58] sm:$0xff]  }
0x176d   : > { %v12862_v41 = vpop.f32.mrf.mxu0 }
0x176e   : > { %v13475_v41 = vld [vmem:[%s15571_s3 + $0x48] sm:$0xff]  }
0x176f   : > { %v7439_v42 = vpop.f32.mrf.mxu0  ;;  %v7482_v43 = vpop.f32.mrf.mxu1 }
0x1770   : > { %v7581_v45 = vsel %vm1565_vm2, %v7482_v43, 0.0  ;;  %v13476_v43 = vld [vmem:[%s15570_s13 + $0x50] sm:$0xff]  }
0x1771   : > { %v12863_v27 = vpop.f32.mrf.mxu0  ;;  %v12868_v44 = vpop.f32.mrf.mxu1  ;;  %v7582_v48 = vadd.f32 %v7581_v45, %v7580_v47  ;;  %v13479_v45 = vld [vmem:[%s15571_s3 + $0x68] sm:$0xff]   ;;  %v13481_v47 = vld [vmem:[%s15571_s3 + $0x60] sm:$0xff]  }
0x1772   : > { %v13477_v27 = vld [vmem:[%s15571_s3 + $0x40] sm:$0xff]   ;;  %v13478_v44 = vld [vmem:[%s15570_s13 + $0x78] sm:$0xff]  }
0x1773   : > { %v7485_v46 = vpop.f32.mrf.mxu1 }
0x1774   : > { %v7528_v31 = vpop.f32.mrf.mxu0  ;;  %v13480_v46 = vld [vmem:[%s15570_s13 + $0x70] sm:$0xff]  }
0x1775   : > { %v7583_v49 = vsel %vm1565_vm2, %v7528_v31, 0.0  ;;  %v12869_v50 = vpop.f32.mrf.mxu1  ;;  %v13482_v31 = vld [vmem:[%s15571_s3 + $0x58] sm:$0xff]  }
0x1776   : > { %v12874_v51 = vpop.f32.mrf.mxu0  ;;  %v7584_v53 = vadd.f32 %v7583_v49, %v7582_v48  ;;  %v13483_v48 = vld [vmem:[%s15572_s8 + $0x48] sm:$0xff]   ;;  %v13484_v49 = vld [vmem:[%s15571_s3 + $0x50] sm:$0xff]   ;;  %v13485_v50 = vld [vmem:[%s15572_s8 + $0x40] sm:$0xff]  }
0x1777   : > { %v7574_v54 = vpop.f32.mrf.mxu1  ;;  %v13486_v51 = vld [vmem:[%s15571_s3 + $0x78] sm:$0xff]  }
0x1778   : > { %v7531_v21 = vpop.f32.mrf.mxu0  ;;  %v7585_v24 = vsel %vm1565_vm2, %v7574_v54, 0.0  ;;  %v13488_v54 = vld [vmem:[%s15571_s3 + $0x70] sm:$0xff]   ;;  %s11668_s3 = sshll.u32 %s14009_s0, 7  ;;  %s13747_s0 = smov [#allocation2]  }
0x1779   : > { %v7586_v52 = vadd.f32 %v7585_v24, %v7584_v53  ;;  %v12880_v57 = vpop.f32.mrf.mxu1  ;;  %v13487_v53 = vld [vmem:[%s15572_s8 + $0x68] sm:$0xff]   ;;  %v13489_v21 = vld [vmem:[%s15572_s8 + $0x60] sm:$0xff]   ;;  %v13490_v24 = vld [vmem:[%s15572_s8 + $0x58] sm:$0xff]  }
0x177a   : > { %v12875_v58 = vpop.f32.mrf.mxu0  ;;  %v13493_v57 = vld [vmem:[%s15572_s8 + $0x70] sm:$0xff]  }
0x177b   : > { %v7594_v56 = vadd.f32 %v11368_v55, %v7586_v52  ;;  %v7577_v59 = vpop.f32.mrf.mxu1  ;;  %v13491_v55 = vld [vmem:[%s15572_s8 + $0x50] sm:$0xff]   ;;  %v13492_v52 = vld [vmem:[%s15572_s8 + $0x78] sm:$0xff]  }
0x177d   : > { %v7595_v60 = vpack.c.bf16 %v7594_v56, %v7594_v56  ;;  %v12881_v28 = vpop.f32.mrf.mxu1 }
0x177f   : > { %12887 = vmatmul.mubr.msk.bf16.vlgmr.msra.gmra.mxu0 %vm1565_vm2, %v7595_v60 }
0x1780   : > { %12906 = vmatprep.mubr.msk.bf16.mxu0 %vm13745_vm0, %v13744_v2  ;;  %12903 = vmatpush3.bf16.msra.mxu0 %v13470_v22 }
0x1781   : > { %12904 = vmatprep.subr.bf16.mxu0 %v13744_v2 }
0x1784   : > { %12905 = vmatpush3.bf16.msra.mxu0 %v13472_v25  ;;  %v11403_v25 = vld [vmem:[%s15574_s1 + $0x6] ss:$0 sm:$0xff] }
0x1785   : > { %12910 = vmatprep.subr.bf16.mxu0 %v13744_v2 }
0x183f   : > { %v7656_v0 = vpop.f32.mrf.mxu0 }
0x1840   : > { %v7657_v1 = vadd.f32 %v11369_v63, %v7656_v0  ;;  %v11437_v0 = vld [vmem:[%s15573_s11 + $0x4] ss:$0 sm:$0xff] }
0x1841   : > { %v12888_v34 = vpop.f32.mrf.mxu0 }
0x1842   : > { %v7662_v3 = vmax.f32 %v7657_v1, 0.0 }
0x1843   : > { %v7659_v4 = vpop.f32.mrf.mxu0 }
0x1844   : > { %v7663_v6 = vpack.c.bf16 %v7662_v3, %v7662_v3 }
0x1845   : > { %v12889_v7 = vpop.f32.mrf.mxu0 }
0x1846   : > { %12899 = vmatmul.mubr.msk.bf16.vlgmr.msra.gmra.mxu1 %vm3014_vm5, %v7663_v6 }
0x1847   : > { %12922 = vmatprep.mubr.msk.bf16.mxu1 %vm13745_vm0, %v13744_v2  ;;  %12919 = vmatpush3.bf16.msra.mxu1 %v13471_v23 }
0x1848   : > { %12920 = vmatprep.subr.bf16.mxu1 %v13744_v2 }
0x184b   : > { %12921 = vmatpush3.bf16.msra.mxu1 %v13473_v26 }
0x184c   : > { %12934 = vmatprep.subr.bf16.mxu1 %v13744_v2 }
0x1906   : > { %v7740_v10 = vpop.f32.mrf.mxu1 }
0x1907   : > { %v7741_v11 = vadd.f32 %v11373_v9, %v7740_v10  ;;  %v11401_v9 = vld [vmem:[%s15574_s1 + $0x4] ss:$0 sm:$0xff] }
0x1908   : > { %v12900_v12 = vpop.f32.mrf.mxu1 }
0x1909   : > { %v7746_v8 = vadd.f32 %v7741_v11, %v7594_v56 }
0x190a   : > { %v7743_v13 = vpop.f32.mrf.mxu1 }
0x190b   : > { %v7749_v14 = vsel %vm1565_vm2, %v7746_v8, 0.0 }
0x190c   : > { %7750 = vadd.xlane.f32.xlu0 %v7749_v14  ;;  %v12901_v15 = vpop.f32.mrf.mxu1  ;;  %v11439_v14 = vld [vmem:[%s15573_s11 + $0x6] ss:$0 sm:$0xff] }
0x1995   : > { %v7751_v16 = vpop.xlane.xlu0 %7750 }
0x1996   : > { %v7752_v17 = vmul.f32 0.03125, %v7751_v16 }
0x1998   : > { %v7753_v18 = vsub.f32 %v7746_v8, %v7752_v17 }
0x199a   : > { %v7754_v19 = vmul.f32 %v7753_v18, %v7753_v18 }
0x199c   : > { %v7755_v20 = vsel %vm1565_vm2, %v7754_v19, 0.0 }
0x199d   : > { %7756 = vadd.xlane.f32.xlu1 %v7755_v20 }
0x1a26   : > { %v7757_v5 = vpop.xlane.xlu1 %7756 }
0x1a27   : > { %v7758_v30 = vmul.f32 0.03125, %v7757_v5 }
0x1a29   : > { %v7759_v32 = vadd.f32 1e-05, %v7758_v30 }
0x1a2b   : > { %13596 = vrsqrt.f32 %v7759_v32 }
0x1a38   : > { %v13597_v35 = vpop.eup %13596 }
0x1a39   : > { %v7761_v37 = vmul.f32 %v13597_v35, %v7753_v18 }
0x1a3b   : > { %v7768_v39 = vmul.f32 %v11379_v29, %v7761_v37  ;;  %v11438_v29 = vld [vmem:[%s15573_s11 + $0x5] ss:$0 sm:$0xff]  ;;  %v11473_v37 = vld [vmem:[%s15575_s6 + $0x4] ss:$0 sm:$0xff] }
0x1a3d   : > { %v7775_v33 = vadd.f32 %v11380_v38, %v7768_v39 }
0x1a3f   : > { %v15003_v42 = vpack.c.bf16 %v7775_v33, %v7775_v33 }
0x1a41   : > { %12907 = vmatmul.mubr.msk.bf16.vlgmr.msra.gmra.mxu0 %vm1565_vm2, %v15003_v42  ;;  %12923 = vmatmul.mubr.msk.bf16.vlgmr.msra.gmra.mxu1 %vm1565_vm2, %v15003_v42 }
0x1a42   : > { %12911 = vmatpush3.bf16.msra.mxu0 %v13474_v40  ;;  %12935 = vmatpush3.bf16.msra.mxu1 %v13475_v41 }
0x1a43   : > { %12912 = vmatprep.subr.bf16.mxu0 %v13744_v2  ;;  %12936 = vmatprep.subr.bf16.mxu1 %v13744_v2 }
0x1a44   : > { %12914 = vmatprep.mubr.msk.bf16.mxu0 %vm13745_vm0, %v13744_v2  ;;  %12938 = vmatprep.mubr.msk.bf16.mxu1 %vm13745_vm0, %v13744_v2 }
0x1a46   : > { %12913 = vmatpush3.bf16.msra.mxu0 %v13476_v43  ;;  %12937 = vmatpush3.bf16.msra.mxu1 %v13477_v27 }
0x1a47   : > { %12926 = vmatprep.subr.bf16.mxu0 %v13744_v2  ;;  %12950 = vmatprep.subr.bf16.mxu1 %v13744_v2 }
0x1a49   : > { %12915 = vmatmul.mubr.msk.bf16.vlgmr.msra.gmra.mxu0 %vm1565_vm2, %v15003_v42  ;;  %12939 = vmatmul.mubr.msk.bf16.vlgmr.msra.gmra.mxu1 %vm1565_vm2, %v15003_v42 }
0x1a4a   : > { %12927 = vmatpush3.bf16.msra.mxu0 %v13478_v44  ;;  %12951 = vmatpush3.bf16.msra.mxu1 %v13479_v45 }
0x1a4b   : > { %12928 = vmatprep.subr.bf16.mxu0 %v13744_v2  ;;  %12952 = vmatprep.subr.bf16.mxu1 %v13744_v2 }
0x1a4c   : > { %12930 = vmatprep.mubr.msk.bf16.mxu0 %vm13745_vm0, %v13744_v2  ;;  %12954 = vmatprep.mubr.msk.bf16.mxu1 %vm13745_vm0, %v13744_v2 }
0x1a4e   : > { %12929 = vmatpush3.bf16.msra.mxu0 %v13480_v46  ;;  %12953 = vmatpush3.bf16.msra.mxu1 %v13481_v47  ;;  %v11402_v46 = vld [vmem:[%s15574_s1 + $0x5] ss:$0 sm:$0xff] }
0x1a4f   : > { %12942 = vmatprep.subr.bf16.mxu0 %v13744_v2  ;;  %12966 = vmatprep.subr.bf16.mxu1 %v13744_v2 }
0x1a51   : > { %12931 = vmatmul.mubr.msk.bf16.vlgmr.msra.gmra.mxu0 %vm1565_vm2, %v15003_v42  ;;  %12955 = vmatmul.mubr.msk.bf16.vlgmr.msra.gmra.mxu1 %vm1565_vm2, %v15003_v42 }
0x1a52   : > { %12943 = vmatpush3.bf16.msra.mxu0 %v13482_v31  ;;  %12967 = vmatpush3.bf16.msra.mxu1 %v13483_v48 }
0x1a53   : > { %12944 = vmatprep.subr.bf16.mxu0 %v13744_v2  ;;  %12968 = vmatprep.subr.bf16.mxu1 %v13744_v2 }
0x1a54   : > { %12946 = vmatprep.mubr.msk.bf16.mxu0 %vm13745_vm0, %v13744_v2  ;;  %12970 = vmatprep.mubr.msk.bf16.mxu1 %vm13745_vm0, %v13744_v2 }
0x1a56   : > { %12945 = vmatpush3.bf16.msra.mxu0 %v13484_v49  ;;  %12969 = vmatpush3.bf16.msra.mxu1 %v13485_v50 }
0x1a57   : > { %12958 = vmatprep.subr.bf16.mxu0 %v13744_v2  ;;  %12982 = vmatprep.subr.bf16.mxu1 %v13744_v2 }
0x1a59   : > { %12947 = vmatmul.mubr.msk.bf16.vlgmr.msra.gmra.mxu0 %vm1565_vm2, %v15003_v42  ;;  %12971 = vmatmul.mubr.msk.bf16.vlgmr.msra.gmra.mxu1 %vm1565_vm2, %v15003_v42 }
0x1a5a   : > { %12959 = vmatpush3.bf16.msra.mxu0 %v13486_v51  ;;  %12983 = vmatpush3.bf16.msra.mxu1 %v13487_v53  ;;  %v11440_v53 = vld [vmem:[%s15573_s11 + $0x7] ss:$0 sm:$0xff] }
0x1a5b   : > { %12960 = vmatprep.subr.bf16.mxu0 %v13744_v2  ;;  %12984 = vmatprep.subr.bf16.mxu1 %v13744_v2 }
0x1a5c   : > { %12962 = vmatprep.mubr.msk.bf16.mxu0 %vm13745_vm0, %v13744_v2  ;;  %12986 = vmatprep.mubr.msk.bf16.mxu1 %vm13745_vm0, %v13744_v2 }
0x1a5e   : > { %12961 = vmatpush3.bf16.msra.mxu0 %v13488_v54  ;;  %12985 = vmatpush3.bf16.msra.mxu1 %v13489_v21 }
0x1a5f   : > { %12974 = vmatprep.subr.bf16.mxu0 %v13744_v2  ;;  %12998 = vmatprep.subr.bf16.mxu1 %v13744_v2 }
0x1a61   : > { %12963 = vmatmul.mubr.msk.bf16.vlgmr.msra.gmra.mxu0 %vm1565_vm2, %v15003_v42  ;;  %12987 = vmatmul.mubr.msk.bf16.vlgmr.msra.gmra.mxu1 %vm1565_vm2, %v15003_v42 }
0x1a62   : > { %12975 = vmatpush3.bf16.msra.mxu0 %v13490_v24  ;;  %12978 = vmatprep.mubr.msk.bf16.mxu0 %vm13745_vm0, %v13744_v2 }
0x1a63   : > { %12976 = vmatprep.subr.bf16.mxu0 %v13744_v2  ;;  %13000 = vmatprep.mubr.msk.bf16.mxu1 %vm13745_vm0, %v13744_v2 }
0x1a66   : > { %12977 = vmatpush3.bf16.msra.mxu0 %v13491_v55 }
0x1a67   : > { %12990 = vmatprep.subr.bf16.mxu0 %v13744_v2 }
0x1a69   : > { %12979 = vmatmul.mubr.msk.bf16.vlgmr.msra.gmra.mxu0 %vm1565_vm2, %v15003_v42 }
0x1a6a   : > { %12991 = vmatpush3.bf16.msra.mxu0 %v13492_v52  ;;  %12994 = vmatprep.mubr.msk.bf16.mxu0 %vm13745_vm0, %v13744_v2 }
0x1a6b   : > { %12992 = vmatprep.subr.bf16.mxu0 %v13744_v2 }
0x1a6e   : > { %12993 = vmatpush3.bf16.msra.mxu0 %v13493_v57 }
0x1a6f   : > { %13004 = vmatprep.subr.bf16.mxu0 %v13744_v2 }
0x1a71   : > { %12995 = vmatmul.mubr.msk.bf16.vlgmr.msra.gmra.mxu0 %vm1565_vm2, %v15003_v42 }
0x1a72   : > { %13006 = vmatprep.mubr.msk.bf16.mxu0 %vm13745_vm0, %v13744_v2 }
0x1b01   : > { %v7872_v58 = vpop.f32.mrf.mxu0  ;;  %v7976_v56 = vpop.f32.mrf.mxu1 }
0x1b02   : > { %v7873_v15 = vadd.f32 %v11401_v9, %v7872_v58  ;;  %v7977_v38 = vadd.f32 %v11403_v25, %v7976_v56 }
0x1b03   : > { %v12908_v59 = vpop.f32.mrf.mxu0  ;;  %v12924_v60 = vpop.f32.mrf.mxu1 }
0x1b04   : > { %v8542_v22 = vpack.c.bf16 %v7873_v15, %v7873_v15  ;;  %v8544_v27 = vpack.c.bf16 %v7977_v38, %v7977_v38  ;;  %v11404_v59 = vld [vmem:[%s15574_s1 + $0x7] ss:$0 sm:$0xff] }
0x1b05   : > { %v7875_v28 = vpop.f32.mrf.mxu0  ;;  %v7979_v61 = vpop.f32.mrf.mxu1 }
0x1b07   : > { %v12909_v62 = vpop.f32.mrf.mxu0  ;;  %v12925_v63 = vpop.f32.mrf.mxu1 }
0x1b09   : > { %v7924_v1 = vpop.f32.mrf.mxu0  ;;  %v8126_v34 = vpop.f32.mrf.mxu1 }
0x1b0a   : > { %v8127_v3 = vadd.f32 %v11437_v0, %v8126_v34  ;;  %v7925_v54 = vadd.f32 %v11402_v46, %v7924_v1  ;;  %v11474_v0 = vld [vmem:[%s15575_s6 + $0x5] ss:$0 sm:$0xff] }
0x1b0b   : > { %v12916_v4 = vpop.f32.mrf.mxu0  ;;  %v12940_v6 = vpop.f32.mrf.mxu1 }
0x1b0c   : > { %v8546_v7 = vpack.c.bf16 %v8127_v3, %v8127_v3  ;;  %v8543_v58 = vpack.c.bf16 %v7925_v54, %v7925_v54 }
0x1b0d   : > { %v7927_v10 = vpop.f32.mrf.mxu0  ;;  %v8129_v11 = vpop.f32.mrf.mxu1 }
0x1b0e   : > { %v8554_v12 = vsel %vm2277_vm3, %v8546_v7, 0 }
0x1b0f   : > { %v12917_v8 = vpop.f32.mrf.mxu0  ;;  %v12941_v13 = vpop.f32.mrf.mxu1  ;;  %12999 = vmatpush3.bf16.xpose.msra.mxu1 %v8554_v12 }
0x1b10   : > { %13010 = vmatprep.subr.bf16.mxu1 %v13744_v2 }
0x1b11   : > { %v8028_v16 = vpop.f32.mrf.mxu0  ;;  %v8230_v17 = vpop.f32.mrf.mxu1 }
0x1b12   : > { %v8231_v18 = vadd.f32 %v11439_v14, %v8230_v17  ;;  %v8029_v1 = vadd.f32 %v11404_v59, %v8028_v16  ;;  %v11475_v59 = vld [vmem:[%s15575_s6 + $0x6] ss:$0 sm:$0xff] }
0x1b13   : > { %v12932_v19 = vpop.f32.mrf.mxu0  ;;  %v12956_v20 = vpop.f32.mrf.mxu1 }
0x1b14   : > { %v8548_v23 = vpack.c.bf16 %v8231_v18, %v8231_v18  ;;  %v8545_v6 = vpack.c.bf16 %v8029_v1, %v8029_v1 }
0x1b15   : > { %v8031_v26 = vpop.f32.mrf.mxu0  ;;  %v8233_v5 = vpop.f32.mrf.mxu1 }
0x1b16   : > { %v8646_v30 = vsel %vm2277_vm3, %v8548_v23, 0  ;;  %13001 = vmatmul.mubr.msk.bf16.vlgmr.msra.gmra.mxu1 %vm2277_vm3, %v8542_v22 }
0x1b17   : > { %v12933_v32 = vpop.f32.mrf.mxu0  ;;  %v12957_v35 = vpop.f32.mrf.mxu1  ;;  %13011 = vmatpush3.bf16.xpose.msra.mxu1 %v8646_v30  ;;  %13012 = vmatprep.mubr.msk.bf16.mxu1 %vm13745_vm0, %v13744_v2 }
0x1b18   : > { %13022 = vmatprep.subr.bf16.mxu1 %v13744_v2 }
0x1b19   : > { %v8178_v39 = vpop.f32.mrf.mxu0  ;;  %v8380_v33 = vpop.f32.mrf.mxu1 }
0x1b1a   : > { %v8179_v40 = vadd.f32 %v11438_v29, %v8178_v39  ;;  %v8381_v41 = vadd.f32 %v11473_v37, %v8380_v33 }
0x1b1b   : > { %v12948_v42 = vpop.f32.mrf.mxu0  ;;  %v12972_v43 = vpop.f32.mrf.mxu1 }
0x1b1c   : > { %v8547_v44 = vpack.c.bf16 %v8179_v40, %v8179_v40  ;;  %v8782_v45 = vpack.c.bf16 %v8381_v41, %v8381_v41 }
0x1b1d   : > { %v8181_v47 = vpop.f32.mrf.mxu0  ;;  %v8383_v31 = vpop.f32.mrf.mxu1 }
0x1b1e   : > { %v8600_v48 = vsel %vm2277_vm3, %v8547_v44, 0  ;;  %v8790_v49 = vsel %vm2517_vm4, %v8782_v45, 0  ;;  %13013 = vmatmul.mubr.msk.bf16.vlgmr.msra.gmra.mxu1 %vm2277_vm3, %v8544_v27 }
0x1b1f   : > { %v12949_v50 = vpop.f32.mrf.mxu0  ;;  %v12973_v51 = vpop.f32.mrf.mxu1  ;;  %13005 = vmatpush3.bf16.xpose.msra.mxu0 %v8600_v48  ;;  %13023 = vmatpush3.bf16.msra.mxu1 %v8790_v49 }
0x1b20   : > { %13016 = vmatprep.subr.bf16.mxu0 %v13744_v2  ;;  %13024 = vmatprep.mubr.msk.bf16.mxu1 %vm13745_vm0, %v13744_v2 }
0x1b21   : > { %v8282_v21 = vpop.f32.mrf.mxu0  ;;  %v15112_v24 = vpop.f32.mrf.mxu1  ;;  %13034 = vmatprep.subr.bf16.mxu1 %v13744_v2 }
0x1b22   : > { %v8283_v55 = vadd.f32 %v11440_v53, %v8282_v21 }
0x1b23   : > { %v12964_v52 = vpop.f32.mrf.mxu0  ;;  %v12988_v57 = vpop.f32.mrf.mxu1 }
0x1b24   : > { %v8549_v56 = vpack.c.bf16 %v8283_v55, %v8283_v55 }
0x1b25   : > { %v8285_v60 = vpop.f32.mrf.mxu0  ;;  %v8487_v28 = vpop.f32.mrf.mxu1 }
0x1b26   : > { %v8692_v61 = vsel %vm2277_vm3, %v8549_v56, 0  ;;  %13007 = vmatmul.mubr.msk.bf16.vlgmr.msra.gmra.mxu0 %vm2277_vm3, %v8543_v58  ;;  %v8485_v28 = vadd.f32 %v11475_v59, %v15112_v24 }
0x1b27   : > { %v12965_v62 = vpop.f32.mrf.mxu0  ;;  %v12989_v63 = vpop.f32.mrf.mxu1  ;;  %13017 = vmatpush3.bf16.xpose.msra.mxu0 %v8692_v61  ;;  %13018 = vmatprep.mubr.msk.bf16.mxu0 %vm13745_vm0, %v13744_v2 }
0x1b28   : > { %13028 = vmatprep.subr.bf16.mxu0 %v13744_v2  ;;  %v8784_v62 = vpack.c.bf16 %v8485_v28, %v8485_v28 }
0x1b29   : > { %v8432_v34 = vpop.f32.mrf.mxu0 }
0x1b2a   : > { %v8433_v3 = vadd.f32 %v11474_v0, %v8432_v34  ;;  %v8882_v34 = vsel %vm2517_vm4, %v8784_v62, 0 }
0x1b2b   : > { %v12980_v4 = vpop.f32.mrf.mxu0 }
0x1b2c   : > { %v8783_v7 = vpack.c.bf16 %v8433_v3, %v8433_v3 }
0x1b2d   : > { %v8435_v9 = vpop.f32.mrf.mxu0 }
0x1b2e   : > { %v8836_v10 = vsel %vm2517_vm4, %v8783_v7, 0  ;;  %13019 = vmatmul.mubr.msk.bf16.vlgmr.msra.gmra.mxu0 %vm2277_vm3, %v8545_v6  ;;  %v11476_v6 = vld [vmem:[%s15575_s6 + $0x7] ss:$0 sm:$0xff] }
0x1b2f   : > { %v12981_v11 = vpop.f32.mrf.mxu0  ;;  %13029 = vmatpush3.bf16.msra.mxu0 %v8836_v10  ;;  %13030 = vmatprep.mubr.msk.bf16.mxu0 %vm13745_vm0, %v13744_v2 }
0x1b30   : > { %13040 = vmatprep.subr.bf16.mxu0 %v13744_v2 }
0x1b31   : > { %v15127_v12 = vpop.f32.mrf.mxu0 }
0x1b32   : > { %v8537_v9 = vadd.f32 %v11476_v6, %v15127_v12 }
0x1b33   : > { %v12996_v8 = vpop.f32.mrf.mxu0 }
0x1b34   : > { %v8785_v11 = vpack.c.bf16 %v8537_v9, %v8537_v9 }
0x1b35   : > { %v8539_v13 = vpop.f32.mrf.mxu0 }
0x1b37   : > { %v12997_v14 = vpop.f32.mrf.mxu0 }
0x1b38   : > { %v8928_v14 = vsel %vm2517_vm4, %v8785_v11, 0 }
0x1bd6   : > { %v8590_v15 = vpop.f32.mrf.mxu1 }
0x1bd7   : > { %v8734_v16 = vsel %vm2277_vm3, %v8590_v15, -inf }
0x1bd8   : > { %8735 = vmax.xlane.f32.xlu0 %v8734_v16  ;;  %v13002_v17 = vpop.f32.mrf.mxu1 }
0x1bd9   : > { %v11497_v17 = vld [vmem:[%s15576_s12 + $0x10] sm:$0xf] }
0x1bda   : > { %v8593_v18 = vpop.f32.mrf.mxu1 }
0x1bdb   : > { %v8983_v18 = vsel %vm2517_vm4, %v11497_v17, 0  ;;  %v13502_v17 = vld [vmem:[%s15579_s17 + $0x48] sm:$0xff]  }
0x1bdc   : > { %v13003_v19 = vpop.f32.mrf.mxu1 }
0x1bdd   : > { %v11498_v19 = vld [vmem:[%s15576_s12 + $0x14] sm:$0xf] }
0x1bde   : > { %v8682_v20 = vpop.f32.mrf.mxu1 }
0x1bdf   : > { %v8740_v22 = vsel %vm2277_vm3, %v8682_v20, -inf }
0x1be0   : > { %8741 = vmax.xlane.f32.xlu0 %v8740_v22  ;;  %v13014_v23 = vpop.f32.mrf.mxu1  ;;  %v11499_v22 = vld [vmem:[%s15576_s12 + $0x18] sm:$0xf] }
0x1be2   : > { %v8685_v25 = vpop.f32.mrf.mxu1 }
0x1be4   : > { %v13015_v26 = vpop.f32.mrf.mxu1 }
0x1be5   : > { %v9075_v26 = vsel %vm2517_vm4, %v11499_v22, 0  ;;  %v13506_v22 = vld [vmem:[%s15579_s17 + $0x68] sm:$0xff]  }
0x1be6   : > { %v8636_v5 = vpop.f32.mrf.mxu0 }
0x1be7   : > { %v8737_v30 = vsel %vm2277_vm3, %v8636_v5, -inf }
0x1be8   : > { %8738 = vmax.xlane.f32.xlu1 %v8737_v30  ;;  %v13008_v32 = vpop.f32.mrf.mxu0 }
0x1bea   : > { %v8639_v35 = vpop.f32.mrf.mxu0 }
0x1bec   : > { %v13009_v29 = vpop.f32.mrf.mxu0 }
0x1bee   : > { %v8728_v37 = vpop.f32.mrf.mxu0 }
0x1bef   : > { %v8743_v38 = vsel %vm2277_vm3, %v8728_v37, -inf }
0x1bf0   : > { %8744 = vmax.xlane.f32.xlu1 %v8743_v38  ;;  %v13020_v39 = vpop.f32.mrf.mxu0 }
0x1bf2   : > { %v8731_v33 = vpop.f32.mrf.mxu0 }
0x1bf3   : > { %v11500_v33 = vld [vmem:[%s15576_s12 + $0x1c] sm:$0xf] }
0x1bf4   : > { %v13021_v40 = vpop.f32.mrf.mxu0 }
0x1c61   : > { %v8736_v41 = vpop.xlane.xlu0 %8735 }
0x1c62   : > { %v8746_v42 = vsub.f32 %v8590_v15, %v8736_v41 }
0x1c64   : > { %v8750_v43 = vmul.f32 1.442695, %v8746_v42  ;;  %v9121_v42 = vsel %vm2517_vm4, %v11500_v33, 0 }
0x1c66   : > { %13598 = vpow2.f32 %v8750_v43 }
0x1c69   : > { %v8742_v27 = vpop.xlane.xlu0 %8741 }
0x1c6a   : > { %v8748_v44 = vsub.f32 %v8682_v20, %v8742_v27  ;;  %v9029_v20 = vsel %vm2517_vm4, %v11498_v19, 0  ;;  %v13504_v19 = vld [vmem:[%s15579_s17 + $0x40] sm:$0xff]  }
0x1c6c   : > { %v8754_v45 = vmul.f32 1.442695, %v8748_v44 }
0x1c6e   : > { %13600 = vpow2.f32 %v8754_v45 }
0x1c71   : > { %v8739_v46 = vpop.xlane.xlu1 %8738 }
0x1c72   : > { %v8747_v47 = vsub.f32 %v8636_v5, %v8739_v46 }
0x1c73   : > { %v13599_v31 = vpop.eup %13598 }
0x1c74   : > { %v8752_v48 = vmul.f32 1.442695, %v8747_v47  ;;  %v8758_v49 = vsel %vm2277_vm3, %v13599_v31, 0.0 }
0x1c75   : > { %8759 = vadd.xlane.f32.xlu0 %v8758_v49  ;;  %v13494_v49 = vld [vmem:[%s15577_s5 + $0x48] sm:$0xff]  }
0x1c76   : > { %13602 = vpow2.f32 %v8752_v48 }
0x1c79   : > { %v8745_v50 = vpop.xlane.xlu1 %8744 }
0x1c7a   : > { %v8749_v51 = vsub.f32 %v8728_v37, %v8745_v50  ;;  %v13495_v50 = vld [vmem:[%s15577_s5 + $0x58] sm:$0xff]  }
0x1c7b   : > { %v13601_v53 = vpop.eup %13600 }
0x1c7c   : > { %v8756_v54 = vmul.f32 1.442695, %v8749_v51  ;;  %v8764_v21 = vsel %vm2277_vm3, %v13601_v53, 0.0  ;;  %v13496_v51 = vld [vmem:[%s15577_s5 + $0x40] sm:$0xff]  }
0x1c7d   : > { %8765 = vadd.xlane.f32.xlu0 %v8764_v21 }
0x1c7e   : > { %13604 = vpow2.f32 %v8756_v54 }
0x1c83   : > { %v13603_v55 = vpop.eup %13602 }
0x1c84   : > { %v8761_v52 = vsel %vm2277_vm3, %v13603_v55, 0.0 }
0x1c85   : > { %8762 = vadd.xlane.f32.xlu1 %v8761_v52 }
0x1c8b   : > { %v13605_v57 = vpop.eup %13604 }
0x1c8c   : > { %v8767_v58 = vsel %vm2277_vm3, %v13605_v57, 0.0 }
0x1c8d   : > { %8768 = vadd.xlane.f32.xlu1 %v8767_v58 }
0x1cfe   : > { %v8760_v56 = vpop.xlane.xlu0 %8759 }
0x1cff   : > { %13606 = vrcp.f32 %v8760_v56 }
0x1d06   : > { %v8766_v60 = vpop.xlane.xlu0 %8765 }
0x1d07   : > { %13608 = vrcp.f32 %v8766_v60 }
0x1d0c   : > { %v13607_v61 = vpop.eup %13606 }
0x1d0d   : > { %v8771_v63 = vmul.f32 %v13607_v61, %v13599_v31 }
0x1d0e   : > { %v8763_v0 = vpop.xlane.xlu1 %8762 }
0x1d0f   : > { %v8778_v1 = vpack.c.bf16 %v8771_v63, %v8771_v63  ;;  %13610 = vrcp.f32 %v8763_v0 }
0x1d11   : > { %13025 = vmatmul.mubr.msk.bf16.vlgmr.msra.gmra.mxu1 %vm2277_vm3, %v8778_v1 }
0x1d12   : > { %13035 = vmatpush3.bf16.msra.mxu1 %v8882_v34  ;;  %13036 = vmatprep.mubr.msk.bf16.mxu1 %vm13745_vm0, %v13744_v2 }
0x1d13   : > { %13046 = vmatprep.subr.bf16.mxu1 %v13744_v2 }
0x1d14   : > { %v13609_v3 = vpop.eup %13608 }
0x1d15   : > { %v8775_v4 = vmul.f32 %v13609_v3, %v13601_v53  ;;  %v13497_v53 = vld [vmem:[%s15577_s5 + $0x50] sm:$0xff]  }
0x1d16   : > { %v8769_v24 = vpop.xlane.xlu1 %8768 }
0x1d17   : > { %v8780_v7 = vpack.c.bf16 %v8775_v4, %v8775_v4  ;;  %13612 = vrcp.f32 %v8769_v24  ;;  %v11506_v24 = vld [vmem:[%s15578_s14 + $0x1] ss:$0 sm:$0xff] }
0x1d19   : > { %13037 = vmatmul.mubr.msk.bf16.vlgmr.msra.gmra.mxu1 %vm2277_vm3, %v8780_v7 }
0x1d1a   : > { %13048 = vmatprep.mubr.msk.bf16.mxu1 %vm13745_vm0, %v13744_v2  ;;  %13047 = vmatpush3.bf16.msra.mxu1 %v8983_v18  ;;  %v13503_v18 = vld [vmem:[%s15579_s17 + $0x58] sm:$0xff]  }
0x1d1b   : > { %13058 = vmatprep.subr.bf16.mxu1 %v13744_v2 }
0x1d1c   : > { %v13611_v10 = vpop.eup %13610 }
0x1d1d   : > { %v8773_v8 = vmul.f32 %v13611_v10, %v13603_v55 }
0x1d1f   : > { %v8779_v13 = vpack.c.bf16 %v8773_v8, %v8773_v8  ;;  %v13498_v8 = vld [vmem:[%s15577_s5 + $0x68] sm:$0xff]  }
0x1d21   : > { %13031 = vmatmul.mubr.msk.bf16.vlgmr.msra.gmra.mxu0 %vm2277_vm3, %v8779_v13  ;;  %v13499_v13 = vld [vmem:[%s15577_s5 + $0x78] sm:$0xff]  }
0x1d22   : > { %13041 = vmatpush3.bf16.msra.mxu0 %v8928_v14  ;;  %13042 = vmatprep.mubr.msk.bf16.mxu0 %vm13745_vm0, %v13744_v2 }
0x1d23   : > { %13052 = vmatprep.subr.bf16.mxu0 %v13744_v2 }
0x1d24   : > { %v13613_v12 = vpop.eup %13612 }
0x1d25   : > { %v8777_v15 = vmul.f32 %v13613_v12, %v13605_v57 }
0x1d27   : > { %v8781_v16 = vpack.c.bf16 %v8777_v15, %v8777_v15  ;;  %v13500_v15 = vld [vmem:[%s15577_s5 + $0x60] sm:$0xff]  }
0x1d29   : > { %13043 = vmatmul.mubr.msk.bf16.vlgmr.msra.gmra.mxu0 %vm2277_vm3, %v8781_v16  ;;  %v13501_v16 = vld [vmem:[%s15577_s5 + $0x70] sm:$0xff]  }
0x1d2a   : > { %13054 = vmatprep.mubr.msk.bf16.mxu0 %vm13745_vm0, %v13744_v2  ;;  %13053 = vmatpush3.bf16.msra.mxu0 %v9029_v20  ;;  %v13505_v20 = vld [vmem:[%s15579_s17 + $0x50] sm:$0xff]  }
0x1d2b   : > { %13064 = vmatprep.subr.bf16.mxu0 %v13744_v2 }
0x1dd1   : > { %v8826_v23 = vpop.f32.mrf.mxu1 }
0x1dd2   : > { %v8970_v25 = vpack.c.bf16 %v8826_v23, %v8826_v23  ;;  %v13507_v23 = vld [vmem:[%s15579_s17 + $0x78] sm:$0xff]  }
0x1dd3   : > { %v13026_v5 = vpop.f32.mrf.mxu1 }
0x1dd4   : > { %13049 = vmatmul.mubr.msk.bf16.vlgmr.msra.gmra.mxu1 %vm2277_vm3, %v8970_v25  ;;  %v13508_v25 = vld [vmem:[%s15579_s17 + $0x60] sm:$0xff]   ;;  %v13510_v5 = vld [vmem:[%s15582_s23 + $0x48] sm:$0xff]  }
0x1dd5   : > { %v8829_v30 = vpop.f32.mrf.mxu1  ;;  %13059 = vmatpush3.bf16.msra.mxu1 %v9075_v26  ;;  %13060 = vmatprep.mubr.msk.bf16.mxu1 %vm13745_vm0, %v13744_v2  ;;  %v13509_v26 = vld [vmem:[%s15579_s17 + $0x70] sm:$0xff]  }
0x1dd6   : > { %13070 = vmatprep.subr.bf16.mxu1 %v13744_v2  ;;  %v13511_v30 = vld [vmem:[%s15582_s23 + $0x58] sm:$0xff]  }
0x1dd7   : > { %v13027_v32 = vpop.f32.mrf.mxu1 }
0x1dd8   : > { %v13512_v32 = vld [vmem:[%s15582_s23 + $0x40] sm:$0xff]  }
0x1dd9   : > { %v8918_v35 = vpop.f32.mrf.mxu1 }
0x1dda   : > { %v8972_v29 = vpack.c.bf16 %v8918_v35, %v8918_v35  ;;  %v13513_v35 = vld [vmem:[%s15582_s23 + $0x50] sm:$0xff]  }
0x1ddb   : > { %v13038_v37 = vpop.f32.mrf.mxu1 }
0x1ddc   : > { %13061 = vmatmul.mubr.msk.bf16.vlgmr.msra.gmra.mxu1 %vm2277_vm3, %v8972_v29  ;;  %v13514_v29 = vld [vmem:[%s15582_s23 + $0x68] sm:$0xff]   ;;  %v13515_v37 = vld [vmem:[%s15582_s23 + $0x78] sm:$0xff]  }
0x1ddd   : > { %v8921_v38 = vpop.f32.mrf.mxu1  ;;  %13074 = vmatprep.mubr.msk.bf16.mxu1 %vm13745_vm0, %v13744_v2  ;;  %13071 = vmatpush3.bf16.msra.mxu1 %v13494_v49 }
0x1dde   : > { %13072 = vmatprep.subr.bf16.mxu1 %v13744_v2  ;;  %v13516_v38 = vld [vmem:[%s15582_s23 + $0x60] sm:$0xff]  }
0x1ddf   : > { %v13039_v39 = vpop.f32.mrf.mxu1 }
0x1de0   : > { %v13517_v39 = vld [vmem:[%s15582_s23 + $0x70] sm:$0xff]  }
0x1de1   : > { %v8872_v40 = vpop.f32.mrf.mxu0  ;;  %13073 = vmatpush3.bf16.msra.mxu1 %v13496_v51 }
0x1de2   : > { %v8971_v41 = vpack.c.bf16 %v8872_v40, %v8872_v40  ;;  %13086 = vmatprep.subr.bf16.mxu1 %v13744_v2 }
0x1de3   : > { %v13032_v43 = vpop.f32.mrf.mxu0 }
0x1de4   : > { %13055 = vmatmul.mubr.msk.bf16.vlgmr.msra.gmra.mxu0 %vm2277_vm3, %v8971_v41 }
0x1de5   : > { %v8875_v27 = vpop.f32.mrf.mxu0  ;;  %13065 = vmatpush3.bf16.msra.mxu0 %v9121_v42  ;;  %13066 = vmatprep.mubr.msk.bf16.mxu0 %vm13745_vm0, %v13744_v2 }
0x1de6   : > { %13078 = vmatprep.subr.bf16.mxu0 %v13744_v2 }
0x1de7   : > { %v13033_v44 = vpop.f32.mrf.mxu0 }
0x1de9   : > { %v8964_v45 = vpop.f32.mrf.mxu0 }
0x1dea   : > { %v8973_v46 = vpack.c.bf16 %v8964_v45, %v8964_v45 }
0x1deb   : > { %v13044_v47 = vpop.f32.mrf.mxu0 }
0x1dec   : > { %13067 = vmatmul.mubr.msk.bf16.vlgmr.msra.gmra.mxu0 %vm2277_vm3, %v8973_v46 }
0x1ded   : > { %v8967_v31 = vpop.f32.mrf.mxu0  ;;  %13082 = vmatprep.mubr.msk.bf16.mxu0 %vm13745_vm0, %v13744_v2  ;;  %13079 = vmatpush3.bf16.msra.mxu0 %v13495_v50 }
0x1dee   : > { %13080 = vmatprep.subr.bf16.mxu0 %v13744_v2 }
0x1def   : > { %v13045_v48 = vpop.f32.mrf.mxu0 }
0x1df1   : > { %13081 = vmatpush3.bf16.msra.mxu0 %v13497_v53  ;;  %v11563_v53 = vld [vmem:[%s15583_s21 + $0x4] ss:$0 sm:$0xff] }
0x1df2   : > { %13094 = vmatprep.subr.bf16.mxu0 %v13744_v2 }
0x1e94   : > { %v9019_v54 = vpop.f32.mrf.mxu1 }
0x1e95   : > { %v9163_v62 = vsel %vm1565_vm2, %v9019_v54, 0.0  ;;  %v11564_v54 = vld [vmem:[%s15583_s21 + $0x5] ss:$0 sm:$0xff] }
0x1e96   : > { %v13050_v21 = vpop.f32.mrf.mxu1 }
0x1e98   : > { %v9022_v55 = vpop.f32.mrf.mxu1 }
0x1e9a   : > { %v13051_v52 = vpop.f32.mrf.mxu1 }
0x1e9c   : > { %v9111_v57 = vpop.f32.mrf.mxu1 }
0x1e9d   : > { %v9166_v34 = vsel %vm1565_vm2, %v9111_v57, 0.0 }
0x1e9e   : > { %v13062_v58 = vpop.f32.mrf.mxu1 }
0x1ea0   : > { %v9114_v56 = vpop.f32.mrf.mxu1 }
0x1ea2   : > { %v13063_v59 = vpop.f32.mrf.mxu1 }
0x1ea4   : > { %v9065_v60 = vpop.f32.mrf.mxu0 }
0x1ea5   : > { %v9164_v28 = vsel %vm1565_vm2, %v9065_v60, 0.0 }
0x1ea6   : > { %v13056_v61 = vpop.f32.mrf.mxu0  ;;  %v9165_v63 = vadd.f32 %v9164_v28, %v9163_v62  ;;  %v11527_v28 = vld [vmem:[%s15584_s19 + $0x4] ss:$0 sm:$0xff] }
0x1ea7   : > { %v11528_v61 = vld [vmem:[%s15584_s19 + $0x5] ss:$0 sm:$0xff] }
0x1ea8   : > { %v9068_v0 = vpop.f32.mrf.mxu0  ;;  %v9167_v4 = vadd.f32 %v9166_v34, %v9165_v63 }
0x1eaa   : > { %v13057_v1 = vpop.f32.mrf.mxu0 }
0x1eac   : > { %v9157_v3 = vpop.f32.mrf.mxu0 }
0x1ead   : > { %v9168_v6 = vsel %vm1565_vm2, %v9157_v3, 0.0 }
0x1eae   : > { %v9169_v7 = vadd.f32 %v9168_v6, %v9167_v4  ;;  %v13068_v9 = vpop.f32.mrf.mxu0  ;;  %v11565_v4 = vld [vmem:[%s15583_s21 + $0x6] ss:$0 sm:$0xff]  ;;  %v11566_v6 = vld [vmem:[%s15583_s21 + $0x7] ss:$0 sm:$0xff] }
0x1eb0   : > { %v9178_v10 = vadd.f32 %v11506_v24, %v9169_v7  ;;  %v9160_v11 = vpop.f32.mrf.mxu0 }
0x1eb2   : > { %v9179_v14 = vpack.c.bf16 %v9178_v10, %v9178_v10  ;;  %v13069_v12 = vpop.f32.mrf.mxu0 }
0x1eb4   : > { %13075 = vmatmul.mubr.msk.bf16.vlgmr.msra.gmra.mxu1 %vm1565_vm2, %v9179_v14  ;;  %13083 = vmatmul.mubr.msk.bf16.vlgmr.msra.gmra.mxu0 %vm1565_vm2, %v9179_v14 }
0x1eb5   : > { %13087 = vmatpush3.bf16.msra.mxu1 %v13498_v8  ;;  %13095 = vmatpush3.bf16.msra.mxu0 %v13499_v13 }
0x1eb6   : > { %13088 = vmatprep.subr.bf16.mxu1 %v13744_v2  ;;  %13096 = vmatprep.subr.bf16.mxu0 %v13744_v2 }
0x1eb7   : > { %13090 = vmatprep.mubr.msk.bf16.mxu1 %vm13745_vm0, %v13744_v2  ;;  %13098 = vmatprep.mubr.msk.bf16.mxu0 %vm13745_vm0, %v13744_v2 }
0x1eb9   : > { %13089 = vmatpush3.bf16.msra.mxu1 %v13500_v15  ;;  %13097 = vmatpush3.bf16.msra.mxu0 %v13501_v16 }
0x1eba   : > { %13102 = vmatprep.subr.bf16.mxu1 %v13744_v2  ;;  %13110 = vmatprep.subr.bf16.mxu0 %v13744_v2 }
0x1ebc   : > { %13091 = vmatmul.mubr.msk.bf16.vlgmr.msra.gmra.mxu1 %vm1565_vm2, %v9179_v14  ;;  %13099 = vmatmul.mubr.msk.bf16.vlgmr.msra.gmra.mxu0 %vm1565_vm2, %v9179_v14 }
0x1ebd   : > { %13103 = vmatpush3.bf16.msra.mxu1 %v13502_v17  ;;  %13111 = vmatpush3.bf16.msra.mxu0 %v13503_v18  ;;  %v11529_v18 = vld [vmem:[%s15584_s19 + $0x6] ss:$0 sm:$0xff] }
0x1ebe   : > { %13104 = vmatprep.subr.bf16.mxu1 %v13744_v2  ;;  %13112 = vmatprep.subr.bf16.mxu0 %v13744_v2 }
0x1ebf   : > { %13106 = vmatprep.mubr.msk.bf16.mxu1 %vm13745_vm0, %v13744_v2  ;;  %13114 = vmatprep.mubr.msk.bf16.mxu0 %vm13745_vm0, %v13744_v2 }
0x1ec1   : > { %13105 = vmatpush3.bf16.msra.mxu1 %v13504_v19  ;;  %13113 = vmatpush3.bf16.msra.mxu0 %v13505_v20  ;;  %v11530_v19 = vld [vmem:[%s15584_s19 + $0x7] ss:$0 sm:$0xff] }
0x1ec2   : > { %13118 = vmatprep.subr.bf16.mxu1 %v13744_v2  ;;  %13126 = vmatprep.subr.bf16.mxu0 %v13744_v2 }
0x1ec4   : > { %13107 = vmatmul.mubr.msk.bf16.vlgmr.msra.gmra.mxu1 %vm1565_vm2, %v14818_v36  ;;  %13115 = vmatmul.mubr.msk.bf16.vlgmr.msra.gmra.mxu0 %vm1565_vm2, %v14818_v36 }
0x1ec5   : > { %13119 = vmatpush3.bf16.msra.mxu1 %v13506_v22  ;;  %13127 = vmatpush3.bf16.msra.mxu0 %v13507_v23 }
0x1ec6   : > { %13120 = vmatprep.subr.bf16.mxu1 %v13744_v2  ;;  %13128 = vmatprep.subr.bf16.mxu0 %v13744_v2 }
0x1ec7   : > { %13122 = vmatprep.mubr.msk.bf16.mxu1 %vm13745_vm0, %v13744_v2  ;;  %13130 = vmatprep.mubr.msk.bf16.mxu0 %vm13745_vm0, %v13744_v2 }
0x1ec9   : > { %13121 = vmatpush3.bf16.msra.mxu1 %v13508_v25  ;;  %13129 = vmatpush3.bf16.msra.mxu0 %v13509_v26 }
0x1eca   : > { %13134 = vmatprep.subr.bf16.mxu1 %v13744_v2  ;;  %13142 = vmatprep.subr.bf16.mxu0 %v13744_v2 }
0x1ecc   : > { %13123 = vmatmul.mubr.msk.bf16.vlgmr.msra.gmra.mxu1 %vm1565_vm2, %v14818_v36  ;;  %13131 = vmatmul.mubr.msk.bf16.vlgmr.msra.gmra.mxu0 %vm1565_vm2, %v14818_v36 }
0x1ecd   : > { %13135 = vmatpush3.bf16.msra.mxu1 %v13510_v5  ;;  %13143 = vmatpush3.bf16.msra.mxu0 %v13511_v30  ;;  %v11599_v30 = vld [vmem:[%s15585_s24 + $0x4] ss:$0 sm:$0xff] }
0x1ece   : > { %13136 = vmatprep.subr.bf16.mxu1 %v13744_v2  ;;  %13144 = vmatprep.subr.bf16.mxu0 %v13744_v2 }
0x1ecf   : > { %13138 = vmatprep.mubr.msk.bf16.mxu1 %vm13745_vm0, %v13744_v2  ;;  %13146 = vmatprep.mubr.msk.bf16.mxu0 %vm13745_vm0, %v13744_v2 }
0x1ed1   : > { %13137 = vmatpush3.bf16.msra.mxu1 %v13512_v32  ;;  %13145 = vmatpush3.bf16.msra.mxu0 %v13513_v35  ;;  %v11600_v32 = vld [vmem:[%s15585_s24 + $0x5] ss:$0 sm:$0xff] }
0x1ed2   : > { %13150 = vmatprep.subr.bf16.mxu1 %v13744_v2  ;;  %13158 = vmatprep.subr.bf16.mxu0 %v13744_v2 }
0x1ed4   : > { %13139 = vmatmul.mubr.msk.bf16.vlgmr.msra.gmra.mxu1 %vm1565_vm2, %v14818_v36  ;;  %13147 = vmatmul.mubr.msk.bf16.vlgmr.msra.gmra.mxu0 %vm1565_vm2, %v14818_v36 }
0x1ed5   : > { %13151 = vmatpush3.bf16.msra.mxu1 %v13514_v29  ;;  %13159 = vmatpush3.bf16.msra.mxu0 %v13515_v37 }
0x1ed6   : > { %13152 = vmatprep.subr.bf16.mxu1 %v13744_v2  ;;  %13160 = vmatprep.subr.bf16.mxu0 %v13744_v2 }
0x1ed7   : > { %13154 = vmatprep.mubr.msk.bf16.mxu1 %vm13745_vm0, %v13744_v2  ;;  %13162 = vmatprep.mubr.msk.bf16.mxu0 %vm13745_vm0, %v13744_v2 }
0x1ed9   : > { %13153 = vmatpush3.bf16.msra.mxu1 %v13516_v38  ;;  %13161 = vmatpush3.bf16.msra.mxu0 %v13517_v39 }
0x1eda   : > { %13166 = vmatprep.subr.bf16.mxu1 %v13744_v2  ;;  %13172 = vmatprep.subr.bf16.mxu0 %v13744_v2 }
0x1edc   : > { %13155 = vmatmul.mubr.msk.bf16.vlgmr.msra.gmra.mxu1 %vm1565_vm2, %v14818_v36  ;;  %13163 = vmatmul.mubr.msk.bf16.vlgmr.msra.gmra.mxu0 %vm1565_vm2, %v14818_v36 }
0x1edd   : > { %13168 = vmatprep.mubr.msk.bf16.mxu1 %vm13745_vm0, %v13744_v2  ;;  %13174 = vmatprep.mubr.msk.bf16.mxu0 %vm13745_vm0, %v13744_v2 }
0x1f74   : > { %v9275_v33 = vpop.f32.mrf.mxu1  ;;  %v9327_v40 = vpop.f32.mrf.mxu0 }
0x1f75   : > { %v9276_v24 = vadd.f32 %v11527_v28, %v9275_v33  ;;  %v9328_v7 = vadd.f32 %v11528_v61, %v9327_v40 }
0x1f76   : > { %v13076_v41 = vpop.f32.mrf.mxu1  ;;  %v13084_v42 = vpop.f32.mrf.mxu0 }
0x1f77   : > { %v9945_v12 = vpack.c.bf16 %v9276_v24, %v9276_v24  ;;  %v9946_v15 = vpack.c.bf16 %v9328_v7, %v9328_v7 }
0x1f78   : > { %v9278_v43 = vpop.f32.mrf.mxu1  ;;  %v9330_v27 = vpop.f32.mrf.mxu0 }
0x1f7a   : > { %v13077_v44 = vpop.f32.mrf.mxu1  ;;  %v13085_v45 = vpop.f32.mrf.mxu0 }
0x1f7c   : > { %v9379_v46 = vpop.f32.mrf.mxu1  ;;  %v9431_v47 = vpop.f32.mrf.mxu0 }
0x1f7d   : > { %v9380_v35 = vadd.f32 %v11529_v18, %v9379_v46  ;;  %v9432_v29 = vadd.f32 %v11530_v19, %v9431_v47 }
0x1f7e   : > { %v13092_v31 = vpop.f32.mrf.mxu1  ;;  %v13100_v36 = vpop.f32.mrf.mxu0 }
0x1f7f   : > { %v9947_v42 = vpack.c.bf16 %v9380_v35, %v9380_v35  ;;  %v9948_v43 = vpack.c.bf16 %v9432_v29, %v9432_v29 }
0x1f80   : > { %v9382_v48 = vpop.f32.mrf.mxu1  ;;  %v9434_v49 = vpop.f32.mrf.mxu0 }
0x1f82   : > { %v13093_v50 = vpop.f32.mrf.mxu1  ;;  %v13101_v51 = vpop.f32.mrf.mxu0 }
0x1f84   : > { %v9529_v21 = vpop.f32.mrf.mxu1  ;;  %v9581_v55 = vpop.f32.mrf.mxu0 }
0x1f85   : > { %v9530_v52 = vadd.f32 %v11563_v53, %v9529_v21  ;;  %v9582_v57 = vadd.f32 %v11564_v54, %v9581_v55 }
0x1f86   : > { %v13108_v58 = vpop.f32.mrf.mxu1  ;;  %v13116_v56 = vpop.f32.mrf.mxu0 }
0x1f87   : > { %v9949_v59 = vpack.c.bf16 %v9530_v52, %v9530_v52  ;;  %v9950_v60 = vpack.c.bf16 %v9582_v57, %v9582_v57 }
0x1f88   : > { %v9532_v62 = vpop.f32.mrf.mxu1  ;;  %v9584_v63 = vpop.f32.mrf.mxu0 }
0x1f89   : > { %v9957_v0 = vsel %vm2277_vm3, %v9949_v59, 0  ;;  %v10003_v1 = vsel %vm2277_vm3, %v9950_v60, 0 }
0x1f8a   : > { %v13109_v34 = vpop.f32.mrf.mxu1  ;;  %v13117_v3 = vpop.f32.mrf.mxu0  ;;  %13167 = vmatpush3.bf16.xpose.msra.mxu1 %v9957_v0  ;;  %13173 = vmatpush3.bf16.xpose.msra.mxu0 %v10003_v1 }
0x1f8b   : > { %13178 = vmatprep.subr.bf16.mxu1 %v13744_v2  ;;  %13184 = vmatprep.subr.bf16.mxu0 %v13744_v2 }
0x1f8c   : > { %v9633_v9 = vpop.f32.mrf.mxu1  ;;  %v9685_v10 = vpop.f32.mrf.mxu0 }
0x1f8d   : > { %v9634_v11 = vadd.f32 %v11565_v4, %v9633_v9  ;;  %v9686_v8 = vadd.f32 %v11566_v6, %v9685_v10 }
0x1f8e   : > { %v13124_v13 = vpop.f32.mrf.mxu1  ;;  %v13132_v14 = vpop.f32.mrf.mxu0 }
0x1f8f   : > { %v9951_v16 = vpack.c.bf16 %v9634_v11, %v9634_v11  ;;  %v9952_v17 = vpack.c.bf16 %v9686_v8, %v9686_v8 }
0x1f90   : > { %v9636_v20 = vpop.f32.mrf.mxu1  ;;  %v9688_v22 = vpop.f32.mrf.mxu0 }
0x1f91   : > { %v10049_v23 = vsel %vm2277_vm3, %v9951_v16, 0  ;;  %v10095_v25 = vsel %vm2277_vm3, %v9952_v17, 0  ;;  %13169 = vmatmul.mubr.msk.bf16.vlgmr.msra.gmra.mxu1 %vm2277_vm3, %v9945_v12  ;;  %13175 = vmatmul.mubr.msk.bf16.vlgmr.msra.gmra.mxu0 %vm2277_vm3, %v9946_v15 }
0x1f92   : > { %v13125_v26 = vpop.f32.mrf.mxu1  ;;  %v13133_v5 = vpop.f32.mrf.mxu0  ;;  %13179 = vmatpush3.bf16.xpose.msra.mxu1 %v10049_v23  ;;  %13185 = vmatpush3.bf16.xpose.msra.mxu0 %v10095_v25 }
0x1f93   : > { %13180 = vmatprep.mubr.msk.bf16.mxu1 %vm13745_vm0, %v13744_v2  ;;  %13186 = vmatprep.mubr.msk.bf16.mxu0 %vm13745_vm0, %v13744_v2 }
0x1f94   : > { %v9783_v37 = vpop.f32.mrf.mxu1  ;;  %v9835_v38 = vpop.f32.mrf.mxu0  ;;  %13190 = vmatprep.subr.bf16.mxu1 %v13744_v2  ;;  %13196 = vmatprep.subr.bf16.mxu0 %v13744_v2 }
0x1f95   : > { %v9784_v39 = vadd.f32 %v11599_v30, %v9783_v37  ;;  %v9836_v33 = vadd.f32 %v11600_v32, %v9835_v38 }
0x1f96   : > { %v13140_v40 = vpop.f32.mrf.mxu1  ;;  %v13148_v41 = vpop.f32.mrf.mxu0 }
0x1f97   : > { %v10185_v27 = vpack.c.bf16 %v9784_v39, %v9784_v39  ;;  %v10186_v44 = vpack.c.bf16 %v9836_v33, %v9836_v33  ;;  %v11601_v33 = vld [vmem:[%s15585_s24 + $0x6] ss:$0 sm:$0xff]  ;;  %v11602_v41 = vld [vmem:[%s15585_s24 + $0x7] ss:$0 sm:$0xff] }
0x1f98   : > { %v9786_v45 = vpop.f32.mrf.mxu1  ;;  %v9838_v46 = vpop.f32.mrf.mxu0 }
0x1f99   : > { %v10193_v47 = vsel %vm2517_vm4, %v10185_v27, 0  ;;  %v10239_v31 = vsel %vm2517_vm4, %v10186_v44, 0  ;;  %13181 = vmatmul.mubr.msk.bf16.vlgmr.msra.gmra.mxu1 %vm2277_vm3, %v9947_v42  ;;  %13187 = vmatmul.mubr.msk.bf16.vlgmr.msra.gmra.mxu0 %vm2277_vm3, %v9948_v43 }
0x1f9a   : > { %v13141_v36 = vpop.f32.mrf.mxu1  ;;  %v13149_v48 = vpop.f32.mrf.mxu0  ;;  %13191 = vmatpush3.bf16.msra.mxu1 %v10193_v47  ;;  %13197 = vmatpush3.bf16.msra.mxu0 %v10239_v31 }
0x1f9b   : > { %13192 = vmatprep.mubr.msk.bf16.mxu1 %vm13745_vm0, %v13744_v2  ;;  %13198 = vmatprep.mubr.msk.bf16.mxu0 %vm13745_vm0, %v13744_v2 }
0x1f9c   : > { %v15310_v49 = vpop.f32.mrf.mxu1  ;;  %v15312_v50 = vpop.f32.mrf.mxu0  ;;  %13202 = vmatprep.subr.bf16.mxu1 %v13744_v2  ;;  %13208 = vmatprep.subr.bf16.mxu0 %v13744_v2 }
0x1f9d   : > { %v9888_v43 = vadd.f32 %v11601_v33, %v15310_v49  ;;  %v9940_v27 = vadd.f32 %v11602_v41, %v15312_v50  ;;  %v11623_v50 = vld [vmem:[%s15586_s25 + $0x10] sm:$0xf] }
0x1f9e   : > { %v13156_v51 = vpop.f32.mrf.mxu1  ;;  %v13164_v53 = vpop.f32.mrf.mxu0 }
0x1f9f   : > { %v10187_v46 = vpack.c.bf16 %v9888_v43, %v9888_v43  ;;  %v10188_v31 = vpack.c.bf16 %v9940_v27, %v9940_v27 }
0x1fa0   : > { %v9890_v54 = vpop.f32.mrf.mxu1  ;;  %v9942_v21 = vpop.f32.mrf.mxu0 }
0x1fa1   : > { %v10285_v53 = vsel %vm2517_vm4, %v10187_v46, 0  ;;  %v10331_v54 = vsel %vm2517_vm4, %v10188_v31, 0  ;;  %v11632_v46 = vld [vmem:[%s15589_s30 + $0x1] ss:$0 sm:$0xff] }
0x1fa2   : > { %v13157_v55 = vpop.f32.mrf.mxu1  ;;  %v13165_v52 = vpop.f32.mrf.mxu0 }
0x1fa3   : > { %v11624_v52 = vld [vmem:[%s15586_s25 + $0x14] sm:$0xf] }
0x2051   : > { %v9993_v57 = vpop.f32.mrf.mxu1  ;;  %v10039_v58 = vpop.f32.mrf.mxu0 }
0x2052   : > { %v10137_v56 = vsel %vm2277_vm3, %v9993_v57, -inf  ;;  %v10140_v59 = vsel %vm2277_vm3, %v10039_v58, -inf }
0x2053   : > { %10138 = vmax.xlane.f32.xlu0 %v10137_v56  ;;  %v13170_v60 = vpop.f32.mrf.mxu1  ;;  %10141 = vmax.xlane.f32.xlu1 %v10140_v59  ;;  %v13176_v28 = vpop.f32.mrf.mxu0  ;;  %v10386_v56 = vsel %vm2517_vm4, %v11623_v50, 0  ;;  %v13522_v50 = vld [vmem:[%s15588_s29 + $0x28] sm:$0xff]  }
0x2054   : > { %v10432_v60 = vsel %vm2517_vm4, %v11624_v52, 0  ;;  %v11625_v28 = vld [vmem:[%s15586_s25 + $0x18] sm:$0xf] }
0x2055   : > { %v9996_v61 = vpop.f32.mrf.mxu1  ;;  %v10042_v62 = vpop.f32.mrf.mxu0 }
0x2056   : > { %v11626_v61 = vld [vmem:[%s15586_s25 + $0x1c] sm:$0xf] }
0x2057   : > { %v13171_v63 = vpop.f32.mrf.mxu1  ;;  %v13177_v0 = vpop.f32.mrf.mxu0 }
0x2059   : > { %v10085_v1 = vpop.f32.mrf.mxu1  ;;  %v10131_v34 = vpop.f32.mrf.mxu0 }
0x205a   : > { %v10143_v3 = vsel %vm2277_vm3, %v10085_v1, -inf  ;;  %v10146_v4 = vsel %vm2277_vm3, %v10131_v34, -inf }
0x205b   : > { %10144 = vmax.xlane.f32.xlu0 %v10143_v3  ;;  %v13182_v6 = vpop.f32.mrf.mxu1  ;;  %10147 = vmax.xlane.f32.xlu1 %v10146_v4  ;;  %v13188_v24 = vpop.f32.mrf.mxu0  ;;  %v10524_v4 = vsel %vm2517_vm4, %v11626_v61, 0  ;;  %v11651_v61 = vld [vmem:[%s15592_s26 + $0x1] ss:$0 sm:$0xff] }
0x205d   : > { %v10088_v7 = vpop.f32.mrf.mxu1  ;;  %v10134_v9 = vpop.f32.mrf.mxu0 }
0x205f   : > { %v13183_v10 = vpop.f32.mrf.mxu1  ;;  %v13189_v11 = vpop.f32.mrf.mxu0 }
0x20dc   : > { %v10139_v8 = vpop.xlane.xlu0 %10138  ;;  %v10142_v13 = vpop.xlane.xlu1 %10141 }
0x20dd   : > { %v10149_v14 = vsub.f32 %v9993_v57, %v10139_v8  ;;  %v10150_v12 = vsub.f32 %v10039_v58, %v10142_v13 }
0x20df   : > { %v10153_v15 = vmul.f32 1.442695, %v10149_v14  ;;  %v10155_v16 = vmul.f32 1.442695, %v10150_v12 }
0x20e1   : > { %13614 = vpow2.f32 %v10153_v15 }
0x20e2   : > { %13616 = vpow2.f32 %v10155_v16 }
0x20e4   : > { %v10145_v17 = vpop.xlane.xlu0 %10144  ;;  %v10148_v18 = vpop.xlane.xlu1 %10147 }
0x20e5   : > { %v10151_v19 = vsub.f32 %v10085_v1, %v10145_v17  ;;  %v10152_v20 = vsub.f32 %v10131_v34, %v10148_v18  ;;  %v10478_v1 = vsel %vm2517_vm4, %v11625_v28, 0 }
0x20e7   : > { %v10157_v22 = vmul.f32 1.442695, %v10151_v19  ;;  %v10159_v23 = vmul.f32 1.442695, %v10152_v20  ;;  %v13518_v20 = vld [vmem:[%s15587_s28 + $0x18] sm:$0xff]  }
0x20e9   : > { %13618 = vpow2.f32 %v10157_v22  ;;  %v13519_v22 = vld [vmem:[%s15587_s28 + $0x10] sm:$0xff]  }
0x20ea   : > { %13620 = vpow2.f32 %v10159_v23  ;;  %v13520_v23 = vld [vmem:[%s15588_s29 + $0x38] sm:$0xff]  }
0x20ee   : > { %v13615_v25 = vpop.eup %13614 }
0x20ef   : > { %v13617_v26 = vpop.eup %13616  ;;  %v10161_v5 = vsel %vm2277_vm3, %v13615_v25, 0.0 }
0x20f0   : > { %10162 = vadd.xlane.f32.xlu0 %v10161_v5  ;;  %v10164_v30 = vsel %vm2277_vm3, %v13617_v26, 0.0 }
0x20f1   : > { %10165 = vadd.xlane.f32.xlu1 %v10164_v30 }
0x20f6   : > { %v13619_v32 = vpop.eup %13618 }
0x20f7   : > { %v13621_v35 = vpop.eup %13620  ;;  %v10167_v29 = vsel %vm2277_vm3, %v13619_v32, 0.0 }
0x20f8   : > { %10168 = vadd.xlane.f32.xlu0 %v10167_v29  ;;  %v10170_v37 = vsel %vm2277_vm3, %v13621_v35, 0.0 }
0x20f9   : > { %10171 = vadd.xlane.f32.xlu1 %v10170_v37 }
0x2179   : > { %v10163_v38 = vpop.xlane.xlu0 %10162 }
0x217a   : > { %13622 = vrcp.f32 %v10163_v38  ;;  %v10166_v39 = vpop.xlane.xlu1 %10165 }
0x217b   : > { %13624 = vrcp.f32 %v10166_v39 }
0x2181   : > { %v10169_v40 = vpop.xlane.xlu0 %10168 }
0x2182   : > { %13626 = vrcp.f32 %v10169_v40  ;;  %v10172_v42 = vpop.xlane.xlu1 %10171 }
0x2183   : > { %13628 = vrcp.f32 %v10172_v42 }
0x2187   : > { %v13623_v44 = vpop.eup %13622 }
0x2188   : > { %v13625_v45 = vpop.eup %13624  ;;  %v10174_v47 = vmul.f32 %v13623_v44, %v13615_v25  ;;  %v13521_v25 = vld [vmem:[%s15588_s29 + $0x30] sm:$0xff]  }
0x2189   : > { %v10176_v36 = vmul.f32 %v13625_v45, %v13617_v26 }
0x218a   : > { %v10181_v48 = vpack.c.bf16 %v10174_v47, %v10174_v47 }
0x218b   : > { %v10182_v51 = vpack.c.bf16 %v10176_v36, %v10176_v36 }
0x218c   : > { %13193 = vmatmul.mubr.msk.bf16.vlgmr.msra.gmra.mxu1 %vm2277_vm3, %v10181_v48 }
0x218d   : > { %13199 = vmatmul.mubr.msk.bf16.vlgmr.msra.gmra.mxu0 %vm2277_vm3, %v10182_v51  ;;  %13203 = vmatpush3.bf16.msra.mxu1 %v10285_v53 }
0x218e   : > { %13209 = vmatpush3.bf16.msra.mxu0 %v10331_v54  ;;  %13204 = vmatprep.mubr.msk.bf16.mxu1 %vm13745_vm0, %v13744_v2 }
0x218f   : > { %v13627_v49 = vpop.eup %13626  ;;  %13210 = vmatprep.mubr.msk.bf16.mxu0 %vm13745_vm0, %v13744_v2  ;;  %13214 = vmatprep.subr.bf16.mxu1 %v13744_v2 }
0x2190   : > { %v13629_v21 = vpop.eup %13628  ;;  %v10178_v55 = vmul.f32 %v13627_v49, %v13619_v32  ;;  %13220 = vmatprep.subr.bf16.mxu0 %v13744_v2 }
0x2191   : > { %v10180_v57 = vmul.f32 %v13629_v21, %v13621_v35  ;;  %v13523_v21 = vld [vmem:[%s15588_s29 + $0x20] sm:$0xff]  }
0x2192   : > { %v10183_v58 = vpack.c.bf16 %v10178_v55, %v10178_v55  ;;  %v11638_v55 = vld [vmem:[%s15590_s2 + $0x1] ss:$0 sm:$0xff]  ;;  %s11010_s2 = sshll.u32 %s1391_s18, 3 }
0x2193   : > { %v10184_v59 = vpack.c.bf16 %v10180_v57, %v10180_v57  ;;  %s1393_s5 = scalar_lea.vmem [#allocation2], %s11010_s2  ;;  %s13639_s2 = sshll.u32 %s13747_s0, 4  ;;  %s13640_s2 = int_to_ptr.vmem [resolvable:$false] %s13639_s2 }
0x2194   : > { %13205 = vmatmul.mubr.msk.bf16.vlgmr.msra.gmra.mxu1 %vm2277_vm3, %v10183_v58  ;;  %s10880_s6 = sshll.u32 %s1393_s5, 4  ;;  %s15408_s6 = int_to_ptr.vmem [resolvable:$true] %s10880_s6 }
0x2195   : > { %13211 = vmatmul.mubr.msk.bf16.vlgmr.msra.gmra.mxu0 %vm2277_vm3, %v10184_v59  ;;  %13215 = vmatpush3.bf16.msra.mxu1 %v10386_v56  ;;  %s13635_s8 = scalar_lea.vmem %s15408_s6, 128  ;;  %p13642_p0 = scmp.lt.s32.totalorder %s15408_s6, %s13640_s2 }
0x2196   : > { %13221 = vmatpush3.bf16.msra.mxu0 %v10432_v60  ;;  %13216 = vmatprep.mubr.msk.bf16.mxu1 %vm13745_vm0, %v13744_v2  ;;  %p13636_p11 = scmp.ne.s32.totalorder %s15408_s6, %s13635_s8 }
0x2197   : > { %13222 = vmatprep.mubr.msk.bf16.mxu0 %vm13745_vm0, %v13744_v2  ;;  %13226 = vmatprep.subr.bf16.mxu1 %v13744_v2 }
0x2198   : > { %13232 = vmatprep.subr.bf16.mxu0 %v13744_v2  ;;  %p13637_p12 = pnand %p13636_p11, %p14026_p5 }
0x219a   : > { %p13638_p13 = pneg %p13637_p12 }
0x224c   : > { %v10229_v62 = vpop.f32.mrf.mxu1 }
0x224d   : > { %v10373_v63 = vpack.c.bf16 %v10229_v62, %v10229_v62  ;;  %v10275_v0 = vpop.f32.mrf.mxu0 }
0x224e   : > { %v10374_v34 = vpack.c.bf16 %v10275_v0, %v10275_v0  ;;  %v13194_v3 = vpop.f32.mrf.mxu1 }
0x224f   : > { %v13200_v6 = vpop.f32.mrf.mxu0  ;;  %13217 = vmatmul.mubr.msk.bf16.vlgmr.msra.gmra.mxu1 %vm2277_vm3, %v10373_v63 }
0x2250   : > { %13223 = vmatmul.mubr.msk.bf16.vlgmr.msra.gmra.mxu0 %vm2277_vm3, %v10374_v34  ;;  %v10232_v24 = vpop.f32.mrf.mxu1  ;;  %13227 = vmatpush3.bf16.msra.mxu1 %v10478_v1 }
0x2251   : > { %v10278_v7 = vpop.f32.mrf.mxu0  ;;  %13233 = vmatpush3.bf16.msra.mxu0 %v10524_v4  ;;  %13228 = vmatprep.mubr.msk.bf16.mxu1 %vm13745_vm0, %v13744_v2 }
0x2252   : > { %v13195_v9 = vpop.f32.mrf.mxu1  ;;  %13234 = vmatprep.mubr.msk.bf16.mxu0 %vm13745_vm0, %v13744_v2  ;;  %13238 = vmatprep.subr.bf16.mxu1 %v13744_v2 }
0x2253   : > { %v13201_v10 = vpop.f32.mrf.mxu0  ;;  %13246 = vmatprep.subr.bf16.mxu0 %v13744_v2 }
0x2254   : > { %v10321_v11 = vpop.f32.mrf.mxu1 }
0x2255   : > { %v10375_v8 = vpack.c.bf16 %v10321_v11, %v10321_v11  ;;  %v10367_v13 = vpop.f32.mrf.mxu0 }
0x2256   : > { %v10376_v14 = vpack.c.bf16 %v10367_v13, %v10367_v13  ;;  %v13206_v12 = vpop.f32.mrf.mxu1 }
0x2257   : > { %v13212_v15 = vpop.f32.mrf.mxu0  ;;  %13229 = vmatmul.mubr.msk.bf16.vlgmr.msra.gmra.mxu1 %vm2277_vm3, %v10375_v8  ;;  %v11659_v12 = vld [vmem:[%s15594_s10 + $0x1] ss:$0 sm:$0xff] }
0x2258   : > { %13235 = vmatmul.mubr.msk.bf16.vlgmr.msra.gmra.mxu0 %vm2277_vm3, %v10376_v14  ;;  %v10324_v16 = vpop.f32.mrf.mxu1  ;;  %13242 = vmatprep.mubr.msk.bf16.mxu1 %vm13745_vm0, %v13744_v2 }
0x2259   : > { %v10370_v17 = vpop.f32.mrf.mxu0  ;;  %13254 = vmatprep.mubr.msk.bf16.mxu0 %vm13745_vm0, %v13744_v2  ;;  %13239 = vmatpush3.bf16.msra.mxu1 %v13518_v20  ;;  %v11660_v16 = vld [vmem:[%s15596_s7 + $0x1] ss:$0 sm:$0xff]  ;;  %s15406_s7 = scalar_lea.hbm %s13986_s9, %s11668_s3 }
0x225a   : > { %v13207_v18 = vpop.f32.mrf.mxu1  ;;  %13240 = vmatprep.subr.bf16.mxu1 %v13744_v2  ;;  %13247 = vmatpush3.bf16.msra.mxu0 %v13520_v23 }
0x225b   : > { %v13213_v19 = vpop.f32.mrf.mxu0  ;;  %13248 = vmatprep.subr.bf16.mxu0 %v13744_v2 }
0x225d   : > { %13241 = vmatpush3.bf16.msra.mxu1 %v13519_v22 }
0x225e   : > { %13258 = vmatprep.subr.bf16.mxu1 %v13744_v2  ;;  %13249 = vmatpush3.bf16.msra.mxu0 %v13521_v25 }
0x225f   : > { %13250 = vmatprep.subr.bf16.mxu0 %v13744_v2 }
0x2262   : > { %13251 = vmatpush3.bf16.msra.mxu0 %v13522_v50 }
0x2263   : > { %13252 = vmatprep.subr.bf16.mxu0 %v13744_v2 }
0x2266   : > { %13253 = vmatpush3.bf16.msra.mxu0 %v13523_v21 }
0x230f   : > { %v10422_v26 = vpop.f32.mrf.mxu1 }
0x2310   : > { %v10468_v5 = vpop.f32.mrf.mxu0  ;;  %v10566_v29 = vsel %vm1565_vm2, %v10422_v26, 0.0 }
0x2311   : > { %v13218_v30 = vpop.f32.mrf.mxu1  ;;  %v10567_v37 = vsel %vm1565_vm2, %v10468_v5, 0.0  ;;  %v13524_v5 = vld [vmem:[%s13976_s27 + $0x8] sm:$0xff]  }
0x2312   : > { %v13224_v32 = vpop.f32.mrf.mxu0  ;;  %v10568_v40 = vadd.f32 %v10567_v37, %v10566_v29  ;;  %v13525_v30 = vld [vmem:[%s13976_s27] sm:$0xff]  }
0x2313   : > { %v10425_v35 = vpop.f32.mrf.mxu1 }
0x2314   : > { %v10471_v38 = vpop.f32.mrf.mxu0 }
0x2315   : > { %v13219_v39 = vpop.f32.mrf.mxu1  ;;  %v11661_v38 = vld [vmem:[%s15597_s15] ss:$0 sm:$0xff]  ;;  %s10867_s15 = scalar_lea.sflag [#allocation3], %s1391_s18 }
0x2316   : > { %v13225_v33 = vpop.f32.mrf.mxu0 }
0x2317   : > { %v10514_v41 = vpop.f32.mrf.mxu1  ;;  %v11662_v33 = vld [vmem:[%s13971_s20] ss:$0 sm:$0xff] }
0x2318   : > { %v10569_v42 = vsel %vm1565_vm2, %v10514_v41, 0.0  ;;  %v10560_v43 = vpop.f32.mrf.mxu0 }
0x2319   : > { %v10570_v27 = vadd.f32 %v10569_v42, %v10568_v40  ;;  %v13230_v44 = vpop.f32.mrf.mxu1  ;;  %v10571_v45 = vsel %vm1565_vm2, %v10560_v43, 0.0 }
0x231a   : > { %v13236_v47 = vpop.f32.mrf.mxu0 }
0x231b   : > { %v10572_v31 = vadd.f32 %v10571_v45, %v10570_v27  ;;  %v10517_v36 = vpop.f32.mrf.mxu1 }
0x231c   : > { %v10563_v48 = vpop.f32.mrf.mxu0 }
0x231d   : > { %v10581_v51 = vadd.f32 %v11632_v46, %v10572_v31  ;;  %v13231_v53 = vpop.f32.mrf.mxu1 }
0x231e   : > { %v13237_v54 = vpop.f32.mrf.mxu0 }
0x231f   : > { %v10582_v49 = vpack.c.bf16 %v10581_v51, %v10581_v51 }
0x2321   : > { %13243 = vmatmul.mubr.msk.bf16.vlgmr.msra.gmra.mxu1 %vm1565_vm2, %v10582_v49 }
0x2322   : > { %13262 = vmatprep.mubr.msk.bf16.mxu1 %vm13745_vm0, %v13744_v2  ;;  %13259 = vmatpush3.bf16.msra.mxu1 %v13524_v5 }
0x2323   : > { %13260 = vmatprep.subr.bf16.mxu1 %v13744_v2  ;;  %v11663_v2 = vld [vmem:[%s15598_s4] ss:$0 sm:$0xff]  ;;  %s13641_s4 = scalar_lea.vmem %s13640_s2, 256 }
0x2324   : > { %p13643_p1 = scmp.lt.s32.totalorder %s13641_s4, %s13635_s8 }
0x2326   : > { %13261 = vmatpush3.bf16.msra.mxu1 %v13525_v30  ;;  %p13644_p2 = por %p13643_p1, %p13642_p0 }
0x2328   : > { %p13645_p3 = pnand %p13644_p2, %p13638_p13 }
0x23e1   : > { %v10645_v52 = vpop.f32.mrf.mxu1 }
0x23e2   : > { %v10646_v57 = vadd.f32 %v11638_v55, %v10645_v52 }
0x23e3   : > { %v13244_v58 = vpop.f32.mrf.mxu1 }
0x23e4   : > { %v10651_v56 = vmax.f32 %v10646_v57, 0.0 }
0x23e5   : > { %v10648_v59 = vpop.f32.mrf.mxu1 }
0x23e6   : > { %v10652_v60 = vpack.c.bf16 %v10651_v56, %v10651_v56 }
0x23e7   : > { %v13245_v28 = vpop.f32.mrf.mxu1 }
0x23e8   : > { %13255 = vmatmul.mubr.msk.bf16.vlgmr.msra.gmra.mxu0 %vm3014_vm5, %v10652_v60 }
0x24a8   : > { %v10731_v62 = vpop.f32.mrf.mxu0 }
0x24a9   : > { %v10732_v63 = vadd.f32 %v11651_v61, %v10731_v62 }
0x24aa   : > { %v13256_v0 = vpop.f32.mrf.mxu0 }
0x24ab   : > { %v10737_v1 = vadd.f32 %v10732_v63, %v10581_v51 }
0x24ac   : > { %v10734_v34 = vpop.f32.mrf.mxu0 }
0x24ad   : > { %v10742_v3 = vsel %vm1565_vm2, %v10737_v1, 0.0 }
0x24ae   : > { %10743 = vadd.xlane.f32.xlu0 %v10742_v3  ;;  %v13257_v4 = vpop.f32.mrf.mxu0 }
0x2537   : > { %v10744_v6 = vpop.xlane.xlu0 %10743 }
0x2538   : > { %v10745_v24 = vmul.f32 0.03125, %v10744_v6 }
0x253a   : > { %v10746_v7 = vsub.f32 %v10737_v1, %v10745_v24 }
0x253c   : > { %v10747_v9 = vmul.f32 %v10746_v7, %v10746_v7 }
0x253e   : > { %v10748_v10 = vsel %vm1565_vm2, %v10747_v9, 0.0 }
0x253f   : > { %10749 = vadd.xlane.f32.xlu1 %v10748_v10 }
0x25c8   : > { %v10750_v11 = vpop.xlane.xlu1 %10749 }
0x25c9   : > { %v10751_v8 = vmul.f32 0.03125, %v10750_v11 }
0x25cb   : > { %v10752_v13 = vadd.f32 1e-05, %v10751_v8 }
0x25cd   : > { %13630 = vrsqrt.f32 %v10752_v13 }
0x25da   : > { %v13631_v14 = vpop.eup %13630 }
0x25db   : > { %v10754_v15 = vmul.f32 %v13631_v14, %v10746_v7 }
0x25dd   : > { %v10761_v17 = vmul.f32 %v11659_v12, %v10754_v15 }
0x25df   : > { %v10768_v18 = vadd.f32 %v11660_v16, %v10761_v17 }
0x25e1   : > { %v10771_v19 = vsel %vm1565_vm2, %v10768_v18, 0.0 }
0x25e2   : > { %10772 = vadd.xlane.f32.xlu0 %v10771_v19 }
0x266b   : > { %v10773_v20 = vpop.xlane.xlu0 %10772 }
0x266c   : > { %v10774_v22 = vmul.f32 0.03125, %v10773_v20 }
0x266e   : > { %v10775_v23 = vsub.f32 %v10768_v18, %v10774_v22 }
0x2670   : > { %v10776_v25 = vmul.f32 %v10775_v23, %v10775_v23 }
0x2672   : > { %v10777_v26 = vsel %vm1565_vm2, %v10776_v25, 0.0 }
0x2673   : > { %10778 = vadd.xlane.f32.xlu1 %v10777_v26 }
0x26fc   : > { %v10779_v32 = vpop.xlane.xlu1 %10778 }
0x26fd   : > { %v10780_v35 = vmul.f32 0.03125, %v10779_v32 }
0x26ff   : > { %v10781_v29 = vadd.f32 1e-05, %v10780_v35 }
0x2701   : > { %13632 = vrsqrt.f32 %v10781_v29 }
0x270e   : > { %v13633_v37 = vpop.eup %13632 }
0x270f   : > { %v10783_v39 = vmul.f32 %v13633_v37, %v10775_v23 }
0x2711   : > { %v10790_v40 = vmul.f32 %v11661_v38, %v10783_v39 }
0x2713   : > { %v10797_v41 = vadd.f32 %v11662_v33, %v10790_v40 }
0x2715   : > { %v10798_v42 = vpack.c.bf16 %v10797_v41, %v10797_v41 }
0x2717   : > { %13263 = vmatmul.mubr.msk.bf16.vlgmr.msra.gmra.mxu1 %vm1565_vm2, %v10798_v42 }
0x27d7   : > { %v10859_v43 = vpop.f32.mrf.mxu1 }
0x27d8   : > { %v10860_v27 = vadd.f32 %v11663_v2, %v10859_v43 }
0x27d9   : > { %v13264_v44 = vpop.f32.mrf.mxu1 }
0x27da   : > { %10865 = vst [vmem:[%s1393_s5] sm:$0xff] %v10860_v27 }
0x27db   : > { %v10862_v45 = vpop.f32.mrf.mxu1 }
0x27dc   : > { %13648 = shalt.err (!%p13645_p3)
}
0x27dd   : > { %s13649_s5 = scalar_lea.hbm %s15406_s7, 128  ;;  %s13653_s3 = scalar_lea.hbm %s13986_s9, 256 }
0x27de   : > { %p13650_p4 = scmp.ne.s32.totalorder %s15406_s7, %s13649_s5  ;;  %p13654_p9 = scmp.lt.s32.totalorder %s15406_s7, %s13986_s9 }
0x27df   : > { %p13655_p10 = scmp.lt.s32.totalorder %s13653_s3, %s13649_s5 }
0x27e0   : > { %p13651_p7 = pnand %p13650_p4, %p14026_p5 }
0x27e1   : > { %p13656_p11 = por %p13655_p10, %p13654_p9 }
0x27e2   : > { %p13652_p8 = pneg %p13651_p7 }
0x27e4   : > { %p13657_p12 = pnand %p13656_p11, %p13652_p8 }
0x27e6   : > { %13660 = shalt.err (!%p13657_p12)
}
0x27e7   : > { %13266 = dma.vmem_to_hbm [thread:$0]  (%p14026_p5), %s15408_s6, 128, %s15406_s7, %s10867_s15   ;;  %v13265_v46 = vpop.f32.mrf.mxu1 }
0x27e8 PF: > { %s15600_s4 = sld [smem:[#allocation49_spill]]  ;;  %p13272_p13 = scmp.ge.s32.totalorder %s13695_s22, 2 }
0x27ea   : > { %p13269_p0 = pnand %p13272_p13, %p14030_p6 }
0x27ec   : > { %p13270_p1 = pneg %p13269_p0 }
0x27ee   : > { %s10892_s18 = sand.u32 1, %s15600_s4  }
0x27ef   : > { %s10893_s0 = scalar_lea.sflag [#allocation3], %s10892_s18 }
0x27f0   : > { %13678 = dma.done.wait (%p13270_p1), %s10893_s0, 128  }
0x27f1   : > { %13680 = vsyncadd (%p13270_p1), %s10893_s0, 4294967168  ;;  %s15602_s22 = sld [smem:[#allocation51_spill]]  ;;  %s15605_s15 = smov %s13687_s16 }
0x27f2   : > { %s15603_s2 = sld [smem:[#allocation50_spill]] }
0x27f3   : > { %s15604_s18 = sld [smem:[#allocation52_spill]] }
0x27f7   : > { %p103_p2 = scmp.ge.s32.totalorder %s15602_s22, 4  }
0x27f8   : > { %s15606_s16 = smov %s15603_s2 }
0x27f9   :  { %105 = sbr.rel (!%p103_p2) target bundleno = 110 (0x6e), region = 327 }
0x27fe   :  { %10898 = vsyncpa [#allocation3], 1 }
0x27ff   :  { %10900 = vsyncpa [#allocation3 + $0x1], 1 }

</bundles_post_ra>
